<compile_context>
chip_gen: v5e
topology: v5e:2x2
jax: 0.10.0
libtpu: 0.0.40
codegen_flags: <defaults>
</compile_context>

<pallas_src>
import functools

import jax
import jax.numpy as jnp
from jax import lax
from jax.experimental import pallas as pl
from jax.experimental.pallas import tpu as pltpu

EPS = 1e-5
LANE = 128


def _round_up(x, m):
    return (x + m - 1) // m * m


# -----------------------------------------------------------------------------
# Fused conv stage:
#   [optional BN-apply + ReLU of the incoming activation]
#   -> assemble spatially padded slab in a VMEM scratch (borders zeroed)
#   -> 3x3 conv as 9 statically shifted MXU matmuls (bf16 operands, f32 acc)
#   -> per-image BN partial statistics (masked) + bf16 conv-output writeback
# One grid step == one image ("parallel" batch axis, no cross-step carry).
# -----------------------------------------------------------------------------
def conv_stage_kernel(x_ref, scale_ref, shift_ref, mask_ref, w_ref,
                      z_ref, sum_ref, sq_ref, slab_ref, *,
                      apply_bn_relu, tap_offsets, p_out, write_off, p_tot):
    mask = mask_ref[...]                              # (p_out, 1) f32, precomputed once
    x = x_ref[0].astype(jnp.float32)                  # (p_out, C_in)
    if apply_bn_relu:
        # BN1-apply + ReLU fused here; mask zeroes the junk (width-padding) columns so the
        # interior store below also produces the left/right zero padding of the next conv.
        a = jnp.maximum(x * scale_ref[...] + shift_ref[...], 0.0) * mask
    else:
        a = x                                          # junk cols already zero from wrapper
    c = a.shape[-1]

    # Assemble the spatially padded slab in VMEM: zero only the border regions, then write
    # the interior (together they cover the whole scratch, so no stale data persists).
    tail = p_tot - write_off - p_out
    slab_ref[pl.ds(0, write_off), :] = jnp.zeros((write_off, c), jnp.float32)
    slab_ref[pl.ds(write_off + p_out, tail), :] = jnp.zeros((tail, c), jnp.float32)
    slab_ref[pl.ds(write_off, p_out), :] = a

    # 3x3 conv = 9 shifted matmuls (bf16 MXU operands, f32 accumulation).
    acc = jnp.dot(slab_ref[pl.ds(tap_offsets[0], p_out), :].astype(jnp.bfloat16),
                  w_ref[0], preferred_element_type=jnp.float32)
    for t in range(1, len(tap_offsets)):
        acc = acc + jnp.dot(slab_ref[pl.ds(tap_offsets[t], p_out), :].astype(jnp.bfloat16),
                            w_ref[t], preferred_element_type=jnp.float32)

    # Per-image BN partial statistics from the f32 accumulator (junk columns masked out).
    zm = acc * mask
    sum_ref[0] = jnp.sum(zm, axis=0, keepdims=True)
    sq_ref[0] = jnp.sum(zm * acc, axis=0, keepdims=True)
    z_ref[0] = acc.astype(z_ref.dtype)                 # bf16 writeback (half HBM traffic)


def _conv_stage(x, scale, shift, mask, w_taps, *, apply_bn_relu, p_out, p_tot,
                write_off, tap_offsets, cout_p):
    n, _, c_in = x.shape
    kern = functools.partial(conv_stage_kernel, apply_bn_relu=apply_bn_relu,
                             tap_offsets=tap_offsets, p_out=p_out,
                             write_off=write_off, p_tot=p_tot)

    flops = 2 * n * len(tap_offsets) * p_out * c_in * cout_p
    bytes_accessed = (n * p_out * c_in * 2 + len(tap_offsets) * c_in * cout_p * 2
                      + n * p_out * cout_p * 2 + 2 * n * cout_p * 4
                      + p_out * 4 + 2 * c_in * 4)
    # double-buffered x/z blocks + weights + f32 slab scratch (+ slack)
    footprint = (2 * p_out * c_in * 2 + 2 * p_out * cout_p * 2
                 + 2 * len(tap_offsets) * c_in * cout_p * 2
                 + p_tot * c_in * 4 + (64 << 10))
    vmem_limit = min(max(4 * footprint, 32 << 20), 56 << 20)

    return pl.pallas_call(
        kern,
        out_shape=(jax.ShapeDtypeStruct((n, p_out, cout_p), jnp.bfloat16),
                   jax.ShapeDtypeStruct((n, 1, cout_p), jnp.float32),
                   jax.ShapeDtypeStruct((n, 1, cout_p), jnp.float32)),
        grid=(n,),
        in_specs=[pl.BlockSpec((1, p_out, c_in), lambda i: (i, 0, 0)),
                  pl.BlockSpec((1, c_in), lambda i: (0, 0)),
                  pl.BlockSpec((1, c_in), lambda i: (0, 0)),
                  pl.BlockSpec((p_out, 1), lambda i: (0, 0)),
                  pl.BlockSpec((len(tap_offsets), c_in, cout_p), lambda i: (0, 0, 0))],
        out_specs=(pl.BlockSpec((1, p_out, cout_p), lambda i: (i, 0, 0)),
                   pl.BlockSpec((1, 1, cout_p), lambda i: (i, 0, 0)),
                   pl.BlockSpec((1, 1, cout_p), lambda i: (i, 0, 0))),
        scratch_shapes=[pltpu.VMEM((p_tot, c_in), jnp.float32)],
        compiler_params=pltpu.CompilerParams(
            dimension_semantics=("parallel",), vmem_limit_bytes=vmem_limit),
        cost_estimate=pl.CostEstimate(flops=flops, transcendentals=0,
                                      bytes_accessed=bytes_accessed),
    )(x, scale, shift, mask, w_taps)


# -----------------------------------------------------------------------------
# Final stage: BN2-apply + ReLU + pool, whole image per grid step.
#   avg: ONE selection matmul with a 4-hot window-membership matrix (no rolls).
#   max: fold window members with non-negative wrap-around rolls, then one-hot select.
# -----------------------------------------------------------------------------
def bn_relu_pool_kernel(z_ref, scale_ref, shift_ref, sel_ref, o_ref, *,
                        ph, pw, wp, p_out, pool_type):
    a = jnp.maximum(z_ref[0].astype(jnp.float32) * scale_ref[...] + shift_ref[...], 0.0)
    if pool_type == "avg":
        cand = a                                        # window fold is inside sel (4-hot)
    elif pool_type == "max":
        cand = a
        for ry in range(ph):
            for rx in range(pw):
                off = ry * wp + rx
                if off:
                    # wrap-around only touches trailing junk rows that are never selected
                    cand = jnp.maximum(cand, pltpu.roll(a, shift=p_out - off, axis=0))
    else:
        raise Exception("Incorrect argument!")
    pooled = jnp.dot(sel_ref[...], cand, preferred_element_type=jnp.float32)
    if pool_type == "avg":
        pooled = pooled * (1.0 / (ph * pw))
    o_ref[0] = pooled.astype(o_ref.dtype)


def _bn_relu_pool(z, scale, shift, sel, *, ph, pw, wp, p_out, pool_type, n_pool):
    n, _, c = z.shape
    kern = functools.partial(bn_relu_pool_kernel, ph=ph, pw=pw, wp=wp,
                             p_out=p_out, pool_type=pool_type)
    flops = 2 * n * n_pool * p_out * c
    bytes_accessed = (n * p_out * c * 2 + n_pool * p_out * 4
                      + n * n_pool * c * 4 + 2 * c * 4)
    footprint = 2 * (p_out * c * 2 + n_pool * c * 4) + 2 * n_pool * p_out * 4 + (64 << 10)
    vmem_limit = min(max(4 * footprint, 32 << 20), 56 << 20)
    return pl.pallas_call(
        kern,
        out_shape=jax.ShapeDtypeStruct((n, n_pool, c), jnp.float32),
        grid=(n,),
        in_specs=[pl.BlockSpec((1, p_out, c), lambda i: (i, 0, 0)),
                  pl.BlockSpec((1, c), lambda i: (0, 0)),
                  pl.BlockSpec((1, c), lambda i: (0, 0)),
                  pl.BlockSpec((n_pool, p_out), lambda i: (0, 0))],
        out_specs=pl.BlockSpec((1, n_pool, c), lambda i: (i, 0, 0)),
        compiler_params=pltpu.CompilerParams(
            dimension_semantics=("parallel",), vmem_limit_bytes=vmem_limit),
        cost_estimate=pl.CostEstimate(flops=flops, transcendentals=0,
                                      bytes_accessed=bytes_accessed),
    )(z, scale, shift, sel)


# ------------------------------ wrapper / glue -------------------------------

def _prep_weights(w, cin_p, cout_p):
    # (Cout, Cin, 3, 3) -> (9, Cin_p, Cout_p), tap-major (dy, dx), bf16 MXU operands
    cout, cin, kh, kw = w.shape
    wt = jnp.transpose(w, (2, 3, 1, 0)).reshape(kh * kw, cin, cout)
    wt = jnp.pad(wt, ((0, 0), (0, cin_p - cin), (0, cout_p - cout)))
    return wt.astype(jnp.bfloat16)


def _bn_scale_shift(s, sq, gamma, beta, count, c_pad):
    c = gamma.shape[0]
    gamma_p = jnp.pad(gamma, (0, c_pad - c), constant_values=1.0).reshape(1, c_pad)
    beta_p = jnp.pad(beta, (0, c_pad - c)).reshape(1, c_pad)
    mean = s / count
    var = jnp.maximum(sq / count - mean * mean, 0.0)
    scale = gamma_p * lax.rsqrt(var + EPS)
    shift = beta_p - mean * scale
    return scale.astype(jnp.float32), shift.astype(jnp.float32)


def conv_block_forward(x_nchw, w1, w2, g1, b1, g2, b2,
                       pool_size=(2, 2), pool_type="avg"):
    if pool_type not in ("avg", "max"):
        raise Exception("Incorrect argument!")
    n, cin, h, w = x_nchw.shape
    cout = w1.shape[0]
    ph, pw = pool_size
    assert h % ph == 0 and w % pw == 0

    cin_p = _round_up(max(cin, 1), LANE)
    cout_p = _round_up(max(cout, 1), LANE)

    wp = w + 2                                   # flat row stride (W + 2 junk columns)
    p_out = h * wp                               # conv-output rows per image (incl. junk)
    lead = (-(wp + 1)) % 16                      # makes the interior VMEM store 16-aligned
    write_off = lead + wp + 1
    p_tot = _round_up(lead + (h + 2) * wp + 2, 16)
    tap_offsets = tuple(lead + dy * wp + dx for dy in range(3) for dx in range(3))
    count = jnp.float32(n * h * w)

    # input prep: one transpose + one pad (width->wp, channels->128) + one cast
    x_nhwc = jnp.transpose(x_nchw, (0, 2, 3, 1))
    x_flat = jnp.pad(x_nhwc, ((0, 0), (0, 0), (0, wp - w), (0, cin_p - cin)))
    x_flat = x_flat.reshape(n, p_out, cin_p).astype(jnp.bfloat16)

    w1_t = _prep_weights(w1, cin_p, cout_p)
    w2_t = _prep_weights(w2, cout_p, cout_p)

    # junk-column mask, precomputed once (flat col index modulo wp < W)
    col = jnp.arange(p_out, dtype=jnp.int32) % wp
    mask = (col < w).astype(jnp.float32).reshape(p_out, 1)

    ones_cin = jnp.ones((1, cin_p), jnp.float32)      # dummy scale/shift for stage 1
    zeros_cin = jnp.zeros((1, cin_p), jnp.float32)

    # stage 1: conv1 + per-image BN partial stats
    z1, s1, q1 = _conv_stage(x_flat, ones_cin, zeros_cin, mask, w1_t,
                             apply_bn_relu=False, p_out=p_out, p_tot=p_tot,
                             write_off=write_off, tap_offsets=tap_offsets, cout_p=cout_p)
    scale1, shift1 = _bn_scale_shift(jnp.sum(s1, axis=0), jnp.sum(q1, axis=0),
                                     g1, b1, count, cout_p)

    # stage 2: BN1-apply + ReLU fused with conv2 + per-image BN partial stats
    z2, s2, q2 = _conv_stage(z1, scale1, shift1, mask, w2_t,
                             apply_bn_relu=True, p_out=p_out, p_tot=p_tot,
                             write_off=write_off, tap_offsets=tap_offsets, cout_p=cout_p)
    scale2, shift2 = _bn_scale_shift(jnp.sum(s2, axis=0), jnp.sum(q2, axis=0),
                                     g2, b2, count, cout_p)

    # stage 3: BN2-apply + ReLU + pool (whole image per grid step)
    h_out, w_out = h // ph, w // pw
    n_pool = h_out * w_out
    kk = jnp.arange(n_pool, dtype=jnp.int32)
    base = (kk // w_out) * (ph * wp) + (kk % w_out) * pw   # flat row of each window's corner
    cols = jnp.arange(p_out, dtype=jnp.int32)
    if pool_type == "avg":
        sel = jnp.zeros((n_pool, p_out), jnp.float32)
        for ry in range(ph):
            for rx in range(pw):
                sel = sel + (base[:, None] + (ry * wp + rx) == cols[None, :]).astype(jnp.float32)
    else:
        sel = (base[:, None] == cols[None, :]).astype(jnp.float32)

    pooled = _bn_relu_pool(z2, scale2, shift2, sel, ph=ph, pw=pw, wp=wp,
                           p_out=p_out, pool_type=pool_type, n_pool=n_pool)

    # strip channel padding, back to NCHW
    y = pooled.reshape(n, h_out, w_out, cout_p)[:, :, :, :cout]
    return jnp.transpose(y, (0, 3, 1, 2))


# ------------------------------ pure-JAX reference ---------------------------

def reference_forward(x, w1, w2, g1, b1, g2, b2, pool_size=(2, 2), pool_type="avg"):
    def conv(x, w):
        return jax.lax.conv_general_dilated(
            x, w, window_strides=(1, 1), padding=((1, 1), (1, 1)),
            dimension_numbers=("NCHW", "OIHW", "NCHW"))

    def bn_relu(x, g, b):
        mean = jnp.mean(x, axis=(0, 2, 3), keepdims=True)
        var = jnp.mean((x - mean) ** 2, axis=(0, 2, 3), keepdims=True)
        y = (x - mean) * jax.lax.rsqrt(var + EPS)
        y = y * g.reshape(1, -1, 1, 1) + b.reshape(1, -1, 1, 1)
        return jnp.maximum(y, 0.0)

    y = bn_relu(conv(x, w1), g1, b1)
    y = bn_relu(conv(y, w2), g2, b2)
    N, C, H, W = y.shape
    ph, pw = pool_size
    yr = y.reshape(N, C, H // ph, ph, W // pw, pw)
    return yr.mean(axis=(3, 5)) if pool_type == "avg" else yr.max(axis=(3, 5))


# ----------------------------------- main ------------------------------------

if __name__ == "__main__":
    N, Cin, Cout, H, W = 2, 4, 8, 16, 16
    key = jax.random.PRNGKey(0)
    kx, kw1, kw2, kg1, kb1, kg2, kb2 = jax.random.split(key, 7)

    x = jax.random.normal(kx, (N, Cin, H, W), dtype=jnp.float32)
    w1 = 0.1 * jax.random.normal(kw1, (Cout, Cin, 3, 3), dtype=jnp.float32)
    w2 = 0.1 * jax.random.normal(kw2, (Cout, Cout, 3, 3), dtype=jnp.float32)
    g1 = 1.0 + 0.1 * jax.random.normal(kg1, (Cout,), dtype=jnp.float32)
    b1 = 0.1 * jax.random.normal(kb1, (Cout,), dtype=jnp.float32)
    g2 = 1.0 + 0.1 * jax.random.normal(kg2, (Cout,), dtype=jnp.float32)
    b2 = 0.1 * jax.random.normal(kb2, (Cout,), dtype=jnp.float32)

    fwd = jax.jit(functools.partial(conv_block_forward, pool_size=(2, 2), pool_type="avg"))
    out = jax.block_until_ready(fwd(x, w1, w2, g1, b1, g2, b2))

    ref = jax.block_until_ready(reference_forward(x, w1, w2, g1, b1, g2, b2))
    assert out.shape == (N, Cout, H // 2, W // 2), out.shape
    err = float(jnp.max(jnp.abs(out - ref)))
    assert jnp.allclose(out, ref, atol=5e-2, rtol=5e-2), err

    print("KERNEL_OK")
</pallas_src>

<mosaic_0001>
module attributes {stable_mosaic.version = 11 : i64} {
  func.func @conv_stage_kernel(%arg0: i32, %arg1: memref<1x288x128xbf16, #tpu.memory_space<vmem>>, %arg2: memref<1x128xf32, #tpu.memory_space<vmem>>, %arg3: memref<1x128xf32, #tpu.memory_space<vmem>>, %arg4: memref<288x1xf32, #tpu.memory_space<vmem>>, %arg5: memref<9x128x128xbf16, #tpu.memory_space<vmem>>, %arg6: memref<1x288x128xbf16, #tpu.memory_space<vmem>>, %arg7: memref<1x1x128xf32, #tpu.memory_space<vmem>>, %arg8: memref<1x1x128xf32, #tpu.memory_space<vmem>>, %arg9: memref<352x128xf32, #tpu.memory_space<vmem>>) attributes {dimension_semantics = [#tpu.dimension_semantics<parallel>], iteration_bounds = array<i64: 2>, scalar_prefetch = 0 : i64, scratch_operands = 1 : i64, tpu.core_type = #tpu.core_type<tc>, window_params = [{transform_indices = @transform_0, window_bounds = array<i64: 1, 288, 128>}, {pipeline_mode = #tpu.pipeline_mode<synchronous>, transform_indices = @transform_1, window_bounds = array<i64: 1, 128>}, {pipeline_mode = #tpu.pipeline_mode<synchronous>, transform_indices = @transform_2, window_bounds = array<i64: 1, 128>}, {pipeline_mode = #tpu.pipeline_mode<synchronous>, transform_indices = @transform_3, window_bounds = array<i64: 288, 1>}, {pipeline_mode = #tpu.pipeline_mode<synchronous>, transform_indices = @transform_4, window_bounds = array<i64: 9, 128, 128>}, {transform_indices = @transform_5, window_bounds = array<i64: 1, 288, 128>}, {transform_indices = @transform_6, window_bounds = array<i64: 1, 1, 128>}, {transform_indices = @transform_7, window_bounds = array<i64: 1, 1, 128>}]} {
    %c0 = arith.constant 0 : index
    %c0_0 = arith.constant 0 : index
    %0 = vector.load %arg4[%c0, %c0_0] : memref<288x1xf32, #tpu.memory_space<vmem>>, vector<288x1xf32>
    %c0_1 = arith.constant 0 : index
    %c0_2 = arith.constant 0 : index
    %c0_3 = arith.constant 0 : index
    %1 = vector.load %arg1[%c0_1, %c0_2, %c0_3] : memref<1x288x128xbf16, #tpu.memory_space<vmem>>, vector<1x288x128xbf16>
    %2 = vector.shape_cast %1 : vector<1x288x128xbf16> to vector<288x128xbf16>
    %3 = arith.extf %2 : vector<288x128xbf16> to vector<288x128xf32>
    %c0_4 = arith.constant 0 : index
    %c0_5 = arith.constant 0 : index
    %4 = vector.load %arg2[%c0_4, %c0_5] : memref<1x128xf32, #tpu.memory_space<vmem>>, vector<1x128xf32>
    %5 = vector.broadcast %4 : vector<1x128xf32> to vector<288x128xf32>
    %6 = arith.mulf %3, %5 : vector<288x128xf32>
    %c0_6 = arith.constant 0 : index
    %c0_7 = arith.constant 0 : index
    %7 = vector.load %arg3[%c0_6, %c0_7] : memref<1x128xf32, #tpu.memory_space<vmem>>, vector<1x128xf32>
    %8 = vector.broadcast %7 : vector<1x128xf32> to vector<288x128xf32>
    %9 = arith.addf %6, %8 : vector<288x128xf32>
    %cst = arith.constant 0.000000e+00 : f32
    %10 = vector.broadcast %cst : f32 to vector<288x128xf32>
    %11 = arith.maximumf %9, %10 : vector<288x128xf32>
    %12 = vector.broadcast %0 : vector<288x1xf32> to vector<288x128xf32>
    %13 = arith.mulf %11, %12 : vector<288x128xf32>
    %cst_8 = arith.constant 0.000000e+00 : f32
    %14 = vector.broadcast %cst_8 : f32 to vector<32x128xf32>
    %c0_9 = arith.constant 0 : index
    %c0_10 = arith.constant 0 : index
    %15 = vector.load %arg9[%c0_9, %c0_10] : memref<352x128xf32, #tpu.memory_space<vmem>>, vector<32x128xf32>
    tpu.vector_store %arg9[%c0_9, %c0_10], %14 {strides = array<i32>} : memref<352x128xf32, #tpu.memory_space<vmem>>, vector<32x128xf32>,
    %cst_11 = arith.constant 0.000000e+00 : f32
    %16 = vector.broadcast %cst_11 : f32 to vector<32x128xf32>
    %c320 = arith.constant 320 : index
    %c0_12 = arith.constant 0 : index
    %17 = vector.load %arg9[%c320, %c0_12] : memref<352x128xf32, #tpu.memory_space<vmem>>, vector<32x128xf32>
    tpu.vector_store %arg9[%c320, %c0_12], %16 {strides = array<i32>} : memref<352x128xf32, #tpu.memory_space<vmem>>, vector<32x128xf32>,
    %c32 = arith.constant 32 : index
    %c0_13 = arith.constant 0 : index
    %18 = vector.load %arg9[%c32, %c0_13] : memref<352x128xf32, #tpu.memory_space<vmem>>, vector<288x128xf32>
    tpu.vector_store %arg9[%c32, %c0_13], %13 {strides = array<i32>} : memref<352x128xf32, #tpu.memory_space<vmem>>, vector<288x128xf32>,
    %c13 = arith.constant 13 : index
    %c0_14 = arith.constant 0 : index
    %19 = vector.load %arg9[%c13, %c0_14] : memref<352x128xf32, #tpu.memory_space<vmem>>, vector<288x128xf32>
    %20 = arith.truncf %19 : vector<288x128xf32> to vector<288x128xbf16>
    %c0_15 = arith.constant 0 : index
    %c0_16 = arith.constant 0 : index
    %c0_17 = arith.constant 0 : index
    %21 = vector.load %arg5[%c0_15, %c0_16, %c0_17] : memref<9x128x128xbf16, #tpu.memory_space<vmem>>, vector<1x128x128xbf16>
    %22 = vector.shape_cast %21 : vector<1x128x128xbf16> to vector<128x128xbf16>
    %cst_18 = arith.constant dense<0.000000e+00> : vector<288x128xf32>
    %23 = tpu.matmul %20, %22, %cst_18 {dimension_numbers = #tpu.dot_dimension_numbers<[1], [0], [0], [1], [0, 0, 1, 1], [], []>} : vector<288x128xbf16>, vector<128x128xbf16>, vector<288x128xf32> -> vector<288x128xf32>
    %c14 = arith.constant 14 : index
    %c0_19 = arith.constant 0 : index
    %24 = vector.load %arg9[%c14, %c0_19] : memref<352x128xf32, #tpu.memory_space<vmem>>, vector<288x128xf32>
    %25 = arith.truncf %24 : vector<288x128xf32> to vector<288x128xbf16>
    %c1 = arith.constant 1 : index
    %c0_20 = arith.constant 0 : index
    %c0_21 = arith.constant 0 : index
    %26 = vector.load %arg5[%c1, %c0_20, %c0_21] : memref<9x128x128xbf16, #tpu.memory_space<vmem>>, vector<1x128x128xbf16>
    %27 = vector.shape_cast %26 : vector<1x128x128xbf16> to vector<128x128xbf16>
    %cst_22 = arith.constant dense<0.000000e+00> : vector<288x128xf32>
    %28 = tpu.matmul %25, %27, %cst_22 {dimension_numbers = #tpu.dot_dimension_numbers<[1], [0], [0], [1], [0, 0, 1, 1], [], []>} : vector<288x128xbf16>, vector<128x128xbf16>, vector<288x128xf32> -> vector<288x128xf32>
    %29 = arith.addf %23, %28 : vector<288x128xf32>
    %c15 = arith.constant 15 : index
    %c0_23 = arith.constant 0 : index
    %30 = vector.load %arg9[%c15, %c0_23] : memref<352x128xf32, #tpu.memory_space<vmem>>, vector<288x128xf32>
    %31 = arith.truncf %30 : vector<288x128xf32> to vector<288x128xbf16>
    %c2 = arith.constant 2 : index
    %c0_24 = arith.constant 0 : index
    %c0_25 = arith.constant 0 : index
    %32 = vector.load %arg5[%c2, %c0_24, %c0_25] : memref<9x128x128xbf16, #tpu.memory_space<vmem>>, vector<1x128x128xbf16>
    %33 = vector.shape_cast %32 : vector<1x128x128xbf16> to vector<128x128xbf16>
    %cst_26 = arith.constant dense<0.000000e+00> : vector<288x128xf32>
    %34 = tpu.matmul %31, %33, %cst_26 {dimension_numbers = #tpu.dot_dimension_numbers<[1], [0], [0], [1], [0, 0, 1, 1], [], []>} : vector<288x128xbf16>, vector<128x128xbf16>, vector<288x128xf32> -> vector<288x128xf32>
    %35 = arith.addf %29, %34 : vector<288x128xf32>
    %c31 = arith.constant 31 : index
    %c0_27 = arith.constant 0 : index
    %36 = vector.load %arg9[%c31, %c0_27] : memref<352x128xf32, #tpu.memory_space<vmem>>, vector<288x128xf32>
    %37 = arith.truncf %36 : vector<288x128xf32> to vector<288x128xbf16>
    %c3 = arith.constant 3 : index
    %c0_28 = arith.constant 0 : index
    %c0_29 = arith.constant 0 : index
    %38 = vector.load %arg5[%c3, %c0_28, %c0_29] : memref<9x128x128xbf16, #tpu.memory_space<vmem>>, vector<1x128x128xbf16>
    %39 = vector.shape_cast %38 : vector<1x128x128xbf16> to vector<128x128xbf16>
    %cst_30 = arith.constant dense<0.000000e+00> : vector<288x128xf32>
    %40 = tpu.matmul %37, %39, %cst_30 {dimension_numbers = #tpu.dot_dimension_numbers<[1], [0], [0], [1], [0, 0, 1, 1], [], []>} : vector<288x128xbf16>, vector<128x128xbf16>, vector<288x128xf32> -> vector<288x128xf32>
    %41 = arith.addf %35, %40 : vector<288x128xf32>
    %c32_31 = arith.constant 32 : index
    %c0_32 = arith.constant 0 : index
    %42 = vector.load %arg9[%c32_31, %c0_32] : memref<352x128xf32, #tpu.memory_space<vmem>>, vector<288x128xf32>
    %43 = arith.truncf %42 : vector<288x128xf32> to vector<288x128xbf16>
    %c4 = arith.constant 4 : index
    %c0_33 = arith.constant 0 : index
    %c0_34 = arith.constant 0 : index
    %44 = vector.load %arg5[%c4, %c0_33, %c0_34] : memref<9x128x128xbf16, #tpu.memory_space<vmem>>, vector<1x128x128xbf16>
    %45 = vector.shape_cast %44 : vector<1x128x128xbf16> to vector<128x128xbf16>
    %cst_35 = arith.constant dense<0.000000e+00> : vector<288x128xf32>
    %46 = tpu.matmul %43, %45, %cst_35 {dimension_numbers = #tpu.dot_dimension_numbers<[1], [0], [0], [1], [0, 0, 1, 1], [], []>} : vector<288x128xbf16>, vector<128x128xbf16>, vector<288x128xf32> -> vector<288x128xf32>
    %47 = arith.addf %41, %46 : vector<288x128xf32>
    %c33 = arith.constant 33 : index
    %c0_36 = arith.constant 0 : index
    %48 = vector.load %arg9[%c33, %c0_36] : memref<352x128xf32, #tpu.memory_space<vmem>>, vector<288x128xf32>
    %49 = arith.truncf %48 : vector<288x128xf32> to vector<288x128xbf16>
    %c5 = arith.constant 5 : index
    %c0_37 = arith.constant 0 : index
    %c0_38 = arith.constant 0 : index
    %50 = vector.load %arg5[%c5, %c0_37, %c0_38] : memref<9x128x128xbf16, #tpu.memory_space<vmem>>, vector<1x128x128xbf16>
    %51 = vector.shape_cast %50 : vector<1x128x128xbf16> to vector<128x128xbf16>
    %cst_39 = arith.constant dense<0.000000e+00> : vector<288x128xf32>
    %52 = tpu.matmul %49, %51, %cst_39 {dimension_numbers = #tpu.dot_dimension_numbers<[1], [0], [0], [1], [0, 0, 1, 1], [], []>} : vector<288x128xbf16>, vector<128x128xbf16>, vector<288x128xf32> -> vector<288x128xf32>
    %53 = arith.addf %47, %52 : vector<288x128xf32>
    %c49 = arith.constant 49 : index
    %c0_40 = arith.constant 0 : index
    %54 = vector.load %arg9[%c49, %c0_40] : memref<352x128xf32, #tpu.memory_space<vmem>>, vector<288x128xf32>
    %55 = arith.truncf %54 : vector<288x128xf32> to vector<288x128xbf16>
    %c6 = arith.constant 6 : index
    %c0_41 = arith.constant 0 : index
    %c0_42 = arith.constant 0 : index
    %56 = vector.load %arg5[%c6, %c0_41, %c0_42] : memref<9x128x128xbf16, #tpu.memory_space<vmem>>, vector<1x128x128xbf16>
    %57 = vector.shape_cast %56 : vector<1x128x128xbf16> to vector<128x128xbf16>
    %cst_43 = arith.constant dense<0.000000e+00> : vector<288x128xf32>
    %58 = tpu.matmul %55, %57, %cst_43 {dimension_numbers = #tpu.dot_dimension_numbers<[1], [0], [0], [1], [0, 0, 1, 1], [], []>} : vector<288x128xbf16>, vector<128x128xbf16>, vector<288x128xf32> -> vector<288x128xf32>
    %59 = arith.addf %53, %58 : vector<288x128xf32>
    %c50 = arith.constant 50 : index
    %c0_44 = arith.constant 0 : index
    %60 = vector.load %arg9[%c50, %c0_44] : memref<352x128xf32, #tpu.memory_space<vmem>>, vector<288x128xf32>
    %61 = arith.truncf %60 : vector<288x128xf32> to vector<288x128xbf16>
    %c7 = arith.constant 7 : index
    %c0_45 = arith.constant 0 : index
    %c0_46 = arith.constant 0 : index
    %62 = vector.load %arg5[%c7, %c0_45, %c0_46] : memref<9x128x128xbf16, #tpu.memory_space<vmem>>, vector<1x128x128xbf16>
    %63 = vector.shape_cast %62 : vector<1x128x128xbf16> to vector<128x128xbf16>
    %cst_47 = arith.constant dense<0.000000e+00> : vector<288x128xf32>
    %64 = tpu.matmul %61, %63, %cst_47 {dimension_numbers = #tpu.dot_dimension_numbers<[1], [0], [0], [1], [0, 0, 1, 1], [], []>} : vector<288x128xbf16>, vector<128x128xbf16>, vector<288x128xf32> -> vector<288x128xf32>
    %65 = arith.addf %59, %64 : vector<288x128xf32>
    %c51 = arith.constant 51 : index
    %c0_48 = arith.constant 0 : index
    %66 = vector.load %arg9[%c51, %c0_48] : memref<352x128xf32, #tpu.memory_space<vmem>>, vector<288x128xf32>
    %67 = arith.truncf %66 : vector<288x128xf32> to vector<288x128xbf16>
    %c8 = arith.constant 8 : index
    %c0_49 = arith.constant 0 : index
    %c0_50 = arith.constant 0 : index
    %68 = vector.load %arg5[%c8, %c0_49, %c0_50] : memref<9x128x128xbf16, #tpu.memory_space<vmem>>, vector<1x128x128xbf16>
    %69 = vector.shape_cast %68 : vector<1x128x128xbf16> to vector<128x128xbf16>
    %cst_51 = arith.constant dense<0.000000e+00> : vector<288x128xf32>
    %70 = tpu.matmul %67, %69, %cst_51 {dimension_numbers = #tpu.dot_dimension_numbers<[1], [0], [0], [1], [0, 0, 1, 1], [], []>} : vector<288x128xbf16>, vector<128x128xbf16>, vector<288x128xf32> -> vector<288x128xf32>
    %71 = arith.addf %65, %70 : vector<288x128xf32>
    %72 = vector.broadcast %0 : vector<288x1xf32> to vector<288x128xf32>
    %73 = arith.mulf %71, %72 : vector<288x128xf32>
    %cst_52 = arith.constant dense<0.000000e+00> : vector<128xf32>
    %74 = vector.multi_reduction <add>, %73, %cst_52 [0] : vector<288x128xf32> to vector<128xf32>
    %75 = vector.shape_cast %74 : vector<128xf32> to vector<1x128xf32>
    %c0_53 = arith.constant 0 : index
    %c0_54 = arith.constant 0 : index
    %c0_55 = arith.constant 0 : index
    %76 = vector.load %arg7[%c0_53, %c0_54, %c0_55] : memref<1x1x128xf32, #tpu.memory_space<vmem>>, vector<1x1x128xf32>
    %77 = vector.shape_cast %76 : vector<1x1x128xf32> to vector<1x128xf32>
    %78 = vector.shape_cast %75 : vector<1x128xf32> to vector<1x1x128xf32>
    tpu.vector_store %arg7[%c0_53, %c0_54, %c0_55], %78 {strides = array<i32>} : memref<1x1x128xf32, #tpu.memory_space<vmem>>, vector<1x1x128xf32>,
    %79 = arith.mulf %73, %71 : vector<288x128xf32>
    %cst_56 = arith.constant dense<0.000000e+00> : vector<128xf32>
    %80 = vector.multi_reduction <add>, %79, %cst_56 [0] : vector<288x128xf32> to vector<128xf32>
    %81 = vector.shape_cast %80 : vector<128xf32> to vector<1x128xf32>
    %c0_57 = arith.constant 0 : index
    %c0_58 = arith.constant 0 : index
    %c0_59 = arith.constant 0 : index
    %82 = vector.load %arg8[%c0_57, %c0_58, %c0_59] : memref<1x1x128xf32, #tpu.memory_space<vmem>>, vector<1x1x128xf32>
    %83 = vector.shape_cast %82 : vector<1x1x128xf32> to vector<1x128xf32>
    %84 = vector.shape_cast %81 : vector<1x128xf32> to vector<1x1x128xf32>
    tpu.vector_store %arg8[%c0_57, %c0_58, %c0_59], %84 {strides = array<i32>} : memref<1x1x128xf32, #tpu.memory_space<vmem>>, vector<1x1x128xf32>,
    %85 = arith.truncf %71 : vector<288x128xf32> to vector<288x128xbf16>
    %c0_60 = arith.constant 0 : index
    %c0_61 = arith.constant 0 : index
    %c0_62 = arith.constant 0 : index
    %86 = vector.load %arg6[%c0_60, %c0_61, %c0_62] : memref<1x288x128xbf16, #tpu.memory_space<vmem>>, vector<1x288x128xbf16>
    %87 = vector.shape_cast %86 : vector<1x288x128xbf16> to vector<288x128xbf16>
    %88 = vector.shape_cast %85 : vector<288x128xbf16> to vector<1x288x128xbf16>
    tpu.vector_store %arg6[%c0_60, %c0_61, %c0_62], %88 {strides = array<i32>} : memref<1x288x128xbf16, #tpu.memory_space<vmem>>, vector<1x288x128xbf16>,
    return
  }
  func.func @transform_0(%arg0: i32) -> (i32, i32, i32) {
    %c0_i32 = arith.constant 0 : i32
    %c0_i32_0 = arith.constant 0 : i32
    %c0_i32_1 = arith.constant 0 : i32
    return %arg0, %c0_i32, %c0_i32_0 : i32, i32, i32
  }
  func.func @transform_1(%arg0: i32) -> (i32, i32) {
    %c0_i32 = arith.constant 0 : i32
    %c0_i32_0 = arith.constant 0 : i32
    %c0_i32_1 = arith.constant 0 : i32
    return %c0_i32, %c0_i32_0 : i32, i32
  }
  func.func @transform_2(%arg0: i32) -> (i32, i32) {
    %c0_i32 = arith.constant 0 : i32
    %c0_i32_0 = arith.constant 0 : i32
    %c0_i32_1 = arith.constant 0 : i32
    return %c0_i32, %c0_i32_0 : i32, i32
  }
  func.func @transform_3(%arg0: i32) -> (i32, i32) {
    %c0_i32 = arith.constant 0 : i32
    %c0_i32_0 = arith.constant 0 : i32
    %c0_i32_1 = arith.constant 0 : i32
    return %c0_i32, %c0_i32_0 : i32, i32
  }
  func.func @transform_4(%arg0: i32) -> (i32, i32, i32) {
    %c0_i32 = arith.constant 0 : i32
    %c0_i32_0 = arith.constant 0 : i32
    %c0_i32_1 = arith.constant 0 : i32
    %c0_i32_2 = arith.constant 0 : i32
    return %c0_i32, %c0_i32_0, %c0_i32_1 : i32, i32, i32
  }
  func.func @transform_5(%arg0: i32) -> (i32, i32, i32) {
    %c0_i32 = arith.constant 0 : i32
    %c0_i32_0 = arith.constant 0 : i32
    %c0_i32_1 = arith.constant 0 : i32
    return %arg0, %c0_i32, %c0_i32_0 : i32, i32, i32
  }
  func.func @transform_6(%arg0: i32) -> (i32, i32, i32) {
    %c0_i32 = arith.constant 0 : i32
    %c0_i32_0 = arith.constant 0 : i32
    %c0_i32_1 = arith.constant 0 : i32
    return %arg0, %c0_i32, %c0_i32_0 : i32, i32, i32
  }
  func.func @transform_7(%arg0: i32) -> (i32, i32, i32) {
    %c0_i32 = arith.constant 0 : i32
    %c0_i32_0 = arith.constant 0 : i32
    %c0_i32_1 = arith.constant 0 : i32
    return %arg0, %c0_i32, %c0_i32_0 : i32, i32, i32
  }
}

module attributes {stable_mosaic.version = 11 : i64} {
  func.func @conv_stage_kernel(%arg0: i32, %arg1: memref<1x288x128xbf16, #tpu.memory_space<vmem>>, %arg2: memref<1x128xf32, #tpu.memory_space<vmem>>, %arg3: memref<1x128xf32, #tpu.memory_space<vmem>>, %arg4: memref<288x1xf32, #tpu.memory_space<vmem>>, %arg5: memref<9x128x128xbf16, #tpu.memory_space<vmem>>, %arg6: memref<1x288x128xbf16, #tpu.memory_space<vmem>>, %arg7: memref<1x1x128xf32, #tpu.memory_space<vmem>>, %arg8: memref<1x1x128xf32, #tpu.memory_space<vmem>>, %arg9: memref<352x128xf32, #tpu.memory_space<vmem>>) attributes {dimension_semantics = [#tpu.dimension_semantics<parallel>], iteration_bounds = array<i64: 2>, scalar_prefetch = 0 : i64, scratch_operands = 1 : i64, tpu.core_type = #tpu.core_type<tc>, window_params = [{transform_indices = @transform_0, window_bounds = array<i64: 1, 288, 128>}, {pipeline_mode = #tpu.pipeline_mode<synchronous>, transform_indices = @transform_1, window_bounds = array<i64: 1, 128>}, {pipeline_mode = #tpu.pipeline_mode<synchronous>, transform_indices = @transform_2, window_bounds = array<i64: 1, 128>}, {pipeline_mode = #tpu.pipeline_mode<synchronous>, transform_indices = @transform_3, window_bounds = array<i64: 288, 1>}, {pipeline_mode = #tpu.pipeline_mode<synchronous>, transform_indices = @transform_4, window_bounds = array<i64: 9, 128, 128>}, {transform_indices = @transform_5, window_bounds = array<i64: 1, 288, 128>}, {transform_indices = @transform_6, window_bounds = array<i64: 1, 1, 128>}, {transform_indices = @transform_7, window_bounds = array<i64: 1, 1, 128>}]} {
    %c0 = arith.constant 0 : index
    %c0_0 = arith.constant 0 : index
    %0 = vector.load %arg4[%c0, %c0_0] : memref<288x1xf32, #tpu.memory_space<vmem>>, vector<288x1xf32>
    %c0_1 = arith.constant 0 : index
    %c0_2 = arith.constant 0 : index
    %c0_3 = arith.constant 0 : index
    %1 = vector.load %arg1[%c0_1, %c0_2, %c0_3] : memref<1x288x128xbf16, #tpu.memory_space<vmem>>, vector<1x288x128xbf16>
    %2 = vector.shape_cast %1 : vector<1x288x128xbf16> to vector<288x128xbf16>
    %3 = arith.extf %2 : vector<288x128xbf16> to vector<288x128xf32>
    %cst = arith.constant 0.000000e+00 : f32
    %4 = vector.broadcast %cst : f32 to vector<32x128xf32>
    %c0_4 = arith.constant 0 : index
    %c0_5 = arith.constant 0 : index
    %5 = vector.load %arg9[%c0_4, %c0_5] : memref<352x128xf32, #tpu.memory_space<vmem>>, vector<32x128xf32>
    tpu.vector_store %arg9[%c0_4, %c0_5], %4 {strides = array<i32>} : memref<352x128xf32, #tpu.memory_space<vmem>>, vector<32x128xf32>,
    %cst_6 = arith.constant 0.000000e+00 : f32
    %6 = vector.broadcast %cst_6 : f32 to vector<32x128xf32>
    %c320 = arith.constant 320 : index
    %c0_7 = arith.constant 0 : index
    %7 = vector.load %arg9[%c320, %c0_7] : memref<352x128xf32, #tpu.memory_space<vmem>>, vector<32x128xf32>
    tpu.vector_store %arg9[%c320, %c0_7], %6 {strides = array<i32>} : memref<352x128xf32, #tpu.memory_space<vmem>>, vector<32x128xf32>,
    %c32 = arith.constant 32 : index
    %c0_8 = arith.constant 0 : index
    %8 = vector.load %arg9[%c32, %c0_8] : memref<352x128xf32, #tpu.memory_space<vmem>>, vector<288x128xf32>
    tpu.vector_store %arg9[%c32, %c0_8], %3 {strides = array<i32>} : memref<352x128xf32, #tpu.memory_space<vmem>>, vector<288x128xf32>,
    %c13 = arith.constant 13 : index
    %c0_9 = arith.constant 0 : index
    %9 = vector.load %arg9[%c13, %c0_9] : memref<352x128xf32, #tpu.memory_space<vmem>>, vector<288x128xf32>
    %10 = arith.truncf %9 : vector<288x128xf32> to vector<288x128xbf16>
    %c0_10 = arith.constant 0 : index
    %c0_11 = arith.constant 0 : index
    %c0_12 = arith.constant 0 : index
    %11 = vector.load %arg5[%c0_10, %c0_11, %c0_12] : memref<9x128x128xbf16, #tpu.memory_space<vmem>>, vector<1x128x128xbf16>
    %12 = vector.shape_cast %11 : vector<1x128x128xbf16> to vector<128x128xbf16>
    %cst_13 = arith.constant dense<0.000000e+00> : vector<288x128xf32>
    %13 = tpu.matmul %10, %12, %cst_13 {dimension_numbers = #tpu.dot_dimension_numbers<[1], [0], [0], [1], [0, 0, 1, 1], [], []>} : vector<288x128xbf16>, vector<128x128xbf16>, vector<288x128xf32> -> vector<288x128xf32>
    %c14 = arith.constant 14 : index
    %c0_14 = arith.constant 0 : index
    %14 = vector.load %arg9[%c14, %c0_14] : memref<352x128xf32, #tpu.memory_space<vmem>>, vector<288x128xf32>
    %15 = arith.truncf %14 : vector<288x128xf32> to vector<288x128xbf16>
    %c1 = arith.constant 1 : index
    %c0_15 = arith.constant 0 : index
    %c0_16 = arith.constant 0 : index
    %16 = vector.load %arg5[%c1, %c0_15, %c0_16] : memref<9x128x128xbf16, #tpu.memory_space<vmem>>, vector<1x128x128xbf16>
    %17 = vector.shape_cast %16 : vector<1x128x128xbf16> to vector<128x128xbf16>
    %cst_17 = arith.constant dense<0.000000e+00> : vector<288x128xf32>
    %18 = tpu.matmul %15, %17, %cst_17 {dimension_numbers = #tpu.dot_dimension_numbers<[1], [0], [0], [1], [0, 0, 1, 1], [], []>} : vector<288x128xbf16>, vector<128x128xbf16>, vector<288x128xf32> -> vector<288x128xf32>
    %19 = arith.addf %13, %18 : vector<288x128xf32>
    %c15 = arith.constant 15 : index
    %c0_18 = arith.constant 0 : index
    %20 = vector.load %arg9[%c15, %c0_18] : memref<352x128xf32, #tpu.memory_space<vmem>>, vector<288x128xf32>
    %21 = arith.truncf %20 : vector<288x128xf32> to vector<288x128xbf16>
    %c2 = arith.constant 2 : index
    %c0_19 = arith.constant 0 : index
    %c0_20 = arith.constant 0 : index
    %22 = vector.load %arg5[%c2, %c0_19, %c0_20] : memref<9x128x128xbf16, #tpu.memory_space<vmem>>, vector<1x128x128xbf16>
    %23 = vector.shape_cast %22 : vector<1x128x128xbf16> to vector<128x128xbf16>
    %cst_21 = arith.constant dense<0.000000e+00> : vector<288x128xf32>
    %24 = tpu.matmul %21, %23, %cst_21 {dimension_numbers = #tpu.dot_dimension_numbers<[1], [0], [0], [1], [0, 0, 1, 1], [], []>} : vector<288x128xbf16>, vector<128x128xbf16>, vector<288x128xf32> -> vector<288x128xf32>
    %25 = arith.addf %19, %24 : vector<288x128xf32>
    %c31 = arith.constant 31 : index
    %c0_22 = arith.constant 0 : index
    %26 = vector.load %arg9[%c31, %c0_22] : memref<352x128xf32, #tpu.memory_space<vmem>>, vector<288x128xf32>
    %27 = arith.truncf %26 : vector<288x128xf32> to vector<288x128xbf16>
    %c3 = arith.constant 3 : index
    %c0_23 = arith.constant 0 : index
    %c0_24 = arith.constant 0 : index
    %28 = vector.load %arg5[%c3, %c0_23, %c0_24] : memref<9x128x128xbf16, #tpu.memory_space<vmem>>, vector<1x128x128xbf16>
    %29 = vector.shape_cast %28 : vector<1x128x128xbf16> to vector<128x128xbf16>
    %cst_25 = arith.constant dense<0.000000e+00> : vector<288x128xf32>
    %30 = tpu.matmul %27, %29, %cst_25 {dimension_numbers = #tpu.dot_dimension_numbers<[1], [0], [0], [1], [0, 0, 1, 1], [], []>} : vector<288x128xbf16>, vector<128x128xbf16>, vector<288x128xf32> -> vector<288x128xf32>
    %31 = arith.addf %25, %30 : vector<288x128xf32>
    %c32_26 = arith.constant 32 : index
    %c0_27 = arith.constant 0 : index
    %32 = vector.load %arg9[%c32_26, %c0_27] : memref<352x128xf32, #tpu.memory_space<vmem>>, vector<288x128xf32>
    %33 = arith.truncf %32 : vector<288x128xf32> to vector<288x128xbf16>
    %c4 = arith.constant 4 : index
    %c0_28 = arith.constant 0 : index
    %c0_29 = arith.constant 0 : index
    %34 = vector.load %arg5[%c4, %c0_28, %c0_29] : memref<9x128x128xbf16, #tpu.memory_space<vmem>>, vector<1x128x128xbf16>
    %35 = vector.shape_cast %34 : vector<1x128x128xbf16> to vector<128x128xbf16>
    %cst_30 = arith.constant dense<0.000000e+00> : vector<288x128xf32>
    %36 = tpu.matmul %33, %35, %cst_30 {dimension_numbers = #tpu.dot_dimension_numbers<[1], [0], [0], [1], [0, 0, 1, 1], [], []>} : vector<288x128xbf16>, vector<128x128xbf16>, vector<288x128xf32> -> vector<288x128xf32>
    %37 = arith.addf %31, %36 : vector<288x128xf32>
    %c33 = arith.constant 33 : index
    %c0_31 = arith.constant 0 : index
    %38 = vector.load %arg9[%c33, %c0_31] : memref<352x128xf32, #tpu.memory_space<vmem>>, vector<288x128xf32>
    %39 = arith.truncf %38 : vector<288x128xf32> to vector<288x128xbf16>
    %c5 = arith.constant 5 : index
    %c0_32 = arith.constant 0 : index
    %c0_33 = arith.constant 0 : index
    %40 = vector.load %arg5[%c5, %c0_32, %c0_33] : memref<9x128x128xbf16, #tpu.memory_space<vmem>>, vector<1x128x128xbf16>
    %41 = vector.shape_cast %40 : vector<1x128x128xbf16> to vector<128x128xbf16>
    %cst_34 = arith.constant dense<0.000000e+00> : vector<288x128xf32>
    %42 = tpu.matmul %39, %41, %cst_34 {dimension_numbers = #tpu.dot_dimension_numbers<[1], [0], [0], [1], [0, 0, 1, 1], [], []>} : vector<288x128xbf16>, vector<128x128xbf16>, vector<288x128xf32> -> vector<288x128xf32>
    %43 = arith.addf %37, %42 : vector<288x128xf32>
    %c49 = arith.constant 49 : index
    %c0_35 = arith.constant 0 : index
    %44 = vector.load %arg9[%c49, %c0_35] : memref<352x128xf32, #tpu.memory_space<vmem>>, vector<288x128xf32>
    %45 = arith.truncf %44 : vector<288x128xf32> to vector<288x128xbf16>
    %c6 = arith.constant 6 : index
    %c0_36 = arith.constant 0 : index
    %c0_37 = arith.constant 0 : index
    %46 = vector.load %arg5[%c6, %c0_36, %c0_37] : memref<9x128x128xbf16, #tpu.memory_space<vmem>>, vector<1x128x128xbf16>
    %47 = vector.shape_cast %46 : vector<1x128x128xbf16> to vector<128x128xbf16>
    %cst_38 = arith.constant dense<0.000000e+00> : vector<288x128xf32>
    %48 = tpu.matmul %45, %47, %cst_38 {dimension_numbers = #tpu.dot_dimension_numbers<[1], [0], [0], [1], [0, 0, 1, 1], [], []>} : vector<288x128xbf16>, vector<128x128xbf16>, vector<288x128xf32> -> vector<288x128xf32>
    %49 = arith.addf %43, %48 : vector<288x128xf32>
    %c50 = arith.constant 50 : index
    %c0_39 = arith.constant 0 : index
    %50 = vector.load %arg9[%c50, %c0_39] : memref<352x128xf32, #tpu.memory_space<vmem>>, vector<288x128xf32>
    %51 = arith.truncf %50 : vector<288x128xf32> to vector<288x128xbf16>
    %c7 = arith.constant 7 : index
    %c0_40 = arith.constant 0 : index
    %c0_41 = arith.constant 0 : index
    %52 = vector.load %arg5[%c7, %c0_40, %c0_41] : memref<9x128x128xbf16, #tpu.memory_space<vmem>>, vector<1x128x128xbf16>
    %53 = vector.shape_cast %52 : vector<1x128x128xbf16> to vector<128x128xbf16>
    %cst_42 = arith.constant dense<0.000000e+00> : vector<288x128xf32>
    %54 = tpu.matmul %51, %53, %cst_42 {dimension_numbers = #tpu.dot_dimension_numbers<[1], [0], [0], [1], [0, 0, 1, 1], [], []>} : vector<288x128xbf16>, vector<128x128xbf16>, vector<288x128xf32> -> vector<288x128xf32>
    %55 = arith.addf %49, %54 : vector<288x128xf32>
    %c51 = arith.constant 51 : index
    %c0_43 = arith.constant 0 : index
    %56 = vector.load %arg9[%c51, %c0_43] : memref<352x128xf32, #tpu.memory_space<vmem>>, vector<288x128xf32>
    %57 = arith.truncf %56 : vector<288x128xf32> to vector<288x128xbf16>
    %c8 = arith.constant 8 : index
    %c0_44 = arith.constant 0 : index
    %c0_45 = arith.constant 0 : index
    %58 = vector.load %arg5[%c8, %c0_44, %c0_45] : memref<9x128x128xbf16, #tpu.memory_space<vmem>>, vector<1x128x128xbf16>
    %59 = vector.shape_cast %58 : vector<1x128x128xbf16> to vector<128x128xbf16>
    %cst_46 = arith.constant dense<0.000000e+00> : vector<288x128xf32>
    %60 = tpu.matmul %57, %59, %cst_46 {dimension_numbers = #tpu.dot_dimension_numbers<[1], [0], [0], [1], [0, 0, 1, 1], [], []>} : vector<288x128xbf16>, vector<128x128xbf16>, vector<288x128xf32> -> vector<288x128xf32>
    %61 = arith.addf %55, %60 : vector<288x128xf32>
    %62 = vector.broadcast %0 : vector<288x1xf32> to vector<288x128xf32>
    %63 = arith.mulf %61, %62 : vector<288x128xf32>
    %cst_47 = arith.constant dense<0.000000e+00> : vector<128xf32>
    %64 = vector.multi_reduction <add>, %63, %cst_47 [0] : vector<288x128xf32> to vector<128xf32>
    %65 = vector.shape_cast %64 : vector<128xf32> to vector<1x128xf32>
    %c0_48 = arith.constant 0 : index
    %c0_49 = arith.constant 0 : index
    %c0_50 = arith.constant 0 : index
    %66 = vector.load %arg7[%c0_48, %c0_49, %c0_50] : memref<1x1x128xf32, #tpu.memory_space<vmem>>, vector<1x1x128xf32>
    %67 = vector.shape_cast %66 : vector<1x1x128xf32> to vector<1x128xf32>
    %68 = vector.shape_cast %65 : vector<1x128xf32> to vector<1x1x128xf32>
    tpu.vector_store %arg7[%c0_48, %c0_49, %c0_50], %68 {strides = array<i32>} : memref<1x1x128xf32, #tpu.memory_space<vmem>>, vector<1x1x128xf32>,
    %69 = arith.mulf %63, %61 : vector<288x128xf32>
    %cst_51 = arith.constant dense<0.000000e+00> : vector<128xf32>
    %70 = vector.multi_reduction <add>, %69, %cst_51 [0] : vector<288x128xf32> to vector<128xf32>
    %71 = vector.shape_cast %70 : vector<128xf32> to vector<1x128xf32>
    %c0_52 = arith.constant 0 : index
    %c0_53 = arith.constant 0 : index
    %c0_54 = arith.constant 0 : index
    %72 = vector.load %arg8[%c0_52, %c0_53, %c0_54] : memref<1x1x128xf32, #tpu.memory_space<vmem>>, vector<1x1x128xf32>
    %73 = vector.shape_cast %72 : vector<1x1x128xf32> to vector<1x128xf32>
    %74 = vector.shape_cast %71 : vector<1x128xf32> to vector<1x1x128xf32>
    tpu.vector_store %arg8[%c0_52, %c0_53, %c0_54], %74 {strides = array<i32>} : memref<1x1x128xf32, #tpu.memory_space<vmem>>, vector<1x1x128xf32>,
    %75 = arith.truncf %61 : vector<288x128xf32> to vector<288x128xbf16>
    %c0_55 = arith.constant 0 : index
    %c0_56 = arith.constant 0 : index
    %c0_57 = arith.constant 0 : index
    %76 = vector.load %arg6[%c0_55, %c0_56, %c0_57] : memref<1x288x128xbf16, #tpu.memory_space<vmem>>, vector<1x288x128xbf16>
    %77 = vector.shape_cast %76 : vector<1x288x128xbf16> to vector<288x128xbf16>
    %78 = vector.shape_cast %75 : vector<288x128xbf16> to vector<1x288x128xbf16>
    tpu.vector_store %arg6[%c0_55, %c0_56, %c0_57], %78 {strides = array<i32>} : memref<1x288x128xbf16, #tpu.memory_space<vmem>>, vector<1x288x128xbf16>,
    return
  }
  func.func @transform_0(%arg0: i32) -> (i32, i32, i32) {
    %c0_i32 = arith.constant 0 : i32
    %c0_i32_0 = arith.constant 0 : i32
    %c0_i32_1 = arith.constant 0 : i32
    return %arg0, %c0_i32, %c0_i32_0 : i32, i32, i32
  }
  func.func @transform_1(%arg0: i32) -> (i32, i32) {
    %c0_i32 = arith.constant 0 : i32
    %c0_i32_0 = arith.constant 0 : i32
    %c0_i32_1 = arith.constant 0 : i32
    return %c0_i32, %c0_i32_0 : i32, i32
  }
  func.func @transform_2(%arg0: i32) -> (i32, i32) {
    %c0_i32 = arith.constant 0 : i32
    %c0_i32_0 = arith.constant 0 : i32
    %c0_i32_1 = arith.constant 0 : i32
    return %c0_i32, %c0_i32_0 : i32, i32
  }
  func.func @transform_3(%arg0: i32) -> (i32, i32) {
    %c0_i32 = arith.constant 0 : i32
    %c0_i32_0 = arith.constant 0 : i32
    %c0_i32_1 = arith.constant 0 : i32
    return %c0_i32, %c0_i32_0 : i32, i32
  }
  func.func @transform_4(%arg0: i32) -> (i32, i32, i32) {
    %c0_i32 = arith.constant 0 : i32
    %c0_i32_0 = arith.constant 0 : i32
    %c0_i32_1 = arith.constant 0 : i32
    %c0_i32_2 = arith.constant 0 : i32
    return %c0_i32, %c0_i32_0, %c0_i32_1 : i32, i32, i32
  }
  func.func @transform_5(%arg0: i32) -> (i32, i32, i32) {
    %c0_i32 = arith.constant 0 : i32
    %c0_i32_0 = arith.constant 0 : i32
    %c0_i32_1 = arith.constant 0 : i32
    return %arg0, %c0_i32, %c0_i32_0 : i32, i32, i32
  }
  func.func @transform_6(%arg0: i32) -> (i32, i32, i32) {
    %c0_i32 = arith.constant 0 : i32
    %c0_i32_0 = arith.constant 0 : i32
    %c0_i32_1 = arith.constant 0 : i32
    return %arg0, %c0_i32, %c0_i32_0 : i32, i32, i32
  }
  func.func @transform_7(%arg0: i32) -> (i32, i32, i32) {
    %c0_i32 = arith.constant 0 : i32
    %c0_i32_0 = arith.constant 0 : i32
    %c0_i32_1 = arith.constant 0 : i32
    return %arg0, %c0_i32, %c0_i32_0 : i32, i32, i32
  }
}

module attributes {stable_mosaic.version = 11 : i64} {
  func.func @bn_relu_pool_kernel(%arg0: i32, %arg1: memref<1x288x128xbf16, #tpu.memory_space<vmem>>, %arg2: memref<1x128xf32, #tpu.memory_space<vmem>>, %arg3: memref<1x128xf32, #tpu.memory_space<vmem>>, %arg4: memref<64x288xf32, #tpu.memory_space<vmem>>, %arg5: memref<1x64x128xf32, #tpu.memory_space<vmem>>) attributes {dimension_semantics = [#tpu.dimension_semantics<parallel>], iteration_bounds = array<i64: 2>, scalar_prefetch = 0 : i64, scratch_operands = 0 : i64, tpu.core_type = #tpu.core_type<tc>, window_params = [{transform_indices = @transform_0, window_bounds = array<i64: 1, 288, 128>}, {pipeline_mode = #tpu.pipeline_mode<synchronous>, transform_indices = @transform_1, window_bounds = array<i64: 1, 128>}, {pipeline_mode = #tpu.pipeline_mode<synchronous>, transform_indices = @transform_2, window_bounds = array<i64: 1, 128>}, {pipeline_mode = #tpu.pipeline_mode<synchronous>, transform_indices = @transform_3, window_bounds = array<i64: 64, 288>}, {transform_indices = @transform_4, window_bounds = array<i64: 1, 64, 128>}]} {
    %c0 = arith.constant 0 : index
    %c0_0 = arith.constant 0 : index
    %c0_1 = arith.constant 0 : index
    %0 = vector.load %arg1[%c0, %c0_0, %c0_1] : memref<1x288x128xbf16, #tpu.memory_space<vmem>>, vector<1x288x128xbf16>
    %1 = vector.shape_cast %0 : vector<1x288x128xbf16> to vector<288x128xbf16>
    %2 = arith.extf %1 : vector<288x128xbf16> to vector<288x128xf32>
    %c0_2 = arith.constant 0 : index
    %c0_3 = arith.constant 0 : index
    %3 = vector.load %arg2[%c0_2, %c0_3] : memref<1x128xf32, #tpu.memory_space<vmem>>, vector<1x128xf32>
    %4 = vector.broadcast %3 : vector<1x128xf32> to vector<288x128xf32>
    %5 = arith.mulf %2, %4 : vector<288x128xf32>
    %c0_4 = arith.constant 0 : index
    %c0_5 = arith.constant 0 : index
    %6 = vector.load %arg3[%c0_4, %c0_5] : memref<1x128xf32, #tpu.memory_space<vmem>>, vector<1x128xf32>
    %7 = vector.broadcast %6 : vector<1x128xf32> to vector<288x128xf32>
    %8 = arith.addf %5, %7 : vector<288x128xf32>
    %cst = arith.constant 0.000000e+00 : f32
    %9 = vector.broadcast %cst : f32 to vector<288x128xf32>
    %10 = arith.maximumf %8, %9 : vector<288x128xf32>
    %c0_6 = arith.constant 0 : index
    %c0_7 = arith.constant 0 : index
    %11 = vector.load %arg4[%c0_6, %c0_7] : memref<64x288xf32, #tpu.memory_space<vmem>>, vector<64x288xf32>
    %cst_8 = arith.constant dense<0.000000e+00> : vector<64x128xf32>
    %12 = tpu.matmul %11, %10, %cst_8 {dimension_numbers = #tpu.dot_dimension_numbers<[1], [0], [0], [1], [0, 0, 1, 1], [], []>} : vector<64x288xf32>, vector<288x128xf32>, vector<64x128xf32> -> vector<64x128xf32>
    %cst_9 = arith.constant 2.500000e-01 : f32
    %13 = vector.broadcast %cst_9 : f32 to vector<64x128xf32>
    %14 = arith.mulf %12, %13 : vector<64x128xf32>
    %c0_10 = arith.constant 0 : index
    %c0_11 = arith.constant 0 : index
    %c0_12 = arith.constant 0 : index
    %15 = vector.load %arg5[%c0_10, %c0_11, %c0_12] : memref<1x64x128xf32, #tpu.memory_space<vmem>>, vector<1x64x128xf32>
    %16 = vector.shape_cast %15 : vector<1x64x128xf32> to vector<64x128xf32>
    %17 = vector.shape_cast %14 : vector<64x128xf32> to vector<1x64x128xf32>
    tpu.vector_store %arg5[%c0_10, %c0_11, %c0_12], %17 {strides = array<i32>} : memref<1x64x128xf32, #tpu.memory_space<vmem>>, vector<1x64x128xf32>,
    return
  }
  func.func @transform_0(%arg0: i32) -> (i32, i32, i32) {
    %c0_i32 = arith.constant 0 : i32
    %c0_i32_0 = arith.constant 0 : i32
    %c0_i32_1 = arith.constant 0 : i32
    return %arg0, %c0_i32, %c0_i32_0 : i32, i32, i32
  }
  func.func @transform_1(%arg0: i32) -> (i32, i32) {
    %c0_i32 = arith.constant 0 : i32
    %c0_i32_0 = arith.constant 0 : i32
    %c0_i32_1 = arith.constant 0 : i32
    return %c0_i32, %c0_i32_0 : i32, i32
  }
  func.func @transform_2(%arg0: i32) -> (i32, i32) {
    %c0_i32 = arith.constant 0 : i32
    %c0_i32_0 = arith.constant 0 : i32
    %c0_i32_1 = arith.constant 0 : i32
    return %c0_i32, %c0_i32_0 : i32, i32
  }
  func.func @transform_3(%arg0: i32) -> (i32, i32) {
    %c0_i32 = arith.constant 0 : i32
    %c0_i32_0 = arith.constant 0 : i32
    %c0_i32_1 = arith.constant 0 : i32
    return %c0_i32, %c0_i32_0 : i32, i32
  }
  func.func @transform_4(%arg0: i32) -> (i32, i32, i32) {
    %c0_i32 = arith.constant 0 : i32
    %c0_i32_0 = arith.constant 0 : i32
    %c0_i32_1 = arith.constant 0 : i32
    return %arg0, %c0_i32, %c0_i32_0 : i32, i32, i32
  }
}

</mosaic_0001>

<bundles_post_ra>
// kernel: conv_block_forward.5
= control target key start
LH: loop header
LB: loop body
LE: loop exit
PB: predicated region body
PF: predicated region fallthrough
CT: control target
= control target key end

     0   :  { %s813_s15 = smov 0   ;;  %s1132_s0 = inlined_call_operand.vmem [shape: bf16[2,288,128], index: 0, kind: input, shape index: {}]   ;;  %s1133_s1 = inlined_call_operand.vmem [shape: f32[1,128], index: 1, kind: input, shape index: {}]   ;;  %s1134_s2 = inlined_call_operand.vmem [shape: f32[1,128], index: 2, kind: input, shape index: {}]   ;;  %s1135_s3 = inlined_call_operand.vmem [shape: f32[64,288], index: 3, kind: input, shape index: {}]   ;;  %s1136_s4 = inlined_call_operand.vmem [shape: f32[2,64,128], index: 4, kind: output, shape index: {}]  }
   0x1 LB: > { %s629_s16 = sadd.s32 4294967295, %s786_s15   ;;  %p633_p0 = scmp.ge.s32.totalorder %s786_s15, 1  ;;  %s786_s15 = sphi %s813_s15, %s14_s15  }
   0x2   : > { %p162_p1 = scmp.lt.s32.totalorder %s786_s15, 3 }
   0x4   : > { %p163_p2 = pnand %p633_p0, %p162_p1 }
   0x5   : > { %p188_p3 = scmp.lt.s32.totalorder (!%p163_p2), %s629_s16, 1 }
   0x6   : > { %166 = sbr.rel (%p163_p2) target bundleno = 236 (0xec), region = 36 }
   0xb   : > { %s1138_s16 = smov (!%p188_p3, %s629_s16), 1  ;;  %v832_v0 = vld [vmem:[%s1133_s1] ss:$0 sm:$0xff]  ;;  %vm410_vm0 = vcmask 261120  }
   0xc   : > { %s769_s17 = smul.u32 144, %s1138_s16  ;;  %v840_v5 = vld [vmem:[%s1134_s2] ss:$0 sm:$0xff]  ;;  %s647_s25 = sshll.u32 %s1138_s16, 6 }
   0xd   : > { %s1119_s28 = scalar_lea.vmem %s1136_s4, %s647_s25 }
   0xe   : > { %s827_s20 = scalar_lea.vmem %s1132_s0, %s769_s17 }
   0xf   : > { %v726_v1 = vld [vmem:[%s827_s20 + $0x38] sm:$0xff]   ;;  %v725_v3 = vld [vmem:[%s827_s20 + $0x30] sm:$0xff]   ;;  %v724_v30 = vld [vmem:[%s827_s20 + $0x28] sm:$0xff]  }
  0x10   : > { %v734_v2 = vld [vmem:[%s827_s20 + $0x78] sm:$0xff]   ;;  %v679_v4 = vunpack.c.h.bf16 %v726_v1  ;;  %v678_v7 = vunpack.c.l.bf16 %v726_v1  ;;  %v733_v9 = vld [vmem:[%s827_s20 + $0x70] sm:$0xff]   ;;  %v675_v10 = vunpack.c.h.bf16 %v725_v3  ;;  %v674_v12 = vunpack.c.l.bf16 %v725_v3  ;;  %v732_v31 = vld [vmem:[%s827_s20 + $0x68] sm:$0xff]  }
  0x11   : > { %v711_v6 = vunpack.c.h.bf16 %v734_v2  ;;  %v710_v8 = vunpack.c.l.bf16 %v734_v2  ;;  %v707_v11 = vunpack.c.h.bf16 %v733_v9  ;;  %v706_v13 = vunpack.c.l.bf16 %v733_v9  ;;  %v736_v32 = vld [vmem:[%s827_s20 + $0x88] sm:$0xff]   ;;  %v723_v37 = vld [vmem:[%s827_s20 + $0x20] sm:$0xff]  }
  0x12   : > { %v289_v14 = vmul.f32 %v832_v0, %v679_v4  ;;  %v288_v16 = vmul.f32 %v832_v0, %v678_v7  ;;  %v287_v18 = vmul.f32 %v832_v0, %v675_v10  ;;  %v286_v20 = vmul.f32 %v832_v0, %v674_v12  ;;  %v874_v38 = vld [vmem:[%s827_s20 + $0x60] sm:$0xff]   ;;  %v722_v10 = vld [vmem:[%s827_s20 + $0x18] sm:$0xff]  }
  0x13   : > { %v305_v15 = vmul.f32 %v832_v0, %v711_v6  ;;  %v304_v17 = vmul.f32 %v832_v0, %v710_v8  ;;  %v303_v19 = vmul.f32 %v832_v0, %v707_v11  ;;  %v302_v21 = vmul.f32 %v832_v0, %v706_v13  ;;  %v879_v43 = vld [vmem:[%s827_s20 + $0x80] sm:$0xff]   ;;  %v730_v11 = vld [vmem:[%s827_s20 + $0x58] sm:$0xff]  }
  0x14   : > { %v329_v22 = vadd.f32 %v840_v5, %v289_v14  ;;  %v328_v24 = vadd.f32 %v840_v5, %v288_v16  ;;  %v327_v26 = vadd.f32 %v840_v5, %v287_v18  ;;  %v326_v28 = vadd.f32 %v840_v5, %v286_v20 }
  0x15   : > { %v853_v23 = vadd.f32 %v840_v5, %v305_v15  ;;  %v857_v25 = vadd.f32 %v840_v5, %v304_v17  ;;  %v861_v27 = vadd.f32 %v840_v5, %v303_v19  ;;  %v865_v29 = vadd.f32 %v840_v5, %v302_v21 }
  0x16   : > { %v365_v33 = vmax.f32 %v329_v22, 0.0  ;;  %v364_v35 = vmax.f32 %v328_v24, 0.0  ;;  %v363_v39 = vmax.f32 %v327_v26, 0.0  ;;  %v362_v41 = vmax.f32 %v326_v28, 0.0 }
  0x17   : > { %v381_v34 = vmax.f32 %v853_v23, 0.0  ;;  %v380_v36 = vmax.f32 %v857_v25, 0.0  ;;  %v379_v40 = vmax.f32 %v861_v27, 0.0  ;;  %v378_v42 = vmax.f32 %v865_v29, 0.0  ;;  %v397_v23 = vld [vmem:[%s1135_s3 + $0x58] sm:$0xff]  ;;  %v407_v25 = vld [vmem:[%s1135_s3 + $0xa8] sm:$0xff] }
  0x18   : > { %435 = vmatpush.msra.mxu0 %v365_v33  ;;  %737 = vmatpush.msra.mxu3 %v365_v33  ;;  %v671_v44 = vunpack.c.h.bf16 %v724_v30  ;;  %v703_v45 = vunpack.c.h.bf16 %v732_v31  ;;  %v719_v46 = vunpack.c.h.bf16 %v736_v32  ;;  %v670_v47 = vunpack.c.l.bf16 %v724_v30  ;;  %v392_v27 = vld [vmem:[%s1135_s3 + $0x30] sm:$0xff]  ;;  %v393_v29 = vld [vmem:[%s1135_s3 + $0x38] sm:$0xff] }
  0x19   : > { %476 = vmatpush.msra.mxu1 %v381_v34  ;;  %v702_v48 = vunpack.c.l.bf16 %v732_v31  ;;  %v718_v49 = vunpack.c.l.bf16 %v736_v32  ;;  %v667_v50 = vunpack.c.h.bf16 %v723_v37  ;;  %v699_v51 = vunpack.c.h.bf16 %v874_v38 }
  0x1a   : > { %436 = vmatpush.msra.mxu0 %v364_v35  ;;  %738 = vmatpush.msra.mxu3 %v364_v35  ;;  %v285_v52 = vmul.f32 %v832_v0, %v671_v44  ;;  %v301_v53 = vmul.f32 %v832_v0, %v703_v45  ;;  %v309_v54 = vmul.f32 %v832_v0, %v719_v46  ;;  %v715_v55 = vunpack.c.h.bf16 %v879_v43 }
  0x1b   : > { %477 = vmatpush.msra.mxu1 %v380_v36  ;;  %v284_v56 = vmul.f32 %v832_v0, %v670_v47  ;;  %v300_v57 = vmul.f32 %v832_v0, %v702_v48  ;;  %v308_v58 = vmul.f32 %v832_v0, %v718_v49  ;;  %v283_v59 = vmul.f32 %v832_v0, %v667_v50 }
  0x1c   : > { %437 = vmatpush.msra.mxu0 %v363_v39  ;;  %739 = vmatpush.msra.mxu3 %v363_v39  ;;  %v325_v60 = vadd.f32 %v840_v5, %v285_v52  ;;  %v896_v61 = vadd.f32 %v840_v5, %v301_v53  ;;  %v349_v62 = vadd.f32 %v840_v5, %v309_v54  ;;  %v666_v63 = vunpack.c.l.bf16 %v723_v37  ;;  %v729_v39 = vld [vmem:[%s827_s20 + $0x50] sm:$0xff]   ;;  %v720_v54 = vld [vmem:[%s827_s20 + $0x8] sm:$0xff]  }
  0x1d   : > { %478 = vmatpush.msra.mxu1 %v379_v40  ;;  %v324_v1 = vadd.f32 %v840_v5, %v284_v56  ;;  %v903_v2 = vadd.f32 %v840_v5, %v300_v57  ;;  %v348_v3 = vadd.f32 %v840_v5, %v308_v58  ;;  %v323_v4 = vadd.f32 %v840_v5, %v283_v59 }
  0x1e   : > { %438 = vmatpush.msra.mxu0 %v362_v41  ;;  %740 = vmatpush.msra.mxu3 %v362_v41  ;;  %v361_v6 = vmax.f32 %v325_v60, 0.0  ;;  %v377_v7 = vmax.f32 %v896_v61, 0.0  ;;  %v385_v8 = vmax.f32 %v349_v62, 0.0  ;;  %v299_v9 = vmul.f32 %v832_v0, %v699_v51  ;;  %v388_v60 = vld [vmem:[%s1135_s3 + $0x10] sm:$0xff]  ;;  %v405_v61 = vld [vmem:[%s1135_s3 + $0x98] sm:$0xff] }
  0x1f   : > { %479 = vmatpush.msra.mxu1 %v378_v42  ;;  %v360_v12 = vmax.f32 %v324_v1, 0.0  ;;  %v376_v13 = vmax.f32 %v903_v2, 0.0  ;;  %v384_v14 = vmax.f32 %v348_v3, 0.0  ;;  %v359_v15 = vmax.f32 %v323_v4, 0.0  ;;  %v398_v2 = vld [vmem:[%s1135_s3 + $0x60] sm:$0xff] }
  0x20   : > { %439 = vmatpush.msra.mxu0 %v361_v6  ;;  %741 = vmatpush.msra.mxu3 %v361_v6  ;;  %v915_v16 = vadd.f32 %v840_v5, %v299_v9  ;;  %v307_v17 = vmul.f32 %v832_v0, %v715_v55  ;;  %v282_v18 = vmul.f32 %v832_v0, %v666_v63  ;;  %v698_v19 = vunpack.c.l.bf16 %v874_v38  ;;  %v721_v38 = vld [vmem:[%s827_s20 + $0x10] sm:$0xff]   ;;  %v728_v55 = vld [vmem:[%s827_s20 + $0x48] sm:$0xff]  }
  0x21   : > { %480 = vmatpush.msra.mxu1 %v377_v7  ;;  %529 = vmatpush.msra.mxu2 %v385_v8  ;;  %v714_v20 = vunpack.c.l.bf16 %v879_v43  ;;  %v663_v21 = vunpack.c.h.bf16 %v722_v10  ;;  %v695_v22 = vunpack.c.h.bf16 %v730_v11  ;;  %v662_v24 = vunpack.c.l.bf16 %v722_v10 }
  0x22   : > { %440 = vmatpush.msra.mxu0 %v360_v12  ;;  %742 = vmatpush.msra.mxu3 %v360_v12  ;;  %v375_v26 = vmax.f32 %v915_v16, 0.0  ;;  %v347_v28 = vadd.f32 %v840_v5, %v307_v17  ;;  %v322_v30 = vadd.f32 %v840_v5, %v282_v18  ;;  %v298_v31 = vmul.f32 %v832_v0, %v698_v19  ;;  %v408_v16 = vld [vmem:[%s1135_s3 + $0xb0] sm:$0xff] }
  0x23   : > { %481 = vmatpush.msra.mxu1 %v376_v13  ;;  %530 = vmatpush.msra.mxu2 %v384_v14  ;;  %v306_v32 = vmul.f32 %v832_v0, %v714_v20  ;;  %v281_v33 = vmul.f32 %v832_v0, %v663_v21  ;;  %v297_v35 = vmul.f32 %v832_v0, %v695_v22  ;;  %v694_v37 = vunpack.c.l.bf16 %v730_v11  ;;  %v649_v20 = vld [vmem:[%s827_s20] sm:$0xff]  }
  0x24   : > { %441 = vmatpush.msra.mxu0 %v359_v15  ;;  %743 = vmatpush.msra.mxu3 %v359_v15  ;;  %v383_v41 = vmax.f32 %v347_v28, 0.0  ;;  %v358_v43 = vmax.f32 %v322_v30, 0.0  ;;  %v935_v44 = vadd.f32 %v840_v5, %v298_v31  ;;  %v280_v45 = vmul.f32 %v832_v0, %v662_v24  ;;  %v727_v21 = vld [vmem:[%s827_s20 + $0x40] sm:$0xff]  }
  0x25   : > { %482 = vmatpush.msra.mxu1 %v375_v26  ;;  %v346_v46 = vadd.f32 %v840_v5, %v306_v32  ;;  %v321_v47 = vadd.f32 %v840_v5, %v281_v33  ;;  %v943_v48 = vadd.f32 %v840_v5, %v297_v35  ;;  %v296_v49 = vmul.f32 %v832_v0, %v694_v37 }
  0x26   : > { %531 = vmatpush.msra.mxu2 %v383_v41  ;;  %442 = vmatpush.msra.mxu0 %v358_v43  ;;  %v374_v50 = vmax.f32 %v935_v44, 0.0  ;;  %v320_v51 = vadd.f32 %v840_v5, %v280_v45  ;;  %v659_v52 = vunpack.c.h.bf16 %v721_v38  ;;  %v691_v53 = vunpack.c.h.bf16 %v729_v39  ;;  %v402_v44 = vld [vmem:[%s1135_s3 + $0x80] sm:$0xff] }
  0x27   : > { %744 = vmatpush.msra.mxu3 %v358_v43  ;;  %v382_v56 = vmax.f32 %v346_v46, 0.0  ;;  %v357_v57 = vmax.f32 %v321_v47, 0.0  ;;  %v373_v58 = vmax.f32 %v943_v48, 0.0  ;;  %v952_v59 = vadd.f32 %v840_v5, %v296_v49  ;;  %v391_v49 = vld [vmem:[%s1135_s3 + $0x28] sm:$0xff]  ;;  %v409_v48 = vld [vmem:[%s1135_s3 + $0xb8] sm:$0xff] }
  0x28   : > { %483 = vmatpush.msra.mxu1 %v374_v50  ;;  %v356_v62 = vmax.f32 %v320_v51, 0.0  ;;  %v279_v63 = vmul.f32 %v832_v0, %v659_v52  ;;  %v295_v1 = vmul.f32 %v832_v0, %v691_v53  ;;  %v658_v3 = vunpack.c.l.bf16 %v721_v38 }
  0x29   : > { %532 = vmatpush.msra.mxu2 %v382_v56  ;;  %443 = vmatpush.msra.mxu0 %v357_v57  ;;  %v372_v4 = vmax.f32 %v952_v59, 0.0  ;;  %v690_v6 = vunpack.c.l.bf16 %v729_v39  ;;  %v655_v8 = vunpack.c.h.bf16 %v720_v54  ;;  %v687_v9 = vunpack.c.h.bf16 %v728_v55 }
  0x2a   : > { %745 = vmatpush.msra.mxu3 %v357_v57  ;;  %484 = vmatpush.msra.mxu1 %v373_v58  ;;  %v319_v10 = vadd.f32 %v840_v5, %v279_v63  ;;  %v966_v11 = vadd.f32 %v840_v5, %v295_v1  ;;  %v278_v12 = vmul.f32 %v832_v0, %v658_v3  ;;  %v654_v14 = vunpack.c.l.bf16 %v720_v54 }
  0x2b   : > { %637 = vmatmul.msk.f32.vlgmr.msra.gmra.mxu2 %vm410_vm0, %v388_v60  ;;  %444 = vmatpush.msra.mxu0 %v356_v62  ;;  %v294_v15 = vmul.f32 %v832_v0, %v690_v6  ;;  %v277_v17 = vmul.f32 %v832_v0, %v655_v8  ;;  %v293_v18 = vmul.f32 %v832_v0, %v687_v9  ;;  %v686_v19 = vunpack.c.l.bf16 %v728_v55 }
  0x2c   : > { %746 = vmatpush.msra.mxu3 %v356_v62  ;;  %485 = vmatpush.msra.mxu1 %v372_v4  ;;  %v355_v22 = vmax.f32 %v319_v10, 0.0  ;;  %v371_v24 = vmax.f32 %v966_v11, 0.0  ;;  %v318_v28 = vadd.f32 %v840_v5, %v278_v12  ;;  %v276_v30 = vmul.f32 %v832_v0, %v654_v14  ;;  %v386_v10 = vld [vmem:[%s1135_s3] sm:$0xff]  ;;  %v387_v12 = vld [vmem:[%s1135_s3 + $0x8] sm:$0xff] }
  0x2d   : > { %v981_v31 = vadd.f32 %v840_v5, %v294_v15  ;;  %v317_v32 = vadd.f32 %v840_v5, %v277_v17  ;;  %v985_v33 = vadd.f32 %v840_v5, %v293_v18  ;;  %v292_v35 = vmul.f32 %v832_v0, %v686_v19  ;;  %v394_v14 = vld [vmem:[%s1135_s3 + $0x40] sm:$0xff]  ;;  %v389_v15 = vld [vmem:[%s1135_s3 + $0x18] sm:$0xff] }
  0x2e   : > { %445 = vmatpush.msra.mxu0 %v355_v22  ;;  %747 = vmatpush.msra.mxu3 %v355_v22  ;;  %v354_v37 = vmax.f32 %v318_v28, 0.0  ;;  %v316_v38 = vadd.f32 %v840_v5, %v276_v30  ;;  %v651_v39 = vunpack.c.h.bf16 %v649_v20  ;;  %v683_v41 = vunpack.c.h.bf16 %v727_v21  ;;  %v390_v17 = vld [vmem:[%s1135_s3 + $0x20] sm:$0xff] }
  0x2f   : > { %486 = vmatpush.msra.mxu1 %v371_v24  ;;  %v370_v43 = vmax.f32 %v981_v31, 0.0  ;;  %v353_v45 = vmax.f32 %v317_v32, 0.0  ;;  %v369_v46 = vmax.f32 %v985_v33, 0.0  ;;  %v994_v47 = vadd.f32 %v840_v5, %v292_v35 }
  0x30   : > { %446 = vmatpush.msra.mxu0 %v354_v37  ;;  %748 = vmatpush.msra.mxu3 %v354_v37  ;;  %v352_v51 = vmax.f32 %v316_v38, 0.0  ;;  %v275_v52 = vmul.f32 %v832_v0, %v651_v39  ;;  %v291_v53 = vmul.f32 %v832_v0, %v683_v41  ;;  %v650_v54 = vunpack.c.l.bf16 %v649_v20 }
  0x31   : > { %487 = vmatpush.msra.mxu1 %v370_v43  ;;  %v368_v55 = vmax.f32 %v994_v47, 0.0  ;;  %v682_v56 = vunpack.c.l.bf16 %v727_v21 }
  0x32   : > { %447 = vmatpush.msra.mxu0 %v353_v45  ;;  %749 = vmatpush.msra.mxu3 %v353_v45  ;;  %v315_v57 = vadd.f32 %v840_v5, %v275_v52  ;;  %v331_v60 = vadd.f32 %v840_v5, %v291_v53  ;;  %v274_v62 = vmul.f32 %v832_v0, %v650_v54 }
  0x33   : > { %488 = vmatpush.msra.mxu1 %v369_v46  ;;  %638 = vmatmul.msk.f32.gmra.mxu2 %vm410_vm0, %v391_v49  ;;  %v290_v63 = vmul.f32 %v832_v0, %v682_v56 }
  0x34   : > { %448 = vmatpush.msra.mxu0 %v352_v51  ;;  %750 = vmatpush.msra.mxu3 %v352_v51  ;;  %v351_v1 = vmax.f32 %v315_v57, 0.0  ;;  %v367_v3 = vmax.f32 %v331_v60, 0.0  ;;  %v314_v6 = vadd.f32 %v840_v5, %v274_v62 }
  0x35   : > { %489 = vmatpush.msra.mxu1 %v368_v55  ;;  %v330_v8 = vadd.f32 %v840_v5, %v290_v63  ;;  %v404_v5 = vld [vmem:[%s1135_s3 + $0x90] sm:$0xff] }
  0x36   : > { %449 = vmatpush.msra.mxu0 %v351_v1  ;;  %751 = vmatpush.msra.mxu3 %v351_v1  ;;  %v350_v9 = vmax.f32 %v314_v6, 0.0 }
  0x37   : > { %490 = vmatpush.msra.mxu1 %v367_v3  ;;  %v366_v0 = vmax.f32 %v330_v8, 0.0 }
  0x38   : > { %450 = vmatpush.msra.mxu0 %v350_v9  ;;  %752 = vmatpush.msra.mxu3 %v350_v9 }
  0x39   : > { %491 = vmatpush.msra.mxu1 %v366_v0  ;;  %451 = vmatmul.f32.vlgmr.msra.gmra.mxu0 %v386_v10 }
  0x3a   : > { %753 = vmatpush.msrb.mxu3 %v381_v34  ;;  %492 = vmatmul.f32.vlgmr.msra.gmra.mxu1 %v387_v12  ;;  %v400_v34 = vld [vmem:[%s1135_s3 + $0x70] sm:$0xff] }
  0x3b   : > { %639 = vmatmul.msk.f32.gmra.mxu2 %vm410_vm0, %v394_v14  ;;  %469 = vmatmul.f32.vlgmr.msra.gmra.mxu3 %v404_v5 }
  0x3c   : > { %754 = vmatpush.msrb.mxu3 %v380_v36  ;;  %v395_v36 = vld [vmem:[%s1135_s3 + $0x48] sm:$0xff] }
  0x3e   : > { %755 = vmatpush.msrb.mxu3 %v379_v40  ;;  %v396_v40 = vld [vmem:[%s1135_s3 + $0x50] sm:$0xff] }
  0x40   : > { %756 = vmatpush.msrb.mxu3 %v378_v42  ;;  %v403_v42 = vld [vmem:[%s1135_s3 + $0x88] sm:$0xff] }
  0x41   : > { %454 = vmatmul.f32.gmra.mxu0 %v389_v15 }
  0x42   : > { %757 = vmatpush.msrb.mxu3 %v377_v7  ;;  %495 = vmatmul.f32.gmra.mxu1 %v390_v17  ;;  %v399_v7 = vld [vmem:[%s1135_s3 + $0x68] sm:$0xff] }
  0x43   : > { %640 = vmatmul.msk.f32.gmra.mxu2 %vm410_vm0, %v397_v23  ;;  %472 = vmatmul.f32.gmra.mxu3 %v407_v25 }
  0x44   : > { %758 = vmatpush.msrb.mxu3 %v376_v13  ;;  %v406_v13 = vld [vmem:[%s1135_s3 + $0xa0] sm:$0xff] }
  0x46   : > { %759 = vmatpush.msrb.mxu3 %v375_v26  ;;  %v401_v26 = vld [vmem:[%s1135_s3 + $0x78] sm:$0xff] }
  0x48   : > { %760 = vmatpush.msrb.mxu3 %v374_v50 }
  0x49   : > { %457 = vmatmul.f32.gmra.mxu0 %v392_v27 }
  0x4a   : > { %761 = vmatpush.msrb.mxu3 %v373_v58  ;;  %498 = vmatmul.f32.gmra.mxu1 %v393_v29 }
  0x4b   : > { %641 = vmatmul.msk.f32.gmra.mxu2 %vm410_vm0, %v400_v34 }
  0x4c   : > { %762 = vmatpush.msrb.mxu3 %v372_v4 }
  0x4e   : > { %763 = vmatpush.msrb.mxu3 %v371_v24 }
  0x50   : > { %764 = vmatpush.msrb.mxu3 %v370_v43 }
  0x51   : > { %460 = vmatmul.f32.gmra.mxu0 %v395_v36 }
  0x52   : > { %765 = vmatpush.msrb.mxu3 %v369_v46  ;;  %501 = vmatmul.f32.gmra.mxu1 %v396_v40 }
  0x53   : > { %642 = vmatmul.msk.f32.gmra.mxu2 %vm410_vm0, %v403_v42 }
  0x54   : > { %766 = vmatpush.msrb.mxu3 %v368_v55 }
  0x56   : > { %767 = vmatpush.msrb.mxu3 %v367_v3 }
  0x58   : > { %768 = vmatpush.msrb.mxu3 %v366_v0 }
  0x59   : > { %510 = vmatmul.f32.vlgmr.msrb.gmra.mxu3 %v405_v61  ;;  %463 = vmatmul.f32.gmra.mxu0 %v398_v2 }
  0x5a   : > { %504 = vmatmul.f32.gmra.mxu1 %v399_v7 }
  0x5b   : > { %643 = vmatmul.msk.f32.gmra.mxu2 %vm410_vm0, %v406_v13 }
  0x61   : > { %513 = vmatmul.f32.gmra.mxu3 %v408_v16  ;;  %466 = vmatmul.f32.gmra.mxu0 %v401_v26 }
  0x62   : > { %507 = vmatmul.f32.gmra.mxu1 %v402_v44 }
  0x63   : > { %644 = vmatmul.msk.f32.gmra.mxu2 %vm410_vm0, %v409_v48 }
  0xae   : > { %v534_v50 = vpop.f32.mrf.mxu2 }
  0xb6   : > { %v537_v58 = vpop.f32.mrf.mxu2  ;;  %v452_v59 = vpop.f32.mrf.mxu0 }
  0xb7   : > { %v493_v4 = vpop.f32.mrf.mxu1 }
  0xb8   : > { %v494_v11 = vadd.f32 %v493_v4, %v452_v59 }
  0xba   : > { %v535_v18 = vadd.f32 %v534_v50, %v494_v11 }
  0xbc   : > { %v558_v19 = vmul.f32 0.25, %v535_v18 }
  0xbe   : > { %566 = vst [vmem:[%s1119_s28] sm:$0xff] %v558_v19  ;;  %v540_v20 = vpop.f32.mrf.mxu2  ;;  %v455_v21 = vpop.f32.mrf.mxu0 }
  0xbf   : > { %v496_v22 = vpop.f32.mrf.mxu1  ;;  %v470_v37 = vpop.f32.mrf.mxu3 }
  0xc0   : > { %v497_v24 = vadd.f32 %v496_v22, %v455_v21 }
  0xc2   : > { %v538_v28 = vadd.f32 %v537_v58, %v497_v24 }
  0xc4   : > { %v559_v30 = vmul.f32 0.25, %v538_v28 }
  0xc6   : > { %567 = vst [vmem:[%s1119_s28 + $0x8] sm:$0xff] %v559_v30  ;;  %v543_v31 = vpop.f32.mrf.mxu2  ;;  %v458_v32 = vpop.f32.mrf.mxu0 }
  0xc7   : > { %v499_v33 = vpop.f32.mrf.mxu1  ;;  %v473_v49 = vpop.f32.mrf.mxu3 }
  0xc8   : > { %v500_v35 = vadd.f32 %v499_v33, %v458_v32 }
  0xca   : > { %v541_v38 = vadd.f32 %v540_v20, %v500_v35 }
  0xcc   : > { %v560_v39 = vmul.f32 0.25, %v541_v38 }
  0xce   : > { %568 = vst [vmem:[%s1119_s28 + $0x10] sm:$0xff] %v560_v39  ;;  %v546_v41 = vpop.f32.mrf.mxu2  ;;  %v461_v43 = vpop.f32.mrf.mxu0 }
  0xcf   : > { %v502_v45 = vpop.f32.mrf.mxu1 }
  0xd0   : > { %v503_v46 = vadd.f32 %v502_v45, %v461_v43 }
  0xd2   : > { %v544_v47 = vadd.f32 %v543_v31, %v503_v46 }
  0xd4   : > { %v561_v51 = vmul.f32 0.25, %v544_v47 }
  0xd6   : > { %569 = vst [vmem:[%s1119_s28 + $0x18] sm:$0xff] %v561_v51  ;;  %v549_v52 = vpop.f32.mrf.mxu2  ;;  %v464_v53 = vpop.f32.mrf.mxu0 }
  0xd7   : > { %v505_v54 = vpop.f32.mrf.mxu1 }
  0xd8   : > { %v506_v55 = vadd.f32 %v505_v54, %v464_v53 }
  0xda   : > { %v547_v56 = vadd.f32 %v546_v41, %v506_v55 }
  0xdc   : > { %v562_v57 = vmul.f32 0.25, %v547_v56  ;;  %v511_v60 = vpop.f32.mrf.mxu3 }
  0xdd   : > { %v512_v62 = vadd.f32 %v511_v60, %v470_v37 }
  0xde   : > { %570 = vst [vmem:[%s1119_s28 + $0x20] sm:$0xff] %v562_v57  ;;  %v552_v63 = vpop.f32.mrf.mxu2  ;;  %v467_v1 = vpop.f32.mrf.mxu0 }
  0xdf   : > { %v553_v3 = vadd.f32 %v552_v63, %v512_v62  ;;  %v508_v6 = vpop.f32.mrf.mxu1 }
  0xe0   : > { %v509_v8 = vadd.f32 %v508_v6, %v467_v1 }
  0xe1   : > { %v564_v9 = vmul.f32 0.25, %v553_v3 }
  0xe2   : > { %v550_v10 = vadd.f32 %v549_v52, %v509_v8 }
  0xe3   : > { %572 = vst [vmem:[%s1119_s28 + $0x30] sm:$0xff] %v564_v9 }
  0xe4   : > { %v563_v0 = vmul.f32 0.25, %v550_v10  ;;  %v514_v12 = vpop.f32.mrf.mxu3 }
  0xe5   : > { %v515_v14 = vadd.f32 %v514_v12, %v473_v49 }
  0xe6   : > { %571 = vst [vmem:[%s1119_s28 + $0x28] sm:$0xff] %v563_v0  ;;  %v555_v5 = vpop.f32.mrf.mxu2 }
  0xe7   : > { %v556_v15 = vadd.f32 %v555_v5, %v515_v14 }
  0xe9   : > { %v565_v17 = vmul.f32 0.25, %v556_v15 }
  0xeb   : > { %573 = vst [vmem:[%s1119_s28 + $0x38] sm:$0xff] %v565_v17 }
  0xec PF: > { %s14_s15 = sadd.s32 1, %s786_s15  }
  0xed   : > { %p11_p4 = scmp.ge.s32.totalorder %s14_s15, 4  }
  0xef   :  { %13 = sbr.rel (!%p11_p4) target bundleno = 1 (0x1), region = 66 }

// kernel: conv_block_forward.4
= control target key start
LH: loop header
LB: loop body
LE: loop exit
PB: predicated region body
PF: predicated region fallthrough
CT: control target
= control target key end

     0   :  { %s4109_s24 = smov 0   ;;  %s5047_s0 = inlined_call_operand.vmem [shape: bf16[2,288,128], index: 0, kind: input, shape index: {}]   ;;  %s5048_s1 = inlined_call_operand.vmem [shape: f32[1,128], index: 1, kind: input, shape index: {}]   ;;  %s5049_s2 = inlined_call_operand.vmem [shape: f32[1,128], index: 2, kind: input, shape index: {}]   ;;  %s5050_s3 = inlined_call_operand.vmem [shape: f32[288,1], index: 3, kind: input, shape index: {}]   ;;  %s5051_s4 = inlined_call_operand.vmem [shape: bf16[9,128,128], index: 4, kind: input, shape index: {}]   ;;  %s5052_s5 = inlined_call_operand.vmem [shape: bf16[2,288,128], index: 5, kind: output, shape index: {0}]   ;;  %s5053_s6 = inlined_call_operand.vmem [shape: f32[2,1,128], index: 6, kind: output, shape index: {1}]   ;;  %s5054_s7 = inlined_call_operand.vmem [shape: f32[2,1,128], index: 7, kind: output, shape index: {2}]  }
   0x1 LB: > { %s3326_s25 = sadd.s32 4294967295, %s4065_s24   ;;  %p3330_p0 = scmp.ge.s32.totalorder %s4065_s24, 1  ;;  %s4065_s24 = sphi %s4109_s24, %s18_s24  }
   0x2   : > { %p242_p1 = scmp.lt.s32.totalorder %s4065_s24, 3 }
   0x4   : > { %p243_p2 = pnand %p3330_p0, %p242_p1 }
   0x6   : > { %246 = sbr.rel (%p243_p2) target bundleno = 961 (0x3c1), region = 40 }
   0xb   : > { %v315_v0 = vld [vmem:[%s5050_s3 + $0x98] sm:$0xff]  ;;  %v313_v1 = vld [vmem:[%s5050_s3 + $0x88] sm:$0xff]  ;;  %v304_v2 = vld [vmem:[%s5050_s3 + $0x40] sm:$0xff]  ;;  %v4067_v3 = vmov 0   ;;  %p280_p3 = scmp.lt.s32.totalorder %s3326_s25, 1  ;;  %v4068_v61 = vmov 0.0  }
   0xc   : > { %4056 = vset.pattern.permute.xlu2 %v4067_v3  ;;  %4055 = vset.pattern.permute.xlu1 %v4067_v3  ;;  %v303_v4 = vld [vmem:[%s5050_s3 + $0x38] sm:$0xff]  ;;  %v314_v5 = vld [vmem:[%s5050_s3 + $0x90] sm:$0xff]  ;;  %v305_v6 = vld [vmem:[%s5050_s3 + $0x48] sm:$0xff]  ;;  %737 = vst [vmem:[#allocation2 + $0x8] sm:$0xff] %v4068_v61 }
   0xd   : > { %4054 = vset.pattern.permute.xlu0 %v4067_v3  ;;  %617 = vperm.xlu1 %4055, %v315_v0   ;;  %v317_v7 = vld [vmem:[%s5050_s3 + $0xa8] sm:$0xff]  ;;  %v316_v8 = vld [vmem:[%s5050_s3 + $0xa0] sm:$0xff]  ;;  %v306_v9 = vld [vmem:[%s5050_s3 + $0x50] sm:$0xff]  ;;  %s5154_s25 = smov (!%p280_p3, %s3326_s25), 1  ;;  %738 = vst [vmem:[#allocation2 + $0x10] sm:$0xff] %v4068_v61 }
   0xe   : > { %607 = vperm.xlu0 %4054, %v313_v1   ;;  %562 = vperm.xlu2 %4056, %v304_v2   ;;  %v296_v10 = vld [vmem:[%s5050_s3] sm:$0xff]  ;;  %v307_v11 = vld [vmem:[%s5050_s3 + $0x58] sm:$0xff]  ;;  %v297_v12 = vld [vmem:[%s5050_s3 + $0x8] sm:$0xff]  ;;  %s4043_s15 = smul.u32 144, %s5154_s25  ;;  %739 = vst [vmem:[#allocation2 + $0x18] sm:$0xff] %v4068_v61  ;;  %s292_s12 = scalar_lea.vmem %s5053_s6, %s5154_s25 }
   0xf   : > { %v319_v13 = vld [vmem:[%s5050_s3 + $0xb8] sm:$0xff]  ;;  %v318_v14 = vld [vmem:[%s5050_s3 + $0xb0] sm:$0xff]  ;;  %v325_v16 = vld [vmem:[%s5050_s3 + $0xe8] sm:$0xff]  ;;  %740 = vst [vmem:[#allocation2 + $0x140] sm:$0xff] %v4068_v61  ;;  %s295_s16 = scalar_lea.vmem %s5054_s7, %s5154_s25 }
  0x10   : > { %v323_v15 = vld [vmem:[%s5050_s3 + $0xd8] sm:$0xff]  ;;  %v324_v17 = vld [vmem:[%s5050_s3 + $0xe0] sm:$0xff]  ;;  %v298_v19 = vld [vmem:[%s5050_s3 + $0x10] sm:$0xff]  ;;  %s4222_s28 = scalar_lea.vmem %s5047_s0, %s4043_s15  ;;  %741 = vst [vmem:[#allocation2 + $0x148] sm:$0xff] %v4068_v61  ;;  %s4948_s10 = scalar_lea.vmem %s5052_s5, %s4043_s15 }
  0x11   : > { %v308_v18 = vld [vmem:[%s5050_s3 + $0x60] sm:$0xff]  ;;  %v309_v20 = vld [vmem:[%s5050_s3 + $0x68] sm:$0xff]  ;;  %v299_v21 = vld [vmem:[%s5050_s3 + $0x18] sm:$0xff]  ;;  %742 = vst [vmem:[#allocation2 + $0x150] sm:$0xff] %v4068_v61 }
  0x12   : > { %v321_v22 = vld [vmem:[%s5050_s3 + $0xc8] sm:$0xff]  ;;  %v320_v23 = vld [vmem:[%s5050_s3 + $0xc0] sm:$0xff]  ;;  %v326_v24 = vld [vmem:[%s5050_s3 + $0xf0] sm:$0xff] }
  0x13   : > { %v310_v25 = vld [vmem:[%s5050_s3 + $0x70] sm:$0xff]  ;;  %v327_v26 = vld [vmem:[%s5050_s3 + $0xf8] sm:$0xff]  ;;  %v301_v28 = vld [vmem:[%s5050_s3 + $0x28] sm:$0xff] }
  0x14   : > { %v311_v27 = vld [vmem:[%s5050_s3 + $0x78] sm:$0xff]  ;;  %v300_v29 = vld [vmem:[%s5050_s3 + $0x20] sm:$0xff]  ;;  %v322_v30 = vld [vmem:[%s5050_s3 + $0xd0] sm:$0xff] }
  0x15   : > { %557 = vperm.xlu1 %4055, %v303_v4   ;;  %v3766_v31 = vld [vmem:[%s5051_s4 + $0x78] sm:$0xff]  ;;  %v3988_v32 = vld [vmem:[%s4222_s28 + $0x20] sm:$0xff]   ;;  %v3765_v33 = vld [vmem:[%s5051_s4 + $0x70] sm:$0xff] }
  0x16   : > { %612 = vperm.xlu0 %4054, %v314_v5   ;;  %567 = vperm.xlu2 %4056, %v305_v6   ;;  %v3841_v34 = vunpack.c.l.bf16 %v3988_v32  ;;  %v328_v35 = vld [vmem:[%s5050_s3 + $0x100] sm:$0xff]  ;;  %v329_v36 = vld [vmem:[%s5050_s3 + $0x108] sm:$0xff]  ;;  %v3842_v44 = vunpack.c.h.bf16 %v3988_v32  ;;  %v330_v45 = vld [vmem:[%s5050_s3 + $0x110] sm:$0xff] }
  0x17   : > { %969 = vmatpush.bf16.msra.mxu0 %v3766_v31  ;;  %4019 = vmatpush.bf16.msra.mxu1 %v3766_v31  ;;  %v312_v37 = vld [vmem:[%s5050_s3 + $0x80] sm:$0xff]  ;;  %v3764_v39 = vld [vmem:[%s5051_s4 + $0x68] sm:$0xff]  ;;  %v302_v46 = vld [vmem:[%s5050_s3 + $0x30] sm:$0xff] }
  0x18   : > { %4020 = vmatpush.bf16.msra.mxu2 %v3766_v31  ;;  %4021 = vmatpush.bf16.msra.mxu3 %v3766_v31  ;;  %v4240_v38 = vld [vmem:[%s5048_s1] ss:$0 sm:$0xff]  ;;  %v331_v47 = vld [vmem:[%s5050_s3 + $0x118] sm:$0xff]  ;;  %v4269_v51 = vld [vmem:[%s4222_s28 + $0x28] sm:$0xff]  }
  0x19   : > { %v416_v40 = vmul.f32 %v4240_v38, %v3841_v34  ;;  %v4249_v41 = vld [vmem:[%s5049_s2] ss:$0 sm:$0xff]  ;;  %v3762_v48 = vld [vmem:[%s5051_s4 + $0x58] sm:$0xff]  ;;  %v417_v50 = vmul.f32 %v4240_v38, %v3842_v44  ;;  %v3845_v55 = vunpack.c.l.bf16 %v4269_v51  ;;  %v3761_v56 = vld [vmem:[%s5051_s4 + $0x50] sm:$0xff] }
  0x1a   : > { %v3763_v42 = vld [vmem:[%s5051_s4 + $0x60] sm:$0xff]  ;;  %v3760_v57 = vld [vmem:[%s5051_s4 + $0x48] sm:$0xff]  ;;  %v3994_v32 = vld [vmem:[%s4222_s28 + $0x50] sm:$0xff]  }
  0x1b   : > { %970 = vmatpush.bf16.msra.mxu0 %v3765_v33  ;;  %4022 = vmatpush.bf16.msra.mxu1 %v3765_v33  ;;  %v456_v43 = vadd.f32 %v4249_v41, %v416_v40  ;;  %v457_v54 = vadd.f32 %v4249_v41, %v417_v50  ;;  %v418_v59 = vmul.f32 %v4240_v38, %v3845_v55  ;;  %v3993_v60 = vld [vmem:[%s4222_s28 + $0x48] sm:$0xff]   ;;  %v4285_v62 = vld [vmem:[%s4222_s28 + $0x40] sm:$0xff]  }
  0x1c   : > { %4023 = vmatpush.bf16.msra.mxu2 %v3765_v33  ;;  %4024 = vmatpush.bf16.msra.mxu3 %v3765_v33  ;;  %v4288_v63 = vld [vmem:[%s4222_s28] sm:$0xff]   ;;  %v3862_v1 = vunpack.c.h.bf16 %v3993_v60  ;;  %v3858_v4 = vunpack.c.h.bf16 %v4285_v62  ;;  %v4327_v33 = vld [vmem:[%s4222_s28 + $0x30] sm:$0xff]  }
  0x1d   : > { %627 = vperm.xlu1 %4055, %v317_v7   ;;  %v492_v49 = vmax.f32 %v456_v43, 0.0  ;;  %v493_v58 = vmax.f32 %v457_v54, 0.0  ;;  %v458_v3 = vadd.f32 %v4249_v41, %v418_v59  ;;  %v3826_v5 = vunpack.c.h.bf16 %v4288_v63  ;;  %v3759_v6 = vld [vmem:[%s5051_s4 + $0x40] sm:$0xff] }
  0x1e   : > { %622 = vperm.xlu0 %4054, %v316_v8   ;;  %572 = vperm.xlu2 %4056, %v306_v9   ;;  %v427_v7 = vmul.f32 %v4240_v38, %v3862_v1  ;;  %v425_v9 = vmul.f32 %v4240_v38, %v3858_v4  ;;  %v3866_v43 = vunpack.c.h.bf16 %v3994_v32 }
  0x1f   : > { %971 = vmatpush.bf16.msra.mxu0 %v3764_v39  ;;  %4025 = vmatpush.bf16.msra.mxu1 %v3764_v39  ;;  %v494_v8 = vmax.f32 %v458_v3, 0.0 }
  0x20   : > { %4026 = vmatpush.bf16.msra.mxu2 %v3764_v39  ;;  %4027 = vmatpush.bf16.msra.mxu3 %v3764_v39  ;;  %v429_v50 = vmul.f32 %v4240_v38, %v3866_v43 }
  0x22   : > { %v469_v4 = vadd.f32 %v4249_v41, %v429_v50  ;;  %v3998_v50 = vld [vmem:[%s4222_s28 + $0x70] sm:$0xff]  }
  0x23   : > { %972 = vmatpush.bf16.msra.mxu0 %v3763_v42  ;;  %4028 = vmatpush.bf16.msra.mxu1 %v3763_v42 }
  0x24   : > { %4029 = vmatpush.bf16.msra.mxu2 %v3763_v42  ;;  %4030 = vmatpush.bf16.msra.mxu3 %v3763_v42  ;;  %v3865_v42 = vunpack.c.l.bf16 %v3994_v32 }
  0x25   : > { %522 = vperm.xlu1 %4055, %v296_v10   ;;  %v409_v10 = vmul.f32 %v4240_v38, %v3826_v5  ;;  %v3825_v5 = vunpack.c.l.bf16 %v4288_v63  ;;  %v3757_v63 = vld [vmem:[%s5051_s4 + $0x30] sm:$0xff] }
  0x26   : > { %577 = vperm.xlu0 %4054, %v307_v11   ;;  %527 = vperm.xlu2 %4056, %v297_v12   ;;  %v4303_v11 = vld [vmem:[%s4222_s28 + $0x18] sm:$0xff]   ;;  %v850_v12 = vld [vmem:[#allocation2 + $0xe] sm:$0xff] }
  0x27   : > { %973 = vmatpush.bf16.msra.mxu0 %v3762_v48  ;;  %4031 = vmatpush.bf16.msra.mxu1 %v3762_v48 }
  0x28   : > { %4032 = vmatpush.bf16.msra.mxu2 %v3762_v48  ;;  %4033 = vmatpush.bf16.msra.mxu3 %v3762_v48 }
  0x2b   : > { %974 = vmatpush.bf16.msra.mxu0 %v3761_v56  ;;  %4034 = vmatpush.bf16.msra.mxu1 %v3761_v56 }
  0x2c   : > { %4035 = vmatpush.bf16.msra.mxu2 %v3761_v56  ;;  %4036 = vmatpush.bf16.msra.mxu3 %v3761_v56  ;;  %v3773_v56 = vld [vmem:[%s5051_s4 + $0xb0] sm:$0xff] }
  0x2d   : > { %637 = vperm.xlu1 %4055, %v319_v13   ;;  %v4306_v13 = vld [vmem:[%s4222_s28 + $0x68] sm:$0xff]  }
  0x2e   : > { %632 = vperm.xlu0 %4054, %v318_v14   ;;  %657 = vperm.xlu2 %4056, %v323_v15   ;;  %v851_v14 = vld [vmem:[#allocation2 + $0x16] sm:$0xff]  ;;  %v3861_v15 = vunpack.c.l.bf16 %v3993_v60  ;;  %v3846_v60 = vunpack.c.h.bf16 %v4269_v51 }
  0x2f   : > { %975 = vmatpush.bf16.msra.mxu0 %v3760_v57  ;;  %4037 = vmatpush.bf16.msra.mxu1 %v3760_v57 }
  0x30   : > { %4038 = vmatpush.bf16.msra.mxu2 %v3760_v57  ;;  %4039 = vmatpush.bf16.msra.mxu3 %v3760_v57  ;;  %v3790_v57 = vld [vmem:[%s5051_s4 + $0x138] sm:$0xff] }
  0x33   : > { %976 = vmatpush.bf16.msra.mxu0 %v3759_v6  ;;  %4040 = vmatpush.bf16.msra.mxu1 %v3759_v6 }
  0x34   : > { %4041 = vmatpush.bf16.msra.mxu2 %v3759_v6  ;;  %4042 = vmatpush.bf16.msra.mxu3 %v3759_v6 }
  0x35   : > { %667 = vperm.xlu1 %4055, %v325_v16   ;;  %v886_v16 = vpack.c.bf16 %v851_v14, %v850_v12  ;;  %v408_v12 = vmul.f32 %v4240_v38, %v3825_v5  ;;  %v3772_v14 = vld [vmem:[%s5051_s4 + $0xa8] sm:$0xff] }
  0x36   : > { %662 = vperm.xlu0 %4054, %v324_v17   ;;  %582 = vperm.xlu2 %4056, %v308_v18   ;;  %v467_v18 = vadd.f32 %v4249_v41, %v427_v7 }
  0x37   : > { %977 = vmatmul.bf16.vlgmr.msra.gmra.mxu0 %v886_v16 }
  0x38   : > { %1842 = vmatpush.bf16.msrb.mxu0 %v3790_v57  ;;  %v4409_v57 = vld [vmem:[%s4222_s28 + $0x38] sm:$0xff]  }
  0x3d   : > { %532 = vperm.xlu1 %4055, %v298_v19   ;;  %v3838_v19 = vunpack.c.h.bf16 %v4303_v11 }
  0x3e   : > { %587 = vperm.xlu0 %4054, %v309_v20   ;;  %537 = vperm.xlu2 %4056, %v299_v21   ;;  %v465_v21 = vadd.f32 %v4249_v41, %v425_v9  ;;  %v419_v9 = vmul.f32 %v4240_v38, %v3846_v60 }
  0x45   : > { %647 = vperm.xlu1 %4055, %v321_v22   ;;  %v449_v22 = vadd.f32 %v4249_v41, %v409_v10  ;;  %v505_v10 = vmax.f32 %v469_v4, 0.0 }
  0x46   : > { %642 = vperm.xlu0 %4054, %v320_v23   ;;  %672 = vperm.xlu2 %4056, %v326_v24   ;;  %v3878_v23 = vunpack.c.h.bf16 %v4306_v13  ;;  %v426_v24 = vmul.f32 %v4240_v38, %v3861_v15  ;;  %v3789_v15 = vld [vmem:[%s5051_s4 + $0x130] sm:$0xff] }
  0x47   : > { %1843 = vmatpush.bf16.msrb.mxu0 %v3789_v15 }
  0x48   : > { %v435_v31 = vmul.f32 %v4240_v38, %v3878_v23  ;;  %v459_v23 = vadd.f32 %v4249_v41, %v419_v9 }
  0x4d   : > { %592 = vperm.xlu1 %4055, %v310_v25   ;;  %v503_v25 = vmax.f32 %v467_v18, 0.0 }
  0x4e   : > { %677 = vperm.xlu0 %4054, %v327_v26   ;;  %597 = vperm.xlu2 %4056, %v311_v27   ;;  %v415_v26 = vmul.f32 %v4240_v38, %v3838_v19  ;;  %v3774_v27 = vld [vmem:[%s5051_s4 + $0xb8] sm:$0xff] }
  0x4f   : > { %1334 = vmatpush.bf16.msrb.mxu2 %v3774_v27  ;;  %v448_v27 = vadd.f32 %v4249_v41, %v408_v12  ;;  %v3854_v12 = vunpack.c.h.bf16 %v4409_v57 }
  0x50   : > { %v455_v40 = vadd.f32 %v4249_v41, %v415_v26 }
  0x52   : > { %v491_v48 = vmax.f32 %v455_v40, 0.0 }
  0x53   : > { %1335 = vmatpush.bf16.msrb.mxu2 %v3773_v56 }
  0x55   : > { %547 = vperm.xlu1 %4055, %v301_v28   ;;  %v3758_v28 = vld [vmem:[%s5051_s4 + $0x38] sm:$0xff] }
  0x56   : > { %542 = vperm.xlu0 %4054, %v300_v29   ;;  %652 = vperm.xlu2 %4056, %v322_v30   ;;  %v501_v29 = vmax.f32 %v465_v21, 0.0  ;;  %v485_v30 = vmax.f32 %v449_v22, 0.0  ;;  %v4386_v21 = vld [vmem:[%s4222_s28 + $0x78] sm:$0xff]  }
  0x57   : > { %1116 = vmatpush.bf16.msrb.mxu1 %v3758_v28  ;;  %1336 = vmatpush.bf16.msrb.mxu2 %v3772_v14  ;;  %v3885_v40 = vunpack.c.l.bf16 %v4386_v21 }
  0x59   : > { %v438_v56 = vmul.f32 %v4240_v38, %v3885_v40 }
  0x5b   : > { %1117 = vmatpush.bf16.msrb.mxu1 %v3757_v63 }
  0x5d   : > { %687 = vperm.xlu1 %4055, %v329_v36  }
  0x5e   : > { %682 = vperm.xlu0 %4054, %v328_v35   ;;  %602 = vperm.xlu2 %4056, %v312_v37   ;;  %v466_v35 = vadd.f32 %v4249_v41, %v426_v24 }
  0x65   : > { %692 = vperm.xlu1 %4055, %v330_v45  }
  0x66   : > { %552 = vperm.xlu0 %4054, %v302_v46   ;;  %697 = vperm.xlu2 %4056, %v331_v47   ;;  %v475_v46 = vadd.f32 %v4249_v41, %v435_v31  ;;  %v3849_v47 = vunpack.c.l.bf16 %v4327_v33 }
  0x68   : > { %v4271_v52 = vpop.permute.xlu2 %562  ;;  %v511_v54 = vmax.f32 %v475_v46, 0.0  ;;  %v420_v55 = vmul.f32 %v4240_v38, %v3849_v47  ;;  %v484_v47 = vmax.f32 %v448_v27, 0.0  ;;  %v3755_v27 = vld [vmem:[%s5051_s4 + $0x20] sm:$0xff] }
  0x69   : > { %5085 = vst [vmem:[#allocation3_spill] sm:$0xff] %v4271_v52  ;;  %v708_v53 = vmul.f32 %v4271_v52, %v492_v49  ;;  %v428_v49 = vmul.f32 %v4240_v38, %v3865_v42 }
  0x6a   : > { %v460_v51 = vadd.f32 %v4249_v41, %v420_v55 }
  0x6b   : > { %752 = vst [vmem:[#allocation2 + $0x60] sm:$0xff] %v708_v53  ;;  %v502_v53 = vmax.f32 %v466_v35, 0.0  ;;  %v468_v3 = vadd.f32 %v4249_v41, %v428_v49 }
  0x6c   : > { %v496_v18 = vmax.f32 %v460_v51, 0.0  ;;  %v3882_v51 = vunpack.c.h.bf16 %v3998_v50 }
  0x6d   : > { %v504_v16 = vmax.f32 %v468_v3, 0.0 }
  0x70   : > { %v4290_v0 = vpop.permute.xlu2 %567 }
  0x71   : > { %5086 = vst [vmem:[#allocation4_spill] sm:$0xff] %v4290_v0  ;;  %v709_v2 = vmul.f32 %v4290_v0, %v493_v58  ;;  %v4355_v58 = vld [vmem:[%s4222_s28 + $0x8] sm:$0xff]  }
  0x73   : > { %753 = vst [vmem:[#allocation2 + $0x68] sm:$0xff] %v709_v2 }
  0x78   : > { %v4308_v17 = vpop.permute.xlu2 %572 }
  0x79   : > { %5087 = vst [vmem:[#allocation5_spill] sm:$0xff] %v4308_v17  ;;  %v710_v20 = vmul.f32 %v4308_v17, %v494_v8  ;;  %v3830_v8 = vunpack.c.h.bf16 %v4355_v58 }
  0x7a   : > { %v861_v35 = vld [vmem:[#allocation2 + $0x66] sm:$0xff] }
  0x7b   : > { %754 = vst [vmem:[#allocation2 + $0x70] sm:$0xff] %v710_v20  ;;  %v411_v19 = vmul.f32 %v4240_v38, %v3830_v8  ;;  %v3995_v20 = vld [vmem:[%s4222_s28 + $0x58] sm:$0xff]  }
  0x7c   : > { %v3869_v28 = vunpack.c.l.bf16 %v3995_v20 }
  0x7f   : > { %v4329_v34 = vpop.permute.xlu1 %617 }
  0x80   : > { %5088 = vst [vmem:[#allocation6_spill] sm:$0xff] %v4329_v34  ;;  %v719_v36 = vmul.f32 %v4329_v34, %v503_v25  ;;  %v4333_v37 = vpop.permute.xlu0 %607  ;;  %v4335_v39 = vpop.permute.xlu2 %527 }
  0x81   : > { %5089 = vst [vmem:[#allocation7_spill] sm:$0xff] %v4333_v37  ;;  %v717_v44 = vmul.f32 %v4333_v37, %v501_v29  ;;  %v4340_v45 = vmul.f32 %v4335_v39, %v485_v30  ;;  %v3870_v29 = vunpack.c.h.bf16 %v3995_v20 }
  0x82   : > { %763 = vst [vmem:[#allocation2 + $0xb8] sm:$0xff] %v719_v36  ;;  %v451_v36 = vadd.f32 %v4249_v41, %v411_v19  ;;  %v3788_v19 = vld [vmem:[%s5051_s4 + $0x128] sm:$0xff] }
  0x83   : > { %761 = vst [vmem:[#allocation2 + $0xa8] sm:$0xff] %v717_v44  ;;  %v431_v49 = vmul.f32 %v4240_v38, %v3870_v29  ;;  %1844 = vmatpush.bf16.msrb.mxu0 %v3788_v19 }
  0x84   : > { %745 = vst [vmem:[#allocation2 + $0x28] sm:$0xff] %v4340_v45  ;;  %v487_v55 = vmax.f32 %v451_v36, 0.0 }
  0x87   : > { %v4357_v59 = vpop.permute.xlu1 %557 }
  0x88   : > { %5090 = vst [vmem:[#allocation8_spill] sm:$0xff] %v4357_v59  ;;  %v4360_v61 = vpop.permute.xlu0 %612  ;;  %v707_v1 = vmul.f32 %v4357_v59, %v491_v48  ;;  %v4363_v2 = vpop.permute.xlu2 %657  ;;  %v430_v48 = vmul.f32 %v4240_v38, %v3869_v28  ;;  %v3782_v28 = vld [vmem:[%s5051_s4 + $0xf8] sm:$0xff] }
  0x89   : > { %5091 = vst [vmem:[#allocation9_spill] sm:$0xff] %v4360_v61  ;;  %v718_v6 = vmul.f32 %v4360_v61, %v502_v53  ;;  %v727_v7 = vmul.f32 %v4363_v2, %v511_v54  ;;  %v3756_v53 = vld [vmem:[%s5051_s4 + $0x28] sm:$0xff]  ;;  %v495_v54 = vmax.f32 %v459_v23, 0.0  ;;  %1588 = vmatpush.bf16.msrb.mxu3 %v3782_v28 }
  0x8a   : > { %5092 = vst [vmem:[#allocation10_spill] sm:$0xff] %v4363_v2  ;;  %1118 = vmatpush.bf16.msrb.mxu1 %v3756_v53  ;;  %v3877_v53 = vunpack.c.l.bf16 %v4306_v13  ;;  %v3781_v13 = vld [vmem:[%s5051_s4 + $0xf0] sm:$0xff] }
  0x8b   : > { %751 = vst [vmem:[#allocation2 + $0x58] sm:$0xff] %v707_v1  ;;  %v3881_v1 = vunpack.c.l.bf16 %v3998_v50 }
  0x8c   : > { %762 = vst [vmem:[#allocation2 + $0xb0] sm:$0xff] %v718_v6  ;;  %v470_v6 = vadd.f32 %v4249_v41, %v430_v48 }
  0x8d   : > { %771 = vst [vmem:[#allocation2 + $0xf8] sm:$0xff] %v727_v7  ;;  %v471_v7 = vadd.f32 %v4249_v41, %v431_v49  ;;  %v436_v14 = vmul.f32 %v4240_v38, %v3881_v1  ;;  %1589 = vmatpush.bf16.msrb.mxu3 %v3781_v13  ;;  %v3886_v13 = vunpack.c.h.bf16 %v4386_v21 }
  0x8e   : > { %v506_v20 = vmax.f32 %v470_v6, 0.0  ;;  %1119 = vmatpush.bf16.msrb.mxu1 %v3755_v27 }
  0x8f   : > { %v4388_v22 = vpop.permute.xlu1 %627  ;;  %v507_v15 = vmax.f32 %v471_v7, 0.0 }
  0x90   : > { %5093 = vst [vmem:[#allocation11_spill] sm:$0xff] %v4388_v22  ;;  %v4391_v24 = vpop.permute.xlu0 %622  ;;  %v721_v25 = vmul.f32 %v4388_v22, %v505_v10  ;;  %v4394_v26 = vpop.permute.xlu2 %582  ;;  %v478_v10 = vadd.f32 %v4249_v41, %v438_v56 }
  0x91   : > { %5094 = vst [vmem:[#allocation12_spill] sm:$0xff] %v4391_v24  ;;  %v720_v30 = vmul.f32 %v4391_v24, %v504_v16  ;;  %v712_v31 = vmul.f32 %v4394_v26, %v496_v18  ;;  %v437_v16 = vmul.f32 %v4240_v38, %v3882_v51  ;;  %v3771_v18 = vld [vmem:[%s5051_s4 + $0xa0] sm:$0xff] }
  0x92   : > { %5095 = vst [vmem:[#allocation13_spill] sm:$0xff] %v4394_v26  ;;  %v860_v32 = vld [vmem:[#allocation2 + $0x5e] sm:$0xff]  ;;  %v514_v23 = vmax.f32 %v478_v10, 0.0  ;;  %1337 = vmatpush.bf16.msrb.mxu2 %v3771_v18 }
  0x93   : > { %765 = vst [vmem:[#allocation2 + $0xc8] sm:$0xff] %v721_v25  ;;  %v891_v42 = vpack.c.bf16 %v861_v35, %v860_v32  ;;  %v870_v43 = vld [vmem:[#allocation2 + $0xae] sm:$0xff]  ;;  %v871_v44 = vld [vmem:[#allocation2 + $0xb6] sm:$0xff]  ;;  %v423_v25 = vmul.f32 %v4240_v38, %v3854_v12  ;;  %v3787_v10 = vld [vmem:[%s5051_s4 + $0x120] sm:$0xff] }
  0x94   : > { %764 = vst [vmem:[#allocation2 + $0xc0] sm:$0xff] %v720_v30  ;;  %v896_v46 = vpack.c.bf16 %v871_v44, %v870_v43  ;;  %v476_v30 = vadd.f32 %v4249_v41, %v436_v14  ;;  %v3850_v43 = vunpack.c.h.bf16 %v4327_v33  ;;  %v3829_v44 = vunpack.c.l.bf16 %v4355_v58  ;;  %v3996_v33 = vld [vmem:[%s4222_s28 + $0x60] sm:$0xff]   ;;  %1845 = vmatpush.bf16.msrb.mxu0 %v3787_v10 }
  0x95   : > { %756 = vst [vmem:[#allocation2 + $0x80] sm:$0xff] %v712_v31  ;;  %1002 = vmatmul.bf16.vlgmr.msra.gmra.mxu1 %v891_v42  ;;  %v477_v42 = vadd.f32 %v4249_v41, %v437_v16  ;;  %v463_v50 = vadd.f32 %v4249_v41, %v423_v25  ;;  %v3754_v16 = vld [vmem:[%s5051_s4 + $0x18] sm:$0xff]  ;;  %v3873_v19 = vunpack.c.l.bf16 %v3996_v33  ;;  %v3853_v10 = vunpack.c.l.bf16 %v4409_v57 }
  0x96   : > { %1027 = vmatmul.bf16.vlgmr.msra.gmra.mxu2 %v896_v46  ;;  %v421_v7 = vmul.f32 %v4240_v38, %v3850_v43  ;;  %v410_v51 = vmul.f32 %v4240_v38, %v3829_v44  ;;  %v512_v12 = vmax.f32 %v476_v30, 0.0  ;;  %1120 = vmatpush.bf16.msrb.mxu1 %v3754_v16  ;;  %v3874_v30 = vunpack.c.h.bf16 %v3996_v33  ;;  %v3780_v44 = vld [vmem:[%s5051_s4 + $0xe8] sm:$0xff] }
  0x97   : > { %v4411_v60 = vpop.permute.xlu1 %522  ;;  %v513_v58 = vmax.f32 %v477_v42, 0.0  ;;  %v499_v14 = vmax.f32 %v463_v50, 0.0  ;;  %v3857_v42 = vunpack.c.l.bf16 %v4285_v62  ;;  %v432_v43 = vmul.f32 %v4240_v38, %v3873_v19  ;;  %1590 = vmatpush.bf16.msrb.mxu3 %v3780_v44  ;;  %v3769_v62 = vld [vmem:[%s5051_s4 + $0x90] sm:$0xff] }
  0x98   : > { %v4413_v3 = vpop.permute.xlu0 %577  ;;  %v4415_v4 = vpop.permute.xlu2 %537  ;;  %v4418_v5 = vmul.f32 %v4411_v60, %v484_v47  ;;  %v461_v27 = vadd.f32 %v4249_v41, %v421_v7  ;;  %v450_v28 = vadd.f32 %v4249_v41, %v410_v51 }
  0x99   : > { %5096 = vst [vmem:[#allocation14_spill] sm:$0xff] %v4413_v3  ;;  %v711_v8 = vmul.f32 %v4413_v3, %v495_v54  ;;  %v4424_v9 = vmul.f32 %v4415_v4, %v487_v55  ;;  %v862_v55 = vld [vmem:[#allocation2 + $0x6e] sm:$0xff]  ;;  %v424_v50 = vmul.f32 %v4240_v38, %v3857_v42 }
  0x9a   : > { %744 = vst [vmem:[#allocation2 + $0x20] sm:$0xff] %v4418_v5  ;;  %v3986_v42 = vld [vmem:[%s4222_s28 + $0x10] sm:$0xff]   ;;  %v1740_v3 = vld [vmem:[#allocation2 + $0xa8] sm:$0xff] }
  0x9b   : > { %755 = vst [vmem:[#allocation2 + $0x78] sm:$0xff] %v711_v8  ;;  %v872_v36 = vld [vmem:[#allocation2 + $0xbe] sm:$0xff]  ;;  %v873_v40 = vld [vmem:[#allocation2 + $0xc6] sm:$0xff] }
  0x9c   : > { %747 = vst [vmem:[#allocation2 + $0x38] sm:$0xff] %v4424_v9  ;;  %v897_v6 = vpack.c.bf16 %v873_v40, %v872_v36  ;;  %v3770_v8 = vld [vmem:[%s5051_s4 + $0x98] sm:$0xff] }
  0x9d   : > { %1338 = vmatpush.bf16.msrb.mxu2 %v3770_v8 }
  0x9f   : > { %v4447_v29 = vpop.permute.xlu1 %637 }
  0xa0   : > { %5097 = vst [vmem:[#allocation15_spill] sm:$0xff] %v4447_v29  ;;  %v4450_v31 = vpop.permute.xlu0 %632  ;;  %v4452_v32 = vpop.permute.xlu2 %672  ;;  %v723_v35 = vmul.f32 %v4447_v29, %v507_v15  ;;  %v434_v15 = vmul.f32 %v4240_v38, %v3877_v53  ;;  %v3786_v53 = vld [vmem:[%s5051_s4 + $0x118] sm:$0xff] }
  0xa1   : > { %5098 = vst [vmem:[#allocation16_spill] sm:$0xff] %v4450_v31  ;;  %v722_v46 = vmul.f32 %v4450_v31, %v506_v20  ;;  %v730_v47 = vmul.f32 %v4452_v32, %v514_v23  ;;  %v852_v48 = vld [vmem:[#allocation2 + $0x1e] sm:$0xff]  ;;  %v853_v49 = vld [vmem:[#allocation2 + $0x26] sm:$0xff]  ;;  %1339 = vmatpush.bf16.msrb.mxu2 %v3769_v62  ;;  %1846 = vmatpush.bf16.msrb.mxu0 %v3786_v53 }
  0xa2   : > { %5099 = vst [vmem:[#allocation17_spill] sm:$0xff] %v4452_v32  ;;  %v887_v54 = vpack.c.bf16 %v853_v49, %v852_v48  ;;  %v863_v56 = vld [vmem:[#allocation2 + $0x76] sm:$0xff]  ;;  %v474_v40 = vadd.f32 %v4249_v41, %v434_v15  ;;  %v497_v48 = vmax.f32 %v461_v27, 0.0  ;;  %v464_v15 = vadd.f32 %v4249_v41, %v424_v50  ;;  %v1469_v21 = vld [vmem:[#allocation2 + $0x1f] sm:$0xff]  ;;  %v792_v32 = vld [vmem:[#allocation2 + $0x6d] sm:$0xff] }
  0xa3   : > { %767 = vst [vmem:[#allocation2 + $0xd8] sm:$0xff] %v723_v35  ;;  %v892_v1 = vpack.c.bf16 %v863_v56, %v862_v55  ;;  %v4510_v55 = vld [vmem:[%s4222_s28 + $0x88] sm:$0xff]   ;;  %v794_v29 = vld [vmem:[#allocation2 + $0x7d] sm:$0xff] }
  0xa4   : > { %766 = vst [vmem:[#allocation2 + $0xd0] sm:$0xff] %v722_v46  ;;  %982 = vmatmul.bf16.gmra.mxu0 %v887_v54  ;;  %v486_v46 = vmax.f32 %v450_v28, 0.0  ;;  %v510_v49 = vmax.f32 %v474_v40, 0.0  ;;  %v3779_v54 = vld [vmem:[%s5051_s4 + $0xe0] sm:$0xff]  ;;  %v3894_v16 = vunpack.c.h.bf16 %v4510_v55  ;;  %v3753_v28 = vld [vmem:[%s5051_s4 + $0x10] sm:$0xff]  ;;  %v422_v40 = vmul.f32 %v4240_v38, %v3853_v10 }
  0xa5   : > { %774 = vst [vmem:[#allocation2 + $0x110] sm:$0xff] %v730_v47  ;;  %1007 = vmatmul.bf16.gmra.mxu1 %v892_v1  ;;  %v433_v47 = vmul.f32 %v4240_v38, %v3874_v30  ;;  %v472_v1 = vadd.f32 %v4249_v41, %v432_v43  ;;  %1591 = vmatpush.bf16.msrb.mxu3 %v3779_v54  ;;  %v500_v44 = vmax.f32 %v464_v15, 0.0 }
  0xa6   : > { %1032 = vmatmul.bf16.gmra.mxu2 %v897_v6  ;;  %1121 = vmatpush.bf16.msrb.mxu1 %v3753_v28  ;;  %v3752_v28 = vld [vmem:[%s5051_s4 + $0x8] sm:$0xff] }
  0xa7   : > { %v4478_v18 = vpop.permute.xlu1 %667  ;;  %v473_v8 = vadd.f32 %v4249_v41, %v433_v47  ;;  %v508_v43 = vmax.f32 %v472_v1, 0.0  ;;  %v3778_v47 = vld [vmem:[%s5051_s4 + $0xd8] sm:$0xff] }
  0xa8   : > { %5100 = vst [vmem:[#allocation18_spill] sm:$0xff] %v4478_v18  ;;  %v4480_v20 = vpop.permute.xlu0 %662  ;;  %v4482_v23 = vpop.permute.xlu2 %597  ;;  %v729_v25 = vmul.f32 %v4478_v18, %v513_v58  ;;  %v1481_v18 = vld [vmem:[#allocation2 + $0x7f] sm:$0xff] }
  0xa9   : > { %5101 = vst [vmem:[#allocation19_spill] sm:$0xff] %v4480_v20  ;;  %v728_v35 = vmul.f32 %v4480_v20, %v512_v12  ;;  %v4489_v36 = vmul.f32 %v4482_v23, %v499_v14  ;;  %v509_v30 = vmax.f32 %v473_v8, 0.0  ;;  %1592 = vmatpush.bf16.msrb.mxu3 %v3778_v47  ;;  %v3767_v47 = vld [vmem:[%s5051_s4 + $0x80] sm:$0xff] }
  0xaa   : > { %5102 = vst [vmem:[#allocation20_spill] sm:$0xff] %v4482_v23  ;;  %1122 = vmatpush.bf16.msrb.mxu1 %v3752_v28 }
  0xab   : > { %773 = vst [vmem:[#allocation2 + $0x108] sm:$0xff] %v729_v25  ;;  %v874_v7 = vld [vmem:[#allocation2 + $0xce] sm:$0xff]  ;;  %v875_v51 = vld [vmem:[#allocation2 + $0xd6] sm:$0xff] }
  0xac   : > { %772 = vst [vmem:[#allocation2 + $0x100] sm:$0xff] %v728_v35  ;;  %v898_v57 = vpack.c.bf16 %v875_v51, %v874_v7  ;;  %v439_v35 = vmul.f32 %v4240_v38, %v3886_v13  ;;  %v462_v7 = vadd.f32 %v4249_v41, %v422_v40  ;;  %v3834_v51 = vunpack.c.h.bf16 %v3986_v42 }
  0xad   : > { %759 = vst [vmem:[#allocation2 + $0x98] sm:$0xff] %v4489_v36 }
  0xae   : > { %v479_v1 = vadd.f32 %v4249_v41, %v439_v35  ;;  %v498_v35 = vmax.f32 %v462_v7, 0.0  ;;  %v413_v40 = vmul.f32 %v4240_v38, %v3834_v51 }
  0xaf   : > { %v4512_v56 = vpop.permute.xlu1 %532 }
  0xb0   : > { %v4515_v6 = vpop.permute.xlu0 %587  ;;  %v4517_v33 = vpop.permute.xlu2 %652  ;;  %v4520_v58 = vmul.f32 %v4512_v56, %v486_v46  ;;  %v443_v46 = vmul.f32 %v4240_v38, %v3894_v16  ;;  %v3833_v16 = vunpack.c.l.bf16 %v3986_v42  ;;  %v4000_v42 = vld [vmem:[%s4222_s28 + $0x80] sm:$0xff]  }
  0xb1   : > { %5103 = vst [vmem:[#allocation21_spill] sm:$0xff] %v4515_v6  ;;  %v4526_v12 = vmul.f32 %v4515_v6, %v497_v48  ;;  %v726_v14 = vmul.f32 %v4517_v33, %v510_v49  ;;  %v3768_v48 = vld [vmem:[%s5051_s4 + $0x88] sm:$0xff]  ;;  %v3785_v49 = vld [vmem:[%s5051_s4 + $0x110] sm:$0xff] }
  0xb2   : > { %5104 = vst [vmem:[#allocation22_spill] sm:$0xff] %v4517_v33  ;;  %1340 = vmatpush.bf16.msrb.mxu2 %v3768_v48  ;;  %1847 = vmatpush.bf16.msrb.mxu0 %v3785_v49  ;;  %v483_v15 = vadd.f32 %v4249_v41, %v443_v46  ;;  %v412_v46 = vmul.f32 %v4240_v38, %v3833_v16  ;;  %v3776_v48 = vld [vmem:[%s5051_s4 + $0xc8] sm:$0xff] }
  0xb3   : > { %746 = vst [vmem:[#allocation2 + $0x30] sm:$0xff] %v4520_v58  ;;  %v880_v19 = vld [vmem:[#allocation2 + $0xfe] sm:$0xff]  ;;  %v881_v25 = vld [vmem:[#allocation2 + $0x106] sm:$0xff] }
  0xb4   : > { %757 = vst [vmem:[#allocation2 + $0x88] sm:$0xff] %v4526_v12  ;;  %v901_v27 = vpack.c.bf16 %v881_v25, %v880_v19  ;;  %v864_v25 = vld [vmem:[#allocation2 + $0x7e] sm:$0xff]  ;;  %v3784_v49 = vld [vmem:[%s5051_s4 + $0x108] sm:$0xff]  ;;  %v452_v16 = vadd.f32 %v4249_v41, %v412_v46 }
  0xb5   : > { %770 = vst [vmem:[#allocation2 + $0xf0] sm:$0xff] %v726_v14  ;;  %v3783_v46 = vld [vmem:[%s5051_s4 + $0x100] sm:$0xff] }
  0xb6   : > { %1037 = vmatmul.bf16.gmra.mxu2 %v898_v57  ;;  %1052 = vmatmul.bf16.vlgmr.msra.gmra.mxu3 %v901_v27 }
  0xb7   : > { %v4551_v50 = vpop.permute.xlu1 %647  ;;  %1341 = vmatpush.bf16.msrb.mxu2 %v3767_v47  ;;  %1848 = vmatpush.bf16.msrb.mxu0 %v3784_v49  ;;  %v3806_v47 = vld [vmem:[%s5051_s4 + $0x1b8] sm:$0xff] }
  0xb8   : > { %5105 = vst [vmem:[#allocation23_spill] sm:$0xff] %v4551_v50  ;;  %v4553_v62 = vpop.permute.xlu0 %642  ;;  %v4555_v53 = vpop.permute.xlu2 %602  ;;  %v725_v54 = vmul.f32 %v4551_v50, %v509_v30  ;;  %v3777_v30 = vld [vmem:[%s5051_s4 + $0xd0] sm:$0xff] }
  0xb9   : > { %5106 = vst [vmem:[#allocation24_spill] sm:$0xff] %v4553_v62  ;;  %v724_v8 = vmul.f32 %v4553_v62, %v508_v43  ;;  %v4562_v13 = vmul.f32 %v4555_v53, %v500_v44  ;;  %v515_v43 = vmax.f32 %v479_v1, 0.0  ;;  %v519_v44 = vmax.f32 %v483_v15, 0.0  ;;  %1593 = vmatpush.bf16.msrb.mxu3 %v3777_v30 }
  0xba   : > { %5107 = vst [vmem:[#allocation25_spill] sm:$0xff] %v4555_v53  ;;  %v854_v10 = vld [vmem:[#allocation2 + $0x2e] sm:$0xff]  ;;  %v855_v14 = vld [vmem:[#allocation2 + $0x36] sm:$0xff] }
  0xbb   : > { %769 = vst [vmem:[#allocation2 + $0xe8] sm:$0xff] %v725_v54  ;;  %v888_v19 = vpack.c.bf16 %v855_v14, %v854_v10  ;;  %v865_v57 = vld [vmem:[#allocation2 + $0x86] sm:$0xff]  ;;  %v3890_v10 = vunpack.c.h.bf16 %v4000_v42  ;;  %1849 = vmatpush.bf16.msrb.mxu0 %v3783_v46  ;;  %2350 = vmatpush.bf16.msra.mxu2 %v3806_v47  ;;  %v3798_v47 = vld [vmem:[%s5051_s4 + $0x178] sm:$0xff]  ;;  %v1767_v52 = vpack.c.bf16 %v1740_v3, %v4562_v13 }
  0xbc   : > { %768 = vst [vmem:[#allocation2 + $0xe0] sm:$0xff] %v724_v8  ;;  %v893_v27 = vpack.c.bf16 %v865_v57, %v864_v25  ;;  %v453_v8 = vadd.f32 %v4249_v41, %v413_v40  ;;  %v488_v40 = vmax.f32 %v452_v16, 0.0 }
  0xbd   : > { %760 = vst [vmem:[#allocation2 + $0xa0] sm:$0xff] %v4562_v13  ;;  %987 = vmatmul.bf16.gmra.mxu0 %v888_v19  ;;  %v3889_v19 = vunpack.c.l.bf16 %v4000_v42  ;;  %1594 = vmatpush.bf16.msrb.mxu3 %v3776_v48  ;;  %v3751_v42 = vld [vmem:[%s5051_s4] sm:$0xff] }
  0xbe   : > { %1012 = vmatmul.bf16.gmra.mxu1 %v893_v27  ;;  %v489_v30 = vmax.f32 %v453_v8, 0.0 }
  0xbf   : > { %v4584_v54 = vpop.permute.xlu1 %592  ;;  %1123 = vmatpush.bf16.msrb.mxu1 %v3751_v42 }
  0xc0   : > { %5108 = vst [vmem:[#allocation26_spill] sm:$0xff] %v4584_v54  ;;  %v4586_v1 = vpop.permute.xlu0 %677  ;;  %v4588_v7 = vpop.permute.xlu2 %697  ;;  %v4591_v51 = vmul.f32 %v4584_v54, %v498_v35  ;;  %v441_v35 = vmul.f32 %v4240_v38, %v3890_v10 }
  0xc1   : > { %5109 = vst [vmem:[#allocation27_spill] sm:$0xff] %v4586_v1  ;;  %v731_v14 = vmul.f32 %v4586_v1, %v515_v43  ;;  %v735_v15 = vmul.f32 %v4588_v7, %v519_v44  ;;  %v440_v43 = vmul.f32 %v4240_v38, %v3889_v19  ;;  %v3775_v44 = vld [vmem:[%s5051_s4 + $0xc0] sm:$0xff] }
  0xc2   : > { %5110 = vst [vmem:[#allocation28_spill] sm:$0xff] %v4588_v7  ;;  %1595 = vmatpush.bf16.msrb.mxu3 %v3775_v44  ;;  %v481_v10 = vadd.f32 %v4249_v41, %v441_v35 }
  0xc3   : > { %758 = vst [vmem:[#allocation2 + $0x90] sm:$0xff] %v4591_v51  ;;  %v876_v25 = vld [vmem:[#allocation2 + $0xde] sm:$0xff]  ;;  %v877_v57 = vld [vmem:[#allocation2 + $0xe6] sm:$0xff]  ;;  %2096 = vmatpush.bf16.msra.mxu1 %v3798_v47 }
  0xc4   : > { %775 = vst [vmem:[#allocation2 + $0x118] sm:$0xff] %v731_v14  ;;  %v899_v28 = vpack.c.bf16 %v877_v57, %v876_v25  ;;  %v3893_v14 = vunpack.c.l.bf16 %v4510_v55  ;;  %v480_v25 = vadd.f32 %v4249_v41, %v440_v43  ;;  %v3837_v57 = vunpack.c.l.bf16 %v4303_v11  ;;  %v3814_v11 = vld [vmem:[%s5051_s4 + $0x1f8] sm:$0xff]  ;;  %v780_v55 = vld [vmem:[#allocation2 + $0xd] sm:$0xff] }
  0xc5   : > { %779 = vst [vmem:[#allocation2 + $0x138] sm:$0xff] %v735_v15  ;;  %v517_v44 = vmax.f32 %v481_v10, 0.0  ;;  %v1486_v61 = vld [vmem:[#allocation2 + $0xa7] sm:$0xff] }
  0xc6   : > { %1042 = vmatmul.bf16.gmra.mxu2 %v899_v28  ;;  %v516_v46 = vmax.f32 %v480_v25, 0.0  ;;  %v414_v43 = vmul.f32 %v4240_v38, %v3837_v57  ;;  %2604 = vmatpush.bf16.msra.mxu3 %v3814_v11 }
  0xc7   : > { %v4614_v48 = vpop.permute.xlu1 %547 }
  0xc8   : > { %v4616_v49 = vpop.permute.xlu0 %542  ;;  %v4619_v8 = vmul.f32 %v4614_v48, %v489_v30  ;;  %v882_v30 = vld [vmem:[#allocation2 + $0x10e] sm:$0xff]  ;;  %v454_v57 = vadd.f32 %v4249_v41, %v414_v43  ;;  %v868_v43 = vld [vmem:[#allocation2 + $0x9e] sm:$0xff] }
  0xc9   : > { %v4624_v15 = vmul.f32 %v4616_v49, %v488_v40  ;;  %v442_v40 = vmul.f32 %v4240_v38, %v3893_v14 }
  0xca   : > { %v866_v16 = vld [vmem:[#allocation2 + $0x8e] sm:$0xff]  ;;  %v867_v19 = vld [vmem:[#allocation2 + $0x96] sm:$0xff]  ;;  %749 = vst [vmem:[#allocation2 + $0x48] sm:$0xff] %v4619_v8  ;;  %v490_v47 = vmax.f32 %v454_v57, 0.0 }
  0xcb   : > { %v894_v28 = vpack.c.bf16 %v867_v19, %v866_v16  ;;  %v883_v42 = vld [vmem:[#allocation2 + $0x116] sm:$0xff]  ;;  %748 = vst [vmem:[#allocation2 + $0x40] sm:$0xff] %v4624_v15  ;;  %v878_v19 = vld [vmem:[#allocation2 + $0xee] sm:$0xff]  ;;  %v482_v25 = vadd.f32 %v4249_v41, %v442_v40 }
  0xcc   : > { %v902_v35 = vpack.c.bf16 %v883_v42, %v882_v30  ;;  %v879_v42 = vld [vmem:[#allocation2 + $0xf6] sm:$0xff]  ;;  %v796_v24 = vld [vmem:[#allocation2 + $0x8d] sm:$0xff] }
  0xcd   : > { %v900_v27 = vpack.c.bf16 %v879_v42, %v878_v19  ;;  %v518_v11 = vmax.f32 %v482_v25, 0.0  ;;  %v797_v34 = vld [vmem:[#allocation2 + $0x95] sm:$0xff] }
  0xce   : > { %1017 = vmatmul.bf16.gmra.mxu1 %v894_v28  ;;  %1057 = vmatmul.bf16.gmra.mxu3 %v902_v35  ;;  %v824_v23 = vpack.c.bf16 %v797_v34, %v796_v24  ;;  %v1487_v34 = vld [vmem:[#allocation2 + $0xaf] sm:$0xff] }
  0xcf   : > { %v4640_v16 = vpop.permute.xlu1 %687 }
  0xd0   : > { %5111 = vst [vmem:[#allocation29_spill] sm:$0xff] %v4640_v16  ;;  %v4642_v10 = vpop.permute.xlu0 %682  ;;  %v733_v14 = vmul.f32 %v4640_v16, %v517_v44  ;;  %v3822_v44 = vld [vmem:[%s5051_s4 + $0x238] sm:$0xff] }
  0xd1   : > { %5112 = vst [vmem:[#allocation30_spill] sm:$0xff] %v4642_v10  ;;  %v732_v38 = vmul.f32 %v4642_v10, %v516_v46  ;;  %2858 = vmatpush.bf16.msra.mxu0 %v3822_v44  ;;  %v1733_v10 = vld [vmem:[#allocation2 + $0x70] sm:$0xff] }
  0xd2   : > { %777 = vst [vmem:[#allocation2 + $0x128] sm:$0xff] %v733_v14  ;;  %v856_v28 = vld [vmem:[#allocation2 + $0x3e] sm:$0xff]  ;;  %v857_v30 = vld [vmem:[#allocation2 + $0x46] sm:$0xff] }
  0xd3   : > { %776 = vst [vmem:[#allocation2 + $0x120] sm:$0xff] %v732_v38  ;;  %v889_v35 = vpack.c.bf16 %v857_v30, %v856_v28  ;;  %v869_v14 = vld [vmem:[#allocation2 + $0xa6] sm:$0xff]  ;;  %v1215_v28 = vld [vmem:[#allocation2 + $0xf] sm:$0xff]  ;;  %v1216_v30 = vld [vmem:[#allocation2 + $0x17] sm:$0xff] }
  0xd4   : > { %v895_v25 = vpack.c.bf16 %v869_v14, %v868_v43  ;;  %v1251_v42 = vpack.c.bf16 %v1216_v30, %v1215_v28  ;;  %v3805_v43 = vld [vmem:[%s5051_s4 + $0x1b0] sm:$0xff] }
  0xd5   : > { %992 = vmatmul.bf16.gmra.mxu0 %v889_v35  ;;  %v3813_v14 = vld [vmem:[%s5051_s4 + $0x1f0] sm:$0xff]  ;;  %2351 = vmatpush.bf16.msra.mxu2 %v3805_v43  ;;  %v3796_v43 = vld [vmem:[%s5051_s4 + $0x168] sm:$0xff] }
  0xd6   : > { %1047 = vmatmul.bf16.gmra.mxu2 %v900_v27  ;;  %2605 = vmatpush.bf16.msra.mxu3 %v3813_v14  ;;  %v786_v14 = vld [vmem:[#allocation2 + $0x3d] sm:$0xff] }
  0xd7   : > { %v4651_v40 = vpop.permute.xlu1 %692 }
  0xd8   : > { %5113 = vst [vmem:[#allocation31_spill] sm:$0xff] %v4651_v40  ;;  %v4653_v46 = vpop.permute.xlu0 %552  ;;  %v734_v41 = vmul.f32 %v4651_v40, %v518_v11  ;;  %v1734_v40 = vld [vmem:[#allocation2 + $0x78] sm:$0xff] }
  0xd9   : > { %5114 = vst [vmem:[#allocation32_spill] sm:$0xff] %v4653_v46  ;;  %v4657_v38 = vmul.f32 %v4653_v46, %v490_v47  ;;  %v781_v47 = vld [vmem:[#allocation2 + $0x15] sm:$0xff] }
  0xda   : > { %778 = vst [vmem:[#allocation2 + $0x130] sm:$0xff] %v734_v41  ;;  %v884_v19 = vld [vmem:[#allocation2 + $0x11e] sm:$0xff]  ;;  %v885_v27 = vld [vmem:[#allocation2 + $0x126] sm:$0xff]  ;;  %v816_v63 = vpack.c.bf16 %v781_v47, %v780_v55 }
  0xdb   : > { %750 = vst [vmem:[#allocation2 + $0x50] sm:$0xff] %v4657_v38  ;;  %v903_v57 = vpack.c.bf16 %v885_v27, %v884_v19  ;;  %v1470_v41 = vld [vmem:[#allocation2 + $0x27] sm:$0xff]  ;;  %v3797_v19 = vld [vmem:[%s5051_s4 + $0x170] sm:$0xff] }
  0xdc   : > { %v1505_v7 = vpack.c.bf16 %v1470_v41, %v1469_v21  ;;  %2097 = vmatpush.bf16.msra.mxu1 %v3797_v19  ;;  %v782_v21 = vld [vmem:[#allocation2 + $0x1d] sm:$0xff]  ;;  %v783_v55 = vld [vmem:[#allocation2 + $0x25] sm:$0xff]  ;;  %v1471_v27 = vld [vmem:[#allocation2 + $0x2f] sm:$0xff] }
  0xdd   : > { %v817_v28 = vpack.c.bf16 %v783_v55, %v782_v21  ;;  %v3804_v47 = vld [vmem:[%s5051_s4 + $0x1a8] sm:$0xff] }
  0xde   : > { %1022 = vmatmul.bf16.gmra.mxu1 %v895_v25  ;;  %1062 = vmatmul.bf16.gmra.mxu3 %v903_v57  ;;  %v1472_v25 = vld [vmem:[#allocation2 + $0x37] sm:$0xff] }
  0xdf   : > { %v3821_v57 = vld [vmem:[%s5051_s4 + $0x230] sm:$0xff]  ;;  %v1506_v30 = vpack.c.bf16 %v1472_v25, %v1471_v27  ;;  %2352 = vmatpush.bf16.msra.mxu2 %v3804_v47  ;;  %v4694_v27 = vpop.f32.mrf.mxu0  ;;  %v3820_v25 = vld [vmem:[%s5051_s4 + $0x228] sm:$0xff] }
  0xe0   : > { %2859 = vmatpush.bf16.msra.mxu0 %v3821_v57  ;;  %2098 = vmatpush.bf16.msra.mxu1 %v3796_v43  ;;  %v1478_v47 = vld [vmem:[#allocation2 + $0x67] sm:$0xff] }
  0xe2   : > { %v858_v35 = vld [vmem:[#allocation2 + $0x4e] sm:$0xff]  ;;  %v859_v44 = vld [vmem:[#allocation2 + $0x56] sm:$0xff] }
  0xe3   : > { %v890_v11 = vpack.c.bf16 %v859_v44, %v858_v35  ;;  %v1474_v35 = vld [vmem:[#allocation2 + $0x47] sm:$0xff]  ;;  %v1475_v21 = vld [vmem:[#allocation2 + $0x4f] sm:$0xff]  ;;  %v1476_v55 = vld [vmem:[#allocation2 + $0x57] sm:$0xff] }
  0xe4   : > { %2860 = vmatpush.bf16.msra.mxu0 %v3820_v25 }
  0xe5   : > { %997 = vmatmul.bf16.gmra.mxu0 %v890_v11 }
  0xe6   : > { %1342 = vmatmul.bf16.vlgmr.msrb.gmra.mxu2 %v1251_v42  ;;  %v1473_v42 = vld [vmem:[#allocation2 + $0x3f] sm:$0xff] }
  0xe7   : > { %v1507_v11 = vpack.c.bf16 %v1474_v35, %v1473_v42  ;;  %v788_v35 = vld [vmem:[#allocation2 + $0x4d] sm:$0xff] }
  0xee   : > { %1124 = vmatmul.bf16.vlgmr.msrb.gmra.mxu1 %v816_v63  ;;  %1596 = vmatmul.bf16.vlgmr.msrb.gmra.mxu3 %v1505_v7  ;;  %v5115_v63 = vpack.c.bf16 %v4340_v45, %v4418_v5  ;;  %v784_v45 = vld [vmem:[#allocation2 + $0x2d] sm:$0xff]  ;;  %v785_v5 = vld [vmem:[#allocation2 + $0x35] sm:$0xff] }
  0xef   : > { %v818_v44 = vpack.c.bf16 %v785_v5, %v784_v45  ;;  %v4704_v45 = vpop.f32.mrf.mxu0 }
  0xf5   : > { %1850 = vmatmul.bf16.vlgmr.msrb.gmra.mxu0 %v5115_v63  ;;  %v787_v63 = vld [vmem:[#allocation2 + $0x45] sm:$0xff] }
  0xf6   : > { %1347 = vmatmul.bf16.gmra.mxu2 %v1505_v7  ;;  %v5116_v7 = vpack.c.bf16 %v4424_v9, %v4520_v58  ;;  %v5117_v9 = vpack.c.bf16 %v4619_v8, %v4624_v15  ;;  %v3812_v58 = vld [vmem:[%s5051_s4 + $0x1e8] sm:$0xff]  ;;  %v819_v8 = vpack.c.bf16 %v787_v63, %v786_v14  ;;  %v1508_v15 = vpack.c.bf16 %v1476_v55, %v1475_v21 }
  0xf7   : > { %2606 = vmatpush.bf16.msra.mxu3 %v3812_v58  ;;  %v1732_v63 = vld [vmem:[#allocation2 + $0x68] sm:$0xff] }
  0xfe   : > { %1129 = vmatmul.bf16.gmra.mxu1 %v817_v28  ;;  %1601 = vmatmul.bf16.gmra.mxu3 %v1506_v30 }
 0x105   : > { %1855 = vmatmul.bf16.gmra.mxu0 %v5116_v7 }
 0x106   : > { %1352 = vmatmul.bf16.gmra.mxu2 %v1506_v30  ;;  %v1730_v30 = vld [vmem:[#allocation2 + $0x58] sm:$0xff] }
 0x107   : > { %v1762_v7 = vpack.c.bf16 %v1730_v30, %v4657_v38  ;;  %v1731_v38 = vld [vmem:[#allocation2 + $0x60] sm:$0xff] }
 0x108   : > { %v1763_v55 = vpack.c.bf16 %v1732_v63, %v1731_v38  ;;  %v790_v30 = vld [vmem:[#allocation2 + $0x5d] sm:$0xff] }
 0x10e   : > { %1134 = vmatmul.bf16.gmra.mxu1 %v818_v44  ;;  %1606 = vmatmul.bf16.gmra.mxu3 %v1507_v11  ;;  %v789_v44 = vld [vmem:[#allocation2 + $0x55] sm:$0xff] }
 0x112   : > { %v4681_v41 = vpop.f32.mrf.mxu1 }
 0x115   : > { %1860 = vmatmul.bf16.gmra.mxu0 %v5117_v9  ;;  %v820_v9 = vpack.c.bf16 %v789_v44, %v788_v35  ;;  %v3811_v35 = vld [vmem:[%s5051_s4 + $0x1e0] sm:$0xff] }
 0x116   : > { %1357 = vmatmul.bf16.gmra.mxu2 %v1507_v11  ;;  %v1477_v11 = vld [vmem:[#allocation2 + $0x5f] sm:$0xff]  ;;  %2607 = vmatpush.bf16.msra.mxu3 %v3811_v35 }
 0x117   : > { %v1509_v58 = vpack.c.bf16 %v1478_v47, %v1477_v11  ;;  %v791_v11 = vld [vmem:[#allocation2 + $0x65] sm:$0xff]  ;;  %v1479_v47 = vld [vmem:[#allocation2 + $0x6f] sm:$0xff] }
 0x118   : > { %v3819_v35 = vld [vmem:[%s5051_s4 + $0x220] sm:$0xff] }
 0x119   : > { %v4692_v19 = vpop.f32.mrf.mxu2  ;;  %2861 = vmatpush.bf16.msra.mxu0 %v3819_v35 }
 0x11a   : > { %v4699_v57 = vpop.f32.mrf.mxu1 }
 0x11e   : > { %1139 = vmatmul.bf16.gmra.mxu1 %v819_v8  ;;  %1611 = vmatmul.bf16.gmra.mxu3 %v1508_v15  ;;  %v3803_v8 = vld [vmem:[%s5051_s4 + $0x1a0] sm:$0xff] }
 0x11f   : > { %2353 = vmatpush.bf16.msra.mxu2 %v3803_v8 }
 0x121   : > { %v4701_v28 = vpop.f32.mrf.mxu2  ;;  %v4710_v43 = vpop.f32.mrf.mxu0 }
 0x122   : > { %v4706_v5 = vpop.f32.mrf.mxu1 }
 0x125   : > { %1865 = vmatmul.bf16.gmra.mxu0 %v1762_v7  ;;  %v1480_v7 = vld [vmem:[#allocation2 + $0x77] sm:$0xff] }
 0x126   : > { %1362 = vmatmul.bf16.gmra.mxu2 %v1508_v15  ;;  %v1510_v38 = vpack.c.bf16 %v1480_v7, %v1479_v47  ;;  %v793_v47 = vld [vmem:[#allocation2 + $0x75] sm:$0xff] }
 0x127   : > { %v822_v20 = vpack.c.bf16 %v793_v47, %v792_v32  ;;  %v795_v32 = vld [vmem:[#allocation2 + $0x85] sm:$0xff] }
 0x128   : > { %v823_v31 = vpack.c.bf16 %v795_v32, %v794_v29 }
 0x129   : > { %v4708_v42 = vpop.f32.mrf.mxu2  ;;  %v4719_v15 = vpop.f32.mrf.mxu0 }
 0x12a   : > { %v4714_v21 = vpop.f32.mrf.mxu1 }
 0x12e   : > { %1144 = vmatmul.bf16.gmra.mxu1 %v820_v9  ;;  %1616 = vmatmul.bf16.gmra.mxu3 %v1509_v58  ;;  %v3795_v9 = vld [vmem:[%s5051_s4 + $0x160] sm:$0xff] }
 0x12f   : > { %2099 = vmatpush.bf16.msra.mxu1 %v3795_v9  ;;  %v1482_v9 = vld [vmem:[#allocation2 + $0x87] sm:$0xff] }
 0x130   : > { %v1511_v2 = vpack.c.bf16 %v1482_v9, %v1481_v18  ;;  %v1483_v18 = vld [vmem:[#allocation2 + $0x8f] sm:$0xff] }
 0x131   : > { %v4712_v14 = vpop.f32.mrf.mxu2 }
 0x135   : > { %1870 = vmatmul.bf16.gmra.mxu0 %v1763_v55 }
 0x136   : > { %1367 = vmatmul.bf16.gmra.mxu2 %v1509_v58  ;;  %v821_v58 = vpack.c.bf16 %v791_v11, %v790_v30  ;;  %v1764_v30 = vpack.c.bf16 %v1734_v40, %v1733_v10 }
 0x139   : > { %v4721_v25 = vpop.f32.mrf.mxu2  ;;  %v4731_v63 = vpop.f32.mrf.mxu3 }
 0x13a   : > { %v4733_v55 = vpop.f32.mrf.mxu0 }
 0x13b   : > { %v4726_v44 = vpop.f32.mrf.mxu1 }
 0x13e   : > { %1149 = vmatmul.bf16.gmra.mxu1 %v821_v58  ;;  %1621 = vmatmul.bf16.gmra.mxu3 %v1510_v38 }
 0x141   : > { %v4735_v8 = vpop.f32.mrf.mxu2  ;;  %v4742_v7 = vpop.f32.mrf.mxu3 }
 0x142   : > { %v4746_v58 = vpop.f32.mrf.mxu0 }
 0x143   : > { %v4740_v16 = vpop.f32.mrf.mxu1 }
 0x145   : > { %1875 = vmatmul.bf16.gmra.mxu0 %v1764_v30  ;;  %v1735_v30 = vld [vmem:[#allocation2 + $0x80] sm:$0xff] }
 0x146   : > { %1372 = vmatmul.bf16.gmra.mxu2 %v1510_v38  ;;  %v1765_v33 = vpack.c.bf16 %v4526_v12, %v1735_v30  ;;  %v3802_v12 = vld [vmem:[%s5051_s4 + $0x198] sm:$0xff] }
 0x147   : > { %2354 = vmatpush.bf16.msra.mxu2 %v3802_v12  ;;  %v1485_v12 = vld [vmem:[#allocation2 + $0x9f] sm:$0xff] }
 0x149   : > { %v4744_v11 = vpop.f32.mrf.mxu2 }
 0x14b   : > { %v4748_v1 = vpop.f32.mrf.mxu1 }
 0x14e   : > { %1154 = vmatmul.bf16.gmra.mxu1 %v822_v20  ;;  %1626 = vmatmul.bf16.gmra.mxu3 %v1511_v2  ;;  %v1484_v20 = vld [vmem:[#allocation2 + $0x97] sm:$0xff] }
 0x14f   : > { %v1512_v22 = vpack.c.bf16 %v1484_v20, %v1483_v18  ;;  %v3818_v20 = vld [vmem:[%s5051_s4 + $0x218] sm:$0xff] }
 0x150   : > { %2862 = vmatpush.bf16.msra.mxu0 %v3818_v20 }
 0x151   : > { %v4750_v35 = vpop.f32.mrf.mxu2  ;;  %v4752_v10 = vpop.f32.mrf.mxu3 }
 0x152   : > { %v4754_v40 = vpop.f32.mrf.mxu0 }
 0x153   : > { %v4756_v38 = vpop.f32.mrf.mxu1 }
 0x155   : > { %1880 = vmatmul.bf16.gmra.mxu0 %v1765_v33  ;;  %v3794_v33 = vld [vmem:[%s5051_s4 + $0x158] sm:$0xff] }
 0x156   : > { %1377 = vmatmul.bf16.gmra.mxu2 %v1511_v2  ;;  %v3810_v2 = vld [vmem:[%s5051_s4 + $0x1d8] sm:$0xff]  ;;  %2100 = vmatpush.bf16.msra.mxu1 %v3794_v33 }
 0x157   : > { %2608 = vmatpush.bf16.msra.mxu3 %v3810_v2 }
 0x159   : > { %v4759_v50 = vpop.f32.mrf.mxu2  ;;  %v4761_v62 = vpop.f32.mrf.mxu3 }
 0x15a   : > { %v4763_v47 = vpop.f32.mrf.mxu0 }
 0x15b   : > { %v4765_v9 = vpop.f32.mrf.mxu1 }
 0x15e   : > { %1159 = vmatmul.bf16.gmra.mxu1 %v823_v31  ;;  %1631 = vmatmul.bf16.gmra.mxu3 %v1512_v22  ;;  %v5118_v31 = vpack.c.bf16 %v4489_v36, %v4591_v51  ;;  %v1513_v36 = vpack.c.bf16 %v1486_v61, %v1485_v12  ;;  %v1488_v12 = vld [vmem:[#allocation2 + $0xb7] sm:$0xff] }
 0x161   : > { %v4776_v30 = vpop.f32.mrf.mxu2  ;;  %v4778_v29 = vpop.f32.mrf.mxu3 }
 0x162   : > { %v4780_v32 = vpop.f32.mrf.mxu0 }
 0x163   : > { %v4782_v18 = vpop.f32.mrf.mxu1 }
 0x165   : > { %1885 = vmatmul.bf16.gmra.mxu0 %v5118_v31 }
 0x166   : > { %1382 = vmatmul.bf16.gmra.mxu2 %v1512_v22 }
 0x169   : > { %v4790_v2 = vpop.f32.mrf.mxu3  ;;  %v1343_v33 = vpop.f32.mrf.mxu2 }
 0x16a   : > { %v4792_v37 = vpop.f32.mrf.mxu0 }
 0x16b   : > { %v1125_v53 = vpop.f32.mrf.mxu1 }
 0x16c   : > { %v1126_v22 = vadd.f32 %v1125_v53, %v4694_v27  ;;  %v799_v27 = vld [vmem:[#allocation2 + $0xa5] sm:$0xff] }
 0x16e   : > { %1164 = vmatmul.bf16.gmra.mxu1 %v824_v23  ;;  %1636 = vmatmul.bf16.gmra.mxu3 %v1513_v36  ;;  %v1433_v51 = vadd.f32 %v1343_v33, %v1126_v22  ;;  %v798_v23 = vld [vmem:[#allocation2 + $0x9d] sm:$0xff] }
 0x171   : > { %v1345_v31 = vpop.f32.mrf.mxu2  ;;  %v1597_v54 = vpop.f32.mrf.mxu3 }
 0x172   : > { %v1687_v6 = vadd.f32 %v1597_v54, %v1433_v51  ;;  %v1851_v26 = vpop.f32.mrf.mxu0 }
 0x173   : > { %v1127_v20 = vpop.f32.mrf.mxu1 }
 0x174   : > { %v1128_v17 = vadd.f32 %v1127_v20, %v4704_v45  ;;  %v4796_v0 = vadd.f32 %v1851_v26, %v1687_v6  ;;  %v825_v26 = vpack.c.bf16 %v799_v27, %v798_v23  ;;  %v1514_v6 = vpack.c.bf16 %v1488_v12, %v1487_v34  ;;  %v1741_v45 = vld [vmem:[#allocation2 + $0xb0] sm:$0xff] }
 0x175   : > { %1890 = vmatmul.bf16.gmra.mxu0 %v1767_v52  ;;  %v3801_v52 = vld [vmem:[%s5051_s4 + $0x190] sm:$0xff] }
 0x176   : > { %1387 = vmatmul.bf16.gmra.mxu2 %v1513_v36  ;;  %v1434_v53 = vadd.f32 %v1345_v31, %v1128_v17  ;;  %v3793_v23 = vld [vmem:[%s5051_s4 + $0x150] sm:$0xff] }
 0x177   : > { %2355 = vmatpush.bf16.msra.mxu2 %v3801_v52  ;;  %2101 = vmatpush.bf16.msra.mxu1 %v3793_v23  ;;  %v800_v12 = vld [vmem:[#allocation2 + $0xad] sm:$0xff] }
 0x179   : > { %v1348_v61 = vpop.f32.mrf.mxu2  ;;  %v1599_v24 = vpop.f32.mrf.mxu3 }
 0x17a   : > { %v1688_v33 = vadd.f32 %v1599_v24, %v1434_v53  ;;  %v1853_v22 = vpop.f32.mrf.mxu0  ;;  %v1742_v53 = vld [vmem:[#allocation2 + $0xb8] sm:$0xff] }
 0x17b   : > { %v1130_v54 = vpop.f32.mrf.mxu1 }
 0x17c   : > { %v1131_v51 = vadd.f32 %v1130_v54, %v4710_v43  ;;  %v4800_v59 = vadd.f32 %v1853_v22, %v1688_v33  ;;  %v3809_v43 = vld [vmem:[%s5051_s4 + $0x1d0] sm:$0xff] }
 0x17d   : > { %2609 = vmatpush.bf16.msra.mxu3 %v3809_v43  ;;  %v801_v22 = vld [vmem:[#allocation2 + $0xb5] sm:$0xff] }
 0x17e   : > { %1169 = vmatmul.bf16.gmra.mxu1 %v825_v26  ;;  %1641 = vmatmul.bf16.gmra.mxu3 %v1514_v6  ;;  %v1435_v3 = vadd.f32 %v1348_v61, %v1131_v51  ;;  %v1768_v61 = vpack.c.bf16 %v1742_v53, %v1741_v45  ;;  %v1489_v51 = vld [vmem:[#allocation2 + $0xbf] sm:$0xff]  ;;  %v1490_v26 = vld [vmem:[#allocation2 + $0xc7] sm:$0xff] }
 0x17f   : > { %v1743_v53 = vld [vmem:[#allocation2 + $0xc0] sm:$0xff] }
 0x181   : > { %v1350_v17 = vpop.f32.mrf.mxu2  ;;  %v1602_v13 = vpop.f32.mrf.mxu3 }
 0x182   : > { %v1689_v36 = vadd.f32 %v1602_v13, %v1435_v3  ;;  %v1856_v20 = vpop.f32.mrf.mxu0 }
 0x183   : > { %v1132_v31 = vpop.f32.mrf.mxu1 }
 0x184   : > { %v1133_v34 = vadd.f32 %v1132_v31, %v4719_v15  ;;  %v4809_v24 = vadd.f32 %v1856_v20, %v1689_v36  ;;  %v3817_v15 = vld [vmem:[%s5051_s4 + $0x210] sm:$0xff] }
 0x185   : > { %1895 = vmatmul.bf16.gmra.mxu0 %v1768_v61 }
 0x186   : > { %1392 = vmatmul.bf16.gmra.mxu2 %v1514_v6  ;;  %v1436_v27 = vadd.f32 %v1350_v17, %v1133_v34  ;;  %v826_v6 = vpack.c.bf16 %v801_v22, %v800_v12  ;;  %v1515_v17 = vpack.c.bf16 %v1490_v26, %v1489_v51  ;;  %2863 = vmatpush.bf16.msra.mxu0 %v3817_v15  ;;  %v1744_v34 = vld [vmem:[#allocation2 + $0xc8] sm:$0xff]  ;;  %v802_v22 = vld [vmem:[#allocation2 + $0xbd] sm:$0xff] }
 0x187   : > { %v1492_v15 = vld [vmem:[#allocation2 + $0xd7] sm:$0xff] }
 0x189   : > { %v1353_v33 = vpop.f32.mrf.mxu2  ;;  %v1604_v54 = vpop.f32.mrf.mxu3 }
 0x18a   : > { %v1690_v3 = vadd.f32 %v1604_v54, %v1436_v27  ;;  %v1858_v13 = vpop.f32.mrf.mxu0 }
 0x18b   : > { %v1135_v52 = vpop.f32.mrf.mxu1 }
 0x18c   : > { %v1136_v45 = vadd.f32 %v1135_v52, %v4733_v55  ;;  %v4818_v36 = vadd.f32 %v1858_v13, %v1690_v3  ;;  %v1769_v55 = vpack.c.bf16 %v1744_v34, %v1743_v53  ;;  %v803_v3 = vld [vmem:[#allocation2 + $0xc5] sm:$0xff]  ;;  %v1745_v34 = vld [vmem:[#allocation2 + $0xd0] sm:$0xff] }
 0x18e   : > { %1174 = vmatmul.bf16.gmra.mxu1 %v826_v6  ;;  %1646 = vmatmul.bf16.gmra.mxu3 %v1515_v17  ;;  %v1437_v43 = vadd.f32 %v1353_v33, %v1136_v45  ;;  %v1491_v33 = vld [vmem:[#allocation2 + $0xcf] sm:$0xff] }
 0x191   : > { %v1355_v31 = vpop.f32.mrf.mxu2  ;;  %v1607_v20 = vpop.f32.mrf.mxu3 }
 0x192   : > { %v1691_v61 = vadd.f32 %v1607_v20, %v1437_v43  ;;  %v1861_v27 = vpop.f32.mrf.mxu0  ;;  %v1516_v20 = vpack.c.bf16 %v1492_v15, %v1491_v33 }
 0x193   : > { %v1137_v23 = vpop.f32.mrf.mxu1 }
 0x194   : > { %v1138_v54 = vadd.f32 %v1137_v23, %v4746_v58  ;;  %v4821_v46 = vadd.f32 %v1861_v27, %v1691_v61  ;;  %v827_v58 = vpack.c.bf16 %v803_v3, %v802_v22  ;;  %v1746_v61 = vld [vmem:[#allocation2 + $0xd8] sm:$0xff]  ;;  %v3792_v3 = vld [vmem:[%s5051_s4 + $0x148] sm:$0xff] }
 0x195   : > { %1900 = vmatmul.bf16.gmra.mxu0 %v1769_v55  ;;  %2102 = vmatpush.bf16.msra.mxu1 %v3792_v3 }
 0x196   : > { %1397 = vmatmul.bf16.gmra.mxu2 %v1515_v17  ;;  %v1438_v12 = vadd.f32 %v1355_v31, %v1138_v54 }
 0x199   : > { %v1358_v51 = vpop.f32.mrf.mxu2  ;;  %v1609_v26 = vpop.f32.mrf.mxu3 }
 0x19a   : > { %v1692_v52 = vadd.f32 %v1609_v26, %v1438_v12  ;;  %v1863_v45 = vpop.f32.mrf.mxu0  ;;  %v1770_v26 = vpack.c.bf16 %v1746_v61, %v1745_v34 }
 0x19b   : > { %v1140_v13 = vpop.f32.mrf.mxu1 }
 0x19c   : > { %v1141_v6 = vadd.f32 %v1140_v13, %v4754_v40  ;;  %v4824_v43 = vadd.f32 %v1863_v45, %v1692_v52  ;;  %v3800_v40 = vld [vmem:[%s5051_s4 + $0x188] sm:$0xff]  ;;  %v805_v52 = vld [vmem:[#allocation2 + $0xd5] sm:$0xff]  ;;  %v1493_v13 = vld [vmem:[#allocation2 + $0xdf] sm:$0xff] }
 0x19d   : > { %2356 = vmatpush.bf16.msra.mxu2 %v3800_v40  ;;  %v1494_v45 = vld [vmem:[#allocation2 + $0xe7] sm:$0xff] }
 0x19e   : > { %1179 = vmatmul.bf16.gmra.mxu1 %v827_v58  ;;  %1651 = vmatmul.bf16.gmra.mxu3 %v1516_v20  ;;  %v1439_v17 = vadd.f32 %v1358_v51, %v1141_v6  ;;  %v3808_v51 = vld [vmem:[%s5051_s4 + $0x1c8] sm:$0xff]  ;;  %v1517_v34 = vpack.c.bf16 %v1494_v45, %v1493_v13  ;;  %v806_v13 = vld [vmem:[#allocation2 + $0xdd] sm:$0xff] }
 0x19f   : > { %2610 = vmatpush.bf16.msra.mxu3 %v3808_v51  ;;  %v807_v45 = vld [vmem:[#allocation2 + $0xe5] sm:$0xff] }
 0x1a1   : > { %v1360_v53 = vpop.f32.mrf.mxu2  ;;  %v1612_v31 = vpop.f32.mrf.mxu3 }
 0x1a2   : > { %v1693_v23 = vadd.f32 %v1612_v31, %v1439_v17  ;;  %v1866_v54 = vpop.f32.mrf.mxu0 }
 0x1a3   : > { %v1142_v27 = vpop.f32.mrf.mxu1 }
 0x1a4   : > { %v1143_v55 = vadd.f32 %v1142_v27, %v4763_v47  ;;  %v4827_v12 = vadd.f32 %v1866_v54, %v1693_v23  ;;  %v804_v47 = vld [vmem:[#allocation2 + $0xcd] sm:$0xff] }
 0x1a5   : > { %1905 = vmatmul.bf16.gmra.mxu0 %v1770_v26  ;;  %v828_v31 = vpack.c.bf16 %v805_v52, %v804_v47  ;;  %v3816_v23 = vld [vmem:[%s5051_s4 + $0x208] sm:$0xff] }
 0x1a6   : > { %1402 = vmatmul.bf16.gmra.mxu2 %v1516_v20  ;;  %v1440_v22 = vadd.f32 %v1360_v53, %v1143_v55  ;;  %2864 = vmatpush.bf16.msra.mxu0 %v3816_v23  ;;  %v1747_v55 = vld [vmem:[#allocation2 + $0xe0] sm:$0xff]  ;;  %v1748_v26 = vld [vmem:[#allocation2 + $0xe8] sm:$0xff] }
 0x1a7   : > { %v1771_v47 = vpack.c.bf16 %v1748_v26, %v1747_v55  ;;  %v1749_v26 = vld [vmem:[#allocation2 + $0xf0] sm:$0xff] }
 0x1a9   : > { %v1363_v33 = vpop.f32.mrf.mxu2  ;;  %v1614_v15 = vpop.f32.mrf.mxu3 }
 0x1aa   : > { %v1694_v6 = vadd.f32 %v1614_v15, %v1440_v22  ;;  %v1868_v20 = vpop.f32.mrf.mxu0 }
 0x1ab   : > { %v1145_v58 = vpop.f32.mrf.mxu1 }
 0x1ac   : > { %v1146_v17 = vadd.f32 %v1145_v58, %v4780_v32  ;;  %v4839_v53 = vadd.f32 %v1868_v20, %v1694_v6  ;;  %v1495_v6 = vld [vmem:[#allocation2 + $0xef] sm:$0xff] }
 0x1ae   : > { %1184 = vmatmul.bf16.gmra.mxu1 %v828_v31  ;;  %1656 = vmatmul.bf16.gmra.mxu3 %v1517_v34  ;;  %v1441_v61 = vadd.f32 %v1363_v33, %v1146_v17  ;;  %v1496_v31 = vld [vmem:[#allocation2 + $0xf7] sm:$0xff] }
 0x1b1   : > { %v1365_v27 = vpop.f32.mrf.mxu2  ;;  %v1617_v54 = vpop.f32.mrf.mxu3 }
 0x1b2   : > { %v1695_v40 = vadd.f32 %v1617_v54, %v1441_v61  ;;  %v1871_v51 = vpop.f32.mrf.mxu0  ;;  %v1518_v54 = vpack.c.bf16 %v1496_v31, %v1495_v6  ;;  %v808_v6 = vld [vmem:[#allocation2 + $0xed] sm:$0xff] }
 0x1b3   : > { %v1147_v22 = vpop.f32.mrf.mxu1 }
 0x1b4   : > { %v1148_v32 = vadd.f32 %v1147_v22, %v4792_v37  ;;  %v4845_v3 = vadd.f32 %v1871_v51, %v1695_v40  ;;  %v829_v37 = vpack.c.bf16 %v807_v45, %v806_v13  ;;  %v3799_v13 = vld [vmem:[%s5051_s4 + $0x180] sm:$0xff] }
 0x1b5   : > { %1910 = vmatmul.bf16.gmra.mxu0 %v1771_v47  ;;  %2357 = vmatpush.bf16.msra.mxu2 %v3799_v13 }
 0x1b6   : > { %1407 = vmatmul.bf16.gmra.mxu2 %v1517_v34  ;;  %v1442_v33 = vadd.f32 %v1365_v27, %v1148_v32  ;;  %v1750_v32 = vld [vmem:[#allocation2 + $0xf8] sm:$0xff] }
 0x1b9   : > { %v1368_v15 = vpop.f32.mrf.mxu2  ;;  %v1619_v52 = vpop.f32.mrf.mxu3 }
 0x1ba   : > { %v1696_v58 = vadd.f32 %v1619_v52, %v1442_v33  ;;  %v1873_v17 = vpop.f32.mrf.mxu0  ;;  %v1772_v52 = vpack.c.bf16 %v1750_v32, %v1749_v26  ;;  %v3791_v26 = vld [vmem:[%s5051_s4 + $0x140] sm:$0xff] }
 0x1bb   : > { %v1150_v20 = vpop.f32.mrf.mxu1  ;;  %2103 = vmatpush.bf16.msra.mxu1 %v3791_v26  ;;  %v1751_v32 = vld [vmem:[#allocation2 + $0x100] sm:$0xff]  ;;  %v1499_v26 = vld [vmem:[#allocation2 + $0x10f] sm:$0xff] }
 0x1bc   : > { %v1151_v61 = vadd.f32 %v1150_v20, %v4681_v41  ;;  %v4848_v23 = vadd.f32 %v1873_v17, %v1696_v58  ;;  %v1497_v58 = vld [vmem:[#allocation2 + $0xff] sm:$0xff]  ;;  %v1498_v20 = vld [vmem:[#allocation2 + $0x107] sm:$0xff] }
 0x1be   : > { %1189 = vmatmul.bf16.gmra.mxu1 %v829_v37  ;;  %1661 = vmatmul.bf16.gmra.mxu3 %v1518_v54  ;;  %v1443_v34 = vadd.f32 %v1368_v15, %v1151_v61  ;;  %v809_v37 = vld [vmem:[#allocation2 + $0xf5] sm:$0xff] }
 0x1c1   : > { %v1370_v55 = vpop.f32.mrf.mxu2  ;;  %v1622_v27 = vpop.f32.mrf.mxu3 }
 0x1c2   : > { %v1697_v40 = vadd.f32 %v1622_v27, %v1443_v34  ;;  %v1876_v51 = vpop.f32.mrf.mxu0  ;;  %v1519_v27 = vpack.c.bf16 %v1498_v20, %v1497_v58 }
 0x1c3   : > { %v1152_v22 = vpop.f32.mrf.mxu1 }
 0x1c4   : > { %v1153_v47 = vadd.f32 %v1152_v22, %v4699_v57  ;;  %v4851_v33 = vadd.f32 %v1876_v51, %v1697_v40  ;;  %v3807_v57 = vld [vmem:[%s5051_s4 + $0x1c0] sm:$0xff] }
 0x1c5   : > { %1915 = vmatmul.bf16.gmra.mxu0 %v1772_v52  ;;  %2611 = vmatpush.bf16.msra.mxu3 %v3807_v57  ;;  %v810_v57 = vld [vmem:[#allocation2 + $0xfd] sm:$0xff] }
 0x1c6   : > { %1412 = vmatmul.bf16.gmra.mxu2 %v1518_v54  ;;  %v1444_v41 = vadd.f32 %v1370_v55, %v1153_v47  ;;  %v830_v55 = vpack.c.bf16 %v809_v37, %v808_v6  ;;  %v1752_v47 = vld [vmem:[#allocation2 + $0x108] sm:$0xff] }
 0x1c7   : > { %v1773_v58 = vpack.c.bf16 %v1752_v47, %v1751_v32  ;;  %v1754_v47 = vld [vmem:[#allocation2 + $0x118] sm:$0xff] }
 0x1c9   : > { %v1373_v15 = vpop.f32.mrf.mxu2  ;;  %v1624_v45 = vpop.f32.mrf.mxu3 }
 0x1ca   : > { %v1698_v17 = vadd.f32 %v1624_v45, %v1444_v41  ;;  %v1878_v61 = vpop.f32.mrf.mxu0 }
 0x1cb   : > { %v1155_v31 = vpop.f32.mrf.mxu1 }
 0x1cc   : > { %v1156_v54 = vadd.f32 %v1155_v31, %v4706_v5  ;;  %v4860_v34 = vadd.f32 %v1878_v61, %v1698_v17  ;;  %v3815_v5 = vld [vmem:[%s5051_s4 + $0x200] sm:$0xff]  ;;  %v1500_v61 = vld [vmem:[#allocation2 + $0x117] sm:$0xff] }
 0x1cd   : > { %2865 = vmatpush.bf16.msra.mxu0 %v3815_v5  ;;  %v811_v31 = vld [vmem:[#allocation2 + $0x105] sm:$0xff] }
 0x1ce   : > { %1194 = vmatmul.bf16.gmra.mxu1 %v830_v55  ;;  %1666 = vmatmul.bf16.gmra.mxu3 %v1519_v27  ;;  %v1445_v40 = vadd.f32 %v1373_v15, %v1156_v54 }
 0x1d1   : > { %v1375_v22 = vpop.f32.mrf.mxu2  ;;  %v1627_v51 = vpop.f32.mrf.mxu3 }
 0x1d2   : > { %v1699_v52 = vadd.f32 %v1627_v51, %v1445_v40  ;;  %v1881_v13 = vpop.f32.mrf.mxu0 }
 0x1d3   : > { %v1157_v41 = vpop.f32.mrf.mxu1 }
 0x1d4   : > { %v1158_v45 = vadd.f32 %v1157_v41, %v4714_v21  ;;  %v4869_v6 = vadd.f32 %v1881_v13, %v1699_v52  ;;  %v831_v21 = vpack.c.bf16 %v811_v31, %v810_v57  ;;  %v1520_v52 = vpack.c.bf16 %v1500_v61, %v1499_v26  ;;  %v813_v61 = vld [vmem:[#allocation2 + $0x115] sm:$0xff] }
 0x1d5   : > { %1920 = vmatmul.bf16.gmra.mxu0 %v1773_v58 }
 0x1d6   : > { %1417 = vmatmul.bf16.gmra.mxu2 %v1519_v27  ;;  %v1446_v15 = vadd.f32 %v1375_v22, %v1158_v45  ;;  %v1753_v45 = vld [vmem:[#allocation2 + $0x110] sm:$0xff] }
 0x1d9   : > { %v1378_v20 = vpop.f32.mrf.mxu2  ;;  %v1629_v17 = vpop.f32.mrf.mxu3 }
 0x1da   : > { %v1700_v37 = vadd.f32 %v1629_v17, %v1446_v15  ;;  %v1883_v55 = vpop.f32.mrf.mxu0  ;;  %v1774_v17 = vpack.c.bf16 %v1754_v47, %v1753_v45 }
 0x1db   : > { %v1160_v54 = vpop.f32.mrf.mxu1 }
 0x1dc   : > { %v1161_v40 = vadd.f32 %v1160_v54, %v4726_v44  ;;  %v4872_v51 = vadd.f32 %v1883_v55, %v1700_v37  ;;  %v1501_v37 = vld [vmem:[#allocation2 + $0x11f] sm:$0xff] }
 0x1de   : > { %1199 = vmatmul.bf16.gmra.mxu1 %v831_v21  ;;  %1671 = vmatmul.bf16.gmra.mxu3 %v1520_v52  ;;  %v1447_v27 = vadd.f32 %v1378_v20, %v1161_v40  ;;  %v1502_v20 = vld [vmem:[#allocation2 + $0x127] sm:$0xff] }
 0x1df   : > { %v812_v40 = vld [vmem:[#allocation2 + $0x10d] sm:$0xff] }
 0x1e1   : > { %v1380_v32 = vpop.f32.mrf.mxu2  ;;  %v1632_v22 = vpop.f32.mrf.mxu3 }
 0x1e2   : > { %v1701_v5 = vadd.f32 %v1632_v22, %v1447_v27  ;;  %v1886_v13 = vpop.f32.mrf.mxu0  ;;  %v1521_v22 = vpack.c.bf16 %v1502_v20, %v1501_v37 }
 0x1e3   : > { %v1162_v41 = vpop.f32.mrf.mxu1 }
 0x1e4   : > { %v1163_v58 = vadd.f32 %v1162_v41, %v4740_v16  ;;  %v4875_v15 = vadd.f32 %v1886_v13, %v1701_v5  ;;  %v832_v16 = vpack.c.bf16 %v813_v61, %v812_v40  ;;  %v1755_v5 = vld [vmem:[#allocation2 + $0x120] sm:$0xff]  ;;  %v1756_v41 = vld [vmem:[#allocation2 + $0x128] sm:$0xff] }
 0x1e5   : > { %1925 = vmatmul.bf16.gmra.mxu0 %v1774_v17  ;;  %v814_v61 = vld [vmem:[#allocation2 + $0x11d] sm:$0xff] }
 0x1e6   : > { %1422 = vmatmul.bf16.gmra.mxu2 %v1520_v52  ;;  %v1448_v44 = vadd.f32 %v1380_v32, %v1163_v58 }
 0x1e9   : > { %v1383_v57 = vpop.f32.mrf.mxu2  ;;  %v1634_v31 = vpop.f32.mrf.mxu3 }
 0x1ea   : > { %v1702_v54 = vadd.f32 %v1634_v31, %v1448_v44  ;;  %v1888_v26 = vpop.f32.mrf.mxu0  ;;  %v1775_v31 = vpack.c.bf16 %v1756_v41, %v1755_v5  ;;  %v1757_v41 = vld [vmem:[#allocation2 + $0x130] sm:$0xff] }
 0x1eb   : > { %v1165_v55 = vpop.f32.mrf.mxu1 }
 0x1ec   : > { %v1166_v21 = vadd.f32 %v1165_v55, %v4748_v1  ;;  %v4878_v27 = vadd.f32 %v1888_v26, %v1702_v54  ;;  %v815_v54 = vld [vmem:[#allocation2 + $0x125] sm:$0xff]  ;;  %v1504_v55 = vld [vmem:[#allocation2 + $0x137] sm:$0xff] }
 0x1ee   : > { %1204 = vmatmul.bf16.gmra.mxu1 %v832_v16  ;;  %1676 = vmatmul.bf16.gmra.mxu3 %v1521_v22  ;;  %v1449_v52 = vadd.f32 %v1383_v57, %v1166_v21  ;;  %v1503_v57 = vld [vmem:[#allocation2 + $0x12f] sm:$0xff] }
 0x1f1   : > { %v1385_v47 = vpop.f32.mrf.mxu2  ;;  %v1637_v32 = vpop.f32.mrf.mxu3 }
 0x1f2   : > { %v1703_v13 = vadd.f32 %v1637_v32, %v1449_v52  ;;  %v1891_v58 = vpop.f32.mrf.mxu0  ;;  %v1522_v32 = vpack.c.bf16 %v1504_v55, %v1503_v57  ;;  %v1978_v57 = vld [vmem:[#allocation2 + $0x29] sm:$0xff]  ;;  %v2486_v55 = vld [vmem:[#allocation2 + $0x3a] sm:$0xff] }
 0x1f3   : > { %v1167_v45 = vpop.f32.mrf.mxu1 }
 0x1f4   : > { %v1168_v17 = vadd.f32 %v1167_v45, %v4756_v38  ;;  %v4881_v44 = vadd.f32 %v1891_v58, %v1703_v13  ;;  %v833_v38 = vpack.c.bf16 %v815_v54, %v814_v61  ;;  %v2232_v13 = vld [vmem:[#allocation2 + $0x39] sm:$0xff] }
 0x1f5   : > { %1930 = vmatmul.bf16.gmra.mxu0 %v1775_v31  ;;  %v1758_v31 = vld [vmem:[#allocation2 + $0x138] sm:$0xff] }
 0x1f6   : > { %5119 = vst [vmem:[#allocation33_spill] sm:$0xff] %v4881_v44  ;;  %1427 = vmatmul.bf16.gmra.mxu2 %v1521_v22  ;;  %v1450_v1 = vadd.f32 %v1385_v47, %v1168_v17 }
 0x1f9   : > { %v1388_v37 = vpop.f32.mrf.mxu2  ;;  %v1639_v20 = vpop.f32.mrf.mxu3 }
 0x1fa   : > { %v1704_v26 = vadd.f32 %v1639_v20, %v1450_v1  ;;  %v1893_v21 = vpop.f32.mrf.mxu0  ;;  %v2231_v1 = vld [vmem:[#allocation2 + $0x31] sm:$0xff] }
 0x1fb   : > { %v1170_v40 = vpop.f32.mrf.mxu1 }
 0x1fc   : > { %v1171_v16 = vadd.f32 %v1170_v40, %v4765_v9  ;;  %v4884_v52 = vadd.f32 %v1893_v21, %v1704_v26  ;;  %v1776_v9 = vpack.c.bf16 %v1758_v31, %v1757_v41  ;;  %v2267_v26 = vpack.c.bf16 %v2232_v13, %v2231_v1 }
 0x1fe   : > { %1209 = vmatmul.bf16.gmra.mxu1 %v833_v38  ;;  %1681 = vmatmul.bf16.gmra.mxu3 %v1522_v32  ;;  %v1451_v22 = vadd.f32 %v1388_v37, %v1171_v16  ;;  %v1977_v38 = vld [vmem:[#allocation2 + $0x21] sm:$0xff]  ;;  %v2485_v32 = vld [vmem:[#allocation2 + $0x32] sm:$0xff] }
 0x201   : > { %v1390_v5 = vpop.f32.mrf.mxu2  ;;  %v1642_v47 = vpop.f32.mrf.mxu3 }
 0x202   : > { %v1705_v45 = vadd.f32 %v1642_v47, %v1451_v22  ;;  %v1896_v17 = vpop.f32.mrf.mxu0 }
 0x203   : > { %v1172_v58 = vpop.f32.mrf.mxu1 }
 0x204   : > { %v1173_v20 = vadd.f32 %v1172_v58, %v4782_v18  ;;  %v4887_v44 = vadd.f32 %v1896_v17, %v1705_v45  ;;  %v2013_v18 = vpack.c.bf16 %v1978_v57, %v1977_v38  ;;  %v2521_v45 = vpack.c.bf16 %v2486_v55, %v2485_v32  ;;  %v2234_v58 = vld [vmem:[#allocation2 + $0x49] sm:$0xff]  ;;  %v2740_v17 = vld [vmem:[#allocation2 + $0x3b] sm:$0xff] }
 0x205   : > { %1935 = vmatmul.bf16.gmra.mxu0 %v1776_v9  ;;  %v2233_v9 = vld [vmem:[#allocation2 + $0x41] sm:$0xff] }
 0x206   : > { %5120 = vst [vmem:[#allocation34_spill] sm:$0xff] %v4887_v44  ;;  %2358 = vmatmul.bf16.vlgmr.msra.gmra.mxu2 %v2267_v26  ;;  %v1452_v61 = vadd.f32 %v1390_v5, %v1173_v20 }
 0x209   : > { %v1393_v54 = vpop.f32.mrf.mxu2  ;;  %v1644_v37 = vpop.f32.mrf.mxu3 }
 0x20a   : > { %v1706_v40 = vadd.f32 %v1644_v37, %v1452_v61  ;;  %v1898_v16 = vpop.f32.mrf.mxu0  ;;  %v2739_v61 = vld [vmem:[#allocation2 + $0x33] sm:$0xff] }
 0x20b   : > { %v1175_v21 = vpop.f32.mrf.mxu1 }
 0x20c   : > { %v1176_v22 = vadd.f32 %v1175_v21, %v4692_v19  ;;  %v4890_v47 = vadd.f32 %v1898_v16, %v1706_v40  ;;  %v2268_v19 = vpack.c.bf16 %v2234_v58, %v2233_v9  ;;  %v2775_v40 = vpack.c.bf16 %v2740_v17, %v2739_v61  ;;  %v2488_v21 = vld [vmem:[#allocation2 + $0x4a] sm:$0xff]  ;;  %v2236_v9 = vld [vmem:[#allocation2 + $0x59] sm:$0xff] }
 0x20d   : > { %v2235_v17 = vld [vmem:[#allocation2 + $0x51] sm:$0xff]  ;;  %v2741_v61 = vld [vmem:[#allocation2 + $0x43] sm:$0xff] }
 0x20e   : > { %2104 = vmatmul.bf16.vlgmr.msra.gmra.mxu1 %v2013_v18  ;;  %2612 = vmatmul.bf16.vlgmr.msra.gmra.mxu3 %v2521_v45  ;;  %v1453_v41 = vadd.f32 %v1393_v54, %v1176_v22  ;;  %v2487_v22 = vld [vmem:[#allocation2 + $0x42] sm:$0xff] }
 0x211   : > { %v1395_v13 = vpop.f32.mrf.mxu2  ;;  %v1647_v5 = vpop.f32.mrf.mxu3 }
 0x212   : > { %v1707_v31 = vadd.f32 %v1647_v5, %v1453_v41  ;;  %v1901_v20 = vpop.f32.mrf.mxu0  ;;  %v2522_v41 = vpack.c.bf16 %v2488_v21, %v2487_v22  ;;  %v2489_v21 = vld [vmem:[#allocation2 + $0x52] sm:$0xff]  ;;  %v2490_v22 = vld [vmem:[#allocation2 + $0x5a] sm:$0xff] }
 0x213   : > { %v1177_v1 = vpop.f32.mrf.mxu1 }
 0x214   : > { %v1178_v37 = vadd.f32 %v1177_v1, %v4701_v28  ;;  %v4893_v44 = vadd.f32 %v1901_v20, %v1707_v31  ;;  %v2742_v31 = vld [vmem:[#allocation2 + $0x4b] sm:$0xff] }
 0x215   : > { %2866 = vmatmul.bf16.vlgmr.msra.gmra.mxu0 %v2775_v40 }
 0x216   : > { %2363 = vmatmul.bf16.gmra.mxu2 %v2268_v19  ;;  %v1454_v57 = vadd.f32 %v1395_v13, %v1178_v37 }
 0x219   : > { %v1398_v55 = vpop.f32.mrf.mxu2  ;;  %v1649_v54 = vpop.f32.mrf.mxu3 }
 0x21a   : > { %v1708_v16 = vadd.f32 %v1649_v54, %v1454_v57  ;;  %v1903_v32 = vpop.f32.mrf.mxu0  ;;  %v2776_v57 = vpack.c.bf16 %v2742_v31, %v2741_v61  ;;  %v2237_v31 = vld [vmem:[#allocation2 + $0x61] sm:$0xff] }
 0x21b   : > { %v1180_v38 = vpop.f32.mrf.mxu1  ;;  %v2744_v61 = vld [vmem:[#allocation2 + $0x5b] sm:$0xff] }
 0x21c   : > { %v1181_v18 = vadd.f32 %v1180_v38, %v4708_v42  ;;  %v4896_v45 = vadd.f32 %v1903_v32, %v1708_v16  ;;  %v2269_v42 = vpack.c.bf16 %v2236_v9, %v2235_v17 }
 0x21e   : > { %2109 = vmatmul.bf16.gmra.mxu1 %v2267_v26  ;;  %2617 = vmatmul.bf16.gmra.mxu3 %v2522_v41  ;;  %v1455_v28 = vadd.f32 %v1398_v55, %v1181_v18 }
 0x221   : > { %v1400_v5 = vpop.f32.mrf.mxu2  ;;  %v1652_v58 = vpop.f32.mrf.mxu3 }
 0x222   : > { %v1709_v13 = vadd.f32 %v1652_v58, %v1455_v28  ;;  %v1906_v20 = vpop.f32.mrf.mxu0  ;;  %v2523_v28 = vpack.c.bf16 %v2490_v22, %v2489_v21  ;;  %v2491_v21 = vld [vmem:[#allocation2 + $0x62] sm:$0xff] }
 0x223   : > { %v1182_v1 = vpop.f32.mrf.mxu1 }
 0x224   : > { %v1183_v37 = vadd.f32 %v1182_v1, %v4712_v14  ;;  %v4899_v40 = vadd.f32 %v1906_v20, %v1709_v13  ;;  %v2238_v13 = vld [vmem:[#allocation2 + $0x69] sm:$0xff] }
 0x225   : > { %2871 = vmatmul.bf16.gmra.mxu0 %v2776_v57 }
 0x226   : > { %2368 = vmatmul.bf16.gmra.mxu2 %v2269_v42  ;;  %v1456_v26 = vadd.f32 %v1400_v5, %v1183_v37  ;;  %v2743_v5 = vld [vmem:[#allocation2 + $0x53] sm:$0xff] }
 0x229   : > { %v1403_v54 = vpop.f32.mrf.mxu2  ;;  %v1654_v55 = vpop.f32.mrf.mxu3 }
 0x22a   : > { %v1710_v16 = vadd.f32 %v1654_v55, %v1456_v26  ;;  %v1908_v32 = vpop.f32.mrf.mxu0  ;;  %v2777_v26 = vpack.c.bf16 %v2744_v61, %v2743_v5  ;;  %v2239_v5 = vld [vmem:[#allocation2 + $0x71] sm:$0xff] }
 0x22b   : > { %v1185_v38 = vpop.f32.mrf.mxu1 }
 0x22c   : > { %v1186_v18 = vadd.f32 %v1185_v38, %v4721_v25  ;;  %v4902_v41 = vadd.f32 %v1908_v32, %v1710_v16  ;;  %v2270_v25 = vpack.c.bf16 %v2238_v13, %v2237_v31  ;;  %v2492_v16 = vld [vmem:[#allocation2 + $0x6a] sm:$0xff] }
 0x22e   : > { %2114 = vmatmul.bf16.gmra.mxu1 %v2268_v19  ;;  %2622 = vmatmul.bf16.gmra.mxu3 %v2523_v28  ;;  %v1457_v14 = vadd.f32 %v1403_v54, %v1186_v18 }
 0x231   : > { %v1405_v58 = vpop.f32.mrf.mxu2  ;;  %v1657_v17 = vpop.f32.mrf.mxu3 }
 0x232   : > { %v1711_v1 = vadd.f32 %v1657_v17, %v1457_v14  ;;  %v1911_v9 = vpop.f32.mrf.mxu0  ;;  %v2524_v14 = vpack.c.bf16 %v2492_v16, %v2491_v21  ;;  %v2745_v17 = vld [vmem:[#allocation2 + $0x63] sm:$0xff]  ;;  %v2493_v21 = vld [vmem:[#allocation2 + $0x72] sm:$0xff]  ;;  %v2494_v16 = vld [vmem:[#allocation2 + $0x7a] sm:$0xff] }
 0x233   : > { %v1187_v20 = vpop.f32.mrf.mxu1 }
 0x234   : > { %v1188_v37 = vadd.f32 %v1187_v20, %v4735_v8  ;;  %v4905_v57 = vadd.f32 %v1911_v9, %v1711_v1  ;;  %v2746_v1 = vld [vmem:[#allocation2 + $0x6b] sm:$0xff] }
 0x235   : > { %2876 = vmatmul.bf16.gmra.mxu0 %v2777_v26 }
 0x236   : > { %2373 = vmatmul.bf16.gmra.mxu2 %v2270_v25  ;;  %v1458_v19 = vadd.f32 %v1405_v58, %v1188_v37  ;;  %v2240_v58 = vld [vmem:[#allocation2 + $0x79] sm:$0xff] }
 0x239   : > { %v1408_v55 = vpop.f32.mrf.mxu2  ;;  %v1659_v54 = vpop.f32.mrf.mxu3 }
 0x23a   : > { %v1712_v38 = vadd.f32 %v1659_v54, %v1458_v19  ;;  %v1913_v22 = vpop.f32.mrf.mxu0  ;;  %v2778_v19 = vpack.c.bf16 %v2746_v1, %v2745_v17 }
 0x23b   : > { %v1190_v32 = vpop.f32.mrf.mxu1 }
 0x23c   : > { %v1191_v18 = vadd.f32 %v1190_v32, %v4744_v11  ;;  %v4908_v28 = vadd.f32 %v1913_v22, %v1712_v38  ;;  %v2271_v11 = vpack.c.bf16 %v2240_v58, %v2239_v5  ;;  %v2242_v5 = vld [vmem:[#allocation2 + $0x89] sm:$0xff]  ;;  %v2747_v58 = vld [vmem:[#allocation2 + $0x73] sm:$0xff] }
 0x23e   : > { %2119 = vmatmul.bf16.gmra.mxu1 %v2269_v42  ;;  %2627 = vmatmul.bf16.gmra.mxu3 %v2524_v14  ;;  %v1459_v8 = vadd.f32 %v1408_v55, %v1191_v18 }
 0x241   : > { %v1410_v31 = vpop.f32.mrf.mxu2  ;;  %v1662_v13 = vpop.f32.mrf.mxu3 }
 0x242   : > { %v1713_v20 = vadd.f32 %v1662_v13, %v1459_v8  ;;  %v1916_v61 = vpop.f32.mrf.mxu0  ;;  %v2525_v8 = vpack.c.bf16 %v2494_v16, %v2493_v21  ;;  %v2496_v21 = vld [vmem:[#allocation2 + $0x8a] sm:$0xff] }
 0x243   : > { %v1192_v9 = vpop.f32.mrf.mxu1 }
 0x244   : > { %v1193_v37 = vadd.f32 %v1192_v9, %v4750_v35  ;;  %v4911_v26 = vadd.f32 %v1916_v61, %v1713_v20  ;;  %v2241_v61 = vld [vmem:[#allocation2 + $0x81] sm:$0xff] }
 0x245   : > { %2881 = vmatmul.bf16.gmra.mxu0 %v2778_v19 }
 0x246   : > { %2378 = vmatmul.bf16.gmra.mxu2 %v2271_v11  ;;  %v1460_v42 = vadd.f32 %v1410_v31, %v1193_v37  ;;  %v2748_v31 = vld [vmem:[#allocation2 + $0x7b] sm:$0xff] }
 0x249   : > { %v1413_v54 = vpop.f32.mrf.mxu2  ;;  %v1664_v55 = vpop.f32.mrf.mxu3 }
 0x24a   : > { %v1714_v38 = vadd.f32 %v1664_v55, %v1460_v42  ;;  %v1918_v22 = vpop.f32.mrf.mxu0  ;;  %v2779_v42 = vpack.c.bf16 %v2748_v31, %v2747_v58  ;;  %v2243_v58 = vld [vmem:[#allocation2 + $0x91] sm:$0xff] }
 0x24b   : > { %v1195_v32 = vpop.f32.mrf.mxu1  ;;  %v2750_v31 = vld [vmem:[#allocation2 + $0x8b] sm:$0xff] }
 0x24c   : > { %v1196_v18 = vadd.f32 %v1195_v32, %v4759_v50  ;;  %v4914_v14 = vadd.f32 %v1918_v22, %v1714_v38  ;;  %v2272_v50 = vpack.c.bf16 %v2242_v5, %v2241_v61  ;;  %v2495_v22 = vld [vmem:[#allocation2 + $0x82] sm:$0xff] }
 0x24d   : > { %v2749_v61 = vld [vmem:[#allocation2 + $0x83] sm:$0xff] }
 0x24e   : > { %2124 = vmatmul.bf16.gmra.mxu1 %v2270_v25  ;;  %2632 = vmatmul.bf16.gmra.mxu3 %v2525_v8  ;;  %v1461_v35 = vadd.f32 %v1413_v54, %v1196_v18 }
 0x251   : > { %v1415_v13 = vpop.f32.mrf.mxu2  ;;  %v1667_v17 = vpop.f32.mrf.mxu3 }
 0x252   : > { %v1715_v1 = vadd.f32 %v1667_v17, %v1461_v35  ;;  %v1921_v9 = vpop.f32.mrf.mxu0  ;;  %v2526_v35 = vpack.c.bf16 %v2496_v21, %v2495_v22  ;;  %v2497_v21 = vld [vmem:[#allocation2 + $0x92] sm:$0xff]  ;;  %v2498_v22 = vld [vmem:[#allocation2 + $0x9a] sm:$0xff] }
 0x253   : > { %v1197_v20 = vpop.f32.mrf.mxu1 }
 0x254   : > { %v1198_v37 = vadd.f32 %v1197_v20, %v4776_v30  ;;  %v4917_v19 = vadd.f32 %v1921_v9, %v1715_v1  ;;  %v2244_v9 = vld [vmem:[#allocation2 + $0x99] sm:$0xff] }
 0x255   : > { %2886 = vmatmul.bf16.gmra.mxu0 %v2779_v42 }
 0x256   : > { %2383 = vmatmul.bf16.gmra.mxu2 %v2272_v50  ;;  %v1462_v25 = vadd.f32 %v1415_v13, %v1198_v37 }
 0x259   : > { %v1418_v55 = vpop.f32.mrf.mxu2  ;;  %v1669_v54 = vpop.f32.mrf.mxu3 }
 0x25a   : > { %v1716_v16 = vadd.f32 %v1669_v54, %v1462_v25  ;;  %v1923_v32 = vpop.f32.mrf.mxu0  ;;  %v2780_v25 = vpack.c.bf16 %v2750_v31, %v2749_v61  ;;  %v2245_v31 = vld [vmem:[#allocation2 + $0xa1] sm:$0xff] }
 0x25b   : > { %v1200_v38 = vpop.f32.mrf.mxu1  ;;  %v2752_v61 = vld [vmem:[#allocation2 + $0x9b] sm:$0xff] }
 0x25c   : > { %v1201_v18 = vadd.f32 %v1200_v38, %v4731_v63  ;;  %v4920_v8 = vadd.f32 %v1923_v32, %v1716_v16  ;;  %v2273_v63 = vpack.c.bf16 %v2244_v9, %v2243_v58  ;;  %v2246_v9 = vld [vmem:[#allocation2 + $0xa9] sm:$0xff] }
 0x25e   : > { %2129 = vmatmul.bf16.gmra.mxu1 %v2271_v11  ;;  %2637 = vmatmul.bf16.gmra.mxu3 %v2526_v35  ;;  %v1463_v30 = vadd.f32 %v1418_v55, %v1201_v18 }
 0x261   : > { %v1420_v17 = vpop.f32.mrf.mxu2  ;;  %v1672_v5 = vpop.f32.mrf.mxu3 }
 0x262   : > { %v1717_v13 = vadd.f32 %v1672_v5, %v1463_v30  ;;  %v1926_v20 = vpop.f32.mrf.mxu0  ;;  %v2527_v30 = vpack.c.bf16 %v2498_v22, %v2497_v21  ;;  %v2499_v21 = vld [vmem:[#allocation2 + $0xa2] sm:$0xff]  ;;  %v2500_v22 = vld [vmem:[#allocation2 + $0xaa] sm:$0xff] }
 0x263   : > { %v1202_v1 = vpop.f32.mrf.mxu1 }
 0x264   : > { %v1203_v37 = vadd.f32 %v1202_v1, %v4742_v7  ;;  %v4923_v42 = vadd.f32 %v1926_v20, %v1717_v13  ;;  %v2751_v13 = vld [vmem:[#allocation2 + $0x93] sm:$0xff] }
 0x265   : > { %2891 = vmatmul.bf16.gmra.mxu0 %v2780_v25 }
 0x266   : > { %2388 = vmatmul.bf16.gmra.mxu2 %v2273_v63  ;;  %v1464_v11 = vadd.f32 %v1420_v17, %v1203_v37 }
 0x269   : > { %v1423_v54 = vpop.f32.mrf.mxu2  ;;  %v1674_v55 = vpop.f32.mrf.mxu3 }
 0x26a   : > { %v1718_v16 = vadd.f32 %v1674_v55, %v1464_v11  ;;  %v1928_v32 = vpop.f32.mrf.mxu0  ;;  %v2781_v11 = vpack.c.bf16 %v2752_v61, %v2751_v13  ;;  %v2248_v13 = vld [vmem:[#allocation2 + $0xb9] sm:$0xff]  ;;  %v2754_v61 = vld [vmem:[#allocation2 + $0xab] sm:$0xff] }
 0x26b   : > { %v1205_v38 = vpop.f32.mrf.mxu1 }
 0x26c   : > { %v1206_v18 = vadd.f32 %v1205_v38, %v4752_v10  ;;  %v4926_v35 = vadd.f32 %v1928_v32, %v1718_v16  ;;  %v2274_v10 = vpack.c.bf16 %v2246_v9, %v2245_v31  ;;  %v2247_v9 = vld [vmem:[#allocation2 + $0xb1] sm:$0xff] }
 0x26e   : > { %2134 = vmatmul.bf16.gmra.mxu1 %v2272_v50  ;;  %2642 = vmatmul.bf16.gmra.mxu3 %v2527_v30  ;;  %v1465_v7 = vadd.f32 %v1423_v54, %v1206_v18 }
 0x271   : > { %v1425_v5 = vpop.f32.mrf.mxu2  ;;  %v1677_v58 = vpop.f32.mrf.mxu3 }
 0x272   : > { %v1719_v17 = vadd.f32 %v1677_v58, %v1465_v7  ;;  %v1931_v20 = vpop.f32.mrf.mxu0  ;;  %v2528_v7 = vpack.c.bf16 %v2500_v22, %v2499_v21  ;;  %v2502_v21 = vld [vmem:[#allocation2 + $0xba] sm:$0xff]  ;;  %v2501_v22 = vld [vmem:[#allocation2 + $0xb2] sm:$0xff] }
 0x273   : > { %v1207_v1 = vpop.f32.mrf.mxu1 }
 0x274   : > { %v1208_v37 = vadd.f32 %v1207_v1, %v4761_v62  ;;  %v4929_v25 = vadd.f32 %v1931_v20, %v1719_v17  ;;  %v2753_v17 = vld [vmem:[#allocation2 + $0xa3] sm:$0xff] }
 0x275   : > { %2896 = vmatmul.bf16.gmra.mxu0 %v2781_v11 }
 0x276   : > { %2393 = vmatmul.bf16.gmra.mxu2 %v2274_v10  ;;  %v1466_v50 = vadd.f32 %v1425_v5, %v1208_v37 }
 0x279   : > { %v1428_v55 = vpop.f32.mrf.mxu2  ;;  %v1679_v54 = vpop.f32.mrf.mxu3 }
 0x27a   : > { %v1720_v16 = vadd.f32 %v1679_v54, %v1466_v50  ;;  %v1933_v32 = vpop.f32.mrf.mxu0  ;;  %v2782_v50 = vpack.c.bf16 %v2754_v61, %v2753_v17  ;;  %v2756_v17 = vld [vmem:[#allocation2 + $0xbb] sm:$0xff] }
 0x27b   : > { %v1210_v38 = vpop.f32.mrf.mxu1 }
 0x27c   : > { %v1211_v18 = vadd.f32 %v1210_v38, %v4778_v29  ;;  %v4932_v30 = vadd.f32 %v1933_v32, %v1720_v16  ;;  %v2275_v29 = vpack.c.bf16 %v2248_v13, %v2247_v9  ;;  %v2250_v13 = vld [vmem:[#allocation2 + $0xc9] sm:$0xff]  ;;  %v2755_v9 = vld [vmem:[#allocation2 + $0xb3] sm:$0xff] }
 0x27e   : > { %2139 = vmatmul.bf16.gmra.mxu1 %v2273_v63  ;;  %2647 = vmatmul.bf16.gmra.mxu3 %v2528_v7  ;;  %v1467_v62 = vadd.f32 %v1428_v55, %v1211_v18  ;;  %v2529_v7 = vpack.c.bf16 %v2502_v21, %v2501_v22  ;;  %v2503_v22 = vld [vmem:[#allocation2 + $0xc2] sm:$0xff] }
 0x281   : > { %v1430_v58 = vpop.f32.mrf.mxu2  ;;  %v1682_v31 = vpop.f32.mrf.mxu3 }
 0x282   : > { %v1721_v5 = vadd.f32 %v1682_v31, %v1467_v62  ;;  %v1936_v20 = vpop.f32.mrf.mxu0 }
 0x283   : > { %v1212_v1 = vpop.f32.mrf.mxu1 }
 0x284   : > { %v1213_v37 = vadd.f32 %v1212_v1, %v4790_v2  ;;  %v4935_v11 = vadd.f32 %v1936_v20, %v1721_v5  ;;  %v2249_v20 = vld [vmem:[#allocation2 + $0xc1] sm:$0xff] }
 0x285   : > { %2901 = vmatmul.bf16.gmra.mxu0 %v2782_v50  ;;  %v2276_v50 = vpack.c.bf16 %v2250_v13, %v2249_v20  ;;  %v2252_v20 = vld [vmem:[#allocation2 + $0xd9] sm:$0xff] }
 0x286   : > { %2398 = vmatmul.bf16.gmra.mxu2 %v2275_v29  ;;  %v1468_v63 = vadd.f32 %v1430_v58, %v1213_v37 }
 0x289   : > { %v1684_v54 = vpop.f32.mrf.mxu3  ;;  %v2359_v55 = vpop.f32.mrf.mxu2 }
 0x28a   : > { %v1722_v16 = vadd.f32 %v1684_v54, %v1468_v63  ;;  %v1938_v38 = vpop.f32.mrf.mxu0  ;;  %v2783_v63 = vpack.c.bf16 %v2756_v17, %v2755_v9  ;;  %v2758_v9 = vld [vmem:[#allocation2 + $0xcb] sm:$0xff] }
 0x28b   : > { %v2105_v32 = vpop.f32.mrf.mxu1 }
 0x28c   : > { %v4937_v18 = vadd.f32 %v1938_v38, %v1722_v16  ;;  %v2195_v62 = vadd.f32 %v2105_v32, %v4796_v0  ;;  %v2504_v16 = vld [vmem:[#allocation2 + $0xca] sm:$0xff] }
 0x28e   : > { %2144 = vmatmul.bf16.gmra.mxu1 %v2274_v10  ;;  %2652 = vmatmul.bf16.gmra.mxu3 %v2529_v7  ;;  %v2449_v5 = vadd.f32 %v2359_v55, %v2195_v62 }
 0x291   : > { %v2361_v2 = vpop.f32.mrf.mxu2  ;;  %v2613_v31 = vpop.f32.mrf.mxu3 }
 0x292   : > { %v2867_v1 = vpop.f32.mrf.mxu0  ;;  %v2703_v61 = vadd.f32 %v2613_v31, %v2449_v5 }
 0x293   : > { %v2107_v58 = vpop.f32.mrf.mxu1 }
 0x294   : > { %v2196_v37 = vadd.f32 %v2107_v58, %v4800_v59  ;;  %v2957_v0 = vadd.f32 %v2867_v1, %v2703_v61  ;;  %v2530_v59 = vpack.c.bf16 %v2504_v16, %v2503_v22  ;;  %v2757_v16 = vld [vmem:[#allocation2 + $0xc3] sm:$0xff] }
 0x295   : > { %2906 = vmatmul.bf16.gmra.mxu0 %v2783_v63 }
 0x296   : > { %2403 = vmatmul.bf16.gmra.mxu2 %v2276_v50  ;;  %v2450_v10 = vadd.f32 %v2361_v2, %v2196_v37  ;;  %v2993_v7 = vmul.f32 %v2957_v0, %v4411_v60 }
 0x298   : > { %v3071_v17 = vmul.f32 %v2993_v7, %v2957_v0 }
 0x299   : > { %v2364_v54 = vpop.f32.mrf.mxu2  ;;  %v2615_v21 = vpop.f32.mrf.mxu3 }
 0x29a   : > { %v2704_v38 = vadd.f32 %v2615_v21, %v2450_v10  ;;  %v2869_v55 = vpop.f32.mrf.mxu0  ;;  %v2251_v21 = vld [vmem:[#allocation2 + $0xd1] sm:$0xff] }
 0x29b   : > { %v2110_v32 = vpop.f32.mrf.mxu1 }
 0x29c   : > { %v2197_v62 = vadd.f32 %v2110_v32, %v4809_v24  ;;  %v2958_v31 = vadd.f32 %v2869_v55, %v2704_v38  ;;  %v2784_v32 = vpack.c.bf16 %v2758_v9, %v2757_v16 }
 0x29e   : > { %v2994_v2 = vmul.f32 %v2958_v31, %v4335_v39  ;;  %v3898_v13 = vpack.c.bf16 %v2958_v31, %v2957_v0  ;;  %2149 = vmatmul.bf16.gmra.mxu1 %v2275_v29  ;;  %2657 = vmatmul.bf16.gmra.mxu3 %v2530_v59  ;;  %v2451_v60 = vadd.f32 %v2364_v54, %v2197_v62 }
 0x29f   : > { %v2277_v29 = vpack.c.bf16 %v2252_v20, %v2251_v21  ;;  %v2760_v21 = vld [vmem:[#allocation2 + $0xdb] sm:$0xff] }
 0x2a0   : > { %v3029_v5 = vadd.f32 %v2994_v2, %v2993_v7  ;;  %v3072_v58 = vmul.f32 %v2994_v2, %v2958_v31  ;;  %3899 = vst [vmem:[%s4948_s10] sm:$0xff] %v3898_v13   ;;  %v2506_v31 = vld [vmem:[#allocation2 + $0xda] sm:$0xff] }
 0x2a1   : > { %v2366_v24 = vpop.f32.mrf.mxu2  ;;  %v2618_v1 = vpop.f32.mrf.mxu3 }
 0x2a2   : > { %v3107_v61 = vadd.f32 %v3072_v58, %v3071_v17  ;;  %v2705_v37 = vadd.f32 %v2618_v1, %v2451_v60  ;;  %v2872_v10 = vpop.f32.mrf.mxu0  ;;  %v2505_v58 = vld [vmem:[#allocation2 + $0xd2] sm:$0xff] }
 0x2a3   : > { %v2112_v63 = vpop.f32.mrf.mxu1  ;;  %v2531_v1 = vpack.c.bf16 %v2506_v31, %v2505_v58 }
 0x2a4   : > { %v2198_v39 = vadd.f32 %v2112_v63, %v4818_v36  ;;  %v2959_v38 = vadd.f32 %v2872_v10, %v2705_v37  ;;  %v2254_v10 = vld [vmem:[#allocation2 + $0xe9] sm:$0xff] }
 0x2a5   : > { %2911 = vmatmul.bf16.gmra.mxu0 %v2784_v32 }
 0x2a6   : > { %v2995_v0 = vmul.f32 %v2959_v38, %v4512_v56  ;;  %2408 = vmatmul.bf16.gmra.mxu2 %v2277_v29  ;;  %v2452_v22 = vadd.f32 %v2366_v24, %v2198_v39 }
 0x2a8   : > { %v3030_v54 = vadd.f32 %v3029_v5, %v2995_v0  ;;  %v3073_v55 = vmul.f32 %v2995_v0, %v2959_v38  ;;  %v2759_v0 = vld [vmem:[#allocation2 + $0xd3] sm:$0xff] }
 0x2a9   : > { %v2369_v7 = vpop.f32.mrf.mxu2  ;;  %v2620_v62 = vpop.f32.mrf.mxu3 }
 0x2aa   : > { %v3108_v59 = vadd.f32 %v3107_v61, %v3073_v55  ;;  %v2706_v2 = vadd.f32 %v2620_v62, %v2452_v22  ;;  %v2874_v17 = vpop.f32.mrf.mxu0  ;;  %v2253_v61 = vld [vmem:[#allocation2 + $0xe1] sm:$0xff] }
 0x2ab   : > { %v2115_v13 = vpop.f32.mrf.mxu1 }
 0x2ac   : > { %v2199_v36 = vadd.f32 %v2115_v13, %v4821_v46  ;;  %v2960_v60 = vadd.f32 %v2874_v17, %v2706_v2  ;;  %v2508_v13 = vld [vmem:[#allocation2 + $0xea] sm:$0xff] }
 0x2ae   : > { %v2996_v56 = vmul.f32 %v2960_v60, %v4415_v4  ;;  %v3903_v20 = vpack.c.bf16 %v2960_v60, %v2959_v38  ;;  %2154 = vmatmul.bf16.gmra.mxu1 %v2276_v50  ;;  %2662 = vmatmul.bf16.gmra.mxu3 %v2531_v1  ;;  %v2453_v9 = vadd.f32 %v2369_v7, %v2199_v36 }
 0x2af   : > { %v2278_v38 = vpack.c.bf16 %v2254_v10, %v2253_v61  ;;  %v2785_v50 = vpack.c.bf16 %v2760_v21, %v2759_v0  ;;  %v2255_v61 = vld [vmem:[#allocation2 + $0xf1] sm:$0xff]  ;;  %v2761_v10 = vld [vmem:[#allocation2 + $0xe3] sm:$0xff] }
 0x2b0   : > { %v3031_v5 = vadd.f32 %v3030_v54, %v2996_v56  ;;  %v3074_v24 = vmul.f32 %v2996_v56, %v2960_v60  ;;  %4002 = vst [vmem:[%s4948_s10 + $0x8] sm:$0xff] %v3903_v20   ;;  %v2762_v21 = vld [vmem:[#allocation2 + $0xeb] sm:$0xff] }
 0x2b1   : > { %v2371_v37 = vpop.f32.mrf.mxu2  ;;  %v2623_v63 = vpop.f32.mrf.mxu3 }
 0x2b2   : > { %v3109_v16 = vadd.f32 %v3108_v59, %v3074_v24  ;;  %v2707_v39 = vadd.f32 %v2623_v63, %v2453_v9  ;;  %v2877_v46 = vpop.f32.mrf.mxu0  ;;  %v2507_v59 = vld [vmem:[#allocation2 + $0xe2] sm:$0xff] }
 0x2b3   : > { %v2117_v32 = vpop.f32.mrf.mxu1  ;;  %v2532_v56 = vpack.c.bf16 %v2508_v13, %v2507_v59 }
 0x2b4   : > { %v2200_v55 = vadd.f32 %v2117_v32, %v4824_v43  ;;  %v2961_v4 = vadd.f32 %v2877_v46, %v2707_v39  ;;  %v2256_v46 = vld [vmem:[#allocation2 + $0xf9] sm:$0xff] }
 0x2b5   : > { %2916 = vmatmul.bf16.gmra.mxu0 %v2785_v50 }
 0x2b6   : > { %v2997_v54 = vmul.f32 %v2961_v4, %v4616_v49  ;;  %2413 = vmatmul.bf16.gmra.mxu2 %v2278_v38  ;;  %v2454_v62 = vadd.f32 %v2371_v37, %v2200_v55  ;;  %v2279_v55 = vpack.c.bf16 %v2256_v46, %v2255_v61  ;;  %v2258_v61 = vld [vmem:[#allocation2 + $0x109] sm:$0xff] }
 0x2b8   : > { %v3032_v22 = vadd.f32 %v3031_v5, %v2997_v54  ;;  %v3075_v7 = vmul.f32 %v2997_v54, %v2961_v4 }
 0x2b9   : > { %v2374_v31 = vpop.f32.mrf.mxu2  ;;  %v2625_v2 = vpop.f32.mrf.mxu3 }
 0x2ba   : > { %v3110_v17 = vadd.f32 %v3109_v16, %v3075_v7  ;;  %v2708_v58 = vadd.f32 %v2625_v2, %v2454_v62  ;;  %v2879_v60 = vpop.f32.mrf.mxu0  ;;  %v2509_v2 = vld [vmem:[#allocation2 + $0xf2] sm:$0xff] }
 0x2bb   : > { %v2120_v36 = vpop.f32.mrf.mxu1 }
 0x2bc   : > { %v2201_v43 = vadd.f32 %v2120_v36, %v4827_v12  ;;  %v2962_v1 = vadd.f32 %v2879_v60, %v2708_v58  ;;  %v2510_v36 = vld [vmem:[#allocation2 + $0xfa] sm:$0xff] }
 0x2be   : > { %v2998_v49 = vmul.f32 %v2962_v1, %v4614_v48  ;;  %v3908_v20 = vpack.c.bf16 %v2962_v1, %v2961_v4  ;;  %2159 = vmatmul.bf16.gmra.mxu1 %v2277_v29  ;;  %2667 = vmatmul.bf16.gmra.mxu3 %v2532_v56  ;;  %v2455_v9 = vadd.f32 %v2374_v31, %v2201_v43  ;;  %v5121_v4 = vld [vmem:[#allocation32_spill] sm:$0xff] }
 0x2bf   : > { %v2786_v29 = vpack.c.bf16 %v2762_v21, %v2761_v10  ;;  %v2533_v43 = vpack.c.bf16 %v2510_v36, %v2509_v2  ;;  %v2763_v10 = vld [vmem:[#allocation2 + $0xf3] sm:$0xff] }
 0x2c0   : > { %v3033_v5 = vadd.f32 %v3032_v22, %v2998_v49  ;;  %v3076_v24 = vmul.f32 %v2998_v49, %v2962_v1  ;;  %4003 = vst [vmem:[%s4948_s10 + $0x10] sm:$0xff] %v3908_v20   ;;  %v5122_v1 = vld [vmem:[#allocation8_spill] sm:$0xff] }
 0x2c1   : > { %v2376_v37 = vpop.f32.mrf.mxu2  ;;  %v2628_v63 = vpop.f32.mrf.mxu3 }
 0x2c2   : > { %v3111_v16 = vadd.f32 %v3110_v17, %v3076_v24  ;;  %v2709_v39 = vadd.f32 %v2628_v63, %v2455_v9  ;;  %v2882_v12 = vpop.f32.mrf.mxu0  ;;  %v2257_v63 = vld [vmem:[#allocation2 + $0x101] sm:$0xff] }
 0x2c3   : > { %v2122_v32 = vpop.f32.mrf.mxu1 }
 0x2c4   : > { %v2202_v0 = vadd.f32 %v2122_v32, %v4839_v53  ;;  %v2963_v48 = vadd.f32 %v2882_v12, %v2709_v39  ;;  %v2764_v32 = vld [vmem:[#allocation2 + $0xfb] sm:$0xff] }
 0x2c5   : > { %2921 = vmatmul.bf16.gmra.mxu0 %v2786_v29 }
 0x2c6   : > { %v2999_v50 = vmul.f32 %v2963_v48, %v5121_v4  ;;  %2418 = vmatmul.bf16.gmra.mxu2 %v2279_v55  ;;  %v2456_v7 = vadd.f32 %v2376_v37, %v2202_v0  ;;  %v2280_v0 = vpack.c.bf16 %v2258_v61, %v2257_v63 }
 0x2c8   : > { %v3034_v54 = vadd.f32 %v3033_v5, %v2999_v50  ;;  %v3077_v22 = vmul.f32 %v2999_v50, %v2963_v48 }
 0x2c9   : > { %v2379_v62 = vpop.f32.mrf.mxu2  ;;  %v2630_v31 = vpop.f32.mrf.mxu3 }
 0x2ca   : > { %v3112_v59 = vadd.f32 %v3111_v16, %v3077_v22  ;;  %v2710_v13 = vadd.f32 %v2630_v31, %v2456_v7  ;;  %v2884_v58 = vpop.f32.mrf.mxu0  ;;  %v2512_v31 = vld [vmem:[#allocation2 + $0x10a] sm:$0xff] }
 0x2cb   : > { %v2125_v17 = vpop.f32.mrf.mxu1 }
 0x2cc   : > { %v2203_v53 = vadd.f32 %v2125_v17, %v4845_v3  ;;  %v2964_v60 = vadd.f32 %v2884_v58, %v2710_v13 }
 0x2ce   : > { %v3000_v56 = vmul.f32 %v2964_v60, %v5122_v1  ;;  %v3913_v49 = vpack.c.bf16 %v2964_v60, %v2963_v48  ;;  %2164 = vmatmul.bf16.gmra.mxu1 %v2278_v38  ;;  %2672 = vmatmul.bf16.gmra.mxu3 %v2533_v43  ;;  %v2457_v24 = vadd.f32 %v2379_v62, %v2203_v53  ;;  %v5123_v48 = vld [vmem:[#allocation3_spill] sm:$0xff]  ;;  %v5124_v53 = vld [vmem:[#allocation4_spill] sm:$0xff] }
 0x2cf   : > { %v2787_v38 = vpack.c.bf16 %v2764_v32, %v2763_v10  ;;  %v2511_v62 = vld [vmem:[#allocation2 + $0x102] sm:$0xff]  ;;  %v5125_v32 = vld [vmem:[#allocation5_spill] sm:$0xff] }
 0x2d0   : > { %v3035_v20 = vadd.f32 %v3034_v54, %v3000_v56  ;;  %v3078_v5 = vmul.f32 %v3000_v56, %v2964_v60  ;;  %4004 = vst [vmem:[%s4948_s10 + $0x18] sm:$0xff] %v3913_v49   ;;  %v2534_v36 = vpack.c.bf16 %v2512_v31, %v2511_v62  ;;  %v2513_v31 = vld [vmem:[#allocation2 + $0x112] sm:$0xff] }
 0x2d1   : > { %v2381_v9 = vpop.f32.mrf.mxu2  ;;  %v2633_v37 = vpop.f32.mrf.mxu3 }
 0x2d2   : > { %v3113_v21 = vadd.f32 %v3112_v59, %v3078_v5  ;;  %v2711_v16 = vadd.f32 %v2633_v37, %v2457_v24  ;;  %v2887_v3 = vpop.f32.mrf.mxu0  ;;  %v2260_v24 = vld [vmem:[#allocation2 + $0x119] sm:$0xff]  ;;  %v2766_v37 = vld [vmem:[#allocation2 + $0x10b] sm:$0xff] }
 0x2d3   : > { %v2127_v39 = vpop.f32.mrf.mxu1 }
 0x2d4   : > { %v2204_v12 = vadd.f32 %v2127_v39, %v4848_v23  ;;  %v2965_v46 = vadd.f32 %v2887_v3, %v2711_v16 }
 0x2d5   : > { %2926 = vmatmul.bf16.gmra.mxu0 %v2787_v38 }
 0x2d6   : > { %v3001_v29 = vmul.f32 %v2965_v46, %v5123_v48  ;;  %2423 = vmatmul.bf16.gmra.mxu2 %v2280_v0  ;;  %v2458_v54 = vadd.f32 %v2381_v9, %v2204_v12  ;;  %v2765_v9 = vld [vmem:[#allocation2 + $0x103] sm:$0xff] }
 0x2d8   : > { %v3036_v4 = vadd.f32 %v3035_v20, %v3001_v29  ;;  %v3079_v50 = vmul.f32 %v3001_v29, %v2965_v46 }
 0x2d9   : > { %v2384_v22 = vpop.f32.mrf.mxu2  ;;  %v2635_v7 = vpop.f32.mrf.mxu3 }
 0x2da   : > { %v3114_v2 = vadd.f32 %v3113_v21, %v3079_v50  ;;  %v2712_v59 = vadd.f32 %v2635_v7, %v2458_v54  ;;  %v2889_v17 = vpop.f32.mrf.mxu0  ;;  %v2259_v21 = vld [vmem:[#allocation2 + $0x111] sm:$0xff]  ;;  %v2514_v50 = vld [vmem:[#allocation2 + $0x11a] sm:$0xff] }
 0x2db   : > { %v2130_v13 = vpop.f32.mrf.mxu1  ;;  %v2281_v3 = vpack.c.bf16 %v2260_v24, %v2259_v21 }
 0x2dc   : > { %v2205_v23 = vadd.f32 %v2130_v13, %v4851_v33  ;;  %v2966_v58 = vadd.f32 %v2889_v17, %v2712_v59  ;;  %v2535_v59 = vpack.c.bf16 %v2514_v50, %v2513_v31  ;;  %v5126_v13 = vld [vmem:[#allocation14_spill] sm:$0xff] }
 0x2de   : > { %v3002_v60 = vmul.f32 %v2966_v58, %v5124_v53  ;;  %v3918_v43 = vpack.c.bf16 %v2966_v58, %v2965_v46  ;;  %2169 = vmatmul.bf16.gmra.mxu1 %v2279_v55  ;;  %2677 = vmatmul.bf16.gmra.mxu3 %v2534_v36  ;;  %v2459_v49 = vadd.f32 %v2384_v22, %v2205_v23 }
 0x2df   : > { %v2788_v55 = vpack.c.bf16 %v2766_v37, %v2765_v9  ;;  %v2767_v9 = vld [vmem:[#allocation2 + $0x113] sm:$0xff] }
 0x2e0   : > { %v3037_v1 = vadd.f32 %v3036_v4, %v3002_v60  ;;  %v3080_v56 = vmul.f32 %v3002_v60, %v2966_v58  ;;  %4005 = vst [vmem:[%s4948_s10 + $0x20] sm:$0xff] %v3918_v43  }
 0x2e1   : > { %v2386_v20 = vpop.f32.mrf.mxu2  ;;  %v2638_v5 = vpop.f32.mrf.mxu3 }
 0x2e2   : > { %v3115_v63 = vadd.f32 %v3114_v2, %v3080_v56  ;;  %v2713_v61 = vadd.f32 %v2638_v5, %v2459_v49  ;;  %v2892_v33 = vpop.f32.mrf.mxu0  ;;  %v2768_v56 = vld [vmem:[#allocation2 + $0x11b] sm:$0xff] }
 0x2e3   : > { %v2132_v10 = vpop.f32.mrf.mxu1 }
 0x2e4   : > { %v2206_v16 = vadd.f32 %v2132_v10, %v4860_v34  ;;  %v2967_v39 = vadd.f32 %v2892_v33, %v2713_v61  ;;  %v5127_v10 = vld [vmem:[#allocation13_spill] sm:$0xff] }
 0x2e5   : > { %2931 = vmatmul.bf16.gmra.mxu0 %v2788_v55 }
 0x2e6   : > { %v3003_v12 = vmul.f32 %v2967_v39, %v5125_v32  ;;  %2428 = vmatmul.bf16.gmra.mxu2 %v2281_v3  ;;  %v2460_v48 = vadd.f32 %v2386_v20, %v2206_v16 }
 0x2e8   : > { %v3038_v46 = vadd.f32 %v3037_v1, %v3003_v12  ;;  %v3081_v38 = vmul.f32 %v3003_v12, %v2967_v39  ;;  %v2262_v1 = vld [vmem:[#allocation2 + $0x129] sm:$0xff] }
 0x2e9   : > { %v2389_v29 = vpop.f32.mrf.mxu2  ;;  %v2640_v4 = vpop.f32.mrf.mxu3  ;;  %v2516_v12 = vld [vmem:[#allocation2 + $0x12a] sm:$0xff] }
 0x2ea   : > { %v3116_v54 = vadd.f32 %v3115_v63, %v3081_v38  ;;  %v2714_v22 = vadd.f32 %v2640_v4, %v2460_v48  ;;  %v2894_v62 = vpop.f32.mrf.mxu0  ;;  %v2515_v4 = vld [vmem:[#allocation2 + $0x122] sm:$0xff] }
 0x2eb   : > { %v2135_v7 = vpop.f32.mrf.mxu1 }
 0x2ec   : > { %v2207_v34 = vadd.f32 %v2135_v7, %v4869_v6  ;;  %v2968_v2 = vadd.f32 %v2894_v62, %v2714_v22  ;;  %v2261_v6 = vld [vmem:[#allocation2 + $0x121] sm:$0xff]  ;;  %v5128_v22 = vld [vmem:[#allocation21_spill] sm:$0xff] }
 0x2ed   : > { %v2282_v61 = vpack.c.bf16 %v2262_v1, %v2261_v6 }
 0x2ee   : > { %v3004_v17 = vmul.f32 %v2968_v2, %v5126_v13  ;;  %v3923_v23 = vpack.c.bf16 %v2968_v2, %v2967_v39  ;;  %2174 = vmatmul.bf16.gmra.mxu1 %v2280_v0  ;;  %2682 = vmatmul.bf16.gmra.mxu3 %v2535_v59  ;;  %v2461_v53 = vadd.f32 %v2389_v29, %v2207_v34 }
 0x2ef   : > { %v2789_v0 = vpack.c.bf16 %v2768_v56, %v2767_v9 }
 0x2f0   : > { %v3039_v58 = vadd.f32 %v3038_v46, %v3004_v17  ;;  %v3082_v36 = vmul.f32 %v3004_v17, %v2968_v2  ;;  %4006 = vst [vmem:[%s4948_s10 + $0x28] sm:$0xff] %v3923_v23   ;;  %v2263_v17 = vld [vmem:[#allocation2 + $0x131] sm:$0xff] }
 0x2f1   : > { %v2391_v60 = vpop.f32.mrf.mxu2  ;;  %v2643_v43 = vpop.f32.mrf.mxu3  ;;  %v2770_v23 = vld [vmem:[#allocation2 + $0x12b] sm:$0xff] }
 0x2f2   : > { %v3117_v49 = vadd.f32 %v3116_v54, %v3082_v36  ;;  %v2715_v20 = vadd.f32 %v2643_v43, %v2461_v53  ;;  %v2897_v24 = vpop.f32.mrf.mxu0  ;;  %v2536_v54 = vpack.c.bf16 %v2516_v12, %v2515_v4  ;;  %v2769_v43 = vld [vmem:[#allocation2 + $0x123] sm:$0xff] }
 0x2f3   : > { %v2137_v5 = vpop.f32.mrf.mxu1  ;;  %v2266_v4 = vld [vmem:[#allocation2 + $0x149] sm:$0xff] }
 0x2f4   : > { %v2208_v37 = vadd.f32 %v2137_v5, %v4872_v51  ;;  %v2969_v63 = vadd.f32 %v2897_v24, %v2715_v20  ;;  %v5129_v20 = vld [vmem:[#allocation26_spill] sm:$0xff] }
 0x2f5   : > { %2936 = vmatmul.bf16.gmra.mxu0 %v2789_v0  ;;  %v2517_v0 = vld [vmem:[#allocation2 + $0x132] sm:$0xff] }
 0x2f6   : > { %v3005_v33 = vmul.f32 %v2969_v63, %v5127_v10  ;;  %2433 = vmatmul.bf16.gmra.mxu2 %v2282_v61  ;;  %v2462_v39 = vadd.f32 %v2391_v60, %v2208_v37 }
 0x2f8   : > { %v3040_v21 = vadd.f32 %v3039_v58, %v3005_v33  ;;  %v3083_v16 = vmul.f32 %v3005_v33, %v2969_v63 }
 0x2f9   : > { %v2394_v55 = vpop.f32.mrf.mxu2  ;;  %v2645_v32 = vpop.f32.mrf.mxu3 }
 0x2fa   : > { %v3118_v46 = vadd.f32 %v3117_v49, %v3083_v16  ;;  %v2716_v38 = vadd.f32 %v2645_v32, %v2462_v39  ;;  %v2899_v29 = vpop.f32.mrf.mxu0  ;;  %v2518_v39 = vld [vmem:[#allocation2 + $0x13a] sm:$0xff] }
 0x2fb   : > { %v2140_v48 = vpop.f32.mrf.mxu1  ;;  %v2537_v12 = vpack.c.bf16 %v2518_v39, %v2517_v0  ;;  %v2774_v39 = vld [vmem:[#allocation2 + $0x14b] sm:$0xff] }
 0x2fc   : > { %v2209_v51 = vadd.f32 %v2140_v48, %v4875_v15  ;;  %v2970_v50 = vadd.f32 %v2899_v29, %v2716_v38  ;;  %v2264_v15 = vld [vmem:[#allocation2 + $0x139] sm:$0xff]  ;;  %v2265_v29 = vld [vmem:[#allocation2 + $0x141] sm:$0xff] }
 0x2fd   : > { %v2283_v49 = vpack.c.bf16 %v2264_v15, %v2263_v17  ;;  %v2772_v17 = vld [vmem:[#allocation2 + $0x13b] sm:$0xff]  ;;  %v2520_v15 = vld [vmem:[#allocation2 + $0x14a] sm:$0xff] }
 0x2fe   : > { %v3006_v7 = vmul.f32 %v2970_v50, %v5128_v22  ;;  %v3928_v62 = vpack.c.bf16 %v2970_v50, %v2969_v63  ;;  %2179 = vmatmul.bf16.gmra.mxu1 %v2281_v3  ;;  %2687 = vmatmul.bf16.gmra.mxu3 %v2536_v54  ;;  %v2463_v2 = vadd.f32 %v2394_v55, %v2209_v51 }
 0x2ff   : > { %v2790_v3 = vpack.c.bf16 %v2770_v23, %v2769_v43 }
 0x300   : > { %v3041_v31 = vadd.f32 %v3040_v21, %v3006_v7  ;;  %v3084_v34 = vmul.f32 %v3006_v7, %v2970_v50  ;;  %4007 = vst [vmem:[%s4948_s10 + $0x30] sm:$0xff] %v3928_v62   ;;  %v2771_v62 = vld [vmem:[#allocation2 + $0x133] sm:$0xff] }
 0x301   : > { %v2396_v59 = vpop.f32.mrf.mxu2  ;;  %v2648_v13 = vpop.f32.mrf.mxu3 }
 0x302   : > { %v3119_v58 = vadd.f32 %v3118_v46, %v3084_v34  ;;  %v2717_v36 = vadd.f32 %v2648_v13, %v2463_v2  ;;  %v2902_v60 = vpop.f32.mrf.mxu0  ;;  %v5131_v46 = vld [vmem:[#allocation20_spill] sm:$0xff]  ;;  %v2284_v2 = vpack.c.bf16 %v2266_v4, %v2265_v29 }
 0x303   : > { %v2142_v53 = vpop.f32.mrf.mxu1 }
 0x304   : > { %v2210_v1 = vadd.f32 %v2142_v53, %v4878_v27  ;;  %v2971_v56 = vadd.f32 %v2902_v60, %v2717_v36  ;;  %v5130_v27 = vld [vmem:[#allocation33_spill] sm:$0xff]  ;;  %v2519_v60 = vld [vmem:[#allocation2 + $0x142] sm:$0xff] }
 0x305   : > { %2941 = vmatmul.bf16.gmra.mxu0 %v2790_v3  ;;  %v5132_v36 = vld [vmem:[#allocation25_spill] sm:$0xff] }
 0x306   : > { %v3007_v5 = vmul.f32 %v2971_v56, %v5129_v20  ;;  %2438 = vmatmul.bf16.gmra.mxu2 %v2283_v49  ;;  %v2464_v9 = vadd.f32 %v2396_v59, %v2210_v1 }
 0x308   : > { %v3042_v24 = vadd.f32 %v3041_v31, %v3007_v5  ;;  %v3085_v6 = vmul.f32 %v3007_v5, %v2971_v56 }
 0x309   : > { %v2399_v37 = vpop.f32.mrf.mxu2  ;;  %v2650_v63 = vpop.f32.mrf.mxu3 }
 0x30a   : > { %v3120_v10 = vadd.f32 %v3119_v58, %v3085_v6  ;;  %v2718_v33 = vadd.f32 %v2650_v63, %v2464_v9  ;;  %v2904_v16 = vpop.f32.mrf.mxu0  ;;  %v2538_v6 = vpack.c.bf16 %v2520_v15, %v2519_v60 }
 0x30b   : > { %v2145_v21 = vpop.f32.mrf.mxu1 }
 0x30c   : > { %v2211_v55 = vadd.f32 %v2145_v21, %v5130_v27  ;;  %v2972_v32 = vadd.f32 %v2904_v16, %v2718_v33  ;;  %v2773_v16 = vld [vmem:[#allocation2 + $0x143] sm:$0xff] }
 0x30d   : > { %v2792_v29 = vpack.c.bf16 %v2774_v39, %v2773_v16 }
 0x30e   : > { %v3008_v38 = vmul.f32 %v2972_v32, %v5131_v46  ;;  %v3933_v48 = vpack.c.bf16 %v2972_v32, %v2971_v56  ;;  %2184 = vmatmul.bf16.gmra.mxu1 %v2282_v61  ;;  %2692 = vmatmul.bf16.gmra.mxu3 %v2537_v12  ;;  %v2465_v54 = vadd.f32 %v2399_v37, %v2211_v55 }
 0x30f   : > { %v2791_v61 = vpack.c.bf16 %v2772_v17, %v2771_v62 }
 0x310   : > { %v3043_v51 = vadd.f32 %v3042_v24, %v3008_v38  ;;  %v3086_v50 = vmul.f32 %v3008_v38, %v2972_v32  ;;  %4008 = vst [vmem:[%s4948_s10 + $0x38] sm:$0xff] %v3933_v48  }
 0x311   : > { %v2401_v22 = vpop.f32.mrf.mxu2  ;;  %v2653_v7 = vpop.f32.mrf.mxu3 }
 0x312   : > { %v3121_v31 = vadd.f32 %v3120_v10, %v3086_v50  ;;  %v2719_v34 = vadd.f32 %v2653_v7, %v2465_v54  ;;  %v2907_v13 = vpop.f32.mrf.mxu0  ;;  %v5134_v10 = vld [vmem:[#allocation7_spill] sm:$0xff] }
 0x313   : > { %v2147_v59 = vpop.f32.mrf.mxu1 }
 0x314   : > { %v2212_v23 = vadd.f32 %v2147_v59, %v4884_v52  ;;  %v2973_v58 = vadd.f32 %v2907_v13, %v2719_v34  ;;  %v5133_v52 = vld [vmem:[#allocation34_spill] sm:$0xff] }
 0x315   : > { %2946 = vmatmul.bf16.gmra.mxu0 %v2791_v61 }
 0x316   : > { %v3009_v53 = vmul.f32 %v2973_v58, %v5132_v36  ;;  %2443 = vmatmul.bf16.gmra.mxu2 %v2284_v2  ;;  %v2466_v56 = vadd.f32 %v2401_v22, %v2212_v23  ;;  %v5135_v22 = vld [vmem:[#allocation9_spill] sm:$0xff]  ;;  %v5136_v36 = vld [vmem:[#allocation6_spill] sm:$0xff] }
 0x318   : > { %v3044_v43 = vadd.f32 %v3043_v51, %v3009_v53  ;;  %v3087_v1 = vmul.f32 %v3009_v53, %v2973_v58 }
 0x319   : > { %v2404_v3 = vpop.f32.mrf.mxu2  ;;  %v2655_v20 = vpop.f32.mrf.mxu3 }
 0x31a   : > { %v3122_v5 = vadd.f32 %v3121_v31, %v3087_v1  ;;  %v2720_v24 = vadd.f32 %v2655_v20, %v2466_v56  ;;  %v2909_v37 = vpop.f32.mrf.mxu0 }
 0x31b   : > { %v2150_v9 = vpop.f32.mrf.mxu1 }
 0x31c   : > { %v2213_v63 = vadd.f32 %v2150_v9, %v5133_v52  ;;  %v2974_v0 = vadd.f32 %v2909_v37, %v2720_v24  ;;  %v5137_v37 = vld [vmem:[#allocation12_spill] sm:$0xff] }
 0x31e   : > { %v3010_v33 = vmul.f32 %v2974_v0, %v5134_v10  ;;  %v3938_v21 = vpack.c.bf16 %v2974_v0, %v2973_v58  ;;  %2189 = vmatmul.bf16.gmra.mxu1 %v2283_v49  ;;  %2697 = vmatmul.bf16.gmra.mxu3 %v2538_v6  ;;  %v2467_v32 = vadd.f32 %v2404_v3, %v2213_v63 }
 0x320   : > { %v3045_v27 = vadd.f32 %v3044_v43, %v3010_v33  ;;  %v3088_v55 = vmul.f32 %v3010_v33, %v2974_v0  ;;  %4009 = vst [vmem:[%s4948_s10 + $0x40] sm:$0xff] %v3938_v21  }
 0x321   : > { %v2406_v12 = vpop.f32.mrf.mxu2  ;;  %v2658_v46 = vpop.f32.mrf.mxu3 }
 0x322   : > { %v3123_v38 = vadd.f32 %v3122_v5, %v3088_v55  ;;  %v2721_v48 = vadd.f32 %v2658_v46, %v2467_v32  ;;  %v2912_v51 = vpop.f32.mrf.mxu0 }
 0x323   : > { %v2152_v4 = vpop.f32.mrf.mxu1 }
 0x324   : > { %v2214_v50 = vadd.f32 %v2152_v4, %v4890_v47  ;;  %v2975_v54 = vadd.f32 %v2912_v51, %v2721_v48 }
 0x325   : > { %2951 = vmatmul.bf16.gmra.mxu0 %v2792_v29 }
 0x326   : > { %v3011_v7 = vmul.f32 %v2975_v54, %v5135_v22  ;;  %v2468_v31 = vadd.f32 %v2406_v12, %v2214_v50  ;;  %v5138_v12 = vld [vmem:[#allocation11_spill] sm:$0xff] }
 0x328   : > { %v3046_v49 = vadd.f32 %v3045_v27, %v3011_v7  ;;  %v3089_v62 = vmul.f32 %v3011_v7, %v2975_v54 }
 0x329   : > { %v2409_v34 = vpop.f32.mrf.mxu2  ;;  %v2660_v2 = vpop.f32.mrf.mxu3 }
 0x32a   : > { %v3124_v59 = vadd.f32 %v3123_v38, %v3089_v62  ;;  %v2722_v13 = vadd.f32 %v2660_v2, %v2468_v31  ;;  %v2914_v23 = vpop.f32.mrf.mxu0  ;;  %v5139_v31 = vld [vmem:[#allocation16_spill] sm:$0xff] }
 0x32b   : > { %v2155_v17 = vpop.f32.mrf.mxu1 }
 0x32c   : > { %v2215_v58 = vadd.f32 %v2155_v17, %v4893_v44  ;;  %v2976_v61 = vadd.f32 %v2914_v23, %v2722_v13 }
 0x32e   : > { %v3012_v53 = vmul.f32 %v2976_v61, %v5136_v36  ;;  %v3943_v47 = vpack.c.bf16 %v2976_v61, %v2975_v54  ;;  %v2469_v43 = vadd.f32 %v2409_v34, %v2215_v58 }
 0x330   : > { %v3047_v60 = vadd.f32 %v3046_v49, %v3012_v53  ;;  %v3090_v15 = vmul.f32 %v3012_v53, %v2976_v61  ;;  %4010 = vst [vmem:[%s4948_s10 + $0x48] sm:$0xff] %v3943_v47  }
 0x331   : > { %v2411_v1 = vpop.f32.mrf.mxu2  ;;  %v2663_v56 = vpop.f32.mrf.mxu3 }
 0x332   : > { %v3125_v3 = vadd.f32 %v3124_v59, %v3090_v15  ;;  %v2723_v20 = vadd.f32 %v2663_v56, %v2469_v43  ;;  %v2917_v24 = vpop.f32.mrf.mxu0 }
 0x333   : > { %v2157_v5 = vpop.f32.mrf.mxu1 }
 0x334   : > { %v2216_v6 = vadd.f32 %v2157_v5, %v4896_v45  ;;  %v2977_v9 = vadd.f32 %v2917_v24, %v2723_v20 }
 0x336   : > { %v3013_v52 = vmul.f32 %v2977_v9, %v5137_v37  ;;  %v2470_v0 = vadd.f32 %v2411_v1, %v2216_v6 }
 0x338   : > { %v3048_v44 = vadd.f32 %v3047_v60, %v3013_v52  ;;  %v3091_v63 = vmul.f32 %v3013_v52, %v2977_v9  ;;  %v5140_v60 = vld [vmem:[#allocation15_spill] sm:$0xff] }
 0x339   : > { %v2414_v10 = vpop.f32.mrf.mxu2  ;;  %v2665_v33 = vpop.f32.mrf.mxu3 }
 0x33a   : > { %v3126_v21 = vadd.f32 %v3125_v3, %v3091_v63  ;;  %v2724_v16 = vadd.f32 %v2665_v33, %v2470_v0  ;;  %v2919_v27 = vpop.f32.mrf.mxu0 }
 0x33b   : > { %v2160_v39 = vpop.f32.mrf.mxu1 }
 0x33c   : > { %v2217_v55 = vadd.f32 %v2160_v39, %v4899_v40  ;;  %v2978_v32 = vadd.f32 %v2919_v27, %v2724_v16 }
 0x33e   : > { %v3014_v46 = vmul.f32 %v2978_v32, %v5138_v12  ;;  %v3948_v38 = vpack.c.bf16 %v2978_v32, %v2977_v9  ;;  %v2471_v29 = vadd.f32 %v2414_v10, %v2217_v55 }
 0x340   : > { %v3049_v45 = vadd.f32 %v3048_v44, %v3014_v46  ;;  %v3092_v48 = vmul.f32 %v3014_v46, %v2978_v32  ;;  %4011 = vst [vmem:[%s4948_s10 + $0x50] sm:$0xff] %v3948_v38   ;;  %v5141_v44 = vld [vmem:[#allocation24_spill] sm:$0xff]  ;;  %v5142_v46 = vld [vmem:[#allocation23_spill] sm:$0xff] }
 0x341   : > { %v2416_v4 = vpop.f32.mrf.mxu2  ;;  %v2668_v51 = vpop.f32.mrf.mxu3 }
 0x342   : > { %v3127_v50 = vadd.f32 %v3126_v21, %v3092_v48  ;;  %v2725_v54 = vadd.f32 %v2668_v51, %v2471_v29  ;;  %v2922_v7 = vpop.f32.mrf.mxu0 }
 0x343   : > { %v2162_v22 = vpop.f32.mrf.mxu1 }
 0x344   : > { %v2218_v49 = vadd.f32 %v2162_v22, %v4902_v41  ;;  %v2979_v62 = vadd.f32 %v2922_v7, %v2725_v54 }
 0x346   : > { %v3015_v34 = vmul.f32 %v2979_v62, %v5139_v31  ;;  %v2472_v59 = vadd.f32 %v2416_v4, %v2218_v49  ;;  %v5143_v31 = vld [vmem:[#allocation22_spill] sm:$0xff] }
 0x348   : > { %v3050_v40 = vadd.f32 %v3049_v45, %v3015_v34  ;;  %v3093_v2 = vmul.f32 %v3015_v34, %v2979_v62 }
 0x349   : > { %v2419_v13 = vpop.f32.mrf.mxu2  ;;  %v2670_v17 = vpop.f32.mrf.mxu3 }
 0x34a   : > { %v3128_v23 = vadd.f32 %v3127_v50, %v3093_v2  ;;  %v2726_v58 = vadd.f32 %v2670_v17, %v2472_v59  ;;  %v2924_v36 = vpop.f32.mrf.mxu0 }
 0x34b   : > { %v2165_v61 = vpop.f32.mrf.mxu1 }
 0x34c   : > { %v2219_v53 = vadd.f32 %v2165_v61, %v4905_v57  ;;  %v2980_v47 = vadd.f32 %v2924_v36, %v2726_v58 }
 0x34e   : > { %v3016_v15 = vmul.f32 %v2980_v47, %v5140_v60  ;;  %v3953_v43 = vpack.c.bf16 %v2980_v47, %v2979_v62  ;;  %v2473_v56 = vadd.f32 %v2419_v13, %v2219_v53 }
 0x350   : > { %v3051_v41 = vadd.f32 %v3050_v40, %v3016_v15  ;;  %v3094_v1 = vmul.f32 %v3016_v15, %v2980_v47  ;;  %4012 = vst [vmem:[%s4948_s10 + $0x58] sm:$0xff] %v3953_v43   ;;  %v5144_v47 = vld [vmem:[#allocation10_spill] sm:$0xff] }
 0x351   : > { %v2421_v3 = vpop.f32.mrf.mxu2  ;;  %v2673_v20 = vpop.f32.mrf.mxu3 }
 0x352   : > { %v3129_v5 = vadd.f32 %v3128_v23, %v3094_v1  ;;  %v2727_v24 = vadd.f32 %v2673_v20, %v2473_v56  ;;  %v2927_v9 = vpop.f32.mrf.mxu0 }
 0x353   : > { %v2167_v6 = vpop.f32.mrf.mxu1 }
 0x354   : > { %v2220_v37 = vadd.f32 %v2167_v6, %v4908_v28  ;;  %v2981_v52 = vadd.f32 %v2927_v9, %v2727_v24 }
 0x356   : > { %v3017_v63 = vmul.f32 %v2981_v52, %v5141_v44  ;;  %v2474_v10 = vadd.f32 %v2421_v3, %v2220_v37  ;;  %v5145_v37 = vld [vmem:[#allocation19_spill] sm:$0xff] }
 0x358   : > { %v3052_v57 = vadd.f32 %v3051_v41, %v3017_v63  ;;  %v3095_v0 = vmul.f32 %v3017_v63, %v2981_v52 }
 0x359   : > { %v2424_v33 = vpop.f32.mrf.mxu2  ;;  %v2675_v21 = vpop.f32.mrf.mxu3 }
 0x35a   : > { %v3130_v16 = vadd.f32 %v3129_v5, %v3095_v0  ;;  %v2728_v39 = vadd.f32 %v2675_v21, %v2474_v10  ;;  %v2929_v55 = vpop.f32.mrf.mxu0 }
 0x35b   : > { %v2170_v27 = vpop.f32.mrf.mxu1 }
 0x35c   : > { %v2221_v32 = vadd.f32 %v2170_v27, %v4911_v26  ;;  %v2982_v12 = vadd.f32 %v2929_v55, %v2728_v39  ;;  %v5146_v55 = vld [vmem:[#allocation18_spill] sm:$0xff] }
 0x35e   : > { %v3018_v38 = vmul.f32 %v2982_v12, %v5142_v46  ;;  %v3958_v45 = vpack.c.bf16 %v2982_v12, %v2981_v52  ;;  %v2475_v29 = vadd.f32 %v2424_v33, %v2221_v32 }
 0x360   : > { %v3053_v28 = vadd.f32 %v3052_v57, %v3018_v38  ;;  %v3096_v48 = vmul.f32 %v3018_v38, %v2982_v12  ;;  %4013 = vst [vmem:[%s4948_s10 + $0x60] sm:$0xff] %v3958_v45  }
 0x361   : > { %v2426_v4 = vpop.f32.mrf.mxu2  ;;  %v2678_v51 = vpop.f32.mrf.mxu3 }
 0x362   : > { %v3131_v50 = vadd.f32 %v3130_v16, %v3096_v48  ;;  %v2729_v54 = vadd.f32 %v2678_v51, %v2475_v29  ;;  %v2932_v7 = vpop.f32.mrf.mxu0 }
 0x363   : > { %v2172_v22 = vpop.f32.mrf.mxu1 }
 0x364   : > { %v2222_v49 = vadd.f32 %v2172_v22, %v4914_v14  ;;  %v2983_v62 = vadd.f32 %v2932_v7, %v2729_v54  ;;  %v5147_v22 = vld [vmem:[#allocation17_spill] sm:$0xff] }
 0x366   : > { %v3019_v34 = vmul.f32 %v2983_v62, %v5143_v31  ;;  %v2476_v2 = vadd.f32 %v2426_v4, %v2222_v49 }
 0x368   : > { %v3054_v26 = vadd.f32 %v3053_v28, %v3019_v34  ;;  %v3097_v40 = vmul.f32 %v3019_v34, %v2983_v62 }
 0x369   : > { %v2429_v59 = vpop.f32.mrf.mxu2  ;;  %v2680_v13 = vpop.f32.mrf.mxu3 }
 0x36a   : > { %v3132_v17 = vadd.f32 %v3131_v50, %v3097_v40  ;;  %v2730_v23 = vadd.f32 %v2680_v13, %v2476_v2  ;;  %v2934_v61 = vpop.f32.mrf.mxu0 }
 0x36b   : > { %v2175_v58 = vpop.f32.mrf.mxu1 }
 0x36c   : > { %v2223_v36 = vadd.f32 %v2175_v58, %v4917_v19  ;;  %v2984_v53 = vadd.f32 %v2934_v61, %v2730_v23  ;;  %v5148_v23 = vld [vmem:[#allocation27_spill] sm:$0xff] }
 0x36e   : > { %v3020_v60 = vmul.f32 %v2984_v53, %v5144_v47  ;;  %v3963_v15 = vpack.c.bf16 %v2984_v53, %v2983_v62  ;;  %v2477_v41 = vadd.f32 %v2429_v59, %v2223_v36 }
 0x370   : > { %v3055_v14 = vadd.f32 %v3054_v26, %v3020_v60  ;;  %v3098_v43 = vmul.f32 %v3020_v60, %v2984_v53  ;;  %4014 = vst [vmem:[%s4948_s10 + $0x68] sm:$0xff] %v3963_v15  }
 0x371   : > { %v2431_v1 = vpop.f32.mrf.mxu2  ;;  %v2683_v56 = vpop.f32.mrf.mxu3 }
 0x372   : > { %v3133_v3 = vadd.f32 %v3132_v17, %v3098_v43  ;;  %v2731_v20 = vadd.f32 %v2683_v56, %v2477_v41  ;;  %v2937_v24 = vpop.f32.mrf.mxu0 }
 0x373   : > { %v2177_v5 = vpop.f32.mrf.mxu1 }
 0x374   : > { %v2224_v6 = vadd.f32 %v2177_v5, %v4920_v8  ;;  %v2985_v9 = vadd.f32 %v2937_v24, %v2731_v20 }
 0x376   : > { %v3021_v52 = vmul.f32 %v2985_v9, %v5145_v37  ;;  %v2478_v63 = vadd.f32 %v2431_v1, %v2224_v6 }
 0x378   : > { %v3056_v19 = vadd.f32 %v3055_v14, %v3021_v52  ;;  %v3099_v44 = vmul.f32 %v3021_v52, %v2985_v9 }
 0x379   : > { %v2434_v57 = vpop.f32.mrf.mxu2  ;;  %v2685_v0 = vpop.f32.mrf.mxu3 }
 0x37a   : > { %v3134_v10 = vadd.f32 %v3133_v3, %v3099_v44  ;;  %v2732_v33 = vadd.f32 %v2685_v0, %v2478_v63  ;;  %v2939_v16 = vpop.f32.mrf.mxu0  ;;  %v5149_v3 = vld [vmem:[#allocation30_spill] sm:$0xff]  ;;  %v5150_v0 = vld [vmem:[#allocation29_spill] sm:$0xff] }
 0x37b   : > { %v2180_v21 = vpop.f32.mrf.mxu1 }
 0x37c   : > { %v2225_v39 = vadd.f32 %v2180_v21, %v4923_v42  ;;  %v2986_v27 = vadd.f32 %v2939_v16, %v2732_v33 }
 0x37e   : > { %v3022_v32 = vmul.f32 %v2986_v27, %v5146_v55  ;;  %v3968_v12 = vpack.c.bf16 %v2986_v27, %v2985_v9  ;;  %v2479_v38 = vadd.f32 %v2434_v57, %v2225_v39 }
 0x380   : > { %v3057_v8 = vadd.f32 %v3056_v19, %v3022_v32  ;;  %v3100_v46 = vmul.f32 %v3022_v32, %v2986_v27  ;;  %4015 = vst [vmem:[%s4948_s10 + $0x70] sm:$0xff] %v3968_v12  }
 0x381   : > { %v2436_v45 = vpop.f32.mrf.mxu2  ;;  %v2688_v28 = vpop.f32.mrf.mxu3 }
 0x382   : > { %v3135_v48 = vadd.f32 %v3134_v10, %v3100_v46  ;;  %v2733_v29 = vadd.f32 %v2688_v28, %v2479_v38  ;;  %v2942_v51 = vpop.f32.mrf.mxu0  ;;  %v5151_v38 = vld [vmem:[#allocation31_spill] sm:$0xff] }
 0x383   : > { %v2182_v4 = vpop.f32.mrf.mxu1 }
 0x384   : > { %v2226_v50 = vadd.f32 %v2182_v4, %v4926_v35  ;;  %v2987_v54 = vadd.f32 %v2942_v51, %v2733_v29 }
 0x386   : > { %v3023_v7 = vmul.f32 %v2987_v54, %v5147_v22  ;;  %v2480_v62 = vadd.f32 %v2436_v45, %v2226_v50 }
 0x388   : > { %v3058_v42 = vadd.f32 %v3057_v8, %v3023_v7  ;;  %v3101_v49 = vmul.f32 %v3023_v7, %v2987_v54  ;;  %v5152_v7 = vld [vmem:[#allocation28_spill] sm:$0xff] }
 0x389   : > { %v2439_v31 = vpop.f32.mrf.mxu2  ;;  %v2690_v34 = vpop.f32.mrf.mxu3 }
 0x38a   : > { %v3136_v26 = vadd.f32 %v3135_v48, %v3101_v49  ;;  %v2734_v40 = vadd.f32 %v2690_v34, %v2480_v62  ;;  %v2944_v59 = vpop.f32.mrf.mxu0 }
 0x38b   : > { %v2185_v2 = vpop.f32.mrf.mxu1 }
 0x38c   : > { %v2227_v13 = vadd.f32 %v2185_v2, %v4929_v25  ;;  %v2988_v17 = vadd.f32 %v2944_v59, %v2734_v40 }
 0x38e   : > { %v3024_v58 = vmul.f32 %v2988_v17, %v5148_v23  ;;  %v3973_v61 = vpack.c.bf16 %v2988_v17, %v2987_v54  ;;  %v2481_v53 = vadd.f32 %v2439_v31, %v2227_v13 }
 0x390   : > { %v3059_v35 = vadd.f32 %v3058_v42, %v3024_v58  ;;  %v3102_v36 = vmul.f32 %v3024_v58, %v2988_v17  ;;  %4016 = vst [vmem:[%s4948_s10 + $0x78] sm:$0xff] %v3973_v61  }
 0x391   : > { %v2693_v47 = vpop.f32.mrf.mxu3  ;;  %v2441_v15 = vpop.f32.mrf.mxu2 }
 0x392   : > { %v3137_v60 = vadd.f32 %v3136_v26, %v3102_v36  ;;  %v2735_v14 = vadd.f32 %v2693_v47, %v2481_v53  ;;  %v2947_v41 = vpop.f32.mrf.mxu0 }
 0x393   : > { %v2187_v43 = vpop.f32.mrf.mxu1 }
 0x394   : > { %v2228_v1 = vadd.f32 %v2187_v43, %v4932_v30  ;;  %v2989_v56 = vadd.f32 %v2947_v41, %v2735_v14 }
 0x396   : > { %v3025_v20 = vmul.f32 %v2989_v56, %v5149_v3  ;;  %v2482_v24 = vadd.f32 %v2441_v15, %v2228_v1 }
 0x398   : > { %v3060_v25 = vadd.f32 %v3059_v35, %v3025_v20  ;;  %v3103_v5 = vmul.f32 %v3025_v20, %v2989_v56 }
 0x399   : > { %v2695_v6 = vpop.f32.mrf.mxu3  ;;  %v2444_v57 = vpop.f32.mrf.mxu2 }
 0x39a   : > { %v3138_v9 = vadd.f32 %v3137_v60, %v3103_v5  ;;  %v2736_v37 = vadd.f32 %v2695_v6, %v2482_v24  ;;  %v2949_v19 = vpop.f32.mrf.mxu0 }
 0x39b   : > { %v2190_v52 = vpop.f32.mrf.mxu1 }
 0x39c   : > { %v2229_v44 = vadd.f32 %v2190_v52, %v4935_v11  ;;  %v2990_v63 = vadd.f32 %v2949_v19, %v2736_v37 }
 0x39e   : > { %v3026_v10 = vmul.f32 %v2990_v63, %v5150_v0  ;;  %v3978_v33 = vpack.c.bf16 %v2990_v63, %v2989_v56  ;;  %v2483_v16 = vadd.f32 %v2444_v57, %v2229_v44 }
 0x3a0   : > { %v3061_v30 = vadd.f32 %v3060_v25, %v3026_v10  ;;  %v3104_v21 = vmul.f32 %v3026_v10, %v2990_v63  ;;  %4017 = vst [vmem:[%s4948_s10 + $0x80] sm:$0xff] %v3978_v33  }
 0x3a1   : > { %v2698_v39 = vpop.f32.mrf.mxu3  ;;  %v2446_v45 = vpop.f32.mrf.mxu2 }
 0x3a2   : > { %v3139_v27 = vadd.f32 %v3138_v9, %v3104_v21  ;;  %v2737_v55 = vadd.f32 %v2698_v39, %v2483_v16  ;;  %v2952_v12 = vpop.f32.mrf.mxu0 }
 0x3a3   : > { %v2192_v32 = vpop.f32.mrf.mxu1 }
 0x3a4   : > { %v2230_v8 = vadd.f32 %v2192_v32, %v4937_v18  ;;  %v2991_v46 = vadd.f32 %v2952_v12, %v2737_v55 }
 0x3a6   : > { %v3027_v11 = vmul.f32 %v2991_v46, %v5151_v38  ;;  %v2484_v29 = vadd.f32 %v2446_v45, %v2230_v8 }
 0x3a8   : > { %v3062_v28 = vadd.f32 %v3061_v30, %v3027_v11  ;;  %v3105_v48 = vmul.f32 %v3027_v11, %v2991_v46 }
 0x3a9   : > { %v2700_v4 = vpop.f32.mrf.mxu3 }
 0x3aa   : > { %v3140_v51 = vadd.f32 %v3139_v27, %v3105_v48  ;;  %v2738_v50 = vadd.f32 %v2700_v4, %v2484_v29  ;;  %v2954_v54 = vpop.f32.mrf.mxu0 }
 0x3ac   : > { %v2992_v22 = vadd.f32 %v2954_v54, %v2738_v50 }
 0x3ae   : > { %v3028_v42 = vmul.f32 %v2992_v22, %v5152_v7  ;;  %v3983_v49 = vpack.c.bf16 %v2992_v22, %v2991_v46 }
 0x3b0   : > { %v3063_v62 = vadd.f32 %v3062_v28, %v3028_v42  ;;  %v3106_v18 = vmul.f32 %v3028_v42, %v2992_v22  ;;  %4018 = vst [vmem:[%s4948_s10 + $0x88] sm:$0xff] %v3983_v49  }
 0x3b2   : > { %v3064_v31 = vrot.slane %v3063_v62, 4  ;;  %v3141_v34 = vadd.f32 %v3140_v51, %v3106_v18 }
 0x3b4   : > { %v3065_v26 = vadd.f32 %v3064_v31, %v3063_v62  ;;  %v3142_v40 = vrot.slane %v3141_v34, 4 }
 0x3b6   : > { %v3066_v2 = vrot.slane %v3065_v26, 2  ;;  %v3143_v59 = vadd.f32 %v3142_v40, %v3141_v34 }
 0x3b8   : > { %v3067_v13 = vadd.f32 %v3066_v2, %v3065_v26  ;;  %v3144_v17 = vrot.slane %v3143_v59, 2 }
 0x3ba   : > { %v3068_v23 = vrot.slane %v3067_v13, 1  ;;  %v3145_v58 = vadd.f32 %v3144_v17, %v3143_v59 }
 0x3bc   : > { %v3069_v61 = vadd.f32 %v3068_v23, %v3067_v13  ;;  %v3146_v35 = vrot.slane %v3145_v58, 1 }
 0x3be   : > { %3070 = vst [vmem:[%s292_s12] sm:$0x1] %v3069_v61  ;;  %v3147_v36 = vadd.f32 %v3146_v35, %v3145_v58 }
 0x3c0   : > { %3148 = vst [vmem:[%s295_s16] sm:$0x1] %v3147_v36 }
 0x3c1 PF: > { %s18_s24 = sadd.s32 1, %s4065_s24  }
 0x3c2   : > { %p15_p4 = scmp.ge.s32.totalorder %s18_s24, 4  }
 0x3c4   :  { %17 = sbr.rel (!%p15_p4) target bundleno = 1 (0x1), region = 102 }

// kernel: conv_block_forward.3
= control target key start
LH: loop header
LB: loop body
LE: loop exit
PB: predicated region body
PF: predicated region fallthrough
CT: control target
= control target key end

     0   :  { %s3965_s24 = smov 0   ;;  %s4780_s0 = inlined_call_operand.vmem [shape: bf16[2,288,128], index: 0, kind: input, shape index: {}]   ;;  %s4781_s1 = inlined_call_operand.vmem [shape: f32[1,128], index: 1, kind: input, shape index: {}]   ;;  %s4782_s2 = inlined_call_operand.vmem [shape: f32[1,128], index: 2, kind: input, shape index: {}]   ;;  %s4783_s3 = inlined_call_operand.vmem [shape: f32[288,1], index: 3, kind: input, shape index: {}]   ;;  %s4784_s4 = inlined_call_operand.vmem [shape: bf16[9,128,128], index: 4, kind: input, shape index: {}]   ;;  %s4785_s5 = inlined_call_operand.vmem [shape: bf16[2,288,128], index: 5, kind: output, shape index: {0}]   ;;  %s4786_s6 = inlined_call_operand.vmem [shape: f32[2,1,128], index: 6, kind: output, shape index: {1}]   ;;  %s4787_s7 = inlined_call_operand.vmem [shape: f32[2,1,128], index: 7, kind: output, shape index: {2}]  }
   0x1 LB: > { %s3174_s1 = sadd.s32 4294967295, %s3921_s24   ;;  %p3178_p0 = scmp.ge.s32.totalorder %s3921_s24, 1  ;;  %s3921_s24 = sphi %s3965_s24, %s18_s24  }
   0x2   : > { %p242_p1 = scmp.lt.s32.totalorder %s3921_s24, 3 }
   0x4   : > { %p243_p2 = pnand %p3178_p0, %p242_p1 }
   0x6   : > { %246 = sbr.rel (%p243_p2) target bundleno = 848 (0x350), region = 40 }
   0xb   : > { %v3614_v0 = vld [vmem:[%s4784_s4 + $0x78] sm:$0xff]  ;;  %p280_p3 = scmp.lt.s32.totalorder %s3174_s1, 1  ;;  %v3613_v1 = vld [vmem:[%s4784_s4 + $0x70] sm:$0xff]  ;;  %v3923_v2 = vmov 0.0   ;;  %v3612_v3 = vld [vmem:[%s4784_s4 + $0x68] sm:$0xff] }
   0xc   : > { %3867 = vmatpush.bf16.msra.mxu1 %v3614_v0  ;;  %3868 = vmatpush.bf16.msra.mxu2 %v3614_v0  ;;  %405 = vst [vmem:[#allocation2 + $0x8] sm:$0xff] %v3923_v2  ;;  %v3611_v13 = vld [vmem:[%s4784_s4 + $0x60] sm:$0xff]  ;;  %v3610_v20 = vld [vmem:[%s4784_s4 + $0x58] sm:$0xff]  ;;  %v3609_v27 = vld [vmem:[%s4784_s4 + $0x50] sm:$0xff] }
   0xd   : > { %s4793_s1 = smov (!%p280_p3, %s3174_s1), 1  ;;  %637 = vmatpush.bf16.msra.mxu0 %v3614_v0  ;;  %3869 = vmatpush.bf16.msra.mxu3 %v3614_v0  ;;  %406 = vst [vmem:[#allocation2 + $0x10] sm:$0xff] %v3923_v2  ;;  %v3608_v34 = vld [vmem:[%s4784_s4 + $0x48] sm:$0xff]  ;;  %v3607_v39 = vld [vmem:[%s4784_s4 + $0x40] sm:$0xff]  ;;  %v3622_v46 = vld [vmem:[%s4784_s4 + $0xb8] sm:$0xff] }
   0xe   : > { %s3891_s28 = smul.u32 144, %s4793_s1  ;;  %407 = vst [vmem:[#allocation2 + $0x18] sm:$0xff] %v3923_v2  ;;  %v3606_v49 = vld [vmem:[%s4784_s4 + $0x38] sm:$0xff]  ;;  %v3621_v56 = vld [vmem:[%s4784_s4 + $0xb0] sm:$0xff]  ;;  %v3620_v0 = vld [vmem:[%s4784_s4 + $0xa8] sm:$0xff]  ;;  %s292_s11 = scalar_lea.vmem %s4786_s6, %s4793_s1 }
   0xf   : > { %408 = vst [vmem:[#allocation2 + $0x140] sm:$0xff] %v3923_v2  ;;  %v3638_v50 = vld [vmem:[%s4784_s4 + $0x138] sm:$0xff]  ;;  %v3605_v60 = vld [vmem:[%s4784_s4 + $0x30] sm:$0xff] }
  0x10   : > { %3870 = vmatpush.bf16.msra.mxu1 %v3613_v1  ;;  %3871 = vmatpush.bf16.msra.mxu2 %v3613_v1  ;;  %s3990_s10 = scalar_lea.vmem %s4780_s0, %s3891_s28  ;;  %409 = vst [vmem:[#allocation2 + $0x148] sm:$0xff] %v3923_v2  ;;  %v3637_v61 = vld [vmem:[%s4784_s4 + $0x130] sm:$0xff]  ;;  %v3630_v63 = vld [vmem:[%s4784_s4 + $0xf8] sm:$0xff]  ;;  %s4613_s19 = scalar_lea.vmem %s4785_s5, %s3891_s28 }
  0x11   : > { %638 = vmatpush.bf16.msra.mxu0 %v3613_v1  ;;  %3872 = vmatpush.bf16.msra.mxu3 %v3613_v1  ;;  %v3993_v4 = vld [vmem:[%s3990_s10 + $0x18] sm:$0xff]   ;;  %v3836_v5 = vld [vmem:[%s3990_s10 + $0x20] sm:$0xff]   ;;  %v3841_v10 = vld [vmem:[%s3990_s10 + $0x48] sm:$0xff]   ;;  %410 = vst [vmem:[#allocation2 + $0x150] sm:$0xff] %v3923_v2 }
  0x12   : > { %v3997_v6 = vld [vmem:[%s3990_s10 + $0x40] sm:$0xff]   ;;  %v3686_v7 = vunpack.c.h.bf16 %v3993_v4  ;;  %v3689_v8 = vunpack.c.l.bf16 %v3836_v5  ;;  %v3690_v9 = vunpack.c.h.bf16 %v3836_v5  ;;  %v3837_v12 = vld [vmem:[%s3990_s10 + $0x28] sm:$0xff]   ;;  %v3709_v14 = vunpack.c.l.bf16 %v3841_v10  ;;  %v3842_v16 = vld [vmem:[%s3990_s10 + $0x50] sm:$0xff]  }
  0x13   : > { %v3706_v11 = vunpack.c.h.bf16 %v3997_v6  ;;  %v3710_v15 = vunpack.c.h.bf16 %v3841_v10  ;;  %v3693_v17 = vunpack.c.l.bf16 %v3837_v12  ;;  %v3694_v18 = vunpack.c.h.bf16 %v3837_v12  ;;  %v3672_v19 = vld [vmem:[%s3990_s10] sm:$0xff]   ;;  %v4012_v23 = vld [vmem:[%s3990_s10 + $0x68] sm:$0xff]   ;;  %v3846_v25 = vld [vmem:[%s3990_s10 + $0x70] sm:$0xff]  }
  0x14   : > { %3873 = vmatpush.bf16.msra.mxu1 %v3612_v3  ;;  %3874 = vmatpush.bf16.msra.mxu2 %v3612_v3  ;;  %419 = vst [vmem:[#allocation2 + $0x58] sm:$0xff] %v3686_v7  ;;  %v3713_v21 = vunpack.c.l.bf16 %v3842_v16  ;;  %v3714_v22 = vunpack.c.h.bf16 %v3842_v16  ;;  %v3673_v24 = vunpack.c.l.bf16 %v3672_v19  ;;  %v3674_v26 = vunpack.c.h.bf16 %v3672_v19  ;;  %v3838_v31 = vld [vmem:[%s3990_s10 + $0x30] sm:$0xff]   ;;  %v3843_v32 = vld [vmem:[%s3990_s10 + $0x58] sm:$0xff]   ;;  %v3833_v36 = vld [vmem:[%s3990_s10 + $0x8] sm:$0xff]  }
  0x15   : > { %639 = vmatpush.bf16.msra.mxu0 %v3612_v3  ;;  %420 = vst [vmem:[#allocation2 + $0x60] sm:$0xff] %v3689_v8  ;;  %3875 = vmatpush.bf16.msra.mxu3 %v3612_v3  ;;  %v3726_v28 = vunpack.c.h.bf16 %v4012_v23  ;;  %v3729_v29 = vunpack.c.l.bf16 %v3846_v25  ;;  %v3730_v30 = vunpack.c.h.bf16 %v3846_v25  ;;  %v3697_v33 = vunpack.c.l.bf16 %v3838_v31  ;;  %v518_v47 = vld [vmem:[#allocation2 + $0xe] sm:$0xff]  ;;  %v519_v48 = vld [vmem:[#allocation2 + $0x16] sm:$0xff] }
  0x16   : > { %421 = vst [vmem:[#allocation2 + $0x68] sm:$0xff] %v3690_v9  ;;  %v3698_v35 = vunpack.c.h.bf16 %v3838_v31  ;;  %v3717_v37 = vunpack.c.l.bf16 %v3843_v32  ;;  %v3718_v38 = vunpack.c.h.bf16 %v3843_v32  ;;  %v3677_v41 = vunpack.c.l.bf16 %v3833_v36  ;;  %v3847_v55 = vld [vmem:[%s3990_s10 + $0x78] sm:$0xff]   ;;  %v3604_v1 = vld [vmem:[%s4784_s4 + $0x28] sm:$0xff]  ;;  %v3629_v5 = vld [vmem:[%s4784_s4 + $0xf0] sm:$0xff] }
  0x17   : > { %429 = vst [vmem:[#allocation2 + $0xa8] sm:$0xff] %v3706_v11  ;;  %v3678_v45 = vunpack.c.h.bf16 %v3833_v36  ;;  %v554_v53 = vpack.c.bf16 %v519_v48, %v518_v47  ;;  %v3733_v58 = vunpack.c.l.bf16 %v3847_v55  ;;  %v3734_v59 = vunpack.c.h.bf16 %v3847_v55  ;;  %v3636_v2 = vld [vmem:[%s4784_s4 + $0x128] sm:$0xff]  ;;  %v3839_v3 = vld [vmem:[%s3990_s10 + $0x38] sm:$0xff]   ;;  %v3844_v9 = vld [vmem:[%s3990_s10 + $0x60] sm:$0xff]  }
  0x18   : > { %3876 = vmatpush.bf16.msra.mxu1 %v3611_v13  ;;  %3877 = vmatpush.bf16.msra.mxu2 %v3611_v13  ;;  %430 = vst [vmem:[#allocation2 + $0xb0] sm:$0xff] %v3709_v14  ;;  %v3701_v7 = vunpack.c.l.bf16 %v3839_v3  ;;  %v3702_v8 = vunpack.c.h.bf16 %v3839_v3  ;;  %v3834_v10 = vld [vmem:[%s3990_s10 + $0x10] sm:$0xff]   ;;  %v3619_v11 = vld [vmem:[%s4784_s4 + $0xa0] sm:$0xff]  ;;  %v3721_v12 = vunpack.c.l.bf16 %v3844_v9 }
  0x19   : > { %640 = vmatpush.bf16.msra.mxu0 %v3611_v13  ;;  %431 = vst [vmem:[#allocation2 + $0xb8] sm:$0xff] %v3710_v15  ;;  %3878 = vmatpush.bf16.msra.mxu3 %v3611_v13  ;;  %v3722_v13 = vunpack.c.h.bf16 %v3844_v9  ;;  %v3603_v14 = vld [vmem:[%s4784_s4 + $0x20] sm:$0xff]  ;;  %v3681_v16 = vunpack.c.l.bf16 %v3834_v10  ;;  %v3682_v19 = vunpack.c.h.bf16 %v3834_v10 }
  0x1a   : > { %422 = vst [vmem:[#allocation2 + $0x70] sm:$0xff] %v3693_v17  ;;  %v3635_v15 = vld [vmem:[%s4784_s4 + $0x120] sm:$0xff] }
  0x1b   : > { %423 = vst [vmem:[#allocation2 + $0x78] sm:$0xff] %v3694_v18 }
  0x1c   : > { %3879 = vmatpush.bf16.msra.mxu1 %v3610_v20  ;;  %3880 = vmatpush.bf16.msra.mxu2 %v3610_v20  ;;  %432 = vst [vmem:[#allocation2 + $0xc0] sm:$0xff] %v3713_v21  ;;  %v528_v40 = vld [vmem:[#allocation2 + $0x5e] sm:$0xff] }
  0x1d   : > { %641 = vmatpush.bf16.msra.mxu0 %v3610_v20  ;;  %3881 = vmatpush.bf16.msra.mxu3 %v3610_v20  ;;  %433 = vst [vmem:[#allocation2 + $0xc8] sm:$0xff] %v3714_v22  ;;  %v529_v42 = vld [vmem:[#allocation2 + $0x66] sm:$0xff] }
  0x1e   : > { %412 = vst [vmem:[#allocation2 + $0x20] sm:$0xff] %v3673_v24  ;;  %v559_v51 = vpack.c.bf16 %v529_v42, %v528_v40  ;;  %v3628_v22 = vld [vmem:[%s4784_s4 + $0xe8] sm:$0xff]  ;;  %v3627_v40 = vld [vmem:[%s4784_s4 + $0xe0] sm:$0xff] }
  0x1f   : > { %413 = vst [vmem:[#allocation2 + $0x28] sm:$0xff] %v3674_v26  ;;  %v538_v43 = vld [vmem:[#allocation2 + $0xae] sm:$0xff]  ;;  %v3618_v26 = vld [vmem:[%s4784_s4 + $0x98] sm:$0xff] }
  0x20   : > { %3882 = vmatpush.bf16.msra.mxu1 %v3609_v27  ;;  %3883 = vmatpush.bf16.msra.mxu2 %v3609_v27  ;;  %439 = vst [vmem:[#allocation2 + $0xf8] sm:$0xff] %v3726_v28  ;;  %v539_v44 = vld [vmem:[#allocation2 + $0xb6] sm:$0xff]  ;;  %v3616_v42 = vld [vmem:[%s4784_s4 + $0x88] sm:$0xff] }
  0x21   : > { %642 = vmatpush.bf16.msra.mxu0 %v3609_v27  ;;  %3884 = vmatpush.bf16.msra.mxu3 %v3609_v27  ;;  %440 = vst [vmem:[#allocation2 + $0x100] sm:$0xff] %v3729_v29  ;;  %v564_v52 = vpack.c.bf16 %v539_v44, %v538_v43  ;;  %v530_v17 = vld [vmem:[#allocation2 + $0x6e] sm:$0xff]  ;;  %v3602_v27 = vld [vmem:[%s4784_s4 + $0x18] sm:$0xff]  ;;  %v4788_v44 = vunpack.c.l.bf16 %v4012_v23 }
  0x22   : > { %441 = vst [vmem:[#allocation2 + $0x108] sm:$0xff] %v3730_v30  ;;  %v531_v18 = vld [vmem:[#allocation2 + $0x76] sm:$0xff] }
  0x23   : > { %424 = vst [vmem:[#allocation2 + $0x80] sm:$0xff] %v3697_v33  ;;  %v540_v20 = vld [vmem:[#allocation2 + $0xbe] sm:$0xff]  ;;  %v560_v28 = vpack.c.bf16 %v531_v18, %v530_v17  ;;  %v3633_v43 = vld [vmem:[%s4784_s4 + $0x110] sm:$0xff] }
  0x24   : > { %3885 = vmatpush.bf16.msra.mxu1 %v3608_v34  ;;  %3886 = vmatpush.bf16.msra.mxu2 %v3608_v34  ;;  %425 = vst [vmem:[#allocation2 + $0x88] sm:$0xff] %v3698_v35  ;;  %v541_v21 = vld [vmem:[#allocation2 + $0xc6] sm:$0xff]  ;;  %v3662_v17 = vld [vmem:[%s4784_s4 + $0x1f8] sm:$0xff] }
  0x25   : > { %643 = vmatpush.bf16.msra.mxu0 %v3608_v34  ;;  %3887 = vmatpush.bf16.msra.mxu3 %v3608_v34  ;;  %434 = vst [vmem:[#allocation2 + $0xd0] sm:$0xff] %v3717_v37  ;;  %v520_v24 = vld [vmem:[#allocation2 + $0x1e] sm:$0xff]  ;;  %v565_v29 = vpack.c.bf16 %v541_v21, %v540_v20  ;;  %v3617_v37 = vld [vmem:[%s4784_s4 + $0x90] sm:$0xff] }
  0x26   : > { %435 = vst [vmem:[#allocation2 + $0xd8] sm:$0xff] %v3718_v38  ;;  %v521_v25 = vld [vmem:[#allocation2 + $0x26] sm:$0xff]  ;;  %v3634_v38 = vld [vmem:[%s4784_s4 + $0x118] sm:$0xff] }
  0x27   : > { %414 = vst [vmem:[#allocation2 + $0x30] sm:$0xff] %v3677_v41  ;;  %v555_v30 = vpack.c.bf16 %v521_v25, %v520_v24  ;;  %v3848_v33 = vld [vmem:[%s3990_s10 + $0x80] sm:$0xff]   ;;  %v3601_v41 = vld [vmem:[%s4784_s4 + $0x10] sm:$0xff]  ;;  %v3646_v18 = vld [vmem:[%s4784_s4 + $0x178] sm:$0xff] }
  0x28   : > { %3888 = vmatpush.bf16.msra.mxu1 %v3607_v39  ;;  %3889 = vmatpush.bf16.msra.mxu2 %v3607_v39  ;;  %v548_v54 = vld [vmem:[#allocation2 + $0xfe] sm:$0xff]  ;;  %415 = vst [vmem:[#allocation2 + $0x38] sm:$0xff] %v3678_v45  ;;  %v3737_v34 = vunpack.c.l.bf16 %v3848_v33  ;;  %v3738_v35 = vunpack.c.h.bf16 %v3848_v33  ;;  %v448_v33 = vld [vmem:[#allocation2 + $0xd] sm:$0xff] }
  0x29   : > { %644 = vmatpush.bf16.msra.mxu0 %v3607_v39  ;;  %v549_v57 = vld [vmem:[#allocation2 + $0x106] sm:$0xff]  ;;  %442 = vst [vmem:[#allocation2 + $0x110] sm:$0xff] %v3733_v58  ;;  %3890 = vmatpush.bf16.msra.mxu3 %v3607_v39  ;;  %v3705_v39 = vunpack.c.l.bf16 %v3997_v6  ;;  %v3626_v45 = vld [vmem:[%s4784_s4 + $0xd8] sm:$0xff] }
  0x2a   : > { %v569_v62 = vpack.c.bf16 %v549_v57, %v548_v54  ;;  %443 = vst [vmem:[#allocation2 + $0x118] sm:$0xff] %v3734_v59  ;;  %v532_v47 = vld [vmem:[#allocation2 + $0x7e] sm:$0xff]  ;;  %v3600_v59 = vld [vmem:[%s4784_s4 + $0x8] sm:$0xff] }
  0x2b   : > { %670 = vmatmul.bf16.vlgmr.msra.gmra.mxu1 %v559_v51  ;;  %695 = vmatmul.bf16.vlgmr.msra.gmra.mxu2 %v564_v52  ;;  %426 = vst [vmem:[#allocation2 + $0x90] sm:$0xff] %v3701_v7  ;;  %v533_v48 = vld [vmem:[#allocation2 + $0x86] sm:$0xff]  ;;  %v3625_v51 = vld [vmem:[%s4784_s4 + $0xd0] sm:$0xff] }
  0x2c   : > { %1002 = vmatpush.bf16.msrb.mxu2 %v3622_v46  ;;  %784 = vmatpush.bf16.msrb.mxu1 %v3606_v49  ;;  %427 = vst [vmem:[#allocation2 + $0x98] sm:$0xff] %v3702_v8  ;;  %v3685_v46 = vunpack.c.l.bf16 %v3993_v4  ;;  %v542_v49 = vld [vmem:[#allocation2 + $0xce] sm:$0xff]  ;;  %v561_v54 = vpack.c.bf16 %v533_v48, %v532_v47  ;;  %v450_v48 = vld [vmem:[#allocation2 + $0x1d] sm:$0xff] }
  0x2d   : > { %1510 = vmatpush.bf16.msrb.mxu0 %v3638_v50  ;;  %720 = vmatmul.bf16.vlgmr.msra.gmra.mxu3 %v569_v62  ;;  %436 = vst [vmem:[#allocation2 + $0xe0] sm:$0xff] %v3721_v12  ;;  %v543_v50 = vld [vmem:[#allocation2 + $0xd6] sm:$0xff]  ;;  %v3632_v62 = vld [vmem:[%s4784_s4 + $0x108] sm:$0xff] }
  0x2e   : > { %645 = vmatmul.bf16.vlgmr.msra.gmra.mxu0 %v554_v53  ;;  %1256 = vmatpush.bf16.msrb.mxu3 %v3630_v63  ;;  %437 = vst [vmem:[#allocation2 + $0xe8] sm:$0xff] %v3722_v13  ;;  %v522_v52 = vld [vmem:[#allocation2 + $0x2e] sm:$0xff]  ;;  %v566_v55 = vpack.c.bf16 %v543_v50, %v542_v49  ;;  %v3599_v63 = vld [vmem:[%s4784_s4] sm:$0xff] }
  0x2f   : > { %416 = vst [vmem:[#allocation2 + $0x40] sm:$0xff] %v3681_v16  ;;  %v523_v53 = vld [vmem:[#allocation2 + $0x36] sm:$0xff]  ;;  %v1137_v13 = vld [vmem:[#allocation2 + $0x1f] sm:$0xff] }
  0x30   : > { %1003 = vmatpush.bf16.msrb.mxu2 %v3621_v56  ;;  %785 = vmatpush.bf16.msrb.mxu1 %v3605_v60  ;;  %417 = vst [vmem:[#allocation2 + $0x48] sm:$0xff] %v3682_v19  ;;  %v550_v31 = vld [vmem:[#allocation2 + $0x10e] sm:$0xff]  ;;  %v556_v56 = vpack.c.bf16 %v523_v53, %v522_v52  ;;  %v3654_v16 = vld [vmem:[%s4784_s4 + $0x1b8] sm:$0xff]  ;;  %v451_v49 = vld [vmem:[#allocation2 + $0x25] sm:$0xff] }
  0x31   : > { %1511 = vmatpush.bf16.msrb.mxu0 %v3637_v61  ;;  %v551_v32 = vld [vmem:[#allocation2 + $0x116] sm:$0xff]  ;;  %444 = vst [vmem:[#allocation2 + $0x120] sm:$0xff] %v3737_v34  ;;  %v3624_v60 = vld [vmem:[%s4784_s4 + $0xc8] sm:$0xff]  ;;  %v3615_v61 = vld [vmem:[%s4784_s4 + $0x80] sm:$0xff]  ;;  %v485_v50 = vpack.c.bf16 %v451_v49, %v450_v48 }
  0x32   : > { %1257 = vmatpush.bf16.msrb.mxu3 %v3629_v5  ;;  %v570_v36 = vpack.c.bf16 %v551_v32, %v550_v31  ;;  %445 = vst [vmem:[#allocation2 + $0x128] sm:$0xff] %v3738_v35  ;;  %v3670_v19 = vld [vmem:[%s4784_s4 + $0x238] sm:$0xff]  ;;  %v883_v35 = vld [vmem:[#allocation2 + $0xf] sm:$0xff]  ;;  %v3643_v48 = vld [vmem:[%s4784_s4 + $0x160] sm:$0xff] }
  0x33   : > { %428 = vst [vmem:[#allocation2 + $0xa0] sm:$0xff] %v3705_v39  ;;  %v535_v3 = vld [vmem:[#allocation2 + $0x96] sm:$0xff] }
  0x34   : > { %1004 = vmatpush.bf16.msrb.mxu2 %v3620_v0  ;;  %786 = vmatpush.bf16.msrb.mxu1 %v3604_v1  ;;  %438 = vst [vmem:[#allocation2 + $0xf0] sm:$0xff] %v4788_v44  ;;  %v3623_v0 = vld [vmem:[%s4784_s4 + $0xc0] sm:$0xff]  ;;  %v1140_v31 = vld [vmem:[#allocation2 + $0x37] sm:$0xff] }
  0x35   : > { %1512 = vmatpush.bf16.msrb.mxu0 %v3636_v2  ;;  %418 = vst [vmem:[#allocation2 + $0x50] sm:$0xff] %v3685_v46  ;;  %v3631_v1 = vld [vmem:[%s4784_s4 + $0x100] sm:$0xff]  ;;  %v534_v2 = vld [vmem:[#allocation2 + $0x8e] sm:$0xff] }
  0x36   : > { %1258 = vmatpush.bf16.msrb.mxu3 %v3628_v22  ;;  %v544_v5 = vld [vmem:[#allocation2 + $0xde] sm:$0xff]  ;;  %v545_v7 = vld [vmem:[#allocation2 + $0xe6] sm:$0xff]  ;;  %v562_v10 = vpack.c.bf16 %v535_v3, %v534_v2  ;;  %v449_v34 = vld [vmem:[#allocation2 + $0x15] sm:$0xff] }
  0x37   : > { %v524_v8 = vld [vmem:[#allocation2 + $0x3e] sm:$0xff]  ;;  %v525_v9 = vld [vmem:[#allocation2 + $0x46] sm:$0xff]  ;;  %v3661_v46 = vld [vmem:[%s4784_s4 + $0x1f0] sm:$0xff] }
  0x38   : > { %1005 = vmatpush.bf16.msrb.mxu2 %v3619_v11  ;;  %787 = vmatpush.bf16.msrb.mxu1 %v3603_v14  ;;  %v552_v57 = vld [vmem:[#allocation2 + $0x11e] sm:$0xff]  ;;  %v567_v11 = vpack.c.bf16 %v545_v7, %v544_v5  ;;  %v557_v12 = vpack.c.bf16 %v525_v9, %v524_v8  ;;  %v1138_v14 = vld [vmem:[#allocation2 + $0x27] sm:$0xff]  ;;  %v3645_v47 = vld [vmem:[%s4784_s4 + $0x170] sm:$0xff] }
  0x39   : > { %1513 = vmatpush.bf16.msrb.mxu0 %v3635_v15  ;;  %v553_v58 = vld [vmem:[#allocation2 + $0x126] sm:$0xff]  ;;  %v1173_v15 = vpack.c.bf16 %v1138_v14, %v1137_v13  ;;  %v3908_v7 = vld [vmem:[%s3990_s10 + $0x18] sm:$0xff]  ;;  %v1147_v8 = vld [vmem:[#allocation2 + $0x6f] sm:$0xff] }
  0x3a   : > { %1259 = vmatpush.bf16.msrb.mxu3 %v3627_v40  ;;  %v571_v4 = vpack.c.bf16 %v553_v58, %v552_v57  ;;  %v536_v20 = vld [vmem:[#allocation2 + $0x9e] sm:$0xff]  ;;  %v537_v21 = vld [vmem:[#allocation2 + $0xa6] sm:$0xff]  ;;  %v453_v57 = vld [vmem:[#allocation2 + $0x35] sm:$0xff] }
  0x3b   : > { %675 = vmatmul.bf16.gmra.mxu1 %v560_v28  ;;  %700 = vmatmul.bf16.gmra.mxu2 %v565_v29  ;;  %v546_v22 = vld [vmem:[#allocation2 + $0xee] sm:$0xff]  ;;  %v547_v24 = vld [vmem:[#allocation2 + $0xf6] sm:$0xff]  ;;  %v3905_v40 = vld [vmem:[%s3990_s10] sm:$0xff] }
  0x3c   : > { %1006 = vmatpush.bf16.msrb.mxu2 %v3618_v26  ;;  %788 = vmatpush.bf16.msrb.mxu1 %v3602_v27  ;;  %v526_v25 = vld [vmem:[#allocation2 + $0x4e] sm:$0xff]  ;;  %v527_v26 = vld [vmem:[#allocation2 + $0x56] sm:$0xff]  ;;  %v563_v27 = vpack.c.bf16 %v537_v21, %v536_v20  ;;  %v568_v28 = vpack.c.bf16 %v547_v24, %v546_v22  ;;  %v3909_v22 = vld [vmem:[%s3990_s10 + $0x20] sm:$0xff] }
  0x3d   : > { %1514 = vmatpush.bf16.msrb.mxu0 %v3634_v38  ;;  %725 = vmatmul.bf16.gmra.mxu3 %v570_v36  ;;  %v558_v29 = vpack.c.bf16 %v527_v26, %v526_v25  ;;  %v884_v36 = vld [vmem:[#allocation2 + $0x17] sm:$0xff]  ;;  %v1143_v52 = vld [vmem:[#allocation2 + $0x4f] sm:$0xff]  ;;  %v1149_v24 = vld [vmem:[#allocation2 + $0x7f] sm:$0xff] }
  0x3e   : > { %650 = vmatmul.bf16.gmra.mxu0 %v555_v30  ;;  %1260 = vmatpush.bf16.msrb.mxu3 %v3626_v45  ;;  %v1139_v30 = vld [vmem:[#allocation2 + $0x2f] sm:$0xff]  ;;  %v919_v38 = vpack.c.bf16 %v884_v36, %v883_v35  ;;  %v1144_v53 = vld [vmem:[#allocation2 + $0x57] sm:$0xff]  ;;  %v1150_v25 = vld [vmem:[#allocation2 + $0x87] sm:$0xff] }
  0x3f   : > { %v1174_v32 = vpack.c.bf16 %v1140_v31, %v1139_v30  ;;  %v3653_v45 = vld [vmem:[%s4784_s4 + $0x1b0] sm:$0xff]  ;;  %v3644_v2 = vld [vmem:[%s4784_s4 + $0x168] sm:$0xff]  ;;  %v3651_v36 = vld [vmem:[%s4784_s4 + $0x1a0] sm:$0xff] }
  0x40   : > { %1007 = vmatpush.bf16.msrb.mxu2 %v3617_v37  ;;  %789 = vmatpush.bf16.msrb.mxu1 %v3601_v41  ;;  %v484_v37 = vpack.c.bf16 %v449_v34, %v448_v33  ;;  %v1141_v41 = vld [vmem:[#allocation2 + $0x3f] sm:$0xff]  ;;  %v1148_v9 = vld [vmem:[#allocation2 + $0x77] sm:$0xff] }
  0x41   : > { %1515 = vmatpush.bf16.msrb.mxu0 %v3633_v43  ;;  %v458_v33 = vld [vmem:[#allocation2 + $0x5d] sm:$0xff]  ;;  %v459_v34 = vld [vmem:[#allocation2 + $0x65] sm:$0xff] }
  0x42   : > { %1261 = vmatpush.bf16.msrb.mxu3 %v3625_v51  ;;  %v3906_v51 = vld [vmem:[%s3990_s10 + $0x8] sm:$0xff] }
  0x44   : > { %1008 = vmatpush.bf16.msrb.mxu2 %v3616_v42  ;;  %790 = vmatpush.bf16.msrb.mxu1 %v3600_v59  ;;  %v1142_v42 = vld [vmem:[#allocation2 + $0x47] sm:$0xff]  ;;  %v1145_v59 = vld [vmem:[#allocation2 + $0x5f] sm:$0xff] }
  0x45   : > { %1516 = vmatpush.bf16.msrb.mxu0 %v3632_v62  ;;  %v1175_v43 = vpack.c.bf16 %v1142_v42, %v1141_v41  ;;  %v3652_v62 = vld [vmem:[%s4784_s4 + $0x1a8] sm:$0xff]  ;;  %v1152_v42 = vld [vmem:[#allocation2 + $0x97] sm:$0xff] }
  0x46   : > { %1262 = vmatpush.bf16.msrb.mxu3 %v3624_v60  ;;  %v1146_v60 = vld [vmem:[#allocation2 + $0x67] sm:$0xff]  ;;  %v1151_v41 = vld [vmem:[#allocation2 + $0x8f] sm:$0xff] }
  0x48   : > { %1009 = vmatpush.bf16.msrb.mxu2 %v3615_v61  ;;  %791 = vmatpush.bf16.msrb.mxu1 %v3599_v63  ;;  %v1177_v61 = vpack.c.bf16 %v1146_v60, %v1145_v59  ;;  %v3660_v63 = vld [vmem:[%s4784_s4 + $0x1e8] sm:$0xff]  ;;  %v1153_v59 = vld [vmem:[#allocation2 + $0x9f] sm:$0xff] }
  0x49   : > { %1517 = vmatpush.bf16.msrb.mxu0 %v3631_v1  ;;  %v455_v1 = vld [vmem:[#allocation2 + $0x45] sm:$0xff] }
  0x4a   : > { %1263 = vmatpush.bf16.msrb.mxu3 %v3623_v0  ;;  %v454_v0 = vld [vmem:[#allocation2 + $0x3d] sm:$0xff]  ;;  %v1154_v60 = vld [vmem:[#allocation2 + $0xa7] sm:$0xff] }
  0x4b   : > { %680 = vmatmul.bf16.gmra.mxu1 %v561_v54  ;;  %705 = vmatmul.bf16.gmra.mxu2 %v566_v55  ;;  %v3669_v54 = vld [vmem:[%s4784_s4 + $0x230] sm:$0xff]  ;;  %v1176_v55 = vpack.c.bf16 %v1144_v53, %v1143_v52  ;;  %v487_v3 = vpack.c.bf16 %v455_v1, %v454_v0 }
  0x4c   : > { %2018 = vmatpush.bf16.msra.mxu2 %v3654_v16  ;;  %1764 = vmatpush.bf16.msra.mxu1 %v3646_v18  ;;  %v457_v18 = vld [vmem:[#allocation2 + $0x55] sm:$0xff] }
  0x4d   : > { %730 = vmatmul.bf16.gmra.mxu3 %v571_v4  ;;  %2526 = vmatpush.bf16.msra.mxu0 %v3670_v19  ;;  %v3907_v4 = vld [vmem:[%s3990_s10 + $0x10] sm:$0xff] }
  0x4e   : > { %655 = vmatmul.bf16.gmra.mxu0 %v556_v56  ;;  %2272 = vmatpush.bf16.msra.mxu3 %v3662_v17  ;;  %v452_v56 = vld [vmem:[#allocation2 + $0x2d] sm:$0xff] }
  0x4f   : > { %v486_v58 = vpack.c.bf16 %v453_v57, %v452_v56  ;;  %v456_v17 = vld [vmem:[#allocation2 + $0x4d] sm:$0xff] }
  0x50   : > { %2019 = vmatpush.bf16.msra.mxu2 %v3653_v45  ;;  %1765 = vmatpush.bf16.msra.mxu1 %v3645_v47  ;;  %v488_v20 = vpack.c.bf16 %v457_v18, %v456_v17  ;;  %v4226_v47 = vpack.c.bf16 %v1152_v42, %v1151_v41  ;;  %v1155_v18 = vld [vmem:[#allocation2 + $0xaf] sm:$0xff]  ;;  %v3666_v42 = vld [vmem:[%s4784_s4 + $0x218] sm:$0xff] }
  0x51   : > { %2527 = vmatpush.bf16.msra.mxu0 %v3669_v54  ;;  %v460_v54 = vld [vmem:[#allocation2 + $0x6d] sm:$0xff] }
  0x52   : > { %2273 = vmatpush.bf16.msra.mxu3 %v3661_v46 }
  0x54   : > { %2020 = vmatpush.bf16.msra.mxu2 %v3652_v62  ;;  %1766 = vmatpush.bf16.msra.mxu1 %v3644_v2 }
  0x56   : > { %2274 = vmatpush.bf16.msra.mxu3 %v3660_v63  ;;  %v4253_v63 = vpack.c.bf16 %v1154_v60, %v1153_v59  ;;  %v1157_v59 = vld [vmem:[#allocation2 + $0xbf] sm:$0xff]  ;;  %v1158_v60 = vld [vmem:[#allocation2 + $0xc7] sm:$0xff] }
  0x58   : > { %2021 = vmatpush.bf16.msra.mxu2 %v3651_v36  ;;  %1767 = vmatpush.bf16.msra.mxu1 %v3643_v48  ;;  %v465_v48 = vld [vmem:[#allocation2 + $0x95] sm:$0xff] }
  0x5b   : > { %685 = vmatmul.bf16.gmra.mxu1 %v562_v10  ;;  %710 = vmatmul.bf16.gmra.mxu2 %v567_v11  ;;  %v4177_v11 = vpack.c.bf16 %v1148_v9, %v1147_v8  ;;  %v463_v8 = vld [vmem:[#allocation2 + $0x85] sm:$0xff] }
  0x5d   : > { %1264 = vmatmul.bf16.vlgmr.msrb.gmra.mxu3 %v1173_v15 }
  0x5e   : > { %660 = vmatmul.bf16.gmra.mxu0 %v557_v12  ;;  %v3668_v12 = vld [vmem:[%s4784_s4 + $0x228] sm:$0xff] }
  0x5f   : > { %2528 = vmatpush.bf16.msra.mxu0 %v3668_v12 }
  0x6b   : > { %690 = vmatmul.bf16.gmra.mxu1 %v563_v27  ;;  %715 = vmatmul.bf16.gmra.mxu2 %v568_v28  ;;  %v4200_v28 = vpack.c.bf16 %v1150_v25, %v1149_v24 }
  0x6d   : > { %1269 = vmatmul.bf16.gmra.mxu3 %v1174_v32 }
  0x6e   : > { %665 = vmatmul.bf16.gmra.mxu0 %v558_v29 }
  0x7b   : > { %792 = vmatmul.bf16.vlgmr.msrb.gmra.mxu1 %v484_v37  ;;  %1010 = vmatmul.bf16.vlgmr.msrb.gmra.mxu2 %v919_v38  ;;  %v489_v37 = vpack.c.bf16 %v459_v34, %v458_v33  ;;  %v3910_v38 = vld [vmem:[%s3990_s10 + $0x28] sm:$0xff]  ;;  %v3650_v33 = vld [vmem:[%s4784_s4 + $0x198] sm:$0xff] }
  0x7c   : > { %v3658_v34 = vld [vmem:[%s4784_s4 + $0x1d8] sm:$0xff]  ;;  %2022 = vmatpush.bf16.msra.mxu2 %v3650_v33 }
  0x7d   : > { %1274 = vmatmul.bf16.gmra.mxu3 %v1175_v43 }
  0x7e   : > { %1518 = vmatmul.bf16.vlgmr.msrb.gmra.mxu0 %v3905_v40 }
  0x8b   : > { %797 = vmatmul.bf16.gmra.mxu1 %v485_v50  ;;  %1015 = vmatmul.bf16.gmra.mxu2 %v1173_v15 }
  0x8d   : > { %1279 = vmatmul.bf16.gmra.mxu3 %v1176_v55 }
  0x8e   : > { %1523 = vmatmul.bf16.gmra.mxu0 %v3906_v51  ;;  %v3667_v51 = vld [vmem:[%s4784_s4 + $0x220] sm:$0xff] }
  0x8f   : > { %2529 = vmatpush.bf16.msra.mxu0 %v3667_v51  ;;  %v1408_v51 = vld [vmem:[#allocation2 + $0xa8] sm:$0xff] }
  0x93   : > { %2530 = vmatpush.bf16.msra.mxu0 %v3666_v42  ;;  %v466_v42 = vld [vmem:[#allocation2 + $0x9d] sm:$0xff] }
  0x9b   : > { %802 = vmatmul.bf16.gmra.mxu1 %v486_v58  ;;  %1020 = vmatmul.bf16.gmra.mxu2 %v1174_v32 }
  0x9d   : > { %1284 = vmatmul.bf16.gmra.mxu3 %v1177_v61 }
  0x9e   : > { %1528 = vmatmul.bf16.gmra.mxu0 %v3907_v4  ;;  %v3911_v4 = vld [vmem:[%s3990_s10 + $0x30] sm:$0xff] }
  0xa8   : > { %v4172_v5 = vpop.f32.mrf.mxu1 }
  0xab   : > { %v4175_v10 = vpop.f32.mrf.mxu0  ;;  %807 = vmatmul.bf16.gmra.mxu1 %v487_v3  ;;  %1025 = vmatmul.bf16.gmra.mxu2 %v1175_v43  ;;  %v3659_v43 = vld [vmem:[%s4784_s4 + $0x1e0] sm:$0xff] }
  0xac   : > { %2275 = vmatpush.bf16.msra.mxu3 %v3659_v43  ;;  %v464_v43 = vld [vmem:[#allocation2 + $0x8d] sm:$0xff] }
  0xad   : > { %1289 = vmatmul.bf16.gmra.mxu3 %v4177_v11 }
  0xae   : > { %1533 = vmatmul.bf16.gmra.mxu0 %v3908_v7  ;;  %v4182_v13 = vpop.f32.mrf.mxu2  ;;  %v462_v7 = vld [vmem:[#allocation2 + $0x7d] sm:$0xff] }
  0xaf   : > { %v491_v12 = vpack.c.bf16 %v463_v8, %v462_v7 }
  0xb0   : > { %v4185_v14 = vpop.f32.mrf.mxu1  ;;  %v4189_v16 = vpop.f32.mrf.mxu3  ;;  %2276 = vmatpush.bf16.msra.mxu3 %v3658_v34 }
  0xb3   : > { %v4187_v15 = vpop.f32.mrf.mxu0 }
  0xb6   : > { %v4191_v19 = vpop.f32.mrf.mxu2 }
  0xb8   : > { %v4193_v21 = vpop.f32.mrf.mxu1  ;;  %v4198_v27 = vpop.f32.mrf.mxu3 }
  0xbb   : > { %v4196_v26 = vpop.f32.mrf.mxu0  ;;  %812 = vmatmul.bf16.gmra.mxu1 %v488_v20  ;;  %1030 = vmatmul.bf16.gmra.mxu2 %v1176_v55  ;;  %v461_v55 = vld [vmem:[#allocation2 + $0x75] sm:$0xff] }
  0xbc   : > { %v490_v57 = vpack.c.bf16 %v461_v55, %v460_v54  ;;  %v1156_v20 = vld [vmem:[#allocation2 + $0xb7] sm:$0xff]  ;;  %v492_v55 = vpack.c.bf16 %v465_v48, %v464_v43  ;;  %v467_v43 = vld [vmem:[#allocation2 + $0xa5] sm:$0xff] }
  0xbd   : > { %1294 = vmatmul.bf16.gmra.mxu3 %v4200_v28  ;;  %v4270_v25 = vpack.c.bf16 %v1156_v20, %v1155_v18  ;;  %v1409_v48 = vld [vmem:[#allocation2 + $0xb0] sm:$0xff] }
  0xbe   : > { %1538 = vmatmul.bf16.gmra.mxu0 %v3909_v22  ;;  %v4202_v29 = vpop.f32.mrf.mxu2 }
  0xc0   : > { %v4205_v30 = vpop.f32.mrf.mxu1  ;;  %v4209_v32 = vpop.f32.mrf.mxu3 }
  0xc3   : > { %v4207_v31 = vpop.f32.mrf.mxu0 }
  0xc6   : > { %v4211_v35 = vpop.f32.mrf.mxu2 }
  0xc8   : > { %v4217_v40 = vpop.f32.mrf.mxu1  ;;  %v4224_v46 = vpop.f32.mrf.mxu3 }
  0xcb   : > { %v4222_v45 = vpop.f32.mrf.mxu0  ;;  %817 = vmatmul.bf16.gmra.mxu1 %v489_v37  ;;  %1035 = vmatmul.bf16.gmra.mxu2 %v1177_v61 }
  0xcd   : > { %1299 = vmatmul.bf16.gmra.mxu3 %v4226_v47 }
  0xce   : > { %1543 = vmatmul.bf16.gmra.mxu0 %v3910_v38  ;;  %v4231_v49 = vpop.f32.mrf.mxu2  ;;  %v3642_v38 = vld [vmem:[%s4784_s4 + $0x158] sm:$0xff] }
  0xcf   : > { %1768 = vmatpush.bf16.msra.mxu1 %v3642_v38 }
  0xd0   : > { %v4234_v50 = vpop.f32.mrf.mxu1  ;;  %v4241_v53 = vpop.f32.mrf.mxu3 }
  0xd3   : > { %v4239_v52 = vpop.f32.mrf.mxu0 }
  0xd6   : > { %v4243_v56 = vpop.f32.mrf.mxu2 }
  0xd8   : > { %v4245_v58 = vpop.f32.mrf.mxu1  ;;  %v4250_v62 = vpop.f32.mrf.mxu3 }
  0xdb   : > { %v4248_v61 = vpop.f32.mrf.mxu0  ;;  %822 = vmatmul.bf16.gmra.mxu1 %v490_v57  ;;  %1040 = vmatmul.bf16.gmra.mxu2 %v4177_v11  ;;  %v3912_v11 = vld [vmem:[%s3990_s10 + $0x38] sm:$0xff] }
  0xdd   : > { %1304 = vmatmul.bf16.gmra.mxu3 %v4253_v63 }
  0xde   : > { %1548 = vmatmul.bf16.gmra.mxu0 %v3911_v4  ;;  %v4255_v0 = vpop.f32.mrf.mxu2  ;;  %v1435_v4 = vpack.c.bf16 %v1408_v51, %v3705_v39  ;;  %v1410_v51 = vld [vmem:[#allocation2 + $0xb8] sm:$0xff] }
  0xe0   : > { %v4258_v1 = vpop.f32.mrf.mxu1  ;;  %v1265_v3 = vpop.f32.mrf.mxu3 }
  0xe3   : > { %v4260_v2 = vpop.f32.mrf.mxu0 }
  0xe6   : > { %v4262_v9 = vpop.f32.mrf.mxu2 }
  0xe8   : > { %v4264_v17 = vpop.f32.mrf.mxu1  ;;  %v1267_v24 = vpop.f32.mrf.mxu3 }
  0xeb   : > { %v4267_v22 = vpop.f32.mrf.mxu0  ;;  %827 = vmatmul.bf16.gmra.mxu1 %v491_v12  ;;  %1045 = vmatmul.bf16.gmra.mxu2 %v4200_v28  ;;  %v4296_v12 = vpack.c.bf16 %v1158_v60, %v1157_v59  ;;  %v1436_v59 = vpack.c.bf16 %v1410_v51, %v1409_v48  ;;  %v1159_v60 = vld [vmem:[#allocation2 + $0xcf] sm:$0xff] }
  0xec   : > { %v3649_v48 = vld [vmem:[%s4784_s4 + $0x190] sm:$0xff] }
  0xed   : > { %1309 = vmatmul.bf16.gmra.mxu3 %v4270_v25  ;;  %2023 = vmatpush.bf16.msra.mxu2 %v3649_v48 }
  0xee   : > { %1553 = vmatmul.bf16.gmra.mxu0 %v3912_v11  ;;  %v4278_v36 = vpop.f32.mrf.mxu2 }
  0xf0   : > { %v4281_v37 = vpop.f32.mrf.mxu1  ;;  %v1270_v41 = vpop.f32.mrf.mxu3 }
  0xf3   : > { %v4283_v28 = vpop.f32.mrf.mxu0 }
  0xf6   : > { %v4291_v54 = vpop.f32.mrf.mxu2 }
  0xf8   : > { %v793_v57 = vpop.f32.mrf.mxu1  ;;  %v1272_v8 = vpop.f32.mrf.mxu3 }
  0xf9   : > { %v794_v11 = vadd.f32 %v793_v57, %v4175_v10  ;;  %v493_v10 = vpack.c.bf16 %v467_v43, %v466_v42 }
  0xfb   : > { %v1519_v7 = vpop.f32.mrf.mxu0  ;;  %832 = vmatmul.bf16.gmra.mxu1 %v492_v55  ;;  %1050 = vmatmul.bf16.gmra.mxu2 %v4226_v47 }
  0xfd   : > { %1314 = vmatmul.bf16.gmra.mxu3 %v4296_v12 }
  0xfe   : > { %1558 = vmatmul.bf16.gmra.mxu0 %v1435_v4  ;;  %v1011_v18 = vpop.f32.mrf.mxu2 }
  0xff   : > { %v1101_v20 = vadd.f32 %v1011_v18, %v794_v11  ;;  %v1160_v11 = vld [vmem:[#allocation2 + $0xd7] sm:$0xff] }
 0x100   : > { %v795_v33 = vpop.f32.mrf.mxu1  ;;  %v4300_v39 = vpop.f32.mrf.mxu3 }
 0x101   : > { %v1355_v34 = vadd.f32 %v1265_v3, %v1101_v20  ;;  %v796_v47 = vadd.f32 %v795_v33, %v4187_v15 }
 0x103   : > { %v1521_v6 = vpop.f32.mrf.mxu0  ;;  %v4302_v38 = vadd.f32 %v1519_v7, %v1355_v34  ;;  %v4308_v7 = vpack.c.bf16 %v1160_v11, %v1159_v60 }
 0x106   : > { %v1013_v55 = vpop.f32.mrf.mxu2 }
 0x107   : > { %v1102_v4 = vadd.f32 %v1013_v55, %v796_v47  ;;  %v468_v55 = vld [vmem:[#allocation2 + $0xad] sm:$0xff] }
 0x108   : > { %v798_v57 = vpop.f32.mrf.mxu1  ;;  %v4305_v20 = vpop.f32.mrf.mxu3 }
 0x109   : > { %v1356_v18 = vadd.f32 %v1267_v24, %v1102_v4  ;;  %v799_v15 = vadd.f32 %v798_v57, %v4196_v26  ;;  %v1412_v57 = vld [vmem:[#allocation2 + $0xc8] sm:$0xff] }
 0x10b   : > { %v1524_v3 = vpop.f32.mrf.mxu0  ;;  %837 = vmatmul.bf16.gmra.mxu1 %v493_v10  ;;  %1055 = vmatmul.bf16.gmra.mxu2 %v4253_v63  ;;  %v4310_v34 = vadd.f32 %v1521_v6, %v1356_v18  ;;  %v3657_v63 = vld [vmem:[%s4784_s4 + $0x1d0] sm:$0xff]  ;;  %v1411_v10 = vld [vmem:[#allocation2 + $0xc0] sm:$0xff] }
 0x10c   : > { %v3641_v6 = vld [vmem:[%s4784_s4 + $0x150] sm:$0xff]  ;;  %2277 = vmatpush.bf16.msra.mxu3 %v3657_v63 }
 0x10d   : > { %4789 = vst [vmem:[#allocation3_spill] sm:$0xff] %v4310_v34  ;;  %1319 = vmatmul.bf16.gmra.mxu3 %v4308_v7  ;;  %1769 = vmatpush.bf16.msra.mxu1 %v3641_v6 }
 0x10e   : > { %1563 = vmatmul.bf16.gmra.mxu0 %v1436_v59  ;;  %v1016_v33 = vpop.f32.mrf.mxu2 }
 0x10f   : > { %v1103_v42 = vadd.f32 %v1016_v33, %v799_v15  ;;  %v1437_v15 = vpack.c.bf16 %v1412_v57, %v1411_v10  ;;  %v1161_v33 = vld [vmem:[#allocation2 + $0xdf] sm:$0xff] }
 0x110   : > { %v800_v43 = vpop.f32.mrf.mxu1  ;;  %v1280_v26 = vpop.f32.mrf.mxu3  ;;  %v471_v57 = vld [vmem:[#allocation2 + $0xc5] sm:$0xff] }
 0x111   : > { %v1357_v47 = vadd.f32 %v1270_v41, %v1103_v42  ;;  %v469_v41 = vld [vmem:[#allocation2 + $0xb5] sm:$0xff]  ;;  %v801_v4 = vadd.f32 %v800_v43, %v4207_v31  ;;  %v1162_v42 = vld [vmem:[#allocation2 + $0xe7] sm:$0xff] }
 0x112   : > { %v494_v11 = vpack.c.bf16 %v469_v41, %v468_v55  ;;  %v4330_v31 = vpack.c.bf16 %v1162_v42, %v1161_v33  ;;  %v1163_v33 = vld [vmem:[#allocation2 + $0xef] sm:$0xff]  ;;  %v1164_v42 = vld [vmem:[#allocation2 + $0xf7] sm:$0xff] }
 0x113   : > { %v1526_v24 = vpop.f32.mrf.mxu0  ;;  %v4323_v51 = vadd.f32 %v1524_v3, %v1357_v47  ;;  %v3665_v3 = vld [vmem:[%s4784_s4 + $0x210] sm:$0xff] }
 0x114   : > { %2531 = vmatpush.bf16.msra.mxu0 %v3665_v3 }
 0x116   : > { %v1018_v59 = vpop.f32.mrf.mxu2 }
 0x117   : > { %v1104_v60 = vadd.f32 %v1018_v59, %v801_v4  ;;  %v1414_v59 = vld [vmem:[#allocation2 + $0xd8] sm:$0xff] }
 0x118   : > { %v803_v18 = vpop.f32.mrf.mxu1  ;;  %v1282_v47 = vpop.f32.mrf.mxu3 }
 0x119   : > { %v1358_v44 = vadd.f32 %v1272_v8, %v1104_v60  ;;  %v804_v48 = vadd.f32 %v803_v18, %v4222_v45 }
 0x11b   : > { %v1529_v34 = vpop.f32.mrf.mxu0  ;;  %842 = vmatmul.bf16.gmra.mxu1 %v494_v11  ;;  %1060 = vmatmul.bf16.gmra.mxu2 %v4270_v25  ;;  %v4332_v43 = vadd.f32 %v1526_v24, %v1358_v44  ;;  %v470_v25 = vld [vmem:[#allocation2 + $0xbd] sm:$0xff]  ;;  %v1413_v24 = vld [vmem:[#allocation2 + $0xd0] sm:$0xff] }
 0x11c   : > { %v495_v11 = vpack.c.bf16 %v471_v57, %v470_v25  ;;  %v3648_v57 = vld [vmem:[%s4784_s4 + $0x188] sm:$0xff] }
 0x11d   : > { %1324 = vmatmul.bf16.gmra.mxu3 %v4330_v31  ;;  %2024 = vmatpush.bf16.msra.mxu2 %v3648_v57 }
 0x11e   : > { %1568 = vmatmul.bf16.gmra.mxu0 %v1437_v15  ;;  %v1021_v63 = vpop.f32.mrf.mxu2  ;;  %v1438_v15 = vpack.c.bf16 %v1414_v59, %v1413_v24  ;;  %v473_v24 = vld [vmem:[#allocation2 + $0xd5] sm:$0xff] }
 0x11f   : > { %v1105_v6 = vadd.f32 %v1021_v63, %v804_v48 }
 0x120   : > { %v805_v8 = vpop.f32.mrf.mxu1  ;;  %v1285_v4 = vpop.f32.mrf.mxu3 }
 0x121   : > { %v1359_v55 = vadd.f32 %v4300_v39, %v1105_v6  ;;  %v806_v44 = vadd.f32 %v805_v8, %v4239_v52 }
 0x123   : > { %v1531_v41 = vpop.f32.mrf.mxu0  ;;  %v4337_v10 = vadd.f32 %v1529_v34, %v1359_v55  ;;  %v4342_v34 = vpack.c.bf16 %v1164_v42, %v1163_v33  ;;  %v1166_v33 = vld [vmem:[#allocation2 + $0x107] sm:$0xff] }
 0x126   : > { %v1023_v60 = vpop.f32.mrf.mxu2 }
 0x127   : > { %v1106_v45 = vadd.f32 %v1023_v60, %v806_v44 }
 0x128   : > { %v808_v18 = vpop.f32.mrf.mxu1  ;;  %v1287_v48 = vpop.f32.mrf.mxu3 }
 0x129   : > { %v1360_v3 = vadd.f32 %v4305_v20, %v1106_v45  ;;  %v809_v52 = vadd.f32 %v808_v18, %v4248_v61  ;;  %v472_v61 = vld [vmem:[#allocation2 + $0xcd] sm:$0xff]  ;;  %v3913_v18 = vld [vmem:[%s3990_s10 + $0x60] sm:$0xff] }
 0x12a   : > { %v496_v45 = vpack.c.bf16 %v473_v24, %v472_v61  ;;  %v474_v24 = vld [vmem:[#allocation2 + $0xdd] sm:$0xff] }
 0x12b   : > { %v1534_v39 = vpop.f32.mrf.mxu0  ;;  %847 = vmatmul.bf16.gmra.mxu1 %v495_v11  ;;  %1065 = vmatmul.bf16.gmra.mxu2 %v4296_v12  ;;  %v4344_v63 = vadd.f32 %v1531_v41, %v1360_v3  ;;  %v3656_v41 = vld [vmem:[%s4784_s4 + $0x1c8] sm:$0xff] }
 0x12c   : > { %2278 = vmatpush.bf16.msra.mxu3 %v3656_v41 }
 0x12d   : > { %1329 = vmatmul.bf16.gmra.mxu3 %v4342_v34 }
 0x12e   : > { %1573 = vmatmul.bf16.gmra.mxu0 %v1438_v15  ;;  %v1026_v6 = vpop.f32.mrf.mxu2  ;;  %v1165_v15 = vld [vmem:[#allocation2 + $0xff] sm:$0xff] }
 0x12f   : > { %v1107_v8 = vadd.f32 %v1026_v6, %v809_v52  ;;  %v3640_v52 = vld [vmem:[%s4784_s4 + $0x148] sm:$0xff]  ;;  %v4362_v6 = vpack.c.bf16 %v1166_v33, %v1165_v15  ;;  %v4790_v15 = vunpack.c.l.bf16 %v4012_v23 }
 0x130   : > { %v810_v55 = vpop.f32.mrf.mxu1  ;;  %v1290_v12 = vpop.f32.mrf.mxu3  ;;  %1770 = vmatpush.bf16.msra.mxu1 %v3640_v52  ;;  %v1168_v52 = vld [vmem:[#allocation2 + $0x117] sm:$0xff] }
 0x131   : > { %v1361_v25 = vadd.f32 %v1280_v26, %v1107_v8  ;;  %v811_v59 = vadd.f32 %v810_v55, %v4260_v2  ;;  %v3664_v8 = vld [vmem:[%s4784_s4 + $0x208] sm:$0xff] }
 0x132   : > { %2532 = vmatpush.bf16.msra.mxu0 %v3664_v8 }
 0x133   : > { %v1536_v20 = vpop.f32.mrf.mxu0  ;;  %v4354_v44 = vadd.f32 %v1534_v39, %v1361_v25 }
 0x136   : > { %v1028_v60 = vpop.f32.mrf.mxu2 }
 0x137   : > { %v1108_v26 = vadd.f32 %v1028_v60, %v811_v59  ;;  %v475_v59 = vld [vmem:[#allocation2 + $0xe5] sm:$0xff] }
 0x138   : > { %v813_v11 = vpop.f32.mrf.mxu1  ;;  %v1292_v39 = vpop.f32.mrf.mxu3 }
 0x139   : > { %v1362_v42 = vadd.f32 %v1282_v47, %v1108_v26  ;;  %v814_v47 = vadd.f32 %v813_v11, %v4267_v22  ;;  %v1418_v26 = vld [vmem:[#allocation2 + $0xf8] sm:$0xff]  ;;  %v497_v22 = vpack.c.bf16 %v475_v59, %v474_v24 }
 0x13a   : > { %v1440_v33 = vpack.c.bf16 %v1418_v26, %v4790_v15  ;;  %v1419_v26 = vld [vmem:[#allocation2 + $0x100] sm:$0xff] }
 0x13b   : > { %v1539_v3 = vpop.f32.mrf.mxu0  ;;  %852 = vmatmul.bf16.gmra.mxu1 %v496_v45  ;;  %1070 = vmatmul.bf16.gmra.mxu2 %v4308_v7  ;;  %v4364_v2 = vadd.f32 %v1536_v20, %v1362_v42  ;;  %v1167_v42 = vld [vmem:[#allocation2 + $0x10f] sm:$0xff] }
 0x13d   : > { %1334 = vmatmul.bf16.gmra.mxu3 %v4362_v6 }
 0x13e   : > { %1578 = vmatmul.bf16.gmra.mxu0 %v3913_v18  ;;  %v1031_v55 = vpop.f32.mrf.mxu2 }
 0x13f   : > { %v1109_v25 = vadd.f32 %v1031_v55, %v814_v47 }
 0x140   : > { %v815_v57 = vpop.f32.mrf.mxu1  ;;  %v4371_v61 = vpop.f32.mrf.mxu3 }
 0x141   : > { %v1363_v41 = vadd.f32 %v1285_v4, %v1109_v25  ;;  %v816_v60 = vadd.f32 %v815_v57, %v4283_v28 }
 0x143   : > { %v1541_v7 = vpop.f32.mrf.mxu0  ;;  %v4373_v20 = vadd.f32 %v1539_v3, %v1363_v41  ;;  %v4381_v3 = vpack.c.bf16 %v1168_v52, %v1167_v42  ;;  %v1170_v42 = vld [vmem:[#allocation2 + $0x127] sm:$0xff] }
 0x146   : > { %v1033_v45 = vpop.f32.mrf.mxu2 }
 0x147   : > { %v1110_v18 = vadd.f32 %v1033_v45, %v816_v60  ;;  %v477_v60 = vld [vmem:[#allocation2 + $0xf5] sm:$0xff]  ;;  %v1420_v45 = vld [vmem:[#allocation2 + $0x108] sm:$0xff] }
 0x148   : > { %v818_v11 = vpop.f32.mrf.mxu1  ;;  %v4378_v47 = vpop.f32.mrf.mxu3  ;;  %v1441_v15 = vpack.c.bf16 %v1420_v45, %v1419_v26 }
 0x149   : > { %v1364_v4 = vadd.f32 %v1287_v48, %v1110_v18  ;;  %v819_v55 = vadd.f32 %v818_v11, %v4172_v5 }
 0x14b   : > { %v1544_v8 = vpop.f32.mrf.mxu0  ;;  %857 = vmatmul.bf16.gmra.mxu1 %v497_v22  ;;  %1075 = vmatmul.bf16.gmra.mxu2 %v4330_v31  ;;  %v4383_v28 = vadd.f32 %v1541_v7, %v1364_v4  ;;  %v476_v31 = vld [vmem:[#allocation2 + $0xed] sm:$0xff] }
 0x14c   : > { %v498_v22 = vpack.c.bf16 %v477_v60, %v476_v31 }
 0x14d   : > { %1339 = vmatmul.bf16.gmra.mxu3 %v4381_v3 }
 0x14e   : > { %1583 = vmatmul.bf16.gmra.mxu0 %v1440_v33  ;;  %v1036_v25 = vpop.f32.mrf.mxu2  ;;  %v1169_v33 = vld [vmem:[#allocation2 + $0x11f] sm:$0xff] }
 0x14f   : > { %v1111_v57 = vadd.f32 %v1036_v25, %v819_v55 }
 0x150   : > { %v820_v23 = vpop.f32.mrf.mxu1  ;;  %v4387_v24 = vpop.f32.mrf.mxu3 }
 0x151   : > { %v1365_v41 = vadd.f32 %v1290_v12, %v1111_v57  ;;  %v821_v7 = vadd.f32 %v820_v23, %v4185_v14  ;;  %v3849_v12 = vld [vmem:[%s3990_s10 + $0x88] sm:$0xff]   ;;  %v3655_v14 = vld [vmem:[%s4784_s4 + $0x1c0] sm:$0xff]  ;;  %v4402_v23 = vpack.c.bf16 %v1170_v42, %v1169_v33  ;;  %v1422_v33 = vld [vmem:[#allocation2 + $0x118] sm:$0xff] }
 0x152   : > { %v3741_v55 = vunpack.c.l.bf16 %v3849_v12  ;;  %v3742_v57 = vunpack.c.h.bf16 %v3849_v12  ;;  %2279 = vmatpush.bf16.msra.mxu3 %v3655_v14 }
 0x153   : > { %v1546_v48 = vpop.f32.mrf.mxu0  ;;  %v4389_v59 = vadd.f32 %v1544_v8, %v1365_v41  ;;  %v3647_v8 = vld [vmem:[%s4784_s4 + $0x180] sm:$0xff] }
 0x154   : > { %446 = vst [vmem:[#allocation2 + $0x130] sm:$0xff] %v3741_v55  ;;  %2025 = vmatpush.bf16.msra.mxu2 %v3647_v8 }
 0x155   : > { %447 = vst [vmem:[#allocation2 + $0x138] sm:$0xff] %v3742_v57 }
 0x156   : > { %v1038_v18 = vpop.f32.mrf.mxu2 }
 0x157   : > { %v1112_v5 = vadd.f32 %v1038_v18, %v821_v7 }
 0x158   : > { %v823_v11 = vpop.f32.mrf.mxu1  ;;  %v4399_v25 = vpop.f32.mrf.mxu3 }
 0x159   : > { %v1366_v52 = vadd.f32 %v1292_v39, %v1112_v5  ;;  %v3639_v39 = vld [vmem:[%s4784_s4 + $0x140] sm:$0xff]  ;;  %v824_v31 = vadd.f32 %v823_v11, %v4193_v21 }
 0x15a   : > { %1771 = vmatpush.bf16.msra.mxu1 %v3639_v39  ;;  %v479_v21 = vld [vmem:[#allocation2 + $0x105] sm:$0xff] }
 0x15b   : > { %v1549_v4 = vpop.f32.mrf.mxu0  ;;  %862 = vmatmul.bf16.gmra.mxu1 %v498_v22  ;;  %1080 = vmatmul.bf16.gmra.mxu2 %v4342_v34  ;;  %v4407_v41 = vadd.f32 %v1546_v48, %v1366_v52  ;;  %v3663_v48 = vld [vmem:[%s4784_s4 + $0x200] sm:$0xff]  ;;  %v1171_v14 = vld [vmem:[#allocation2 + $0x12f] sm:$0xff] }
 0x15c   : > { %2533 = vmatpush.bf16.msra.mxu0 %v3663_v48  ;;  %v478_v22 = vld [vmem:[#allocation2 + $0xfd] sm:$0xff] }
 0x15d   : > { %1344 = vmatmul.bf16.gmra.mxu3 %v4402_v23  ;;  %v499_v52 = vpack.c.bf16 %v479_v21, %v478_v22  ;;  %v1172_v55 = vld [vmem:[#allocation2 + $0x137] sm:$0xff] }
 0x15e   : > { %1588 = vmatmul.bf16.gmra.mxu0 %v1441_v15  ;;  %v1041_v60 = vpop.f32.mrf.mxu2  ;;  %v1421_v15 = vld [vmem:[#allocation2 + $0x110] sm:$0xff] }
 0x15f   : > { %v1113_v7 = vadd.f32 %v1041_v60, %v824_v31 }
 0x160   : > { %v825_v34 = vpop.f32.mrf.mxu1  ;;  %v1305_v18 = vpop.f32.mrf.mxu3 }
 0x161   : > { %v1367_v26 = vadd.f32 %v4371_v61, %v1113_v7  ;;  %v826_v11 = vadd.f32 %v825_v34, %v4205_v30  ;;  %v1442_v61 = vpack.c.bf16 %v1422_v33, %v1421_v15  ;;  %v481_v15 = vld [vmem:[#allocation2 + $0x115] sm:$0xff]  ;;  %v1423_v33 = vld [vmem:[#allocation2 + $0x120] sm:$0xff] }
 0x163   : > { %v1551_v45 = vpop.f32.mrf.mxu0  ;;  %v4415_v5 = vadd.f32 %v1549_v4, %v1367_v26  ;;  %v1190_v4 = vpack.c.bf16 %v1172_v55, %v1171_v14  ;;  %v2154_v14 = vld [vmem:[#allocation2 + $0x3a] sm:$0xff] }
 0x166   : > { %v1043_v42 = vpop.f32.mrf.mxu2 }
 0x167   : > { %v1114_v12 = vadd.f32 %v1043_v42, %v826_v11  ;;  %v480_v11 = vld [vmem:[#allocation2 + $0x10d] sm:$0xff] }
 0x168   : > { %v828_v8 = vpop.f32.mrf.mxu1  ;;  %v1307_v31 = vpop.f32.mrf.mxu3 }
 0x169   : > { %v1368_v57 = vadd.f32 %v4378_v47, %v1114_v12  ;;  %v829_v30 = vadd.f32 %v828_v8, %v4217_v40 }
 0x16b   : > { %v1554_v39 = vpop.f32.mrf.mxu0  ;;  %867 = vmatmul.bf16.gmra.mxu1 %v499_v52  ;;  %1085 = vmatmul.bf16.gmra.mxu2 %v4362_v6  ;;  %v4420_v60 = vadd.f32 %v1551_v45, %v1368_v57  ;;  %v1424_v45 = vld [vmem:[#allocation2 + $0x128] sm:$0xff]  ;;  %v500_v52 = vpack.c.bf16 %v481_v15, %v480_v11  ;;  %v482_v15 = vld [vmem:[#allocation2 + $0x11d] sm:$0xff] }
 0x16c   : > { %v1443_v8 = vpack.c.bf16 %v1424_v45, %v1423_v33 }
 0x16d   : > { %1349 = vmatmul.bf16.gmra.mxu3 %v1190_v4 }
 0x16e   : > { %1593 = vmatmul.bf16.gmra.mxu0 %v1442_v61  ;;  %v1046_v7 = vpop.f32.mrf.mxu2  ;;  %v2153_v61 = vld [vmem:[#allocation2 + $0x32] sm:$0xff] }
 0x16f   : > { %v1115_v34 = vadd.f32 %v1046_v7, %v829_v30 }
 0x170   : > { %v830_v26 = vpop.f32.mrf.mxu1  ;;  %v1310_v21 = vpop.f32.mrf.mxu3 }
 0x171   : > { %v1369_v48 = vadd.f32 %v4387_v24, %v1115_v34  ;;  %v831_v6 = vadd.f32 %v830_v26, %v4234_v50 }
 0x173   : > { %v1556_v22 = vpop.f32.mrf.mxu0  ;;  %v4424_v47 = vadd.f32 %v1554_v39, %v1369_v48  ;;  %v2189_v39 = vpack.c.bf16 %v2154_v14, %v2153_v61 }
 0x176   : > { %v1048_v42 = vpop.f32.mrf.mxu2 }
 0x177   : > { %v1116_v12 = vadd.f32 %v1048_v42, %v831_v6  ;;  %v483_v6 = vld [vmem:[#allocation2 + $0x125] sm:$0xff] }
 0x178   : > { %v833_v40 = vpop.f32.mrf.mxu1  ;;  %v4428_v57 = vpop.f32.mrf.mxu3  ;;  %v501_v45 = vpack.c.bf16 %v483_v6, %v482_v15  ;;  %v1900_v15 = vld [vmem:[#allocation2 + $0x39] sm:$0xff] }
 0x179   : > { %v1370_v55 = vadd.f32 %v4399_v25, %v1116_v12  ;;  %v834_v50 = vadd.f32 %v833_v40, %v4245_v58  ;;  %v3914_v58 = vld [vmem:[%s3990_s10 + $0x88] sm:$0xff]  ;;  %v2407_v6 = vld [vmem:[#allocation2 + $0x33] sm:$0xff] }
 0x17a   : > { %v2155_v12 = vld [vmem:[#allocation2 + $0x42] sm:$0xff] }
 0x17b   : > { %v1559_v24 = vpop.f32.mrf.mxu0  ;;  %872 = vmatmul.bf16.gmra.mxu1 %v500_v52  ;;  %1090 = vmatmul.bf16.gmra.mxu2 %v4381_v3  ;;  %v4431_v4 = vadd.f32 %v1556_v22, %v1370_v55  ;;  %v2156_v52 = vld [vmem:[#allocation2 + $0x4a] sm:$0xff] }
 0x17d   : > { %2280 = vmatmul.bf16.vlgmr.msra.gmra.mxu3 %v2189_v39 }
 0x17e   : > { %1598 = vmatmul.bf16.gmra.mxu0 %v1443_v8  ;;  %v1051_v30 = vpop.f32.mrf.mxu2 }
 0x17f   : > { %v1117_v7 = vadd.f32 %v1051_v30, %v834_v50 }
 0x180   : > { %v835_v34 = vpop.f32.mrf.mxu1  ;;  %v4434_v25 = vpop.f32.mrf.mxu3 }
 0x181   : > { %v1371_v26 = vadd.f32 %v1305_v18, %v1117_v7  ;;  %v836_v3 = vadd.f32 %v835_v34, %v4258_v1  ;;  %v2190_v18 = vpack.c.bf16 %v2156_v52, %v2155_v12  ;;  %v3924_v7 = vmov 0   ;;  %v1645_v34 = vld [vmem:[#allocation2 + $0x21] sm:$0xff]  ;;  %v2157_v52 = vld [vmem:[#allocation2 + $0x52] sm:$0xff] }
 0x182   : > { %3902 = vset.pattern.permute.xlu0 %v3924_v7  ;;  %3903 = vset.pattern.permute.xlu1 %v3924_v7 }
 0x183   : > { %v1561_v48 = vpop.f32.mrf.mxu0  ;;  %v4436_v11 = vadd.f32 %v1559_v24, %v1371_v26  ;;  %3904 = vset.pattern.permute.xlu2 %v3924_v7 }
 0x186   : > { %v1053_v22 = vpop.f32.mrf.mxu2 }
 0x187   : > { %v1118_v33 = vadd.f32 %v1053_v22, %v836_v3  ;;  %v2408_v3 = vld [vmem:[#allocation2 + $0x3b] sm:$0xff] }
 0x188   : > { %v838_v42 = vpop.f32.mrf.mxu1  ;;  %v4440_v61 = vpop.f32.mrf.mxu3  ;;  %v2443_v12 = vpack.c.bf16 %v2408_v3, %v2407_v6  ;;  %v2410_v3 = vld [vmem:[#allocation2 + $0x4b] sm:$0xff] }
 0x189   : > { %v1372_v40 = vadd.f32 %v1307_v31, %v1118_v33  ;;  %v839_v1 = vadd.f32 %v838_v42, %v4264_v17  ;;  %v296_v31 = vld [vmem:[%s4783_s3] sm:$0xff]  ;;  %v1646_v17 = vld [vmem:[#allocation2 + $0x29] sm:$0xff] }
 0x18a   : > { %2663 = vperm.xlu0 %3902, %v296_v31  }
 0x18b   : > { %v1564_v8 = vpop.f32.mrf.mxu0  ;;  %877 = vmatmul.bf16.gmra.mxu1 %v501_v45  ;;  %1095 = vmatmul.bf16.gmra.mxu2 %v4402_v23  ;;  %v4443_v14 = vadd.f32 %v1561_v48, %v1372_v40  ;;  %v1899_v48 = vld [vmem:[#allocation2 + $0x31] sm:$0xff]  ;;  %v1681_v45 = vpack.c.bf16 %v1646_v17, %v1645_v34  ;;  %v2158_v40 = vld [vmem:[#allocation2 + $0x5a] sm:$0xff] }
 0x18c   : > { %v1935_v42 = vpack.c.bf16 %v1900_v15, %v1899_v48  ;;  %v298_v17 = vld [vmem:[%s4783_s3 + $0x10] sm:$0xff] }
 0x18d   : > { %2285 = vmatmul.bf16.gmra.mxu3 %v2190_v18  ;;  %2673 = vperm.xlu1 %3903, %v298_v17  }
 0x18e   : > { %1603 = vmatmul.bf16.gmra.mxu0 %v3914_v58  ;;  %v1056_v55 = vpop.f32.mrf.mxu2 }
 0x18f   : > { %v1119_v24 = vadd.f32 %v1056_v55, %v839_v1 }
 0x190   : > { %v840_v39 = vpop.f32.mrf.mxu1  ;;  %v4449_v23 = vpop.f32.mrf.mxu3 }
 0x191   : > { %v1373_v50 = vadd.f32 %v1310_v21, %v1119_v24  ;;  %v841_v21 = vadd.f32 %v840_v39, %v4281_v37  ;;  %v2191_v37 = vpack.c.bf16 %v2158_v40, %v2157_v52  ;;  %v2160_v52 = vld [vmem:[#allocation2 + $0x6a] sm:$0xff] }
 0x193   : > { %v1566_v30 = vpop.f32.mrf.mxu0  ;;  %v4451_v26 = vadd.f32 %v1564_v8, %v1373_v50  ;;  %v297_v8 = vld [vmem:[%s4783_s3 + $0x8] sm:$0xff] }
 0x194   : > { %2668 = vperm.xlu0 %3902, %v297_v8  }
 0x196   : > { %v1058_v22 = vpop.f32.mrf.mxu2 }
 0x197   : > { %v1120_v33 = vadd.f32 %v1058_v22, %v841_v21  ;;  %v1902_v21 = vld [vmem:[#allocation2 + $0x49] sm:$0xff] }
 0x198   : > { %v843_v58 = vpop.f32.mrf.mxu1  ;;  %v1322_v55 = vpop.f32.mrf.mxu3 }
 0x199   : > { %v1374_v18 = vadd.f32 %v4428_v57, %v1120_v33  ;;  %v844_v39 = vadd.f32 %v843_v58, %v4182_v13  ;;  %v2409_v13 = vld [vmem:[#allocation2 + $0x43] sm:$0xff] }
 0x19b   : > { %v1569_v1 = vpop.f32.mrf.mxu0  ;;  %1772 = vmatmul.bf16.vlgmr.msra.gmra.mxu1 %v1681_v45  ;;  %2026 = vmatmul.bf16.vlgmr.msra.gmra.mxu2 %v1935_v42  ;;  %v4458_v24 = vadd.f32 %v1566_v30, %v1374_v18  ;;  %v1901_v30 = vld [vmem:[#allocation2 + $0x41] sm:$0xff] }
 0x19c   : > { %v1936_v45 = vpack.c.bf16 %v1902_v21, %v1901_v30  ;;  %v1903_v21 = vld [vmem:[#allocation2 + $0x51] sm:$0xff] }
 0x19d   : > { %2290 = vmatmul.bf16.gmra.mxu3 %v2191_v37 }
 0x19e   : > { %2534 = vmatmul.bf16.vlgmr.msra.gmra.mxu0 %v2443_v12  ;;  %v1061_v50 = vpop.f32.mrf.mxu2  ;;  %v2159_v12 = vld [vmem:[#allocation2 + $0x62] sm:$0xff] }
 0x19f   : > { %v1121_v7 = vadd.f32 %v1061_v50, %v844_v39 }
 0x1a0   : > { %v845_v31 = vpop.f32.mrf.mxu1  ;;  %v1325_v48 = vpop.f32.mrf.mxu3 }
 0x1a1   : > { %v1375_v57 = vadd.f32 %v4434_v25, %v1121_v7  ;;  %v846_v6 = vadd.f32 %v845_v31, %v4191_v19  ;;  %v2444_v25 = vpack.c.bf16 %v2410_v3, %v2409_v13  ;;  %v2192_v19 = vpack.c.bf16 %v2160_v52, %v2159_v12  ;;  %v2411_v13 = vld [vmem:[#allocation2 + $0x53] sm:$0xff] }
 0x1a2   : > { %v2162_v12 = vld [vmem:[#allocation2 + $0x7a] sm:$0xff] }
 0x1a3   : > { %v1571_v34 = vpop.f32.mrf.mxu0  ;;  %v4465_v15 = vadd.f32 %v1569_v1, %v1375_v57  ;;  %v299_v1 = vld [vmem:[%s4783_s3 + $0x18] sm:$0xff] }
 0x1a4   : > { %2678 = vperm.xlu1 %3903, %v299_v1  }
 0x1a6   : > { %v1063_v22 = vpop.f32.mrf.mxu2 }
 0x1a7   : > { %v1122_v33 = vadd.f32 %v1063_v22, %v846_v6  ;;  %v1904_v6 = vld [vmem:[#allocation2 + $0x59] sm:$0xff] }
 0x1a8   : > { %v848_v58 = vpop.f32.mrf.mxu1  ;;  %v1327_v8 = vpop.f32.mrf.mxu3 }
 0x1a9   : > { %v1376_v40 = vadd.f32 %v4440_v61, %v1122_v33  ;;  %v849_v39 = vadd.f32 %v848_v58, %v4202_v29  ;;  %v1937_v33 = vpack.c.bf16 %v1904_v6, %v1903_v21  ;;  %v1906_v21 = vld [vmem:[#allocation2 + $0x69] sm:$0xff] }
 0x1ab   : > { %v1574_v18 = vpop.f32.mrf.mxu0  ;;  %1777 = vmatmul.bf16.gmra.mxu1 %v1935_v42  ;;  %2031 = vmatmul.bf16.gmra.mxu2 %v1936_v45  ;;  %v4472_v37 = vadd.f32 %v1571_v34, %v1376_v40  ;;  %v2412_v34 = vld [vmem:[#allocation2 + $0x5b] sm:$0xff] }
 0x1ac   : > { %v2445_v58 = vpack.c.bf16 %v2412_v34, %v2411_v13 }
 0x1ad   : > { %2295 = vmatmul.bf16.gmra.mxu3 %v2192_v19 }
 0x1ae   : > { %2539 = vmatmul.bf16.gmra.mxu0 %v2444_v25  ;;  %v1066_v50 = vpop.f32.mrf.mxu2  ;;  %v2161_v25 = vld [vmem:[#allocation2 + $0x72] sm:$0xff] }
 0x1af   : > { %v1123_v7 = vadd.f32 %v1066_v50, %v849_v39 }
 0x1b0   : > { %v850_v31 = vpop.f32.mrf.mxu1  ;;  %v1330_v17 = vpop.f32.mrf.mxu3 }
 0x1b1   : > { %v1377_v61 = vadd.f32 %v4449_v23, %v1123_v7  ;;  %v851_v42 = vadd.f32 %v850_v31, %v4211_v35 }
 0x1b3   : > { %v1576_v57 = vpop.f32.mrf.mxu0  ;;  %v4476_v30 = vadd.f32 %v1574_v18, %v1377_v61  ;;  %v2193_v18 = vpack.c.bf16 %v2162_v12, %v2161_v25 }
 0x1b6   : > { %v1068_v3 = vpop.f32.mrf.mxu2 }
 0x1b7   : > { %v1124_v22 = vadd.f32 %v1068_v3, %v851_v42  ;;  %v2414_v42 = vld [vmem:[#allocation2 + $0x6b] sm:$0xff] }
 0x1b8   : > { %v853_v29 = vpop.f32.mrf.mxu1  ;;  %v4479_v23 = vpop.f32.mrf.mxu3 }
 0x1b9   : > { %v1378_v52 = vadd.f32 %v1322_v55, %v1124_v22  ;;  %v854_v35 = vadd.f32 %v853_v29, %v4231_v49  ;;  %v302_v55 = vld [vmem:[%s4783_s3 + $0x30] sm:$0xff]  ;;  %v2413_v49 = vld [vmem:[#allocation2 + $0x63] sm:$0xff] }
 0x1ba   : > { %2693 = vperm.xlu0 %3902, %v302_v55   ;;  %v2446_v22 = vpack.c.bf16 %v2414_v42, %v2413_v49  ;;  %v2163_v29 = vld [vmem:[#allocation2 + $0x82] sm:$0xff] }
 0x1bb   : > { %v1579_v40 = vpop.f32.mrf.mxu0  ;;  %1782 = vmatmul.bf16.gmra.mxu1 %v1936_v45  ;;  %2036 = vmatmul.bf16.gmra.mxu2 %v1937_v33  ;;  %v4481_v1 = vadd.f32 %v1576_v57, %v1378_v52  ;;  %v1905_v57 = vld [vmem:[#allocation2 + $0x61] sm:$0xff] }
 0x1bc   : > { %v1938_v3 = vpack.c.bf16 %v1906_v21, %v1905_v57  ;;  %v300_v52 = vld [vmem:[%s4783_s3 + $0x20] sm:$0xff]  ;;  %v301_v57 = vld [vmem:[%s4783_s3 + $0x28] sm:$0xff] }
 0x1bd   : > { %2300 = vmatmul.bf16.gmra.mxu3 %v2193_v18  ;;  %2683 = vperm.xlu2 %3904, %v300_v52   ;;  %v2416_v42 = vld [vmem:[#allocation2 + $0x7b] sm:$0xff] }
 0x1be   : > { %2544 = vmatmul.bf16.gmra.mxu0 %v2445_v58  ;;  %v1071_v19 = vpop.f32.mrf.mxu2  ;;  %v2164_v58 = vld [vmem:[#allocation2 + $0x8a] sm:$0xff] }
 0x1bf   : > { %v1125_v39 = vadd.f32 %v1071_v19, %v854_v35  ;;  %v2194_v18 = vpack.c.bf16 %v2164_v58, %v2163_v29  ;;  %v2165_v29 = vld [vmem:[#allocation2 + $0x92] sm:$0xff]  ;;  %v2166_v58 = vld [vmem:[#allocation2 + $0x9a] sm:$0xff] }
 0x1c0   : > { %v855_v50 = vpop.f32.mrf.mxu1  ;;  %v4487_v61 = vpop.f32.mrf.mxu3 }
 0x1c1   : > { %v1379_v7 = vadd.f32 %v1325_v48, %v1125_v39  ;;  %v856_v6 = vadd.f32 %v855_v50, %v4243_v56 }
 0x1c3   : > { %v1581_v31 = vpop.f32.mrf.mxu0  ;;  %v4489_v45 = vadd.f32 %v1579_v40, %v1379_v7  ;;  %v303_v40 = vld [vmem:[%s4783_s3 + $0x38] sm:$0xff] }
 0x1c4   : > { %2698 = vperm.xlu1 %3903, %v303_v40  }
 0x1c5   : > { %2688 = vperm.xlu2 %3904, %v301_v57   ;;  %v306_v57 = vld [vmem:[%s4783_s3 + $0x50] sm:$0xff] }
 0x1c6   : > { %v1073_v13 = vpop.f32.mrf.mxu2 }
 0x1c7   : > { %v1126_v34 = vadd.f32 %v1073_v13, %v856_v6  ;;  %v1908_v6 = vld [vmem:[#allocation2 + $0x79] sm:$0xff] }
 0x1c8   : > { %v858_v48 = vpop.f32.mrf.mxu1  ;;  %v4498_v56 = vpop.f32.mrf.mxu3 }
 0x1c9   : > { %v1380_v25 = vadd.f32 %v1327_v8, %v1126_v34  ;;  %v859_v8 = vadd.f32 %v858_v48, %v4255_v0  ;;  %v2415_v0 = vld [vmem:[#allocation2 + $0x73] sm:$0xff] }
 0x1cb   : > { %v1584_v12 = vpop.f32.mrf.mxu0  ;;  %1787 = vmatmul.bf16.gmra.mxu1 %v1937_v33  ;;  %2041 = vmatmul.bf16.gmra.mxu2 %v1938_v3  ;;  %v4500_v35 = vadd.f32 %v1581_v31, %v1380_v25  ;;  %v1907_v31 = vld [vmem:[#allocation2 + $0x71] sm:$0xff] }
 0x1cc   : > { %v1939_v48 = vpack.c.bf16 %v1908_v6, %v1907_v31  ;;  %2713 = vperm.xlu1 %3903, %v306_v57   ;;  %v1910_v6 = vld [vmem:[#allocation2 + $0x89] sm:$0xff]  ;;  %v308_v57 = vld [vmem:[%s4783_s3 + $0x60] sm:$0xff] }
 0x1cd   : > { %2305 = vmatmul.bf16.gmra.mxu3 %v2194_v18 }
 0x1ce   : > { %2549 = vmatmul.bf16.gmra.mxu0 %v2446_v22  ;;  %v1076_v19 = vpop.f32.mrf.mxu2  ;;  %v2447_v22 = vpack.c.bf16 %v2416_v42, %v2415_v0  ;;  %v2418_v0 = vld [vmem:[#allocation2 + $0x8b] sm:$0xff] }
 0x1cf   : > { %v1127_v39 = vadd.f32 %v1076_v19, %v859_v8 }
 0x1d0   : > { %v860_v50 = vpop.f32.mrf.mxu1  ;;  %v4506_v21 = vpop.f32.mrf.mxu3 }
 0x1d1   : > { %v1381_v7 = vadd.f32 %v1330_v17, %v1127_v39  ;;  %v861_v49 = vadd.f32 %v860_v50, %v4262_v9  ;;  %v2195_v9 = vpack.c.bf16 %v2166_v58, %v2165_v29  ;;  %v2168_v29 = vld [vmem:[#allocation2 + $0xaa] sm:$0xff] }
 0x1d3   : > { %v1586_v55 = vpop.f32.mrf.mxu0  ;;  %v4508_v33 = vadd.f32 %v1584_v12, %v1381_v7  ;;  %v305_v12 = vld [vmem:[%s4783_s3 + $0x48] sm:$0xff] }
 0x1d4   : > { %2708 = vperm.xlu0 %3902, %v305_v12  }
 0x1d6   : > { %v1078_v13 = vpop.f32.mrf.mxu2 }
 0x1d7   : > { %v1128_v34 = vadd.f32 %v1078_v13, %v861_v49  ;;  %v2417_v49 = vld [vmem:[#allocation2 + $0x83] sm:$0xff] }
 0x1d8   : > { %v863_v17 = vpop.f32.mrf.mxu1  ;;  %v4515_v40 = vpop.f32.mrf.mxu3 }
 0x1d9   : > { %v1382_v25 = vadd.f32 %v4479_v23, %v1128_v34  ;;  %v864_v8 = vadd.f32 %v863_v17, %v4278_v36  ;;  %v2448_v17 = vpack.c.bf16 %v2418_v0, %v2417_v49  ;;  %v2420_v49 = vld [vmem:[#allocation2 + $0x9b] sm:$0xff] }
 0x1db   : > { %v1589_v52 = vpop.f32.mrf.mxu0  ;;  %1792 = vmatmul.bf16.gmra.mxu1 %v1938_v3  ;;  %2046 = vmatmul.bf16.gmra.mxu2 %v1939_v48  ;;  %v4517_v18 = vadd.f32 %v1586_v55, %v1382_v25  ;;  %v1909_v55 = vld [vmem:[#allocation2 + $0x81] sm:$0xff] }
 0x1dc   : > { %v1940_v34 = vpack.c.bf16 %v1910_v6, %v1909_v55  ;;  %2723 = vperm.xlu0 %3902, %v308_v57   ;;  %v1912_v6 = vld [vmem:[#allocation2 + $0x99] sm:$0xff] }
 0x1dd   : > { %2310 = vmatmul.bf16.gmra.mxu3 %v2195_v9  ;;  %v307_v57 = vld [vmem:[%s4783_s3 + $0x58] sm:$0xff] }
 0x1de   : > { %2554 = vmatmul.bf16.gmra.mxu0 %v2447_v22  ;;  %v1081_v19 = vpop.f32.mrf.mxu2  ;;  %v2167_v22 = vld [vmem:[#allocation2 + $0xa2] sm:$0xff] }
 0x1df   : > { %v1129_v39 = vadd.f32 %v1081_v19, %v864_v8 }
 0x1e0   : > { %v865_v23 = vpop.f32.mrf.mxu1  ;;  %v4524_v31 = vpop.f32.mrf.mxu3 }
 0x1e1   : > { %v1383_v50 = vadd.f32 %v4487_v61, %v1129_v39  ;;  %v866_v36 = vadd.f32 %v865_v23, %v4291_v54  ;;  %v2196_v54 = vpack.c.bf16 %v2168_v29, %v2167_v22  ;;  %v2170_v22 = vld [vmem:[#allocation2 + $0xba] sm:$0xff] }
 0x1e3   : > { %v1591_v7 = vpop.f32.mrf.mxu0  ;;  %v4526_v3 = vadd.f32 %v1589_v52, %v1383_v50  ;;  %v304_v52 = vld [vmem:[%s4783_s3 + $0x40] sm:$0xff] }
 0x1e4   : > { %2703 = vperm.xlu2 %3904, %v304_v52  }
 0x1e6   : > { %v1083_v42 = vpop.f32.mrf.mxu2 }
 0x1e7   : > { %v1130_v13 = vadd.f32 %v1083_v42, %v866_v36  ;;  %v2419_v36 = vld [vmem:[#allocation2 + $0x93] sm:$0xff] }
 0x1e8   : > { %v868_v61 = vpop.f32.mrf.mxu1  ;;  %v4533_v12 = vpop.f32.mrf.mxu3 }
 0x1e9   : > { %v1384_v58 = vadd.f32 %v4498_v56, %v1130_v13  ;;  %v869_v8 = vadd.f32 %v868_v61, %v4189_v16  ;;  %v2449_v61 = vpack.c.bf16 %v2420_v49, %v2419_v36  ;;  %v2422_v36 = vld [vmem:[#allocation2 + $0xab] sm:$0xff] }
 0x1eb   : > { %v1594_v25 = vpop.f32.mrf.mxu0  ;;  %1797 = vmatmul.bf16.gmra.mxu1 %v1939_v48  ;;  %2051 = vmatmul.bf16.gmra.mxu2 %v1940_v34  ;;  %v4535_v9 = vadd.f32 %v1591_v7, %v1384_v58  ;;  %v1911_v7 = vld [vmem:[#allocation2 + $0x91] sm:$0xff] }
 0x1ec   : > { %v1941_v13 = vpack.c.bf16 %v1912_v6, %v1911_v7  ;;  %2718 = vperm.xlu2 %3904, %v307_v57   ;;  %v1914_v6 = vld [vmem:[#allocation2 + $0xa9] sm:$0xff]  ;;  %v312_v57 = vld [vmem:[%s4783_s3 + $0x80] sm:$0xff] }
 0x1ed   : > { %2315 = vmatmul.bf16.gmra.mxu3 %v2196_v54 }
 0x1ee   : > { %2559 = vmatmul.bf16.gmra.mxu0 %v2448_v17  ;;  %v1086_v19 = vpop.f32.mrf.mxu2  ;;  %v2169_v17 = vld [vmem:[#allocation2 + $0xb2] sm:$0xff] }
 0x1ef   : > { %v1131_v39 = vadd.f32 %v1086_v19, %v869_v8 }
 0x1f0   : > { %v870_v56 = vpop.f32.mrf.mxu1  ;;  %v4542_v55 = vpop.f32.mrf.mxu3 }
 0x1f1   : > { %v1385_v23 = vadd.f32 %v4506_v21, %v1131_v39  ;;  %v871_v16 = vadd.f32 %v870_v56, %v4198_v27  ;;  %v2197_v27 = vpack.c.bf16 %v2170_v22, %v2169_v17  ;;  %v2172_v17 = vld [vmem:[#allocation2 + $0xca] sm:$0xff] }
 0x1f3   : > { %v1596_v50 = vpop.f32.mrf.mxu0  ;;  %v4544_v48 = vadd.f32 %v1594_v25, %v1385_v23  ;;  %v309_v25 = vld [vmem:[%s4783_s3 + $0x68] sm:$0xff] }
 0x1f4   : > { %2728 = vperm.xlu1 %3903, %v309_v25  }
 0x1f6   : > { %v1088_v0 = vpop.f32.mrf.mxu2 }
 0x1f7   : > { %v1132_v42 = vadd.f32 %v1088_v0, %v871_v16  ;;  %v2421_v16 = vld [vmem:[#allocation2 + $0xa3] sm:$0xff] }
 0x1f8   : > { %v873_v21 = vpop.f32.mrf.mxu1  ;;  %v4551_v52 = vpop.f32.mrf.mxu3 }
 0x1f9   : > { %v1386_v29 = vadd.f32 %v4515_v40, %v1132_v42  ;;  %v874_v8 = vadd.f32 %v873_v21, %v4209_v32  ;;  %v2450_v21 = vpack.c.bf16 %v2422_v36, %v2421_v16  ;;  %v2424_v16 = vld [vmem:[#allocation2 + $0xbb] sm:$0xff] }
 0x1fb   : > { %v1599_v58 = vpop.f32.mrf.mxu0  ;;  %1802 = vmatmul.bf16.gmra.mxu1 %v1940_v34  ;;  %2056 = vmatmul.bf16.gmra.mxu2 %v1941_v13  ;;  %v4553_v54 = vadd.f32 %v1596_v50, %v1386_v29  ;;  %v1913_v50 = vld [vmem:[#allocation2 + $0xa1] sm:$0xff] }
 0x1fc   : > { %v1942_v42 = vpack.c.bf16 %v1914_v6, %v1913_v50  ;;  %2743 = vperm.xlu1 %3903, %v312_v57   ;;  %v1916_v6 = vld [vmem:[#allocation2 + $0xb9] sm:$0xff]  ;;  %v314_v57 = vld [vmem:[%s4783_s3 + $0x90] sm:$0xff] }
 0x1fd   : > { %2320 = vmatmul.bf16.gmra.mxu3 %v2197_v27 }
 0x1fe   : > { %2564 = vmatmul.bf16.gmra.mxu0 %v2449_v61  ;;  %v1091_v19 = vpop.f32.mrf.mxu2  ;;  %v2171_v61 = vld [vmem:[#allocation2 + $0xc2] sm:$0xff] }
 0x1ff   : > { %v1133_v39 = vadd.f32 %v1091_v19, %v874_v8 }
 0x200   : > { %v875_v40 = vpop.f32.mrf.mxu1  ;;  %v4560_v7 = vpop.f32.mrf.mxu3 }
 0x201   : > { %v1387_v56 = vadd.f32 %v4524_v31, %v1133_v39  ;;  %v876_v32 = vadd.f32 %v875_v40, %v4224_v46  ;;  %v2198_v46 = vpack.c.bf16 %v2172_v17, %v2171_v61  ;;  %v2174_v61 = vld [vmem:[#allocation2 + $0xda] sm:$0xff] }
 0x203   : > { %v1601_v23 = vpop.f32.mrf.mxu0  ;;  %v4562_v34 = vadd.f32 %v1599_v58, %v1387_v56  ;;  %v311_v58 = vld [vmem:[%s4783_s3 + $0x78] sm:$0xff] }
 0x204   : > { %2738 = vperm.xlu0 %3902, %v311_v58  }
 0x206   : > { %v1093_v49 = vpop.f32.mrf.mxu2 }
 0x207   : > { %v1134_v0 = vadd.f32 %v1093_v49, %v876_v32  ;;  %v2423_v32 = vld [vmem:[#allocation2 + $0xb3] sm:$0xff] }
 0x208   : > { %v878_v31 = vpop.f32.mrf.mxu1  ;;  %v4569_v25 = vpop.f32.mrf.mxu3 }
 0x209   : > { %v1388_v22 = vadd.f32 %v4533_v12, %v1134_v0  ;;  %v879_v8 = vadd.f32 %v878_v31, %v4241_v53  ;;  %v2451_v31 = vpack.c.bf16 %v2424_v16, %v2423_v32  ;;  %v2426_v16 = vld [vmem:[#allocation2 + $0xcb] sm:$0xff] }
 0x20b   : > { %v1604_v29 = vpop.f32.mrf.mxu0  ;;  %1807 = vmatmul.bf16.gmra.mxu1 %v1941_v13  ;;  %2061 = vmatmul.bf16.gmra.mxu2 %v1942_v42  ;;  %v4571_v27 = vadd.f32 %v1601_v23, %v1388_v22  ;;  %v1915_v23 = vld [vmem:[#allocation2 + $0xb1] sm:$0xff] }
 0x20c   : > { %v1943_v0 = vpack.c.bf16 %v1916_v6, %v1915_v23  ;;  %2753 = vperm.xlu0 %3902, %v314_v57   ;;  %v1918_v6 = vld [vmem:[#allocation2 + $0xc9] sm:$0xff] }
 0x20d   : > { %2325 = vmatmul.bf16.gmra.mxu3 %v2198_v46 }
 0x20e   : > { %2569 = vmatmul.bf16.gmra.mxu0 %v2450_v21  ;;  %v1096_v19 = vpop.f32.mrf.mxu2  ;;  %v2173_v21 = vld [vmem:[#allocation2 + $0xd2] sm:$0xff] }
 0x20f   : > { %v1135_v39 = vadd.f32 %v1096_v19, %v879_v8 }
 0x210   : > { %v880_v12 = vpop.f32.mrf.mxu1  ;;  %v4578_v50 = vpop.f32.mrf.mxu3 }
 0x211   : > { %v1389_v40 = vadd.f32 %v4542_v55, %v1135_v39  ;;  %v881_v53 = vadd.f32 %v880_v12, %v4250_v62  ;;  %v2199_v62 = vpack.c.bf16 %v2174_v61, %v2173_v21  ;;  %v2664_v12 = vpop.permute.xlu0 %2663  ;;  %v315_v21 = vld [vmem:[%s4783_s3 + $0x98] sm:$0xff] }
 0x212   : > { %2758 = vperm.xlu1 %3903, %v315_v21  }
 0x213   : > { %v1606_v56 = vpop.f32.mrf.mxu0  ;;  %v4580_v13 = vadd.f32 %v1604_v29, %v1389_v40  ;;  %v310_v29 = vld [vmem:[%s4783_s3 + $0x70] sm:$0xff] }
 0x214   : > { %2733 = vperm.xlu2 %3904, %v310_v29   ;;  %v2176_v29 = vld [vmem:[#allocation2 + $0xea] sm:$0xff] }
 0x216   : > { %v1098_v36 = vpop.f32.mrf.mxu2 }
 0x217   : > { %v1136_v49 = vadd.f32 %v1098_v36, %v881_v53  ;;  %v4791_v53 = vld [vmem:[#allocation3_spill] sm:$0xff] }
 0x218   : > { %v1773_v55 = vpop.f32.mrf.mxu1  ;;  %v4587_v58 = vpop.f32.mrf.mxu3 }
 0x219   : > { %v1390_v17 = vadd.f32 %v4551_v52, %v1136_v49  ;;  %v1863_v8 = vadd.f32 %v1773_v55, %v4302_v38  ;;  %v2425_v38 = vld [vmem:[#allocation2 + $0xc3] sm:$0xff] }
 0x21a   : > { %v2452_v61 = vpack.c.bf16 %v2426_v16, %v2425_v38  ;;  %v318_v38 = vld [vmem:[%s4783_s3 + $0xb0] sm:$0xff] }
 0x21b   : > { %v2535_v22 = vpop.f32.mrf.mxu0  ;;  %1812 = vmatmul.bf16.gmra.mxu1 %v1942_v42  ;;  %2066 = vmatmul.bf16.gmra.mxu2 %v1943_v0  ;;  %v4589_v46 = vadd.f32 %v1606_v56, %v1390_v17  ;;  %v1917_v56 = vld [vmem:[#allocation2 + $0xc1] sm:$0xff] }
 0x21c   : > { %v2175_v17 = vld [vmem:[#allocation2 + $0xe2] sm:$0xff]  ;;  %2773 = vperm.xlu1 %3903, %v318_v38  }
 0x21d   : > { %2330 = vmatmul.bf16.gmra.mxu3 %v2199_v62  ;;  %v2200_v57 = vpack.c.bf16 %v2176_v29, %v2175_v17  ;;  %v1919_v17 = vld [vmem:[#allocation2 + $0xd1] sm:$0xff]  ;;  %v1920_v29 = vld [vmem:[#allocation2 + $0xd9] sm:$0xff] }
 0x21e   : > { %2574 = vmatmul.bf16.gmra.mxu0 %v2451_v31  ;;  %v2027_v19 = vpop.f32.mrf.mxu2  ;;  %v4599_v31 = vpack.c.bf16 %v1918_v6, %v1917_v56 }
 0x21f   : > { %v2117_v39 = vadd.f32 %v2027_v19, %v1863_v8 }
 0x220   : > { %v1775_v52 = vpop.f32.mrf.mxu1  ;;  %v4596_v42 = vpop.f32.mrf.mxu3 }
 0x221   : > { %v2371_v23 = vadd.f32 %v4560_v7, %v2117_v39  ;;  %v1864_v32 = vadd.f32 %v1775_v52, %v4791_v53  ;;  %v2669_v39 = vpop.permute.xlu0 %2668 }
 0x223   : > { %v2537_v40 = vpop.f32.mrf.mxu0  ;;  %v2625_v36 = vadd.f32 %v2535_v22, %v2371_v23 }
 0x225   : > { %v2841_v19 = vmul.f32 %v2664_v12, %v2625_v36 }
 0x226   : > { %v2029_v49 = vpop.f32.mrf.mxu2 }
 0x227   : > { %v2118_v55 = vadd.f32 %v2029_v49, %v1864_v32  ;;  %v2919_v56 = vmul.f32 %v2841_v19, %v2625_v36 }
 0x228   : > { %v1778_v7 = vpop.f32.mrf.mxu1  ;;  %v4605_v22 = vpop.f32.mrf.mxu3 }
 0x229   : > { %v2372_v62 = vadd.f32 %v4569_v25, %v2118_v55  ;;  %v1865_v25 = vadd.f32 %v1778_v7, %v4323_v51  ;;  %v2674_v51 = vpop.permute.xlu1 %2673 }
 0x22b   : > { %v2540_v8 = vpop.f32.mrf.mxu0  ;;  %1817 = vmatmul.bf16.gmra.mxu1 %v1943_v0  ;;  %2071 = vmatmul.bf16.gmra.mxu2 %v4599_v31  ;;  %v2626_v52 = vadd.f32 %v2537_v40, %v2372_v62  ;;  %v317_v0 = vld [vmem:[%s4783_s3 + $0xa8] sm:$0xff] }
 0x22c   : > { %2768 = vperm.xlu0 %3902, %v317_v0   ;;  %v4633_v0 = vpack.c.bf16 %v1920_v29, %v1919_v17 }
 0x22d   : > { %v2842_v23 = vmul.f32 %v2669_v39, %v2626_v52  ;;  %v3746_v12 = vpack.c.bf16 %v2626_v52, %v2625_v36  ;;  %2335 = vmatmul.bf16.gmra.mxu3 %v2200_v57  ;;  %v313_v36 = vld [vmem:[%s4783_s3 + $0x88] sm:$0xff]  ;;  %v2427_v39 = vld [vmem:[#allocation2 + $0xd3] sm:$0xff] }
 0x22e   : > { %2579 = vmatmul.bf16.gmra.mxu0 %v2452_v61  ;;  %v2032_v6 = vpop.f32.mrf.mxu2  ;;  %2748 = vperm.xlu2 %3904, %v313_v36  }
 0x22f   : > { %v2877_v40 = vadd.f32 %v2842_v23, %v2841_v19  ;;  %v2920_v53 = vmul.f32 %v2842_v23, %v2626_v52  ;;  %3747 = vst [vmem:[%s4613_s19] sm:$0xff] %v3746_v12   ;;  %v2119_v32 = vadd.f32 %v2032_v6, %v1865_v25  ;;  %v2428_v52 = vld [vmem:[#allocation2 + $0xdb] sm:$0xff]  ;;  %v2177_v6 = vld [vmem:[#allocation2 + $0xf2] sm:$0xff] }
 0x230   : > { %v1780_v16 = vpop.f32.mrf.mxu1  ;;  %v4627_v7 = vpop.f32.mrf.mxu3 }
 0x231   : > { %v2955_v49 = vadd.f32 %v2920_v53, %v2919_v56  ;;  %v2373_v55 = vadd.f32 %v4578_v50, %v2119_v32  ;;  %v1866_v62 = vadd.f32 %v1780_v16, %v4332_v43  ;;  %v320_v50 = vld [vmem:[%s4783_s3 + $0xc0] sm:$0xff]  ;;  %v2453_v43 = vpack.c.bf16 %v2428_v52, %v2427_v39 }
 0x232   : > { %v2178_v53 = vld [vmem:[#allocation2 + $0xfa] sm:$0xff] }
 0x233   : > { %v2542_v21 = vpop.f32.mrf.mxu0  ;;  %v2627_v61 = vadd.f32 %v2540_v8, %v2373_v55  ;;  %v321_v8 = vld [vmem:[%s4783_s3 + $0xc8] sm:$0xff]  ;;  %v2201_v36 = vpack.c.bf16 %v2178_v53, %v2177_v6 }
 0x234   : > { %2783 = vperm.xlu0 %3902, %v320_v50   ;;  %2788 = vperm.xlu1 %3903, %v321_v8   ;;  %v2684_v50 = vpop.permute.xlu2 %2683  ;;  %v1921_v8 = vld [vmem:[#allocation2 + $0xe1] sm:$0xff] }
 0x235   : > { %v2843_v19 = vmul.f32 %v2674_v51, %v2627_v61  ;;  %v2679_v51 = vpop.permute.xlu1 %2678  ;;  %v2429_v53 = vld [vmem:[#allocation2 + $0xe3] sm:$0xff] }
 0x236   : > { %v2034_v57 = vpop.f32.mrf.mxu2 }
 0x237   : > { %v2878_v25 = vadd.f32 %v2877_v40, %v2843_v19  ;;  %v2921_v23 = vmul.f32 %v2843_v19, %v2627_v61  ;;  %v2120_v12 = vadd.f32 %v2034_v57, %v1866_v62 }
 0x238   : > { %v1783_v56 = vpop.f32.mrf.mxu1  ;;  %v4639_v40 = vpop.f32.mrf.mxu3 }
 0x239   : > { %v2956_v32 = vadd.f32 %v2955_v49, %v2921_v23  ;;  %v2374_v38 = vadd.f32 %v4587_v58, %v2120_v12  ;;  %v1867_v17 = vadd.f32 %v1783_v56, %v4337_v10  ;;  %v323_v58 = vld [vmem:[%s4783_s3 + $0xd8] sm:$0xff]  ;;  %v316_v23 = vld [vmem:[%s4783_s3 + $0xa0] sm:$0xff]  ;;  %v1922_v56 = vld [vmem:[#allocation2 + $0xe9] sm:$0xff] }
 0x23a   : > { %2763 = vperm.xlu2 %3904, %v316_v23  }
 0x23b   : > { %v2545_v16 = vpop.f32.mrf.mxu0  ;;  %1822 = vmatmul.bf16.gmra.mxu1 %v4599_v31  ;;  %2076 = vmatmul.bf16.gmra.mxu2 %v4633_v0  ;;  %v2628_v55 = vadd.f32 %v2542_v21, %v2374_v38  ;;  %v324_v31 = vld [vmem:[%s4783_s3 + $0xe0] sm:$0xff]  ;;  %v2430_v38 = vld [vmem:[#allocation2 + $0xeb] sm:$0xff] }
 0x23c   : > { %2798 = vperm.xlu0 %3902, %v323_v58   ;;  %2803 = vperm.xlu1 %3903, %v324_v31   ;;  %v2180_v58 = vld [vmem:[#allocation2 + $0x10a] sm:$0xff]  ;;  %v2689_v31 = vpop.permute.xlu2 %2688 }
 0x23d   : > { %v2844_v29 = vmul.f32 %v2679_v51, %v2628_v55  ;;  %v3751_v62 = vpack.c.bf16 %v2628_v55, %v2627_v61  ;;  %2340 = vmatmul.bf16.gmra.mxu3 %v2201_v36 }
 0x23e   : > { %2584 = vmatmul.bf16.gmra.mxu0 %v2453_v43  ;;  %v2037_v49 = vpop.f32.mrf.mxu2 }
 0x23f   : > { %v2879_v19 = vadd.f32 %v2878_v25, %v2844_v29  ;;  %v2922_v39 = vmul.f32 %v2844_v29, %v2628_v55  ;;  %3850 = vst [vmem:[%s4613_s19 + $0x8] sm:$0xff] %v3751_v62   ;;  %v2121_v52 = vadd.f32 %v2037_v49, %v1867_v17  ;;  %v1946_v17 = vpack.c.bf16 %v1922_v56, %v1921_v8  ;;  %v329_v8 = vld [vmem:[%s4783_s3 + $0x108] sm:$0xff] }
 0x240   : > { %v1785_v21 = vpop.f32.mrf.mxu1  ;;  %v4655_v25 = vpop.f32.mrf.mxu3  ;;  %v2454_v62 = vpack.c.bf16 %v2430_v38, %v2429_v53 }
 0x241   : > { %v2957_v10 = vadd.f32 %v2956_v32, %v2922_v39  ;;  %v2375_v61 = vadd.f32 %v4596_v42, %v2121_v52  ;;  %v1868_v43 = vadd.f32 %v1785_v21, %v4344_v63  ;;  %v326_v42 = vld [vmem:[%s4783_s3 + $0xf0] sm:$0xff]  ;;  %v2179_v63 = vld [vmem:[#allocation2 + $0x102] sm:$0xff] }
 0x243   : > { %v2547_v57 = vpop.f32.mrf.mxu0  ;;  %v2629_v12 = vadd.f32 %v2545_v16, %v2375_v61  ;;  %v327_v16 = vld [vmem:[%s4783_s3 + $0xf8] sm:$0xff]  ;;  %v2202_v61 = vpack.c.bf16 %v2180_v58, %v2179_v63 }
 0x244   : > { %2813 = vperm.xlu0 %3902, %v326_v42   ;;  %2818 = vperm.xlu1 %3903, %v327_v16   ;;  %v322_v42 = vld [vmem:[%s4783_s3 + $0xd0] sm:$0xff]  ;;  %v1924_v16 = vld [vmem:[#allocation2 + $0xf9] sm:$0xff] }
 0x245   : > { %v2845_v6 = vmul.f32 %v2684_v50, %v2629_v12  ;;  %v2431_v63 = vld [vmem:[#allocation2 + $0xf3] sm:$0xff]  ;;  %v2432_v58 = vld [vmem:[#allocation2 + $0xfb] sm:$0xff] }
 0x246   : > { %v2039_v32 = vpop.f32.mrf.mxu2 }
 0x247   : > { %v2880_v51 = vadd.f32 %v2879_v19, %v2845_v6  ;;  %v2923_v55 = vmul.f32 %v2845_v6, %v2629_v12  ;;  %v2122_v36 = vadd.f32 %v2039_v32, %v1868_v43  ;;  %v319_v19 = vld [vmem:[%s4783_s3 + $0xb8] sm:$0xff]  ;;  %v2694_v32 = vpop.permute.xlu0 %2693 }
 0x248   : > { %v1788_v29 = vpop.f32.mrf.mxu1  ;;  %v4668_v21 = vpop.f32.mrf.mxu3  ;;  %2778 = vperm.xlu2 %3904, %v319_v19  }
 0x249   : > { %v2958_v49 = vadd.f32 %v2957_v10, %v2923_v55  ;;  %v2376_v39 = vadd.f32 %v4605_v22, %v2122_v36  ;;  %v1869_v10 = vadd.f32 %v1788_v29, %v4354_v44  ;;  %v1923_v36 = vld [vmem:[#allocation2 + $0xf1] sm:$0xff] }
 0x24b   : > { %v2550_v52 = vpop.f32.mrf.mxu0  ;;  %1827 = vmatmul.bf16.gmra.mxu1 %v4633_v0  ;;  %2081 = vmatmul.bf16.gmra.mxu2 %v1946_v17  ;;  %v2630_v50 = vadd.f32 %v2547_v57, %v2376_v39  ;;  %v330_v0 = vld [vmem:[%s4783_s3 + $0x110] sm:$0xff] }
 0x24c   : > { %2828 = vperm.xlu0 %3902, %v329_v8   ;;  %2833 = vperm.xlu1 %3903, %v330_v0  }
 0x24d   : > { %v2846_v23 = vmul.f32 %v2689_v31, %v2630_v50  ;;  %v3756_v22 = vpack.c.bf16 %v2630_v50, %v2629_v12  ;;  %2345 = vmatmul.bf16.gmra.mxu3 %v2202_v61  ;;  %v1947_v31 = vpack.c.bf16 %v1924_v16, %v1923_v36  ;;  %v2455_v61 = vpack.c.bf16 %v2432_v58, %v2431_v63  ;;  %v1926_v58 = vld [vmem:[#allocation2 + $0x109] sm:$0xff] }
 0x24e   : > { %2589 = vmatmul.bf16.gmra.mxu0 %v2454_v62  ;;  %v2042_v56 = vpop.f32.mrf.mxu2 }
 0x24f   : > { %v2881_v43 = vadd.f32 %v2880_v51, %v2846_v23  ;;  %v2924_v6 = vmul.f32 %v2846_v23, %v2630_v50  ;;  %3851 = vst [vmem:[%s4613_s19 + $0x10] sm:$0xff] %v3756_v22   ;;  %v2123_v53 = vadd.f32 %v2042_v56, %v1869_v10  ;;  %v2181_v10 = vld [vmem:[#allocation2 + $0x112] sm:$0xff]  ;;  %v2182_v23 = vld [vmem:[#allocation2 + $0x11a] sm:$0xff]  ;;  %v2699_v56 = vpop.permute.xlu1 %2698 }
 0x250   : > { %v1790_v57 = vpop.f32.mrf.mxu1  ;;  %v4683_v51 = vpop.f32.mrf.mxu3  ;;  %2793 = vperm.xlu2 %3904, %v322_v42  }
 0x251   : > { %v2959_v44 = vadd.f32 %v2958_v49, %v2924_v6  ;;  %v2377_v12 = vadd.f32 %v4627_v7, %v2123_v53  ;;  %v1870_v29 = vadd.f32 %v1790_v57, %v4364_v2  ;;  %v325_v2 = vld [vmem:[%s4783_s3 + $0xe8] sm:$0xff]  ;;  %v2203_v53 = vpack.c.bf16 %v2182_v23, %v2181_v10 }
 0x253   : > { %v2552_v38 = vpop.f32.mrf.mxu0  ;;  %v2631_v55 = vadd.f32 %v2550_v52, %v2377_v12 }
 0x255   : > { %v2847_v62 = vmul.f32 %v2694_v32, %v2631_v55 }
 0x256   : > { %v2044_v49 = vpop.f32.mrf.mxu2 }
 0x257   : > { %v2882_v39 = vadd.f32 %v2881_v43, %v2847_v62  ;;  %v2925_v7 = vmul.f32 %v2847_v62, %v2631_v55  ;;  %v2124_v19 = vadd.f32 %v2044_v49, %v1870_v29 }
 0x258   : > { %v1793_v50 = vpop.f32.mrf.mxu1  ;;  %v4690_v6 = vpop.f32.mrf.mxu3  ;;  %2808 = vperm.xlu2 %3904, %v325_v2   ;;  %v2183_v2 = vld [vmem:[#allocation2 + $0x122] sm:$0xff] }
 0x259   : > { %v2960_v22 = vadd.f32 %v2959_v44, %v2925_v7  ;;  %v2378_v8 = vadd.f32 %v4639_v40, %v2124_v19  ;;  %v1871_v0 = vadd.f32 %v1793_v50, %v4373_v20  ;;  %v2433_v7 = vld [vmem:[#allocation2 + $0x103] sm:$0xff]  ;;  %v2434_v19 = vld [vmem:[#allocation2 + $0x10b] sm:$0xff] }
 0x25b   : > { %v2555_v52 = vpop.f32.mrf.mxu0  ;;  %1832 = vmatmul.bf16.gmra.mxu1 %v1946_v17  ;;  %2086 = vmatmul.bf16.gmra.mxu2 %v1947_v31  ;;  %v2632_v43 = vadd.f32 %v2552_v38, %v2378_v8  ;;  %v328_v17 = vld [vmem:[%s4783_s3 + $0x100] sm:$0xff]  ;;  %v2704_v38 = vpop.permute.xlu2 %2703  ;;  %v2456_v8 = vpack.c.bf16 %v2434_v19, %v2433_v7  ;;  %v2435_v19 = vld [vmem:[#allocation2 + $0x113] sm:$0xff] }
 0x25c   : > { %v1928_v7 = vld [vmem:[#allocation2 + $0x119] sm:$0xff] }
 0x25d   : > { %v2848_v57 = vmul.f32 %v2699_v56, %v2632_v43  ;;  %v3761_v44 = vpack.c.bf16 %v2632_v43, %v2631_v55  ;;  %2350 = vmatmul.bf16.gmra.mxu3 %v2203_v53  ;;  %v1925_v55 = vld [vmem:[#allocation2 + $0x101] sm:$0xff]  ;;  %v2184_v56 = vld [vmem:[#allocation2 + $0x12a] sm:$0xff] }
 0x25e   : > { %2594 = vmatmul.bf16.gmra.mxu0 %v2455_v61  ;;  %v2047_v40 = vpop.f32.mrf.mxu2  ;;  %v1948_v23 = vpack.c.bf16 %v1926_v58, %v1925_v55 }
 0x25f   : > { %v2883_v12 = vadd.f32 %v2882_v39, %v2848_v57  ;;  %v2926_v42 = vmul.f32 %v2848_v57, %v2632_v43  ;;  %3852 = vst [vmem:[%s4613_s19 + $0x18] sm:$0xff] %v3761_v44   ;;  %v2125_v32 = vadd.f32 %v2047_v40, %v1871_v0  ;;  %v2709_v0 = vpop.permute.xlu0 %2708  ;;  %v2204_v40 = vpack.c.bf16 %v2184_v56, %v2183_v2 }
 0x260   : > { %v1795_v36 = vpop.f32.mrf.mxu1  ;;  %v4698_v63 = vpop.f32.mrf.mxu3  ;;  %2823 = vperm.xlu2 %3904, %v328_v17  }
 0x261   : > { %v2961_v16 = vadd.f32 %v2960_v22, %v2926_v42  ;;  %v2379_v29 = vadd.f32 %v4655_v25, %v2125_v32  ;;  %v1872_v49 = vadd.f32 %v1795_v36, %v4383_v28  ;;  %v331_v28 = vld [vmem:[%s4783_s3 + $0x118] sm:$0xff] }
 0x263   : > { %v2557_v62 = vpop.f32.mrf.mxu0  ;;  %v2633_v20 = vadd.f32 %v2555_v52, %v2379_v29 }
 0x265   : > { %v2849_v39 = vmul.f32 %v2704_v38, %v2633_v20 }
 0x266   : > { %v2049_v50 = vpop.f32.mrf.mxu2 }
 0x267   : > { %v2884_v61 = vadd.f32 %v2883_v12, %v2849_v39  ;;  %v2927_v25 = vmul.f32 %v2849_v39, %v2633_v20  ;;  %v2126_v10 = vadd.f32 %v2049_v50, %v1872_v49  ;;  %v1927_v39 = vld [vmem:[#allocation2 + $0x111] sm:$0xff]  ;;  %v2436_v50 = vld [vmem:[#allocation2 + $0x11b] sm:$0xff] }
 0x268   : > { %v1798_v22 = vpop.f32.mrf.mxu1  ;;  %v4705_v57 = vpop.f32.mrf.mxu3  ;;  %2838 = vperm.xlu2 %3904, %v331_v28   ;;  %v2457_v56 = vpack.c.bf16 %v2436_v50, %v2435_v19 }
 0x269   : > { %v2962_v43 = vadd.f32 %v2961_v16, %v2927_v25  ;;  %v2380_v53 = vadd.f32 %v4668_v21, %v2126_v10  ;;  %v1873_v12 = vadd.f32 %v1798_v22, %v4389_v59 }
 0x26b   : > { %v2560_v52 = vpop.f32.mrf.mxu0  ;;  %1837 = vmatmul.bf16.gmra.mxu1 %v1947_v31  ;;  %2091 = vmatmul.bf16.gmra.mxu2 %v1948_v23  ;;  %v2634_v44 = vadd.f32 %v2557_v62, %v2380_v53  ;;  %v2714_v31 = vpop.permute.xlu1 %2713 }
 0x26d   : > { %v2850_v42 = vmul.f32 %v2709_v0, %v2634_v44  ;;  %v3766_v32 = vpack.c.bf16 %v2634_v44, %v2633_v20  ;;  %2355 = vmatmul.bf16.gmra.mxu3 %v2204_v40  ;;  %v2719_v0 = vpop.permute.xlu2 %2718 }
 0x26e   : > { %2599 = vmatmul.bf16.gmra.mxu0 %v2456_v8  ;;  %v2052_v21 = vpop.f32.mrf.mxu2  ;;  %v1949_v8 = vpack.c.bf16 %v1928_v7, %v1927_v39  ;;  %v1929_v39 = vld [vmem:[#allocation2 + $0x121] sm:$0xff]  ;;  %v1930_v7 = vld [vmem:[#allocation2 + $0x129] sm:$0xff] }
 0x26f   : > { %v2885_v36 = vadd.f32 %v2884_v61, %v2850_v42  ;;  %v2928_v16 = vmul.f32 %v2850_v42, %v2634_v44  ;;  %3853 = vst [vmem:[%s4613_s19 + $0x20] sm:$0xff] %v3766_v32   ;;  %v2127_v29 = vadd.f32 %v2052_v21, %v1873_v12 }
 0x270   : > { %v1800_v17 = vpop.f32.mrf.mxu1  ;;  %v4710_v49 = vpop.f32.mrf.mxu3 }
 0x271   : > { %v2963_v38 = vadd.f32 %v2962_v43, %v2928_v16  ;;  %v2381_v55 = vadd.f32 %v4683_v51, %v2127_v29  ;;  %v1874_v59 = vadd.f32 %v1800_v17, %v4407_v41  ;;  %v2185_v51 = vld [vmem:[#allocation2 + $0x132] sm:$0xff]  ;;  %v2186_v43 = vld [vmem:[#allocation2 + $0x13a] sm:$0xff] }
 0x272   : > { %v2205_v40 = vpack.c.bf16 %v2186_v43, %v2185_v51 }
 0x273   : > { %v2562_v58 = vpop.f32.mrf.mxu0  ;;  %v2635_v62 = vadd.f32 %v2560_v52, %v2381_v55 }
 0x275   : > { %v2851_v20 = vmul.f32 %v2714_v31, %v2635_v62 }
 0x276   : > { %v2054_v61 = vpop.f32.mrf.mxu2 }
 0x277   : > { %v2886_v25 = vadd.f32 %v2885_v36, %v2851_v20  ;;  %v2929_v10 = vmul.f32 %v2851_v20, %v2635_v62  ;;  %v2128_v22 = vadd.f32 %v2054_v61, %v1874_v59  ;;  %v2437_v59 = vld [vmem:[#allocation2 + $0x123] sm:$0xff]  ;;  %v2438_v20 = vld [vmem:[#allocation2 + $0x12b] sm:$0xff] }
 0x278   : > { %v1803_v2 = vpop.f32.mrf.mxu1  ;;  %v4714_v44 = vpop.f32.mrf.mxu3 }
 0x279   : > { %v2964_v53 = vadd.f32 %v2963_v38, %v2929_v10  ;;  %v2382_v52 = vadd.f32 %v4690_v6, %v2128_v22  ;;  %v1875_v12 = vadd.f32 %v1803_v2, %v4415_v5  ;;  %v1950_v10 = vpack.c.bf16 %v1930_v7, %v1929_v39  ;;  %v2439_v39 = vld [vmem:[#allocation2 + $0x133] sm:$0xff]  ;;  %v2440_v7 = vld [vmem:[#allocation2 + $0x13b] sm:$0xff] }
 0x27a   : > { %v2458_v2 = vpack.c.bf16 %v2438_v20, %v2437_v59 }
 0x27b   : > { %v2565_v28 = vpop.f32.mrf.mxu0  ;;  %1842 = vmatmul.bf16.gmra.mxu1 %v1948_v23  ;;  %2096 = vmatmul.bf16.gmra.mxu2 %v1949_v8  ;;  %v2636_v41 = vadd.f32 %v2562_v58, %v2382_v52  ;;  %v2724_v23 = vpop.permute.xlu0 %2723 }
 0x27c   : > { %v2729_v52 = vpop.permute.xlu1 %2728 }
 0x27d   : > { %v2852_v42 = vmul.f32 %v2719_v0, %v2636_v41  ;;  %v3771_v32 = vpack.c.bf16 %v2636_v41, %v2635_v62  ;;  %2360 = vmatmul.bf16.gmra.mxu3 %v2205_v40 }
 0x27e   : > { %2604 = vmatmul.bf16.gmra.mxu0 %v2457_v56  ;;  %v2057_v21 = vpop.f32.mrf.mxu2  ;;  %v2188_v56 = vld [vmem:[#allocation2 + $0x14a] sm:$0xff] }
 0x27f   : > { %v2887_v36 = vadd.f32 %v2886_v25, %v2852_v42  ;;  %v2930_v16 = vmul.f32 %v2852_v42, %v2636_v41  ;;  %3854 = vst [vmem:[%s4613_s19 + $0x28] sm:$0xff] %v3771_v32   ;;  %v2129_v29 = vadd.f32 %v2057_v21, %v1875_v12 }
 0x280   : > { %v1805_v6 = vpop.f32.mrf.mxu1  ;;  %v4719_v31 = vpop.f32.mrf.mxu3 }
 0x281   : > { %v2965_v17 = vadd.f32 %v2964_v53, %v2930_v16  ;;  %v2383_v38 = vadd.f32 %v4698_v63, %v2129_v29  ;;  %v1876_v5 = vadd.f32 %v1805_v6, %v4420_v60  ;;  %v2187_v63 = vld [vmem:[#allocation2 + $0x142] sm:$0xff] }
 0x282   : > { %v2206_v0 = vpack.c.bf16 %v2188_v56, %v2187_v63 }
 0x283   : > { %v2567_v55 = vpop.f32.mrf.mxu0  ;;  %v2637_v58 = vadd.f32 %v2565_v28, %v2383_v38 }
 0x285   : > { %v2853_v62 = vmul.f32 %v2724_v23, %v2637_v58  ;;  %v1932_v23 = vld [vmem:[#allocation2 + $0x139] sm:$0xff] }
 0x286   : > { %v2059_v19 = vpop.f32.mrf.mxu2 }
 0x287   : > { %v2888_v50 = vadd.f32 %v2887_v36, %v2853_v62  ;;  %v2931_v61 = vmul.f32 %v2853_v62, %v2637_v58  ;;  %v2130_v25 = vadd.f32 %v2059_v19, %v1876_v5 }
 0x288   : > { %v1808_v22 = vpop.f32.mrf.mxu1  ;;  %v4723_v28 = vpop.f32.mrf.mxu3 }
 0x289   : > { %v2966_v51 = vadd.f32 %v2965_v17, %v2931_v61  ;;  %v2384_v43 = vadd.f32 %v4705_v57, %v2130_v25  ;;  %v1877_v40 = vadd.f32 %v1808_v22, %v4424_v47  ;;  %v2734_v17 = vpop.permute.xlu2 %2733 }
 0x28b   : > { %v2570_v53 = vpop.f32.mrf.mxu0  ;;  %v2638_v60 = vadd.f32 %v2567_v55, %v2384_v43  ;;  %1847 = vmatmul.bf16.gmra.mxu1 %v1949_v8  ;;  %2101 = vmatmul.bf16.gmra.mxu2 %v1950_v10  ;;  %v1931_v55 = vld [vmem:[#allocation2 + $0x131] sm:$0xff] }
 0x28c   : > { %v1951_v19 = vpack.c.bf16 %v1932_v23, %v1931_v55 }
 0x28d   : > { %v3776_v41 = vpack.c.bf16 %v2638_v60, %v2637_v58  ;;  %v2854_v12 = vmul.f32 %v2729_v52, %v2638_v60  ;;  %2365 = vmatmul.bf16.gmra.mxu3 %v2206_v0 }
 0x28e   : > { %2609 = vmatmul.bf16.gmra.mxu0 %v2458_v2  ;;  %v2062_v42 = vpop.f32.mrf.mxu2  ;;  %v2739_v2 = vpop.permute.xlu0 %2738 }
 0x28f   : > { %3855 = vst [vmem:[%s4613_s19 + $0x30] sm:$0xff] %v3776_v41   ;;  %v2889_v32 = vadd.f32 %v2888_v50, %v2854_v12  ;;  %v2932_v21 = vmul.f32 %v2854_v12, %v2638_v60  ;;  %v2131_v36 = vadd.f32 %v2062_v42, %v1877_v40  ;;  %v2744_v42 = vpop.permute.xlu1 %2743 }
 0x290   : > { %v1810_v57 = vpop.f32.mrf.mxu1  ;;  %v4728_v8 = vpop.f32.mrf.mxu3 }
 0x291   : > { %v2967_v16 = vadd.f32 %v2966_v51, %v2932_v21  ;;  %v2385_v29 = vadd.f32 %v4710_v49, %v2131_v36  ;;  %v1878_v47 = vadd.f32 %v1810_v57, %v4431_v4  ;;  %v2459_v49 = vpack.c.bf16 %v2440_v7, %v2439_v39  ;;  %v1934_v36 = vld [vmem:[#allocation2 + $0x149] sm:$0xff] }
 0x293   : > { %v2572_v6 = vpop.f32.mrf.mxu0  ;;  %v2639_v38 = vadd.f32 %v2570_v53, %v2385_v29  ;;  %v2442_v29 = vld [vmem:[#allocation2 + $0x14b] sm:$0xff] }
 0x295   : > { %v2855_v58 = vmul.f32 %v2734_v17, %v2639_v38 }
 0x296   : > { %v2064_v5 = vpop.f32.mrf.mxu2 }
 0x297   : > { %v2890_v62 = vadd.f32 %v2889_v32, %v2855_v58  ;;  %v2933_v59 = vmul.f32 %v2855_v58, %v2639_v38  ;;  %v2132_v20 = vadd.f32 %v2064_v5, %v1878_v47  ;;  %v2749_v5 = vpop.permute.xlu2 %2748 }
 0x298   : > { %v1813_v50 = vpop.f32.mrf.mxu1  ;;  %v4732_v63 = vpop.f32.mrf.mxu3 }
 0x299   : > { %v2968_v61 = vadd.f32 %v2967_v16, %v2933_v59  ;;  %v2386_v25 = vadd.f32 %v4714_v44, %v2132_v20  ;;  %v1879_v51 = vadd.f32 %v1813_v50, %v4436_v11  ;;  %v2441_v11 = vld [vmem:[#allocation2 + $0x143] sm:$0xff] }
 0x29a   : > { %v2460_v58 = vpack.c.bf16 %v2442_v29, %v2441_v11 }
 0x29b   : > { %v2575_v22 = vpop.f32.mrf.mxu0  ;;  %v2640_v56 = vadd.f32 %v2572_v6, %v2386_v25  ;;  %1852 = vmatmul.bf16.gmra.mxu1 %v1950_v10  ;;  %2106 = vmatmul.bf16.gmra.mxu2 %v1951_v19  ;;  %v1933_v10 = vld [vmem:[#allocation2 + $0x141] sm:$0xff] }
 0x29c   : > { %v1952_v23 = vpack.c.bf16 %v1934_v36, %v1933_v10  ;;  %v2759_v10 = vpop.permute.xlu1 %2758 }
 0x29d   : > { %v3781_v4 = vpack.c.bf16 %v2640_v56, %v2639_v38  ;;  %v2856_v43 = vmul.f32 %v2739_v2, %v2640_v56 }
 0x29e   : > { %2614 = vmatmul.bf16.gmra.mxu0 %v2459_v49  ;;  %v2067_v53 = vpop.f32.mrf.mxu2 }
 0x29f   : > { %3856 = vst [vmem:[%s4613_s19 + $0x38] sm:$0xff] %v3781_v4   ;;  %v2891_v52 = vadd.f32 %v2890_v62, %v2856_v43  ;;  %v2934_v60 = vmul.f32 %v2856_v43, %v2640_v56  ;;  %v2133_v0 = vadd.f32 %v2067_v53, %v1879_v51  ;;  %v2754_v51 = vpop.permute.xlu0 %2753 }
 0x2a0   : > { %v1815_v41 = vpop.f32.mrf.mxu1  ;;  %v2331_v32 = vpop.f32.mrf.mxu3 }
 0x2a1   : > { %v2969_v40 = vadd.f32 %v2968_v61, %v2934_v60  ;;  %v2387_v44 = vadd.f32 %v4719_v31, %v2133_v0  ;;  %v1880_v57 = vadd.f32 %v1815_v41, %v4443_v14 }
 0x2a3   : > { %v2577_v12 = vpop.f32.mrf.mxu0  ;;  %v2641_v21 = vadd.f32 %v2575_v22, %v2387_v44 }
 0x2a5   : > { %v2857_v16 = vmul.f32 %v2744_v42, %v2641_v21 }
 0x2a6   : > { %v2069_v6 = vpop.f32.mrf.mxu2 }
 0x2a7   : > { %v2892_v17 = vadd.f32 %v2891_v52, %v2857_v16  ;;  %v2935_v38 = vmul.f32 %v2857_v16, %v2641_v21  ;;  %v2134_v55 = vadd.f32 %v2069_v6, %v1880_v57 }
 0x2a8   : > { %v1818_v47 = vpop.f32.mrf.mxu1  ;;  %v2333_v14 = vpop.f32.mrf.mxu3 }
 0x2a9   : > { %v2970_v31 = vadd.f32 %v2969_v40, %v2935_v38  ;;  %v2388_v39 = vadd.f32 %v4723_v28, %v2134_v55  ;;  %v1881_v20 = vadd.f32 %v1818_v47, %v4451_v26 }
 0x2ab   : > { %v2580_v7 = vpop.f32.mrf.mxu0  ;;  %v2642_v62 = vadd.f32 %v2577_v12, %v2388_v39  ;;  %1857 = vmatmul.bf16.gmra.mxu1 %v1951_v19  ;;  %2111 = vmatmul.bf16.gmra.mxu2 %v1952_v23 }
 0x2ad   : > { %v3786_v59 = vpack.c.bf16 %v2642_v62, %v2641_v21  ;;  %v2858_v50 = vmul.f32 %v2749_v5, %v2642_v62 }
 0x2ae   : > { %2619 = vmatmul.bf16.gmra.mxu0 %v2460_v58  ;;  %v2072_v49 = vpop.f32.mrf.mxu2  ;;  %v2764_v58 = vpop.permute.xlu2 %2763 }
 0x2af   : > { %3857 = vst [vmem:[%s4613_s19 + $0x40] sm:$0xff] %v3786_v59   ;;  %v2893_v61 = vadd.f32 %v2892_v17, %v2858_v50  ;;  %v2936_v25 = vmul.f32 %v2858_v50, %v2642_v62  ;;  %v2135_v22 = vadd.f32 %v2072_v49, %v1881_v20 }
 0x2b0   : > { %v1820_v2 = vpop.f32.mrf.mxu1  ;;  %v2336_v60 = vpop.f32.mrf.mxu3 }
 0x2b1   : > { %v2971_v56 = vadd.f32 %v2970_v31, %v2936_v25  ;;  %v2389_v28 = vadd.f32 %v4728_v8, %v2135_v22  ;;  %v1882_v19 = vadd.f32 %v1820_v2, %v4458_v24  ;;  %v2769_v25 = vpop.permute.xlu0 %2768 }
 0x2b3   : > { %v2582_v4 = vpop.f32.mrf.mxu0  ;;  %v2643_v43 = vadd.f32 %v2580_v7, %v2389_v28 }
 0x2b5   : > { %v2859_v53 = vmul.f32 %v2754_v51, %v2643_v43 }
 0x2b6   : > { %v2074_v52 = vpop.f32.mrf.mxu2 }
 0x2b7   : > { %v2894_v26 = vadd.f32 %v2893_v61, %v2859_v53  ;;  %v2937_v0 = vmul.f32 %v2859_v53, %v2643_v43  ;;  %v2136_v41 = vadd.f32 %v2074_v52, %v1882_v19 }
 0x2b8   : > { %v1823_v40 = vpop.f32.mrf.mxu1  ;;  %v2338_v17 = vpop.f32.mrf.mxu3 }
 0x2b9   : > { %v2972_v44 = vadd.f32 %v2971_v56, %v2937_v0  ;;  %v2390_v12 = vadd.f32 %v4732_v63, %v2136_v41  ;;  %v1883_v36 = vadd.f32 %v1823_v40, %v4465_v15 }
 0x2bb   : > { %v2585_v42 = vpop.f32.mrf.mxu0  ;;  %v2644_v21 = vadd.f32 %v2582_v4, %v2390_v12 }
 0x2bd   : > { %v3791_v8 = vpack.c.bf16 %v2644_v21, %v2643_v43  ;;  %v2860_v57 = vmul.f32 %v2759_v10, %v2644_v21 }
 0x2be   : > { %v2077_v16 = vpop.f32.mrf.mxu2 }
 0x2bf   : > { %3858 = vst [vmem:[%s4613_s19 + $0x48] sm:$0xff] %v3791_v8   ;;  %v2895_v24 = vadd.f32 %v2894_v26, %v2860_v57  ;;  %v2938_v11 = vmul.f32 %v2860_v57, %v2644_v21  ;;  %v2137_v29 = vadd.f32 %v2077_v16, %v1883_v36  ;;  %v2774_v26 = vpop.permute.xlu1 %2773  ;;  %v2779_v57 = vpop.permute.xlu2 %2778 }
 0x2c0   : > { %v1825_v6 = vpop.f32.mrf.mxu1  ;;  %v2341_v49 = vpop.f32.mrf.mxu3 }
 0x2c1   : > { %v2973_v38 = vadd.f32 %v2972_v44, %v2938_v11  ;;  %v2391_v55 = vadd.f32 %v2331_v32, %v2137_v29  ;;  %v1884_v31 = vadd.f32 %v1825_v6, %v4472_v37 }
 0x2c3   : > { %v2587_v23 = vpop.f32.mrf.mxu0  ;;  %v2645_v47 = vadd.f32 %v2585_v42, %v2391_v55 }
 0x2c5   : > { %v2861_v63 = vmul.f32 %v2764_v58, %v2645_v47 }
 0x2c6   : > { %v2079_v39 = vpop.f32.mrf.mxu2 }
 0x2c7   : > { %v2896_v7 = vadd.f32 %v2895_v24, %v2861_v63  ;;  %v2939_v15 = vmul.f32 %v2861_v63, %v2645_v47  ;;  %v2138_v5 = vadd.f32 %v2079_v39, %v1884_v31  ;;  %v2784_v31 = vpop.permute.xlu0 %2783 }
 0x2c8   : > { %v1828_v62 = vpop.f32.mrf.mxu1 }
 0x2c9   : > { %v2974_v59 = vadd.f32 %v2973_v38, %v2939_v15  ;;  %v2392_v20 = vadd.f32 %v2333_v14, %v2138_v5  ;;  %v1885_v2 = vadd.f32 %v1828_v62, %v4476_v30  ;;  %v2343_v14 = vpop.f32.mrf.mxu3 }
 0x2cb   : > { %v2590_v50 = vpop.f32.mrf.mxu0  ;;  %v2646_v61 = vadd.f32 %v2587_v23, %v2392_v20 }
 0x2cd   : > { %v2862_v22 = vmul.f32 %v2769_v25, %v2646_v61  ;;  %v3796_v32 = vpack.c.bf16 %v2646_v61, %v2645_v47 }
 0x2ce   : > { %v2082_v56 = vpop.f32.mrf.mxu2 }
 0x2cf   : > { %v2897_v28 = vadd.f32 %v2896_v7, %v2862_v22  ;;  %v2940_v4 = vmul.f32 %v2862_v22, %v2646_v61  ;;  %3859 = vst [vmem:[%s4613_s19 + $0x50] sm:$0xff] %v3796_v32   ;;  %v2139_v37 = vadd.f32 %v2082_v56, %v1885_v2  ;;  %v2789_v22 = vpop.permute.xlu1 %2788 }
 0x2d0   : > { %v1830_v51 = vpop.f32.mrf.mxu1 }
 0x2d1   : > { %v2975_v43 = vadd.f32 %v2974_v59, %v2940_v4  ;;  %v2393_v19 = vadd.f32 %v2336_v60, %v2139_v37  ;;  %v1886_v41 = vadd.f32 %v1830_v51, %v4481_v1  ;;  %v2346_v29 = vpop.f32.mrf.mxu3 }
 0x2d3   : > { %v2592_v53 = vpop.f32.mrf.mxu0  ;;  %v2647_v52 = vadd.f32 %v2590_v50, %v2393_v19 }
 0x2d5   : > { %v2863_v0 = vmul.f32 %v2774_v26, %v2647_v52  ;;  %v2794_v26 = vpop.permute.xlu2 %2793 }
 0x2d6   : > { %v2084_v40 = vpop.f32.mrf.mxu2 }
 0x2d7   : > { %v2898_v44 = vadd.f32 %v2897_v28, %v2863_v0  ;;  %v2941_v12 = vmul.f32 %v2863_v0, %v2647_v52  ;;  %v2140_v30 = vadd.f32 %v2084_v40, %v1886_v41 }
 0x2d8   : > { %v1833_v42 = vpop.f32.mrf.mxu1 }
 0x2d9   : > { %v2976_v21 = vadd.f32 %v2975_v43, %v2941_v12  ;;  %v2394_v10 = vadd.f32 %v2338_v17, %v2140_v30  ;;  %v1887_v24 = vadd.f32 %v1833_v42, %v4489_v45  ;;  %v2348_v59 = vpop.f32.mrf.mxu3 }
 0x2db   : > { %v2595_v8 = vpop.f32.mrf.mxu0  ;;  %v2648_v36 = vadd.f32 %v2592_v53, %v2394_v10 }
 0x2dd   : > { %v2864_v16 = vmul.f32 %v2779_v57, %v2648_v36  ;;  %v3801_v60 = vpack.c.bf16 %v2648_v36, %v2647_v52 }
 0x2de   : > { %v2087_v11 = vpop.f32.mrf.mxu2 }
 0x2df   : > { %v2899_v6 = vadd.f32 %v2898_v44, %v2864_v16  ;;  %v2942_v38 = vmul.f32 %v2864_v16, %v2648_v36  ;;  %3860 = vst [vmem:[%s4613_s19 + $0x58] sm:$0xff] %v3801_v60   ;;  %v2141_v1 = vadd.f32 %v2087_v11, %v1887_v24 }
 0x2e0   : > { %v1835_v55 = vpop.f32.mrf.mxu1 }
 0x2e1   : > { %v2977_v23 = vadd.f32 %v2976_v21, %v2942_v38  ;;  %v2395_v47 = vadd.f32 %v2341_v49, %v2141_v1  ;;  %v1888_v39 = vadd.f32 %v1835_v55, %v4500_v35  ;;  %v2351_v53 = vpop.f32.mrf.mxu3 }
 0x2e3   : > { %v2597_v58 = vpop.f32.mrf.mxu0  ;;  %v2649_v63 = vadd.f32 %v2595_v8, %v2395_v47  ;;  %v2799_v8 = vpop.permute.xlu0 %2798 }
 0x2e4   : > { %v2804_v47 = vpop.permute.xlu1 %2803 }
 0x2e5   : > { %v2865_v17 = vmul.f32 %v2784_v31, %v2649_v63 }
 0x2e6   : > { %v2089_v7 = vpop.f32.mrf.mxu2 }
 0x2e7   : > { %v2900_v15 = vadd.f32 %v2899_v6, %v2865_v17  ;;  %v2943_v5 = vmul.f32 %v2865_v17, %v2649_v63  ;;  %v2142_v45 = vadd.f32 %v2089_v7, %v1888_v39 }
 0x2e8   : > { %v1838_v62 = vpop.f32.mrf.mxu1 }
 0x2e9   : > { %v2978_v20 = vadd.f32 %v2977_v23, %v2943_v5  ;;  %v2396_v50 = vadd.f32 %v2343_v14, %v2142_v45  ;;  %v1889_v2 = vadd.f32 %v1838_v62, %v4508_v33  ;;  %v2353_v36 = vpop.f32.mrf.mxu3 }
 0x2eb   : > { %v2600_v61 = vpop.f32.mrf.mxu0  ;;  %v2650_v25 = vadd.f32 %v2597_v58, %v2396_v50 }
 0x2ed   : > { %v2866_v32 = vmul.f32 %v2789_v22, %v2650_v25  ;;  %v3806_v49 = vpack.c.bf16 %v2650_v25, %v2649_v63 }
 0x2ee   : > { %v2092_v56 = vpop.f32.mrf.mxu2 }
 0x2ef   : > { %v2901_v28 = vadd.f32 %v2900_v15, %v2866_v32  ;;  %v2944_v4 = vmul.f32 %v2866_v32, %v2650_v25  ;;  %3861 = vst [vmem:[%s4613_s19 + $0x60] sm:$0xff] %v3806_v49   ;;  %v2143_v35 = vadd.f32 %v2092_v56, %v1889_v2 }
 0x2f0   : > { %v1840_v37 = vpop.f32.mrf.mxu1 }
 0x2f1   : > { %v2979_v51 = vadd.f32 %v2978_v20, %v2944_v4  ;;  %v2397_v43 = vadd.f32 %v2346_v29, %v2143_v35  ;;  %v1890_v0 = vadd.f32 %v1840_v37, %v4517_v18  ;;  %v2356_v17 = vpop.f32.mrf.mxu3  ;;  %v2809_v20 = vpop.permute.xlu2 %2808 }
 0x2f3   : > { %v2602_v19 = vpop.f32.mrf.mxu0  ;;  %v2651_v52 = vadd.f32 %v2600_v61, %v2397_v43 }
 0x2f5   : > { %v2867_v14 = vmul.f32 %v2794_v26, %v2651_v52 }
 0x2f6   : > { %v2094_v41 = vpop.f32.mrf.mxu2 }
 0x2f7   : > { %v2902_v40 = vadd.f32 %v2901_v28, %v2867_v14  ;;  %v2945_v44 = vmul.f32 %v2867_v14, %v2651_v52  ;;  %v2144_v33 = vadd.f32 %v2094_v41, %v1890_v0 }
 0x2f8   : > { %v1843_v12 = vpop.f32.mrf.mxu1 }
 0x2f9   : > { %v2980_v30 = vadd.f32 %v2979_v51, %v2945_v44  ;;  %v2398_v42 = vadd.f32 %v2348_v59, %v2144_v33  ;;  %v1891_v60 = vadd.f32 %v1843_v12, %v4526_v3  ;;  %v2358_v56 = vpop.f32.mrf.mxu3  ;;  %v2814_v51 = vpop.permute.xlu0 %2813 }
 0x2fa   : > { %v2819_v33 = vpop.permute.xlu1 %2818 }
 0x2fb   : > { %v2605_v21 = vpop.f32.mrf.mxu0  ;;  %v2652_v10 = vadd.f32 %v2602_v19, %v2398_v42 }
 0x2fd   : > { %v2868_v57 = vmul.f32 %v2799_v8, %v2652_v10  ;;  %v3811_v16 = vpack.c.bf16 %v2652_v10, %v2651_v52 }
 0x2fe   : > { %v2097_v24 = vpop.f32.mrf.mxu2 }
 0x2ff   : > { %v2903_v11 = vadd.f32 %v2902_v40, %v2868_v57  ;;  %v2946_v29 = vmul.f32 %v2868_v57, %v2652_v10  ;;  %3862 = vst [vmem:[%s4613_s19 + $0x68] sm:$0xff] %v3811_v16   ;;  %v2145_v18 = vadd.f32 %v2097_v24, %v1891_v60 }
 0x300   : > { %v1845_v6 = vpop.f32.mrf.mxu1 }
 0x301   : > { %v2981_v38 = vadd.f32 %v2980_v30, %v2946_v29  ;;  %v2399_v1 = vadd.f32 %v2351_v53, %v2145_v18  ;;  %v1892_v63 = vadd.f32 %v1845_v6, %v4535_v9  ;;  %v2361_v40 = vpop.f32.mrf.mxu3 }
 0x303   : > { %v2607_v55 = vpop.f32.mrf.mxu0  ;;  %v2653_v23 = vadd.f32 %v2605_v21, %v2399_v1 }
 0x305   : > { %v2869_v58 = vmul.f32 %v2804_v47, %v2653_v23 }
 0x306   : > { %v2099_v31 = vpop.f32.mrf.mxu2 }
 0x307   : > { %v2904_v39 = vadd.f32 %v2903_v11, %v2869_v58  ;;  %v2947_v7 = vmul.f32 %v2869_v58, %v2653_v23  ;;  %v2146_v3 = vadd.f32 %v2099_v31, %v1892_v63  ;;  %v2824_v11 = vpop.permute.xlu2 %2823 }
 0x308   : > { %v1848_v15 = vpop.f32.mrf.mxu1 }
 0x309   : > { %v2982_v5 = vadd.f32 %v2981_v38, %v2947_v7  ;;  %v2400_v45 = vadd.f32 %v2353_v36, %v2146_v3  ;;  %v1893_v25 = vadd.f32 %v1848_v15, %v4544_v48  ;;  %v2363_v29 = vpop.f32.mrf.mxu3 }
 0x30b   : > { %v2610_v62 = vpop.f32.mrf.mxu0  ;;  %v2654_v59 = vadd.f32 %v2607_v55, %v2400_v45 }
 0x30d   : > { %v2870_v50 = vmul.f32 %v2809_v20, %v2654_v59  ;;  %v3816_v61 = vpack.c.bf16 %v2654_v59, %v2653_v23 }
 0x30e   : > { %v2102_v22 = vpop.f32.mrf.mxu2 }
 0x30f   : > { %v2905_v32 = vadd.f32 %v2904_v39, %v2870_v50  ;;  %v2948_v49 = vmul.f32 %v2870_v50, %v2654_v59  ;;  %3863 = vst [vmem:[%s4613_s19 + $0x70] sm:$0xff] %v3816_v61   ;;  %v2147_v9 = vadd.f32 %v2102_v22, %v1893_v25  ;;  %v2834_v22 = vpop.permute.xlu1 %2833 }
 0x310   : > { %v1850_v2 = vpop.f32.mrf.mxu1 }
 0x311   : > { %v2983_v28 = vadd.f32 %v2982_v5, %v2948_v49  ;;  %v2401_v4 = vadd.f32 %v2356_v17, %v2147_v9  ;;  %v1894_v19 = vadd.f32 %v1850_v2, %v4553_v54  ;;  %v2829_v17 = vpop.permute.xlu0 %2828  ;;  %v2366_v15 = vpop.f32.mrf.mxu3 }
 0x313   : > { %v2612_v35 = vpop.f32.mrf.mxu0  ;;  %v2655_v37 = vadd.f32 %v2610_v62, %v2401_v4 }
 0x315   : > { %v2871_v43 = vmul.f32 %v2814_v51, %v2655_v37 }
 0x316   : > { %v2104_v53 = vpop.f32.mrf.mxu2 }
 0x317   : > { %v2906_v52 = vadd.f32 %v2905_v32, %v2871_v43  ;;  %v2949_v26 = vmul.f32 %v2871_v43, %v2655_v37  ;;  %v2148_v48 = vadd.f32 %v2104_v53, %v1894_v19  ;;  %v2839_v43 = vpop.permute.xlu2 %2838 }
 0x318   : > { %v1853_v14 = vpop.f32.mrf.mxu1 }
 0x319   : > { %v2984_v0 = vadd.f32 %v2983_v28, %v2949_v26  ;;  %v2402_v41 = vadd.f32 %v2358_v56, %v2148_v48  ;;  %v1895_v21 = vadd.f32 %v1853_v14, %v4562_v34  ;;  %v2368_v28 = vpop.f32.mrf.mxu3 }
 0x31b   : > { %v2656_v44 = vadd.f32 %v2612_v35, %v2402_v41  ;;  %v2615_v12 = vpop.f32.mrf.mxu0 }
 0x31d   : > { %v2872_v30 = vmul.f32 %v2819_v33, %v2656_v44  ;;  %v3821_v42 = vpack.c.bf16 %v2656_v44, %v2655_v37 }
 0x31e   : > { %v2107_v10 = vpop.f32.mrf.mxu2 }
 0x31f   : > { %v2907_v8 = vadd.f32 %v2906_v52, %v2872_v30  ;;  %v2950_v36 = vmul.f32 %v2872_v30, %v2656_v44  ;;  %3864 = vst [vmem:[%s4613_s19 + $0x78] sm:$0xff] %v3821_v42   ;;  %v2149_v54 = vadd.f32 %v2107_v10, %v1895_v21 }
 0x320   : > { %v1855_v57 = vpop.f32.mrf.mxu1 }
 0x321   : > { %v2985_v16 = vadd.f32 %v2984_v0, %v2950_v36  ;;  %v2403_v60 = vadd.f32 %v2361_v40, %v2149_v54  ;;  %v1896_v6 = vadd.f32 %v1855_v57, %v4571_v27 }
 0x323   : > { %v2657_v24 = vadd.f32 %v2615_v12, %v2403_v60  ;;  %v2617_v38 = vpop.f32.mrf.mxu0 }
 0x325   : > { %v2873_v18 = vmul.f32 %v2824_v11, %v2657_v24 }
 0x326   : > { %v2109_v1 = vpop.f32.mrf.mxu2 }
 0x327   : > { %v2908_v55 = vadd.f32 %v2907_v8, %v2873_v18  ;;  %v2951_v23 = vmul.f32 %v2873_v18, %v2657_v24  ;;  %v2150_v34 = vadd.f32 %v2109_v1, %v1896_v6 }
 0x328   : > { %v1858_v47 = vpop.f32.mrf.mxu1 }
 0x329   : > { %v2986_v58 = vadd.f32 %v2985_v16, %v2951_v23  ;;  %v2404_v63 = vadd.f32 %v2363_v29, %v2150_v34  ;;  %v1897_v3 = vadd.f32 %v1858_v47, %v4580_v13 }
 0x32b   : > { %v2658_v31 = vadd.f32 %v2617_v38, %v2404_v63  ;;  %v2620_v59 = vpop.f32.mrf.mxu0 }
 0x32d   : > { %v2874_v39 = vmul.f32 %v2829_v17, %v2658_v31  ;;  %v3826_v7 = vpack.c.bf16 %v2658_v31, %v2657_v24 }
 0x32e   : > { %v2112_v5 = vpop.f32.mrf.mxu2 }
 0x32f   : > { %v2909_v45 = vadd.f32 %v2908_v55, %v2874_v39  ;;  %v2952_v62 = vmul.f32 %v2874_v39, %v2658_v31  ;;  %3865 = vst [vmem:[%s4613_s19 + $0x80] sm:$0xff] %v3826_v7   ;;  %v2151_v27 = vadd.f32 %v2112_v5, %v1897_v3 }
 0x330   : > { %v1860_v61 = vpop.f32.mrf.mxu1 }
 0x331   : > { %v2987_v20 = vadd.f32 %v2986_v58, %v2952_v62  ;;  %v2405_v50 = vadd.f32 %v2366_v15, %v2151_v27  ;;  %v1898_v49 = vadd.f32 %v1860_v61, %v4589_v46 }
 0x333   : > { %v2659_v25 = vadd.f32 %v2620_v59, %v2405_v50  ;;  %v2622_v37 = vpop.f32.mrf.mxu0 }
 0x335   : > { %v2875_v32 = vmul.f32 %v2834_v22, %v2659_v25 }
 0x336   : > { %v2114_v9 = vpop.f32.mrf.mxu2 }
 0x337   : > { %v2910_v2 = vadd.f32 %v2909_v45, %v2875_v32  ;;  %v2953_v56 = vmul.f32 %v2875_v32, %v2659_v25  ;;  %v2152_v13 = vadd.f32 %v2114_v9, %v1898_v49 }
 0x339   : > { %v2988_v4 = vadd.f32 %v2987_v20, %v2953_v56  ;;  %v2406_v35 = vadd.f32 %v2368_v28, %v2152_v13 }
 0x33b   : > { %v2660_v51 = vadd.f32 %v2622_v37, %v2406_v35 }
 0x33d   : > { %v2876_v19 = vmul.f32 %v2839_v43, %v2660_v51  ;;  %v3831_v53 = vpack.c.bf16 %v2660_v51, %v2659_v25 }
 0x33f   : > { %v2911_v52 = vadd.f32 %v2910_v2, %v2876_v19  ;;  %v2954_v26 = vmul.f32 %v2876_v19, %v2660_v51  ;;  %3866 = vst [vmem:[%s4613_s19 + $0x88] sm:$0xff] %v3831_v53   ;;  %s295_s19 = scalar_lea.vmem %s4787_s7, %s4793_s1 }
 0x341   : > { %v2912_v48 = vrot.slane %v2911_v52, 4  ;;  %v2989_v14 = vadd.f32 %v2988_v4, %v2954_v26 }
 0x343   : > { %v2913_v46 = vadd.f32 %v2912_v48, %v2911_v52  ;;  %v2990_v0 = vrot.slane %v2989_v14, 4 }
 0x345   : > { %v2914_v41 = vrot.slane %v2913_v46, 2  ;;  %v2991_v40 = vadd.f32 %v2990_v0, %v2989_v14 }
 0x347   : > { %v2915_v44 = vadd.f32 %v2914_v41, %v2913_v46  ;;  %v2992_v33 = vrot.slane %v2991_v40, 2 }
 0x349   : > { %v2916_v12 = vrot.slane %v2915_v44, 1  ;;  %v2993_v30 = vadd.f32 %v2992_v33, %v2991_v40 }
 0x34b   : > { %v2917_v42 = vadd.f32 %v2916_v12, %v2915_v44  ;;  %v2994_v21 = vrot.slane %v2993_v30, 1 }
 0x34d   : > { %2918 = vst [vmem:[%s292_s11] sm:$0x1] %v2917_v42  ;;  %v2995_v10 = vadd.f32 %v2994_v21, %v2993_v30 }
 0x34f   : > { %2996 = vst [vmem:[%s295_s19] sm:$0x1] %v2995_v10 }
 0x350 PF: > { %s18_s24 = sadd.s32 1, %s3921_s24  }
 0x351   : > { %p15_p4 = scmp.ge.s32.totalorder %s18_s24, 4  }
 0x353   :  { %17 = sbr.rel (!%p15_p4) target bundleno = 1 (0x1), region = 102 }

</bundles_post_ra>
